<compile_context>
chip_gen: v7x
topology: tpu7x:2x2x1
jax: 0.10.0
libtpu: 0.0.40
codegen_flags: <defaults>
</compile_context>

<pallas_src>
import jax
import jax.numpy as jnp
from jax import lax
from jax.experimental import pallas as pl
from jax.experimental.pallas import tpu as pltpu

# ---------------- configuration (scaled-down but structurally faithful) -----
VOCAB = 100          # vocab_size
EMB = 32             # emb_dim
HID = 32             # per-direction LSTM hidden (hid_dim)
E2 = 2 * HID         # bidirectional model dim (self.hid_dim after *2)
NHEAD = 8
DH = E2 // NHEAD
DFF = 128            # TransformerEncoderLayer feedforward (PyTorch default 2048; scaled down)
N_ARTICLE = 6        # len(maps['article2idx'])
N_CHARGE = 5         # len(maps['charge2idx'])
B = 2
S = 8
LN_EPS = 1e-5

NSTREAM = 3                  # fact, rat_1, rat_2
NGROUP = 2 * NSTREAM         # (stream, direction) groups
GH = NGROUP * HID            # 192 -- fused LSTM hidden width


# ---------------------------- in-kernel math helpers -------------------------
def _ln_math(x2d, g, b):
    """LayerNorm over last dim (biased variance), g/b shape (1, D)."""
    mu = jnp.mean(x2d, axis=-1, keepdims=True)
    xc = x2d - mu
    var = jnp.mean(xc * xc, axis=-1, keepdims=True)
    return xc * lax.rsqrt(var + LN_EPS) * g + b


def _mha_math(q_in, kv_in, in_w_t, in_b, out_w_t, out_b):
    """nn.MultiheadAttention (batch_first, no mask, eval). All args are values.

    q_in: (B, Sq, E); kv_in: (B, Sk, E); in_w_t: (E, 3E); in_b: (1, 3E);
    out_w_t: (E, E); out_b: (1, E). Returns (B, Sq, E).
    """
    bb, sq, e = q_in.shape
    sk = kv_in.shape[1]
    dh = e // NHEAD
    scale = 1.0 / float(dh) ** 0.5

    q2d = q_in.reshape(bb * sq, e)
    if q_in is kv_in:
        # self-attention: one fused (N, E) @ (E, 3E) projection, lane-dense output
        qkv = jnp.dot(q2d, in_w_t, preferred_element_type=jnp.float32) + in_b
        q, k, v = qkv[:, :e], qkv[:, e:2 * e], qkv[:, 2 * e:]
    else:
        kv2d = kv_in.reshape(bb * sk, e)
        q = jnp.dot(q2d, in_w_t[:, :e], preferred_element_type=jnp.float32) + in_b[:, :e]
        kvp = jnp.dot(kv2d, in_w_t[:, e:], preferred_element_type=jnp.float32) + in_b[:, e:]
        k, v = kvp[:, :e], kvp[:, e:]

    q = q.reshape(bb, sq, e)
    k = k.reshape(bb, sk, e)
    v = v.reshape(bb, sk, e)

    heads = []
    for h in range(NHEAD):                       # static unroll over heads
        qh = q[:, :, h * dh:(h + 1) * dh]        # (B, Sq, dh)
        kh = k[:, :, h * dh:(h + 1) * dh]
        vh = v[:, :, h * dh:(h + 1) * dh]
        s = jnp.einsum("bqd,bkd->bqk", qh, kh,
                       preferred_element_type=jnp.float32) * scale
        m = jnp.max(s, axis=-1, keepdims=True)
        p = jnp.exp(s - m)
        p = p * pl.reciprocal(jnp.sum(p, axis=-1, keepdims=True), approx=True)
        heads.append(jnp.einsum("bqk,bkd->bqd", p, vh,
                                preferred_element_type=jnp.float32))
    o = jnp.concatenate(heads, axis=-1).reshape(bb * sq, e)
    o = jnp.dot(o, out_w_t, preferred_element_type=jnp.float32) + out_b
    return o.reshape(bb, sq, e)


# ---------------------------- Pallas kernels --------------------------------
def _lstm_proj_kernel(x_ref, w_ref, b_ref, o_ref):
    # x: (B*S, 3*EMB), w: (3*EMB, 4*GH) block-diag over streams, b: (1, 4*GH)
    o_ref[...] = (
        jnp.dot(x_ref[...], w_ref[...], preferred_element_type=jnp.float32)
        + b_ref[...]
    )


def _lstm_rec_kernel(xp_ref, whh_ref, o_ref, h_sc, c_sc):
    # xp_ref: (S, B, 4*GH) gate-major (i|f|g|o, each GH wide, group-minor inside)
    # whh_ref: (GH, 4*GH) block-diagonal recurrent weights; o_ref: (S, B, GH)
    h_sc[...] = jnp.zeros_like(h_sc)
    c_sc[...] = jnp.zeros_like(c_sc)
    n_steps = xp_ref.shape[0]
    # fully unrolled (S is small & static): the only serial part of the model
    for t in range(n_steps):
        gates = xp_ref[t] + jnp.dot(
            h_sc[...], whh_ref[...], preferred_element_type=jnp.float32
        )
        i = jax.nn.sigmoid(gates[:, 0 * GH:1 * GH])
        f = jax.nn.sigmoid(gates[:, 1 * GH:2 * GH])
        g = jnp.tanh(gates[:, 2 * GH:3 * GH])
        o = jax.nn.sigmoid(gates[:, 3 * GH:4 * GH])
        c = f * c_sc[...] + i * g
        h = o * jnp.tanh(c)
        c_sc[...] = c
        h_sc[...] = h
        o_ref[t] = h


def _cross_mha_kernel(q_ref, kv_ref, inw_ref, inb_ref, outw_ref, outb_ref, o_ref):
    o_ref[0] = _mha_math(q_ref[...], kv_ref[0], inw_ref[0], inb_ref[0],
                         outw_ref[0], outb_ref[0])


def _encoder_kernel(x_ref, inw_ref, inb_ref, outw_ref, outb_ref,
                    ln1g_ref, ln1b_ref, w1_ref, b1_ref, w2_ref, b2_ref,
                    ln2g_ref, ln2b_ref, o_ref):
    # nn.TransformerEncoderLayer, post-norm, relu, eval mode (dropout = id)
    x = x_ref[0]                                 # (B, S, E)
    bb, ss, e = x.shape
    sa = _mha_math(x, x, inw_ref[0], inb_ref[0], outw_ref[0], outb_ref[0])
    h = _ln_math((x + sa).reshape(bb * ss, e), ln1g_ref[0], ln1b_ref[0])
    ff = jnp.maximum(
        jnp.dot(h, w1_ref[0], preferred_element_type=jnp.float32) + b1_ref[0], 0.0)
    ff = jnp.dot(ff, w2_ref[0], preferred_element_type=jnp.float32) + b2_ref[0]
    y = _ln_math(h + ff, ln2g_ref[0], ln2b_ref[0])
    o_ref[0] = y.reshape(bb, ss, e)


def _head_kernel(f_ref, r1_ref, r2_ref, wa_ref, ba_ref, wc_ref, bc_ref,
                 wj_ref, bj_ref, art_ref, chg_ref, jdg_ref):
    # mean pooling over the sequence + the three classification heads
    inv_s = 1.0 / f_ref.shape[1]
    fm = jnp.sum(f_ref[...], axis=1) * inv_s     # (B, E)
    r1m = jnp.sum(r1_ref[...], axis=1) * inv_s
    r2m = jnp.sum(r2_ref[...], axis=1) * inv_s
    art_ref[...] = (jnp.dot(fm, wa_ref[...], preferred_element_type=jnp.float32)
                    + ba_ref[...])
    chg_ref[...] = (jnp.dot(jnp.concatenate([fm, r1m], axis=-1), wc_ref[...],
                            preferred_element_type=jnp.float32) + bc_ref[...])
    jdg_ref[...] = (jnp.dot(jnp.concatenate([fm, r1m, r2m], axis=-1), wj_ref[...],
                            preferred_element_type=jnp.float32) + bj_ref[...])


# ---------------------------- wrappers ---------------------------------------
def _block_diag(blocks):
    """Block-diagonal matrix from a list of 2-D blocks (traced-time glue)."""
    ncols = [b.shape[1] for b in blocks]
    rows = []
    for i, blk in enumerate(blocks):
        row = [blk if j == i else jnp.zeros((blk.shape[0], ncols[j]), blk.dtype)
               for j in range(len(blocks))]
        rows.append(jnp.concatenate(row, axis=1))
    return jnp.concatenate(rows, axis=0)


def _build_lstm_mats(lstm_list):
    """Fuse 3 streams x 2 directions into block-structured weights.

    Column layout (4*GH wide): gate-major (i | f | g | o), each GH=6*H wide,
    group-minor inside a gate block with group index g = 2*stream + dir.
    """
    wih_gates, whh_gates, b_gates = [], [], []
    for k in range(4):                                  # PyTorch gate order i,f,g,o
        wih_stream, whh_groups, b_parts = [], [], []
        for lp in lstm_list:
            per_dir = []
            for dname in ("fwd", "bwd"):
                p = lp[dname]
                per_dir.append(p["w_ih"][k * HID:(k + 1) * HID, :].T)    # (EMB, H)
                whh_groups.append(p["w_hh"][k * HID:(k + 1) * HID, :].T)  # (H, H)
                b_parts.append(p["b_ih"][k * HID:(k + 1) * HID]
                               + p["b_hh"][k * HID:(k + 1) * HID])
            wih_stream.append(jnp.concatenate(per_dir, axis=1))           # (EMB, 2H)
        wih_gates.append(_block_diag(wih_stream))        # (3*EMB, GH)
        whh_gates.append(_block_diag(whh_groups))        # (GH, GH)
        b_gates.append(jnp.concatenate(b_parts, axis=0))  # (GH,)
    w_ih_big = jnp.concatenate(wih_gates, axis=1)        # (3*EMB, 4*GH)
    w_hh_big = jnp.concatenate(whh_gates, axis=1)        # (GH, 4*GH)
    b_big = jnp.concatenate(b_gates, axis=0)             # (4*GH,)
    return w_ih_big, w_hh_big, b_big


def tri_bilstm(fact, rat1, rat2, params):
    """All three bidirectional LSTMs fused into 2 kernels. Inputs: (B, S, EMB)."""
    bb, ss, _ = fact.shape
    w_ih_big, w_hh_big, b_big = _build_lstm_mats(
        [params["fact_lstm"], params["rat1_lstm"], params["rat2_lstm"]])

    x_row = jnp.concatenate([fact, rat1, rat2], axis=-1).reshape(bb * ss, NSTREAM * EMB)

    xp = pl.pallas_call(
        _lstm_proj_kernel,
        out_shape=jax.ShapeDtypeStruct((bb * ss, 4 * GH), jnp.float32),
    )(x_row, w_ih_big, b_big.reshape(1, 4 * GH))

    # (B, S, gate, group, H); time-reverse the inputs of the backward groups
    xp = xp.reshape(bb, ss, 4, NGROUP, HID)
    xp_f = xp[:, :, :, 0::2, :]                 # forward groups, original time
    xp_b = xp[:, ::-1, :, 1::2, :]              # backward groups, reversed time
    xp = jnp.stack([xp_f, xp_b], axis=4).reshape(bb, ss, 4 * GH)
    xp = xp.transpose(1, 0, 2)                  # (S, B, 4*GH) time-major

    h_seq = pl.pallas_call(
        _lstm_rec_kernel,
        out_shape=jax.ShapeDtypeStruct((ss, bb, GH), jnp.float32),
        scratch_shapes=[pltpu.VMEM((bb, GH), jnp.float32),
                        pltpu.VMEM((bb, GH), jnp.float32)],
    )(xp, w_hh_big)

    h_seq = h_seq.transpose(1, 0, 2).reshape(bb, ss, NGROUP, HID)
    h_f = h_seq[:, :, 0::2, :]                  # (B, S, 3, H)
    h_b = h_seq[:, ::-1, 1::2, :]               # (B, S, 3, H) un-reversed in time
    hidden = jnp.concatenate([h_f, h_b], axis=-1)   # (B, S, 3, 2H) [fwd|bwd]
    return hidden[:, :, 0, :], hidden[:, :, 1, :], hidden[:, :, 2, :]


def cross_mha(q, kv_stack, inw, inb, outw, outb):
    """Both cross-attentions (fact->rat1, fact->rat2) in one call, grid=(2,)."""
    n, bb, ss, e = kv_stack.shape
    return pl.pallas_call(
        _cross_mha_kernel,
        out_shape=jax.ShapeDtypeStruct((n, bb, ss, e), jnp.float32),
        grid=(n,),
        in_specs=[
            pl.BlockSpec((bb, ss, e), lambda i: (0, 0, 0)),        # shared query
            pl.BlockSpec((1, bb, ss, e), lambda i: (i, 0, 0, 0)),
            pl.BlockSpec((1, e, 3 * e), lambda i: (i, 0, 0)),
            pl.BlockSpec((1, 1, 3 * e), lambda i: (i, 0, 0)),
            pl.BlockSpec((1, e, e), lambda i: (i, 0, 0)),
            pl.BlockSpec((1, 1, e), lambda i: (i, 0, 0)),
        ],
        out_specs=pl.BlockSpec((1, bb, ss, e), lambda i: (i, 0, 0, 0)),
        compiler_params=pltpu.CompilerParams(dimension_semantics=("parallel",)),
    )(q, kv_stack, inw, inb, outw, outb)


def encoder_stack(x_stack, enc_list):
    """All three TransformerEncoderLayers in one call, grid=(3,) parallel."""
    n, bb, ss, e = x_stack.shape
    inw = jnp.stack([p["sa"]["in_w"].T for p in enc_list])               # (3, E, 3E)
    inb = jnp.stack([p["sa"]["in_b"].reshape(1, -1) for p in enc_list])  # (3, 1, 3E)
    outw = jnp.stack([p["sa"]["out_w"].T for p in enc_list])             # (3, E, E)
    outb = jnp.stack([p["sa"]["out_b"].reshape(1, -1) for p in enc_list])
    ln1g = jnp.stack([p["ln1_g"].reshape(1, -1) for p in enc_list])
    ln1b = jnp.stack([p["ln1_b"].reshape(1, -1) for p in enc_list])
    w1 = jnp.stack([p["w1"].T for p in enc_list])                        # (3, E, DFF)
    b1 = jnp.stack([p["b1"].reshape(1, -1) for p in enc_list])
    w2 = jnp.stack([p["w2"].T for p in enc_list])                        # (3, DFF, E)
    b2 = jnp.stack([p["b2"].reshape(1, -1) for p in enc_list])
    ln2g = jnp.stack([p["ln2_g"].reshape(1, -1) for p in enc_list])
    ln2b = jnp.stack([p["ln2_b"].reshape(1, -1) for p in enc_list])
    return pl.pallas_call(
        _encoder_kernel,
        out_shape=jax.ShapeDtypeStruct((n, bb, ss, e), jnp.float32),
        grid=(n,),
        in_specs=[
            pl.BlockSpec((1, bb, ss, e), lambda i: (i, 0, 0, 0)),
            pl.BlockSpec((1, e, 3 * e), lambda i: (i, 0, 0)),
            pl.BlockSpec((1, 1, 3 * e), lambda i: (i, 0, 0)),
            pl.BlockSpec((1, e, e), lambda i: (i, 0, 0)),
            pl.BlockSpec((1, 1, e), lambda i: (i, 0, 0)),
            pl.BlockSpec((1, 1, e), lambda i: (i, 0, 0)),
            pl.BlockSpec((1, 1, e), lambda i: (i, 0, 0)),
            pl.BlockSpec((1, e, DFF), lambda i: (i, 0, 0)),
            pl.BlockSpec((1, 1, DFF), lambda i: (i, 0, 0)),
            pl.BlockSpec((1, DFF, e), lambda i: (i, 0, 0)),
            pl.BlockSpec((1, 1, e), lambda i: (i, 0, 0)),
            pl.BlockSpec((1, 1, e), lambda i: (i, 0, 0)),
            pl.BlockSpec((1, 1, e), lambda i: (i, 0, 0)),
        ],
        out_specs=pl.BlockSpec((1, bb, ss, e), lambda i: (i, 0, 0, 0)),
        compiler_params=pltpu.CompilerParams(dimension_semantics=("parallel",)),
    )(x_stack, inw, inb, outw, outb, ln1g, ln1b, w1, b1, w2, b2, ln2g, ln2b)


def heads(fact_e, fr1_e, fr2_e, params):
    """Fused epilogue: mean pooling x3 + the three linear heads in one kernel."""
    bb = fact_e.shape[0]
    wa = params["fc_article"]["w"].T
    ba = params["fc_article"]["b"].reshape(1, -1)
    wc = params["fc_charge"]["w"].T
    bc = params["fc_charge"]["b"].reshape(1, -1)
    wj = params["fc_judge"]["w"].T
    bj = params["fc_judge"]["b"].reshape(1, -1)
    out_shapes = (jax.ShapeDtypeStruct((bb, N_ARTICLE), jnp.float32),
                  jax.ShapeDtypeStruct((bb, N_CHARGE), jnp.float32),
                  jax.ShapeDtypeStruct((bb, 1), jnp.float32))
    return pl.pallas_call(_head_kernel, out_shape=out_shapes)(
        fact_e, fr1_e, fr2_e, wa, ba, wc, bc, wj, bj)


# ---------------------------- parameters -------------------------------------
def init_params(key):
    keys = iter(jax.random.split(key, 128))

    def rnd(shape, scale=0.1):
        return (scale * jax.random.normal(next(keys), shape)).astype(jnp.float32)

    def lstm_params():
        out = {}
        for direction in ("fwd", "bwd"):
            out[direction] = dict(
                w_ih=rnd((4 * HID, EMB)),
                w_hh=rnd((4 * HID, HID)),
                b_ih=rnd((4 * HID,)),
                b_hh=rnd((4 * HID,)),
            )
        return out

    def mha_params():
        return dict(
            in_w=rnd((3 * E2, E2)),
            in_b=rnd((3 * E2,)),
            out_w=rnd((E2, E2)),
            out_b=rnd((E2,)),
        )

    def enc_params():
        return dict(
            sa=mha_params(),
            w1=rnd((DFF, E2)),
            b1=rnd((DFF,)),
            w2=rnd((E2, DFF)),
            b2=rnd((E2,)),
            ln1_g=jnp.ones((E2,), jnp.float32),
            ln1_b=jnp.zeros((E2,), jnp.float32),
            ln2_g=jnp.ones((E2,), jnp.float32),
            ln2_b=jnp.zeros((E2,), jnp.float32),
        )

    return dict(
        embedding=rnd((VOCAB, EMB), 1.0),
        fact_lstm=lstm_params(),
        rat1_lstm=lstm_params(),
        rat2_lstm=lstm_params(),
        mha1=mha_params(),
        mha2=mha_params(),
        enc_fact=enc_params(),
        enc_r1=enc_params(),
        enc_r2=enc_params(),
        fc_article=dict(w=rnd((N_ARTICLE, E2)), b=rnd((N_ARTICLE,))),
        fc_charge=dict(w=rnd((N_CHARGE, 2 * E2)), b=rnd((N_CHARGE,))),
        fc_judge=dict(w=rnd((1, 3 * E2)), b=rnd((1,))),
        # fr1_W / fr2_W exist in the PyTorch module but are never used in forward.
    )


# ---------------------------- forward ----------------------------------------
@jax.jit
def forward(params, fact_ids, rat1_ids, rat2_ids):
    emb = params["embedding"]
    fact = jnp.take(emb, fact_ids, axis=0)   # (B, S, EMB) -- gather is glue
    rat1 = jnp.take(emb, rat1_ids, axis=0)
    rat2 = jnp.take(emb, rat2_ids, axis=0)

    # --- 3 bidirectional LSTMs fused into 2 kernels -------------------------
    fact_h, rat1_h, rat2_h = tri_bilstm(fact, rat1, rat2, params)   # (B, S, 2H) each

    # --- 2 cross multi-head attentions in one fused kernel ------------------
    kv_stack = jnp.stack([rat1_h, rat2_h])                          # (2, B, S, E)
    inw = jnp.stack([params["mha1"]["in_w"].T, params["mha2"]["in_w"].T])
    inb = jnp.stack([params["mha1"]["in_b"].reshape(1, -1),
                     params["mha2"]["in_b"].reshape(1, -1)])
    outw = jnp.stack([params["mha1"]["out_w"].T, params["mha2"]["out_w"].T])
    outb = jnp.stack([params["mha1"]["out_b"].reshape(1, -1),
                      params["mha2"]["out_b"].reshape(1, -1)])
    fr = cross_mha(fact_h, kv_stack, inw, inb, outw, outb)          # (2, B, S, E)

    # --- 3 transformer encoder layers in one fused kernel -------------------
    x_stack = jnp.concatenate([fact_h[None], fr], axis=0)           # (3, B, S, E)
    enc = encoder_stack(
        x_stack, [params["enc_fact"], params["enc_r1"], params["enc_r2"]])

    # --- pooling + heads, one fused epilogue kernel --------------------------
    out_article, out_charge, out_judge = heads(enc[0], enc[1], enc[2], params)
    return {"article": out_article, "charge": out_charge, "judge": out_judge}


# ---------------------------- main --------------------------------------------
if __name__ == "__main__":
    root = jax.random.PRNGKey(0)
    k_params, k_f, k_r1, k_r2 = jax.random.split(root, 4)
    params = init_params(k_params)

    fact_ids = jax.random.randint(k_f, (B, S), 0, VOCAB, dtype=jnp.int32)
    rat1_ids = jax.random.randint(k_r1, (B, S), 0, VOCAB, dtype=jnp.int32)
    rat2_ids = jax.random.randint(k_r2, (B, S), 0, VOCAB, dtype=jnp.int32)

    out = forward(params, fact_ids, rat1_ids, rat2_ids)
    out = jax.block_until_ready(out)

    assert out["article"].shape == (B, N_ARTICLE)
    assert out["charge"].shape == (B, N_CHARGE)
    assert out["judge"].shape == (B, 1)
    assert all(bool(jnp.all(jnp.isfinite(v))) for v in out.values())
    print("KERNEL_OK")
</pallas_src>

<mosaic_0001>
module attributes {stable_mosaic.version = 11 : i64} {
  func.func @_lstm_proj_kernel(%arg0: memref<16x96xf32, #tpu.memory_space<vmem>>, %arg1: memref<96x768xf32, #tpu.memory_space<vmem>>, %arg2: memref<1x768xf32, #tpu.memory_space<vmem>>, %arg3: memref<16x768xf32, #tpu.memory_space<vmem>>) attributes {dimension_semantics = [], scalar_prefetch = 0 : i64, scratch_operands = 0 : i64, tpu.core_type = #tpu.core_type<tc>} {
    %c0 = arith.constant 0 : index
    %c0_0 = arith.constant 0 : index
    %0 = vector.load %arg0[%c0, %c0_0] : memref<16x96xf32, #tpu.memory_space<vmem>>, vector<16x96xf32>
    %c0_1 = arith.constant 0 : index
    %c0_2 = arith.constant 0 : index
    %1 = vector.load %arg1[%c0_1, %c0_2] : memref<96x768xf32, #tpu.memory_space<vmem>>, vector<96x768xf32>
    %cst = arith.constant dense<0.000000e+00> : vector<16x768xf32>
    %2 = tpu.matmul %0, %1, %cst {dimension_numbers = #tpu.dot_dimension_numbers<[1], [0], [0], [1], [0, 0, 1, 1], [], []>} : vector<16x96xf32>, vector<96x768xf32>, vector<16x768xf32> -> vector<16x768xf32>
    %c0_3 = arith.constant 0 : index
    %c0_4 = arith.constant 0 : index
    %3 = vector.load %arg2[%c0_3, %c0_4] : memref<1x768xf32, #tpu.memory_space<vmem>>, vector<1x768xf32>
    %4 = vector.broadcast %3 : vector<1x768xf32> to vector<16x768xf32>
    %5 = arith.addf %2, %4 : vector<16x768xf32>
    %c0_5 = arith.constant 0 : index
    %c0_6 = arith.constant 0 : index
    %6 = vector.load %arg3[%c0_5, %c0_6] : memref<16x768xf32, #tpu.memory_space<vmem>>, vector<16x768xf32>
    tpu.vector_store %arg3[%c0_5, %c0_6], %5 {strides = array<i32>} : memref<16x768xf32, #tpu.memory_space<vmem>>, vector<16x768xf32>,
    return
  }
}

module attributes {stable_mosaic.version = 11 : i64} {
  func.func @_lstm_rec_kernel(%arg0: memref<8x2x768xf32, #tpu.memory_space<vmem>>, %arg1: memref<192x768xf32, #tpu.memory_space<vmem>>, %arg2: memref<8x2x192xf32, #tpu.memory_space<vmem>>, %arg3: memref<2x192xf32, #tpu.memory_space<vmem>>, %arg4: memref<2x192xf32, #tpu.memory_space<vmem>>) attributes {dimension_semantics = [], scalar_prefetch = 0 : i64, scratch_operands = 2 : i64, tpu.core_type = #tpu.core_type<tc>} {
    %cst = arith.constant 0.000000e+00 : f32
    %0 = vector.broadcast %cst : f32 to vector<2x192xf32>
    %c0 = arith.constant 0 : index
    %c0_0 = arith.constant 0 : index
    %1 = vector.load %arg3[%c0, %c0_0] : memref<2x192xf32, #tpu.memory_space<vmem>>, vector<2x192xf32>
    tpu.vector_store %arg3[%c0, %c0_0], %0 {strides = array<i32>} : memref<2x192xf32, #tpu.memory_space<vmem>>, vector<2x192xf32>,
    %cst_1 = arith.constant 0.000000e+00 : f32
    %2 = vector.broadcast %cst_1 : f32 to vector<2x192xf32>
    %c0_2 = arith.constant 0 : index
    %c0_3 = arith.constant 0 : index
    %3 = vector.load %arg4[%c0_2, %c0_3] : memref<2x192xf32, #tpu.memory_space<vmem>>, vector<2x192xf32>
    tpu.vector_store %arg4[%c0_2, %c0_3], %2 {strides = array<i32>} : memref<2x192xf32, #tpu.memory_space<vmem>>, vector<2x192xf32>,
    %c0_4 = arith.constant 0 : index
    %c0_5 = arith.constant 0 : index
    %c0_6 = arith.constant 0 : index
    %4 = vector.load %arg0[%c0_4, %c0_5, %c0_6] : memref<8x2x768xf32, #tpu.memory_space<vmem>>, vector<1x2x768xf32>
    %5 = vector.shape_cast %4 : vector<1x2x768xf32> to vector<2x768xf32>
    %c0_7 = arith.constant 0 : index
    %c0_8 = arith.constant 0 : index
    %6 = vector.load %arg3[%c0_7, %c0_8] : memref<2x192xf32, #tpu.memory_space<vmem>>, vector<2x192xf32>
    %c0_9 = arith.constant 0 : index
    %c0_10 = arith.constant 0 : index
    %7 = vector.load %arg1[%c0_9, %c0_10] : memref<192x768xf32, #tpu.memory_space<vmem>>, vector<192x768xf32>
    %cst_11 = arith.constant dense<0.000000e+00> : vector<2x768xf32>
    %8 = tpu.matmul %6, %7, %cst_11 {dimension_numbers = #tpu.dot_dimension_numbers<[1], [0], [0], [1], [0, 0, 1, 1], [], []>} : vector<2x192xf32>, vector<192x768xf32>, vector<2x768xf32> -> vector<2x768xf32>
    %9 = arith.addf %5, %8 : vector<2x768xf32>
    %10 = vector.extract_strided_slice %9 {offsets = [0, 0], sizes = [2, 192], strides = [1, 1]} : vector<2x768xf32> to vector<2x192xf32>
    %11 = arith.negf %10 : vector<2x192xf32>
    %12 = math.exp %11 : vector<2x192xf32>
    %cst_12 = arith.constant 1.000000e+00 : f32
    %13 = vector.broadcast %cst_12 : f32 to vector<2x192xf32>
    %14 = arith.addf %13, %12 : vector<2x192xf32>
    %15 = arith.divf %13, %14 : vector<2x192xf32>
    %16 = vector.extract_strided_slice %9 {offsets = [0, 192], sizes = [2, 192], strides = [1, 1]} : vector<2x768xf32> to vector<2x192xf32>
    %17 = arith.negf %16 : vector<2x192xf32>
    %18 = math.exp %17 : vector<2x192xf32>
    %cst_13 = arith.constant 1.000000e+00 : f32
    %19 = vector.broadcast %cst_13 : f32 to vector<2x192xf32>
    %20 = arith.addf %19, %18 : vector<2x192xf32>
    %21 = arith.divf %19, %20 : vector<2x192xf32>
    %22 = vector.extract_strided_slice %9 {offsets = [0, 384], sizes = [2, 192], strides = [1, 1]} : vector<2x768xf32> to vector<2x192xf32>
    %23 = math.tanh %22 : vector<2x192xf32>
    %24 = vector.extract_strided_slice %9 {offsets = [0, 576], sizes = [2, 192], strides = [1, 1]} : vector<2x768xf32> to vector<2x192xf32>
    %25 = arith.negf %24 : vector<2x192xf32>
    %26 = math.exp %25 : vector<2x192xf32>
    %cst_14 = arith.constant 1.000000e+00 : f32
    %27 = vector.broadcast %cst_14 : f32 to vector<2x192xf32>
    %28 = arith.addf %27, %26 : vector<2x192xf32>
    %29 = arith.divf %27, %28 : vector<2x192xf32>
    %c0_15 = arith.constant 0 : index
    %c0_16 = arith.constant 0 : index
    %30 = vector.load %arg4[%c0_15, %c0_16] : memref<2x192xf32, #tpu.memory_space<vmem>>, vector<2x192xf32>
    %31 = arith.mulf %21, %30 : vector<2x192xf32>
    %32 = arith.mulf %15, %23 : vector<2x192xf32>
    %33 = arith.addf %31, %32 : vector<2x192xf32>
    %34 = math.tanh %33 : vector<2x192xf32>
    %35 = arith.mulf %29, %34 : vector<2x192xf32>
    %c0_17 = arith.constant 0 : index
    %c0_18 = arith.constant 0 : index
    %36 = vector.load %arg4[%c0_17, %c0_18] : memref<2x192xf32, #tpu.memory_space<vmem>>, vector<2x192xf32>
    tpu.vector_store %arg4[%c0_17, %c0_18], %33 {strides = array<i32>} : memref<2x192xf32, #tpu.memory_space<vmem>>, vector<2x192xf32>,
    %c0_19 = arith.constant 0 : index
    %c0_20 = arith.constant 0 : index
    %37 = vector.load %arg3[%c0_19, %c0_20] : memref<2x192xf32, #tpu.memory_space<vmem>>, vector<2x192xf32>
    tpu.vector_store %arg3[%c0_19, %c0_20], %35 {strides = array<i32>} : memref<2x192xf32, #tpu.memory_space<vmem>>, vector<2x192xf32>,
    %c0_21 = arith.constant 0 : index
    %c0_22 = arith.constant 0 : index
    %c0_23 = arith.constant 0 : index
    %38 = vector.load %arg2[%c0_21, %c0_22, %c0_23] : memref<8x2x192xf32, #tpu.memory_space<vmem>>, vector<1x2x192xf32>
    %39 = vector.shape_cast %38 : vector<1x2x192xf32> to vector<2x192xf32>
    %40 = vector.shape_cast %35 : vector<2x192xf32> to vector<1x2x192xf32>
    tpu.vector_store %arg2[%c0_21, %c0_22, %c0_23], %40 {strides = array<i32>} : memref<8x2x192xf32, #tpu.memory_space<vmem>>, vector<1x2x192xf32>,
    %c1 = arith.constant 1 : index
    %c0_24 = arith.constant 0 : index
    %c0_25 = arith.constant 0 : index
    %41 = vector.load %arg0[%c1, %c0_24, %c0_25] : memref<8x2x768xf32, #tpu.memory_space<vmem>>, vector<1x2x768xf32>
    %42 = vector.shape_cast %41 : vector<1x2x768xf32> to vector<2x768xf32>
    %c0_26 = arith.constant 0 : index
    %c0_27 = arith.constant 0 : index
    %43 = vector.load %arg3[%c0_26, %c0_27] : memref<2x192xf32, #tpu.memory_space<vmem>>, vector<2x192xf32>
    %c0_28 = arith.constant 0 : index
    %c0_29 = arith.constant 0 : index
    %44 = vector.load %arg1[%c0_28, %c0_29] : memref<192x768xf32, #tpu.memory_space<vmem>>, vector<192x768xf32>
    %cst_30 = arith.constant dense<0.000000e+00> : vector<2x768xf32>
    %45 = tpu.matmul %43, %44, %cst_30 {dimension_numbers = #tpu.dot_dimension_numbers<[1], [0], [0], [1], [0, 0, 1, 1], [], []>} : vector<2x192xf32>, vector<192x768xf32>, vector<2x768xf32> -> vector<2x768xf32>
    %46 = arith.addf %42, %45 : vector<2x768xf32>
    %47 = vector.extract_strided_slice %46 {offsets = [0, 0], sizes = [2, 192], strides = [1, 1]} : vector<2x768xf32> to vector<2x192xf32>
    %48 = arith.negf %47 : vector<2x192xf32>
    %49 = math.exp %48 : vector<2x192xf32>
    %cst_31 = arith.constant 1.000000e+00 : f32
    %50 = vector.broadcast %cst_31 : f32 to vector<2x192xf32>
    %51 = arith.addf %50, %49 : vector<2x192xf32>
    %52 = arith.divf %50, %51 : vector<2x192xf32>
    %53 = vector.extract_strided_slice %46 {offsets = [0, 192], sizes = [2, 192], strides = [1, 1]} : vector<2x768xf32> to vector<2x192xf32>
    %54 = arith.negf %53 : vector<2x192xf32>
    %55 = math.exp %54 : vector<2x192xf32>
    %cst_32 = arith.constant 1.000000e+00 : f32
    %56 = vector.broadcast %cst_32 : f32 to vector<2x192xf32>
    %57 = arith.addf %56, %55 : vector<2x192xf32>
    %58 = arith.divf %56, %57 : vector<2x192xf32>
    %59 = vector.extract_strided_slice %46 {offsets = [0, 384], sizes = [2, 192], strides = [1, 1]} : vector<2x768xf32> to vector<2x192xf32>
    %60 = math.tanh %59 : vector<2x192xf32>
    %61 = vector.extract_strided_slice %46 {offsets = [0, 576], sizes = [2, 192], strides = [1, 1]} : vector<2x768xf32> to vector<2x192xf32>
    %62 = arith.negf %61 : vector<2x192xf32>
    %63 = math.exp %62 : vector<2x192xf32>
    %cst_33 = arith.constant 1.000000e+00 : f32
    %64 = vector.broadcast %cst_33 : f32 to vector<2x192xf32>
    %65 = arith.addf %64, %63 : vector<2x192xf32>
    %66 = arith.divf %64, %65 : vector<2x192xf32>
    %c0_34 = arith.constant 0 : index
    %c0_35 = arith.constant 0 : index
    %67 = vector.load %arg4[%c0_34, %c0_35] : memref<2x192xf32, #tpu.memory_space<vmem>>, vector<2x192xf32>
    %68 = arith.mulf %58, %67 : vector<2x192xf32>
    %69 = arith.mulf %52, %60 : vector<2x192xf32>
    %70 = arith.addf %68, %69 : vector<2x192xf32>
    %71 = math.tanh %70 : vector<2x192xf32>
    %72 = arith.mulf %66, %71 : vector<2x192xf32>
    %c0_36 = arith.constant 0 : index
    %c0_37 = arith.constant 0 : index
    %73 = vector.load %arg4[%c0_36, %c0_37] : memref<2x192xf32, #tpu.memory_space<vmem>>, vector<2x192xf32>
    tpu.vector_store %arg4[%c0_36, %c0_37], %70 {strides = array<i32>} : memref<2x192xf32, #tpu.memory_space<vmem>>, vector<2x192xf32>,
    %c0_38 = arith.constant 0 : index
    %c0_39 = arith.constant 0 : index
    %74 = vector.load %arg3[%c0_38, %c0_39] : memref<2x192xf32, #tpu.memory_space<vmem>>, vector<2x192xf32>
    tpu.vector_store %arg3[%c0_38, %c0_39], %72 {strides = array<i32>} : memref<2x192xf32, #tpu.memory_space<vmem>>, vector<2x192xf32>,
    %c1_40 = arith.constant 1 : index
    %c0_41 = arith.constant 0 : index
    %c0_42 = arith.constant 0 : index
    %75 = vector.load %arg2[%c1_40, %c0_41, %c0_42] : memref<8x2x192xf32, #tpu.memory_space<vmem>>, vector<1x2x192xf32>
    %76 = vector.shape_cast %75 : vector<1x2x192xf32> to vector<2x192xf32>
    %77 = vector.shape_cast %72 : vector<2x192xf32> to vector<1x2x192xf32>
    tpu.vector_store %arg2[%c1_40, %c0_41, %c0_42], %77 {strides = array<i32>} : memref<8x2x192xf32, #tpu.memory_space<vmem>>, vector<1x2x192xf32>,
    %c2 = arith.constant 2 : index
    %c0_43 = arith.constant 0 : index
    %c0_44 = arith.constant 0 : index
    %78 = vector.load %arg0[%c2, %c0_43, %c0_44] : memref<8x2x768xf32, #tpu.memory_space<vmem>>, vector<1x2x768xf32>
    %79 = vector.shape_cast %78 : vector<1x2x768xf32> to vector<2x768xf32>
    %c0_45 = arith.constant 0 : index
    %c0_46 = arith.constant 0 : index
    %80 = vector.load %arg3[%c0_45, %c0_46] : memref<2x192xf32, #tpu.memory_space<vmem>>, vector<2x192xf32>
    %c0_47 = arith.constant 0 : index
    %c0_48 = arith.constant 0 : index
    %81 = vector.load %arg1[%c0_47, %c0_48] : memref<192x768xf32, #tpu.memory_space<vmem>>, vector<192x768xf32>
    %cst_49 = arith.constant dense<0.000000e+00> : vector<2x768xf32>
    %82 = tpu.matmul %80, %81, %cst_49 {dimension_numbers = #tpu.dot_dimension_numbers<[1], [0], [0], [1], [0, 0, 1, 1], [], []>} : vector<2x192xf32>, vector<192x768xf32>, vector<2x768xf32> -> vector<2x768xf32>
    %83 = arith.addf %79, %82 : vector<2x768xf32>
    %84 = vector.extract_strided_slice %83 {offsets = [0, 0], sizes = [2, 192], strides = [1, 1]} : vector<2x768xf32> to vector<2x192xf32>
    %85 = arith.negf %84 : vector<2x192xf32>
    %86 = math.exp %85 : vector<2x192xf32>
    %cst_50 = arith.constant 1.000000e+00 : f32
    %87 = vector.broadcast %cst_50 : f32 to vector<2x192xf32>
    %88 = arith.addf %87, %86 : vector<2x192xf32>
    %89 = arith.divf %87, %88 : vector<2x192xf32>
    %90 = vector.extract_strided_slice %83 {offsets = [0, 192], sizes = [2, 192], strides = [1, 1]} : vector<2x768xf32> to vector<2x192xf32>
    %91 = arith.negf %90 : vector<2x192xf32>
    %92 = math.exp %91 : vector<2x192xf32>
    %cst_51 = arith.constant 1.000000e+00 : f32
    %93 = vector.broadcast %cst_51 : f32 to vector<2x192xf32>
    %94 = arith.addf %93, %92 : vector<2x192xf32>
    %95 = arith.divf %93, %94 : vector<2x192xf32>
    %96 = vector.extract_strided_slice %83 {offsets = [0, 384], sizes = [2, 192], strides = [1, 1]} : vector<2x768xf32> to vector<2x192xf32>
    %97 = math.tanh %96 : vector<2x192xf32>
    %98 = vector.extract_strided_slice %83 {offsets = [0, 576], sizes = [2, 192], strides = [1, 1]} : vector<2x768xf32> to vector<2x192xf32>
    %99 = arith.negf %98 : vector<2x192xf32>
    %100 = math.exp %99 : vector<2x192xf32>
    %cst_52 = arith.constant 1.000000e+00 : f32
    %101 = vector.broadcast %cst_52 : f32 to vector<2x192xf32>
    %102 = arith.addf %101, %100 : vector<2x192xf32>
    %103 = arith.divf %101, %102 : vector<2x192xf32>
    %c0_53 = arith.constant 0 : index
    %c0_54 = arith.constant 0 : index
    %104 = vector.load %arg4[%c0_53, %c0_54] : memref<2x192xf32, #tpu.memory_space<vmem>>, vector<2x192xf32>
    %105 = arith.mulf %95, %104 : vector<2x192xf32>
    %106 = arith.mulf %89, %97 : vector<2x192xf32>
    %107 = arith.addf %105, %106 : vector<2x192xf32>
    %108 = math.tanh %107 : vector<2x192xf32>
    %109 = arith.mulf %103, %108 : vector<2x192xf32>
    %c0_55 = arith.constant 0 : index
    %c0_56 = arith.constant 0 : index
    %110 = vector.load %arg4[%c0_55, %c0_56] : memref<2x192xf32, #tpu.memory_space<vmem>>, vector<2x192xf32>
    tpu.vector_store %arg4[%c0_55, %c0_56], %107 {strides = array<i32>} : memref<2x192xf32, #tpu.memory_space<vmem>>, vector<2x192xf32>,
    %c0_57 = arith.constant 0 : index
    %c0_58 = arith.constant 0 : index
    %111 = vector.load %arg3[%c0_57, %c0_58] : memref<2x192xf32, #tpu.memory_space<vmem>>, vector<2x192xf32>
    tpu.vector_store %arg3[%c0_57, %c0_58], %109 {strides = array<i32>} : memref<2x192xf32, #tpu.memory_space<vmem>>, vector<2x192xf32>,
    %c2_59 = arith.constant 2 : index
    %c0_60 = arith.constant 0 : index
    %c0_61 = arith.constant 0 : index
    %112 = vector.load %arg2[%c2_59, %c0_60, %c0_61] : memref<8x2x192xf32, #tpu.memory_space<vmem>>, vector<1x2x192xf32>
    %113 = vector.shape_cast %112 : vector<1x2x192xf32> to vector<2x192xf32>
    %114 = vector.shape_cast %109 : vector<2x192xf32> to vector<1x2x192xf32>
    tpu.vector_store %arg2[%c2_59, %c0_60, %c0_61], %114 {strides = array<i32>} : memref<8x2x192xf32, #tpu.memory_space<vmem>>, vector<1x2x192xf32>,
    %c3 = arith.constant 3 : index
    %c0_62 = arith.constant 0 : index
    %c0_63 = arith.constant 0 : index
    %115 = vector.load %arg0[%c3, %c0_62, %c0_63] : memref<8x2x768xf32, #tpu.memory_space<vmem>>, vector<1x2x768xf32>
    %116 = vector.shape_cast %115 : vector<1x2x768xf32> to vector<2x768xf32>
    %c0_64 = arith.constant 0 : index
    %c0_65 = arith.constant 0 : index
    %117 = vector.load %arg3[%c0_64, %c0_65] : memref<2x192xf32, #tpu.memory_space<vmem>>, vector<2x192xf32>
    %c0_66 = arith.constant 0 : index
    %c0_67 = arith.constant 0 : index
    %118 = vector.load %arg1[%c0_66, %c0_67] : memref<192x768xf32, #tpu.memory_space<vmem>>, vector<192x768xf32>
    %cst_68 = arith.constant dense<0.000000e+00> : vector<2x768xf32>
    %119 = tpu.matmul %117, %118, %cst_68 {dimension_numbers = #tpu.dot_dimension_numbers<[1], [0], [0], [1], [0, 0, 1, 1], [], []>} : vector<2x192xf32>, vector<192x768xf32>, vector<2x768xf32> -> vector<2x768xf32>
    %120 = arith.addf %116, %119 : vector<2x768xf32>
    %121 = vector.extract_strided_slice %120 {offsets = [0, 0], sizes = [2, 192], strides = [1, 1]} : vector<2x768xf32> to vector<2x192xf32>
    %122 = arith.negf %121 : vector<2x192xf32>
    %123 = math.exp %122 : vector<2x192xf32>
    %cst_69 = arith.constant 1.000000e+00 : f32
    %124 = vector.broadcast %cst_69 : f32 to vector<2x192xf32>
    %125 = arith.addf %124, %123 : vector<2x192xf32>
    %126 = arith.divf %124, %125 : vector<2x192xf32>
    %127 = vector.extract_strided_slice %120 {offsets = [0, 192], sizes = [2, 192], strides = [1, 1]} : vector<2x768xf32> to vector<2x192xf32>
    %128 = arith.negf %127 : vector<2x192xf32>
    %129 = math.exp %128 : vector<2x192xf32>
    %cst_70 = arith.constant 1.000000e+00 : f32
    %130 = vector.broadcast %cst_70 : f32 to vector<2x192xf32>
    %131 = arith.addf %130, %129 : vector<2x192xf32>
    %132 = arith.divf %130, %131 : vector<2x192xf32>
    %133 = vector.extract_strided_slice %120 {offsets = [0, 384], sizes = [2, 192], strides = [1, 1]} : vector<2x768xf32> to vector<2x192xf32>
    %134 = math.tanh %133 : vector<2x192xf32>
    %135 = vector.extract_strided_slice %120 {offsets = [0, 576], sizes = [2, 192], strides = [1, 1]} : vector<2x768xf32> to vector<2x192xf32>
    %136 = arith.negf %135 : vector<2x192xf32>
    %137 = math.exp %136 : vector<2x192xf32>
    %cst_71 = arith.constant 1.000000e+00 : f32
    %138 = vector.broadcast %cst_71 : f32 to vector<2x192xf32>
    %139 = arith.addf %138, %137 : vector<2x192xf32>
    %140 = arith.divf %138, %139 : vector<2x192xf32>
    %c0_72 = arith.constant 0 : index
    %c0_73 = arith.constant 0 : index
    %141 = vector.load %arg4[%c0_72, %c0_73] : memref<2x192xf32, #tpu.memory_space<vmem>>, vector<2x192xf32>
    %142 = arith.mulf %132, %141 : vector<2x192xf32>
    %143 = arith.mulf %126, %134 : vector<2x192xf32>
    %144 = arith.addf %142, %143 : vector<2x192xf32>
    %145 = math.tanh %144 : vector<2x192xf32>
    %146 = arith.mulf %140, %145 : vector<2x192xf32>
    %c0_74 = arith.constant 0 : index
    %c0_75 = arith.constant 0 : index
    %147 = vector.load %arg4[%c0_74, %c0_75] : memref<2x192xf32, #tpu.memory_space<vmem>>, vector<2x192xf32>
    tpu.vector_store %arg4[%c0_74, %c0_75], %144 {strides = array<i32>} : memref<2x192xf32, #tpu.memory_space<vmem>>, vector<2x192xf32>,
    %c0_76 = arith.constant 0 : index
    %c0_77 = arith.constant 0 : index
    %148 = vector.load %arg3[%c0_76, %c0_77] : memref<2x192xf32, #tpu.memory_space<vmem>>, vector<2x192xf32>
    tpu.vector_store %arg3[%c0_76, %c0_77], %146 {strides = array<i32>} : memref<2x192xf32, #tpu.memory_space<vmem>>, vector<2x192xf32>,
    %c3_78 = arith.constant 3 : index
    %c0_79 = arith.constant 0 : index
    %c0_80 = arith.constant 0 : index
    %149 = vector.load %arg2[%c3_78, %c0_79, %c0_80] : memref<8x2x192xf32, #tpu.memory_space<vmem>>, vector<1x2x192xf32>
    %150 = vector.shape_cast %149 : vector<1x2x192xf32> to vector<2x192xf32>
    %151 = vector.shape_cast %146 : vector<2x192xf32> to vector<1x2x192xf32>
    tpu.vector_store %arg2[%c3_78, %c0_79, %c0_80], %151 {strides = array<i32>} : memref<8x2x192xf32, #tpu.memory_space<vmem>>, vector<1x2x192xf32>,
    %c4 = arith.constant 4 : index
    %c0_81 = arith.constant 0 : index
    %c0_82 = arith.constant 0 : index
    %152 = vector.load %arg0[%c4, %c0_81, %c0_82] : memref<8x2x768xf32, #tpu.memory_space<vmem>>, vector<1x2x768xf32>
    %153 = vector.shape_cast %152 : vector<1x2x768xf32> to vector<2x768xf32>
    %c0_83 = arith.constant 0 : index
    %c0_84 = arith.constant 0 : index
    %154 = vector.load %arg3[%c0_83, %c0_84] : memref<2x192xf32, #tpu.memory_space<vmem>>, vector<2x192xf32>
    %c0_85 = arith.constant 0 : index
    %c0_86 = arith.constant 0 : index
    %155 = vector.load %arg1[%c0_85, %c0_86] : memref<192x768xf32, #tpu.memory_space<vmem>>, vector<192x768xf32>
    %cst_87 = arith.constant dense<0.000000e+00> : vector<2x768xf32>
    %156 = tpu.matmul %154, %155, %cst_87 {dimension_numbers = #tpu.dot_dimension_numbers<[1], [0], [0], [1], [0, 0, 1, 1], [], []>} : vector<2x192xf32>, vector<192x768xf32>, vector<2x768xf32> -> vector<2x768xf32>
    %157 = arith.addf %153, %156 : vector<2x768xf32>
    %158 = vector.extract_strided_slice %157 {offsets = [0, 0], sizes = [2, 192], strides = [1, 1]} : vector<2x768xf32> to vector<2x192xf32>
    %159 = arith.negf %158 : vector<2x192xf32>
    %160 = math.exp %159 : vector<2x192xf32>
    %cst_88 = arith.constant 1.000000e+00 : f32
    %161 = vector.broadcast %cst_88 : f32 to vector<2x192xf32>
    %162 = arith.addf %161, %160 : vector<2x192xf32>
    %163 = arith.divf %161, %162 : vector<2x192xf32>
    %164 = vector.extract_strided_slice %157 {offsets = [0, 192], sizes = [2, 192], strides = [1, 1]} : vector<2x768xf32> to vector<2x192xf32>
    %165 = arith.negf %164 : vector<2x192xf32>
    %166 = math.exp %165 : vector<2x192xf32>
    %cst_89 = arith.constant 1.000000e+00 : f32
    %167 = vector.broadcast %cst_89 : f32 to vector<2x192xf32>
    %168 = arith.addf %167, %166 : vector<2x192xf32>
    %169 = arith.divf %167, %168 : vector<2x192xf32>
    %170 = vector.extract_strided_slice %157 {offsets = [0, 384], sizes = [2, 192], strides = [1, 1]} : vector<2x768xf32> to vector<2x192xf32>
    %171 = math.tanh %170 : vector<2x192xf32>
    %172 = vector.extract_strided_slice %157 {offsets = [0, 576], sizes = [2, 192], strides = [1, 1]} : vector<2x768xf32> to vector<2x192xf32>
    %173 = arith.negf %172 : vector<2x192xf32>
    %174 = math.exp %173 : vector<2x192xf32>
    %cst_90 = arith.constant 1.000000e+00 : f32
    %175 = vector.broadcast %cst_90 : f32 to vector<2x192xf32>
    %176 = arith.addf %175, %174 : vector<2x192xf32>
    %177 = arith.divf %175, %176 : vector<2x192xf32>
    %c0_91 = arith.constant 0 : index
    %c0_92 = arith.constant 0 : index
    %178 = vector.load %arg4[%c0_91, %c0_92] : memref<2x192xf32, #tpu.memory_space<vmem>>, vector<2x192xf32>
    %179 = arith.mulf %169, %178 : vector<2x192xf32>
    %180 = arith.mulf %163, %171 : vector<2x192xf32>
    %181 = arith.addf %179, %180 : vector<2x192xf32>
    %182 = math.tanh %181 : vector<2x192xf32>
    %183 = arith.mulf %177, %182 : vector<2x192xf32>
    %c0_93 = arith.constant 0 : index
    %c0_94 = arith.constant 0 : index
    %184 = vector.load %arg4[%c0_93, %c0_94] : memref<2x192xf32, #tpu.memory_space<vmem>>, vector<2x192xf32>
    tpu.vector_store %arg4[%c0_93, %c0_94], %181 {strides = array<i32>} : memref<2x192xf32, #tpu.memory_space<vmem>>, vector<2x192xf32>,
    %c0_95 = arith.constant 0 : index
    %c0_96 = arith.constant 0 : index
    %185 = vector.load %arg3[%c0_95, %c0_96] : memref<2x192xf32, #tpu.memory_space<vmem>>, vector<2x192xf32>
    tpu.vector_store %arg3[%c0_95, %c0_96], %183 {strides = array<i32>} : memref<2x192xf32, #tpu.memory_space<vmem>>, vector<2x192xf32>,
    %c4_97 = arith.constant 4 : index
    %c0_98 = arith.constant 0 : index
    %c0_99 = arith.constant 0 : index
    %186 = vector.load %arg2[%c4_97, %c0_98, %c0_99] : memref<8x2x192xf32, #tpu.memory_space<vmem>>, vector<1x2x192xf32>
    %187 = vector.shape_cast %186 : vector<1x2x192xf32> to vector<2x192xf32>
    %188 = vector.shape_cast %183 : vector<2x192xf32> to vector<1x2x192xf32>
    tpu.vector_store %arg2[%c4_97, %c0_98, %c0_99], %188 {strides = array<i32>} : memref<8x2x192xf32, #tpu.memory_space<vmem>>, vector<1x2x192xf32>,
    %c5 = arith.constant 5 : index
    %c0_100 = arith.constant 0 : index
    %c0_101 = arith.constant 0 : index
    %189 = vector.load %arg0[%c5, %c0_100, %c0_101] : memref<8x2x768xf32, #tpu.memory_space<vmem>>, vector<1x2x768xf32>
    %190 = vector.shape_cast %189 : vector<1x2x768xf32> to vector<2x768xf32>
    %c0_102 = arith.constant 0 : index
    %c0_103 = arith.constant 0 : index
    %191 = vector.load %arg3[%c0_102, %c0_103] : memref<2x192xf32, #tpu.memory_space<vmem>>, vector<2x192xf32>
    %c0_104 = arith.constant 0 : index
    %c0_105 = arith.constant 0 : index
    %192 = vector.load %arg1[%c0_104, %c0_105] : memref<192x768xf32, #tpu.memory_space<vmem>>, vector<192x768xf32>
    %cst_106 = arith.constant dense<0.000000e+00> : vector<2x768xf32>
    %193 = tpu.matmul %191, %192, %cst_106 {dimension_numbers = #tpu.dot_dimension_numbers<[1], [0], [0], [1], [0, 0, 1, 1], [], []>} : vector<2x192xf32>, vector<192x768xf32>, vector<2x768xf32> -> vector<2x768xf32>
    %194 = arith.addf %190, %193 : vector<2x768xf32>
    %195 = vector.extract_strided_slice %194 {offsets = [0, 0], sizes = [2, 192], strides = [1, 1]} : vector<2x768xf32> to vector<2x192xf32>
    %196 = arith.negf %195 : vector<2x192xf32>
    %197 = math.exp %196 : vector<2x192xf32>
    %cst_107 = arith.constant 1.000000e+00 : f32
    %198 = vector.broadcast %cst_107 : f32 to vector<2x192xf32>
    %199 = arith.addf %198, %197 : vector<2x192xf32>
    %200 = arith.divf %198, %199 : vector<2x192xf32>
    %201 = vector.extract_strided_slice %194 {offsets = [0, 192], sizes = [2, 192], strides = [1, 1]} : vector<2x768xf32> to vector<2x192xf32>
    %202 = arith.negf %201 : vector<2x192xf32>
    %203 = math.exp %202 : vector<2x192xf32>
    %cst_108 = arith.constant 1.000000e+00 : f32
    %204 = vector.broadcast %cst_108 : f32 to vector<2x192xf32>
    %205 = arith.addf %204, %203 : vector<2x192xf32>
    %206 = arith.divf %204, %205 : vector<2x192xf32>
    %207 = vector.extract_strided_slice %194 {offsets = [0, 384], sizes = [2, 192], strides = [1, 1]} : vector<2x768xf32> to vector<2x192xf32>
    %208 = math.tanh %207 : vector<2x192xf32>
    %209 = vector.extract_strided_slice %194 {offsets = [0, 576], sizes = [2, 192], strides = [1, 1]} : vector<2x768xf32> to vector<2x192xf32>
    %210 = arith.negf %209 : vector<2x192xf32>
    %211 = math.exp %210 : vector<2x192xf32>
    %cst_109 = arith.constant 1.000000e+00 : f32
    %212 = vector.broadcast %cst_109 : f32 to vector<2x192xf32>
    %213 = arith.addf %212, %211 : vector<2x192xf32>
    %214 = arith.divf %212, %213 : vector<2x192xf32>
    %c0_110 = arith.constant 0 : index
    %c0_111 = arith.constant 0 : index
    %215 = vector.load %arg4[%c0_110, %c0_111] : memref<2x192xf32, #tpu.memory_space<vmem>>, vector<2x192xf32>
    %216 = arith.mulf %206, %215 : vector<2x192xf32>
    %217 = arith.mulf %200, %208 : vector<2x192xf32>
    %218 = arith.addf %216, %217 : vector<2x192xf32>
    %219 = math.tanh %218 : vector<2x192xf32>
    %220 = arith.mulf %214, %219 : vector<2x192xf32>
    %c0_112 = arith.constant 0 : index
    %c0_113 = arith.constant 0 : index
    %221 = vector.load %arg4[%c0_112, %c0_113] : memref<2x192xf32, #tpu.memory_space<vmem>>, vector<2x192xf32>
    tpu.vector_store %arg4[%c0_112, %c0_113], %218 {strides = array<i32>} : memref<2x192xf32, #tpu.memory_space<vmem>>, vector<2x192xf32>,
    %c0_114 = arith.constant 0 : index
    %c0_115 = arith.constant 0 : index
    %222 = vector.load %arg3[%c0_114, %c0_115] : memref<2x192xf32, #tpu.memory_space<vmem>>, vector<2x192xf32>
    tpu.vector_store %arg3[%c0_114, %c0_115], %220 {strides = array<i32>} : memref<2x192xf32, #tpu.memory_space<vmem>>, vector<2x192xf32>,
    %c5_116 = arith.constant 5 : index
    %c0_117 = arith.constant 0 : index
    %c0_118 = arith.constant 0 : index
    %223 = vector.load %arg2[%c5_116, %c0_117, %c0_118] : memref<8x2x192xf32, #tpu.memory_space<vmem>>, vector<1x2x192xf32>
    %224 = vector.shape_cast %223 : vector<1x2x192xf32> to vector<2x192xf32>
    %225 = vector.shape_cast %220 : vector<2x192xf32> to vector<1x2x192xf32>
    tpu.vector_store %arg2[%c5_116, %c0_117, %c0_118], %225 {strides = array<i32>} : memref<8x2x192xf32, #tpu.memory_space<vmem>>, vector<1x2x192xf32>,
    %c6 = arith.constant 6 : index
    %c0_119 = arith.constant 0 : index
    %c0_120 = arith.constant 0 : index
    %226 = vector.load %arg0[%c6, %c0_119, %c0_120] : memref<8x2x768xf32, #tpu.memory_space<vmem>>, vector<1x2x768xf32>
    %227 = vector.shape_cast %226 : vector<1x2x768xf32> to vector<2x768xf32>
    %c0_121 = arith.constant 0 : index
    %c0_122 = arith.constant 0 : index
    %228 = vector.load %arg3[%c0_121, %c0_122] : memref<2x192xf32, #tpu.memory_space<vmem>>, vector<2x192xf32>
    %c0_123 = arith.constant 0 : index
    %c0_124 = arith.constant 0 : index
    %229 = vector.load %arg1[%c0_123, %c0_124] : memref<192x768xf32, #tpu.memory_space<vmem>>, vector<192x768xf32>
    %cst_125 = arith.constant dense<0.000000e+00> : vector<2x768xf32>
    %230 = tpu.matmul %228, %229, %cst_125 {dimension_numbers = #tpu.dot_dimension_numbers<[1], [0], [0], [1], [0, 0, 1, 1], [], []>} : vector<2x192xf32>, vector<192x768xf32>, vector<2x768xf32> -> vector<2x768xf32>
    %231 = arith.addf %227, %230 : vector<2x768xf32>
    %232 = vector.extract_strided_slice %231 {offsets = [0, 0], sizes = [2, 192], strides = [1, 1]} : vector<2x768xf32> to vector<2x192xf32>
    %233 = arith.negf %232 : vector<2x192xf32>
    %234 = math.exp %233 : vector<2x192xf32>
    %cst_126 = arith.constant 1.000000e+00 : f32
    %235 = vector.broadcast %cst_126 : f32 to vector<2x192xf32>
    %236 = arith.addf %235, %234 : vector<2x192xf32>
    %237 = arith.divf %235, %236 : vector<2x192xf32>
    %238 = vector.extract_strided_slice %231 {offsets = [0, 192], sizes = [2, 192], strides = [1, 1]} : vector<2x768xf32> to vector<2x192xf32>
    %239 = arith.negf %238 : vector<2x192xf32>
    %240 = math.exp %239 : vector<2x192xf32>
    %cst_127 = arith.constant 1.000000e+00 : f32
    %241 = vector.broadcast %cst_127 : f32 to vector<2x192xf32>
    %242 = arith.addf %241, %240 : vector<2x192xf32>
    %243 = arith.divf %241, %242 : vector<2x192xf32>
    %244 = vector.extract_strided_slice %231 {offsets = [0, 384], sizes = [2, 192], strides = [1, 1]} : vector<2x768xf32> to vector<2x192xf32>
    %245 = math.tanh %244 : vector<2x192xf32>
    %246 = vector.extract_strided_slice %231 {offsets = [0, 576], sizes = [2, 192], strides = [1, 1]} : vector<2x768xf32> to vector<2x192xf32>
    %247 = arith.negf %246 : vector<2x192xf32>
    %248 = math.exp %247 : vector<2x192xf32>
    %cst_128 = arith.constant 1.000000e+00 : f32
    %249 = vector.broadcast %cst_128 : f32 to vector<2x192xf32>
    %250 = arith.addf %249, %248 : vector<2x192xf32>
    %251 = arith.divf %249, %250 : vector<2x192xf32>
    %c0_129 = arith.constant 0 : index
    %c0_130 = arith.constant 0 : index
    %252 = vector.load %arg4[%c0_129, %c0_130] : memref<2x192xf32, #tpu.memory_space<vmem>>, vector<2x192xf32>
    %253 = arith.mulf %243, %252 : vector<2x192xf32>
    %254 = arith.mulf %237, %245 : vector<2x192xf32>
    %255 = arith.addf %253, %254 : vector<2x192xf32>
    %256 = math.tanh %255 : vector<2x192xf32>
    %257 = arith.mulf %251, %256 : vector<2x192xf32>
    %c0_131 = arith.constant 0 : index
    %c0_132 = arith.constant 0 : index
    %258 = vector.load %arg4[%c0_131, %c0_132] : memref<2x192xf32, #tpu.memory_space<vmem>>, vector<2x192xf32>
    tpu.vector_store %arg4[%c0_131, %c0_132], %255 {strides = array<i32>} : memref<2x192xf32, #tpu.memory_space<vmem>>, vector<2x192xf32>,
    %c0_133 = arith.constant 0 : index
    %c0_134 = arith.constant 0 : index
    %259 = vector.load %arg3[%c0_133, %c0_134] : memref<2x192xf32, #tpu.memory_space<vmem>>, vector<2x192xf32>
    tpu.vector_store %arg3[%c0_133, %c0_134], %257 {strides = array<i32>} : memref<2x192xf32, #tpu.memory_space<vmem>>, vector<2x192xf32>,
    %c6_135 = arith.constant 6 : index
    %c0_136 = arith.constant 0 : index
    %c0_137 = arith.constant 0 : index
    %260 = vector.load %arg2[%c6_135, %c0_136, %c0_137] : memref<8x2x192xf32, #tpu.memory_space<vmem>>, vector<1x2x192xf32>
    %261 = vector.shape_cast %260 : vector<1x2x192xf32> to vector<2x192xf32>
    %262 = vector.shape_cast %257 : vector<2x192xf32> to vector<1x2x192xf32>
    tpu.vector_store %arg2[%c6_135, %c0_136, %c0_137], %262 {strides = array<i32>} : memref<8x2x192xf32, #tpu.memory_space<vmem>>, vector<1x2x192xf32>,
    %c7 = arith.constant 7 : index
    %c0_138 = arith.constant 0 : index
    %c0_139 = arith.constant 0 : index
    %263 = vector.load %arg0[%c7, %c0_138, %c0_139] : memref<8x2x768xf32, #tpu.memory_space<vmem>>, vector<1x2x768xf32>
    %264 = vector.shape_cast %263 : vector<1x2x768xf32> to vector<2x768xf32>
    %c0_140 = arith.constant 0 : index
    %c0_141 = arith.constant 0 : index
    %265 = vector.load %arg3[%c0_140, %c0_141] : memref<2x192xf32, #tpu.memory_space<vmem>>, vector<2x192xf32>
    %c0_142 = arith.constant 0 : index
    %c0_143 = arith.constant 0 : index
    %266 = vector.load %arg1[%c0_142, %c0_143] : memref<192x768xf32, #tpu.memory_space<vmem>>, vector<192x768xf32>
    %cst_144 = arith.constant dense<0.000000e+00> : vector<2x768xf32>
    %267 = tpu.matmul %265, %266, %cst_144 {dimension_numbers = #tpu.dot_dimension_numbers<[1], [0], [0], [1], [0, 0, 1, 1], [], []>} : vector<2x192xf32>, vector<192x768xf32>, vector<2x768xf32> -> vector<2x768xf32>
    %268 = arith.addf %264, %267 : vector<2x768xf32>
    %269 = vector.extract_strided_slice %268 {offsets = [0, 0], sizes = [2, 192], strides = [1, 1]} : vector<2x768xf32> to vector<2x192xf32>
    %270 = arith.negf %269 : vector<2x192xf32>
    %271 = math.exp %270 : vector<2x192xf32>
    %cst_145 = arith.constant 1.000000e+00 : f32
    %272 = vector.broadcast %cst_145 : f32 to vector<2x192xf32>
    %273 = arith.addf %272, %271 : vector<2x192xf32>
    %274 = arith.divf %272, %273 : vector<2x192xf32>
    %275 = vector.extract_strided_slice %268 {offsets = [0, 192], sizes = [2, 192], strides = [1, 1]} : vector<2x768xf32> to vector<2x192xf32>
    %276 = arith.negf %275 : vector<2x192xf32>
    %277 = math.exp %276 : vector<2x192xf32>
    %cst_146 = arith.constant 1.000000e+00 : f32
    %278 = vector.broadcast %cst_146 : f32 to vector<2x192xf32>
    %279 = arith.addf %278, %277 : vector<2x192xf32>
    %280 = arith.divf %278, %279 : vector<2x192xf32>
    %281 = vector.extract_strided_slice %268 {offsets = [0, 384], sizes = [2, 192], strides = [1, 1]} : vector<2x768xf32> to vector<2x192xf32>
    %282 = math.tanh %281 : vector<2x192xf32>
    %283 = vector.extract_strided_slice %268 {offsets = [0, 576], sizes = [2, 192], strides = [1, 1]} : vector<2x768xf32> to vector<2x192xf32>
    %284 = arith.negf %283 : vector<2x192xf32>
    %285 = math.exp %284 : vector<2x192xf32>
    %cst_147 = arith.constant 1.000000e+00 : f32
    %286 = vector.broadcast %cst_147 : f32 to vector<2x192xf32>
    %287 = arith.addf %286, %285 : vector<2x192xf32>
    %288 = arith.divf %286, %287 : vector<2x192xf32>
    %c0_148 = arith.constant 0 : index
    %c0_149 = arith.constant 0 : index
    %289 = vector.load %arg4[%c0_148, %c0_149] : memref<2x192xf32, #tpu.memory_space<vmem>>, vector<2x192xf32>
    %290 = arith.mulf %280, %289 : vector<2x192xf32>
    %291 = arith.mulf %274, %282 : vector<2x192xf32>
    %292 = arith.addf %290, %291 : vector<2x192xf32>
    %293 = math.tanh %292 : vector<2x192xf32>
    %294 = arith.mulf %288, %293 : vector<2x192xf32>
    %c0_150 = arith.constant 0 : index
    %c0_151 = arith.constant 0 : index
    %295 = vector.load %arg4[%c0_150, %c0_151] : memref<2x192xf32, #tpu.memory_space<vmem>>, vector<2x192xf32>
    tpu.vector_store %arg4[%c0_150, %c0_151], %292 {strides = array<i32>} : memref<2x192xf32, #tpu.memory_space<vmem>>, vector<2x192xf32>,
    %c0_152 = arith.constant 0 : index
    %c0_153 = arith.constant 0 : index
    %296 = vector.load %arg3[%c0_152, %c0_153] : memref<2x192xf32, #tpu.memory_space<vmem>>, vector<2x192xf32>
    tpu.vector_store %arg3[%c0_152, %c0_153], %294 {strides = array<i32>} : memref<2x192xf32, #tpu.memory_space<vmem>>, vector<2x192xf32>,
    %c7_154 = arith.constant 7 : index
    %c0_155 = arith.constant 0 : index
    %c0_156 = arith.constant 0 : index
    %297 = vector.load %arg2[%c7_154, %c0_155, %c0_156] : memref<8x2x192xf32, #tpu.memory_space<vmem>>, vector<1x2x192xf32>
    %298 = vector.shape_cast %297 : vector<1x2x192xf32> to vector<2x192xf32>
    %299 = vector.shape_cast %294 : vector<2x192xf32> to vector<1x2x192xf32>
    tpu.vector_store %arg2[%c7_154, %c0_155, %c0_156], %299 {strides = array<i32>} : memref<8x2x192xf32, #tpu.memory_space<vmem>>, vector<1x2x192xf32>,
    return
  }
}

module attributes {stable_mosaic.version = 11 : i64} {
  func.func @_cross_mha_kernel(%arg0: i32, %arg1: memref<2x8x64xf32, #tpu.memory_space<vmem>>, %arg2: memref<1x2x8x64xf32, #tpu.memory_space<vmem>>, %arg3: memref<1x64x192xf32, #tpu.memory_space<vmem>>, %arg4: memref<1x1x192xf32, #tpu.memory_space<vmem>>, %arg5: memref<1x64x64xf32, #tpu.memory_space<vmem>>, %arg6: memref<1x1x64xf32, #tpu.memory_space<vmem>>, %arg7: memref<1x2x8x64xf32, #tpu.memory_space<vmem>>) attributes {dimension_semantics = [#tpu.dimension_semantics<parallel>], iteration_bounds = array<i64: 2>, scalar_prefetch = 0 : i64, scratch_operands = 0 : i64, tpu.core_type = #tpu.core_type<tc>, window_params = [{pipeline_mode = #tpu.pipeline_mode<synchronous>, transform_indices = @transform_0, window_bounds = array<i64: 2, 8, 64>}, {transform_indices = @transform_1, window_bounds = array<i64: 1, 2, 8, 64>}, {transform_indices = @transform_2, window_bounds = array<i64: 1, 64, 192>}, {transform_indices = @transform_3, window_bounds = array<i64: 1, 1, 192>}, {transform_indices = @transform_4, window_bounds = array<i64: 1, 64, 64>}, {transform_indices = @transform_5, window_bounds = array<i64: 1, 1, 64>}, {transform_indices = @transform_6, window_bounds = array<i64: 1, 2, 8, 64>}]} {
    %c0 = arith.constant 0 : index
    %c0_0 = arith.constant 0 : index
    %c0_1 = arith.constant 0 : index
    %0 = vector.load %arg1[%c0, %c0_0, %c0_1] : memref<2x8x64xf32, #tpu.memory_space<vmem>>, vector<2x8x64xf32>
    %c0_2 = arith.constant 0 : index
    %c0_3 = arith.constant 0 : index
    %c0_4 = arith.constant 0 : index
    %c0_5 = arith.constant 0 : index
    %1 = vector.load %arg2[%c0_2, %c0_3, %c0_4, %c0_5] : memref<1x2x8x64xf32, #tpu.memory_space<vmem>>, vector<1x2x8x64xf32>
    %2 = vector.shape_cast %1 : vector<1x2x8x64xf32> to vector<2x8x64xf32>
    %c0_6 = arith.constant 0 : index
    %c0_7 = arith.constant 0 : index
    %c0_8 = arith.constant 0 : index
    %3 = vector.load %arg3[%c0_6, %c0_7, %c0_8] : memref<1x64x192xf32, #tpu.memory_space<vmem>>, vector<1x64x192xf32>
    %4 = vector.shape_cast %3 : vector<1x64x192xf32> to vector<64x192xf32>
    %c0_9 = arith.constant 0 : index
    %c0_10 = arith.constant 0 : index
    %c0_11 = arith.constant 0 : index
    %5 = vector.load %arg4[%c0_9, %c0_10, %c0_11] : memref<1x1x192xf32, #tpu.memory_space<vmem>>, vector<1x1x192xf32>
    %6 = vector.shape_cast %5 : vector<1x1x192xf32> to vector<1x192xf32>
    %c0_12 = arith.constant 0 : index
    %c0_13 = arith.constant 0 : index
    %c0_14 = arith.constant 0 : index
    %7 = vector.load %arg5[%c0_12, %c0_13, %c0_14] : memref<1x64x64xf32, #tpu.memory_space<vmem>>, vector<1x64x64xf32>
    %8 = vector.shape_cast %7 : vector<1x64x64xf32> to vector<64x64xf32>
    %c0_15 = arith.constant 0 : index
    %c0_16 = arith.constant 0 : index
    %c0_17 = arith.constant 0 : index
    %9 = vector.load %arg6[%c0_15, %c0_16, %c0_17] : memref<1x1x64xf32, #tpu.memory_space<vmem>>, vector<1x1x64xf32>
    %10 = vector.shape_cast %9 : vector<1x1x64xf32> to vector<1x64xf32>
    %11 = vector.shape_cast %0 : vector<2x8x64xf32> to vector<16x64xf32>
    %12 = vector.shape_cast %2 : vector<2x8x64xf32> to vector<16x64xf32>
    %13 = vector.extract_strided_slice %4 {offsets = [0, 0], sizes = [64, 64], strides = [1, 1]} : vector<64x192xf32> to vector<64x64xf32>
    %cst = arith.constant dense<0.000000e+00> : vector<16x64xf32>
    %14 = tpu.matmul %11, %13, %cst {dimension_numbers = #tpu.dot_dimension_numbers<[1], [0], [0], [1], [0, 0, 1, 1], [], []>} : vector<16x64xf32>, vector<64x64xf32>, vector<16x64xf32> -> vector<16x64xf32>
    %15 = vector.extract_strided_slice %6 {offsets = [0, 0], sizes = [1, 64], strides = [1, 1]} : vector<1x192xf32> to vector<1x64xf32>
    %16 = vector.broadcast %15 : vector<1x64xf32> to vector<16x64xf32>
    %17 = arith.addf %14, %16 : vector<16x64xf32>
    %18 = vector.extract_strided_slice %4 {offsets = [0, 64], sizes = [64, 128], strides = [1, 1]} : vector<64x192xf32> to vector<64x128xf32>
    %cst_18 = arith.constant dense<0.000000e+00> : vector<16x128xf32>
    %19 = tpu.matmul %12, %18, %cst_18 {dimension_numbers = #tpu.dot_dimension_numbers<[1], [0], [0], [1], [0, 0, 1, 1], [], []>} : vector<16x64xf32>, vector<64x128xf32>, vector<16x128xf32> -> vector<16x128xf32>
    %20 = vector.extract_strided_slice %6 {offsets = [0, 64], sizes = [1, 128], strides = [1, 1]} : vector<1x192xf32> to vector<1x128xf32>
    %21 = vector.broadcast %20 : vector<1x128xf32> to vector<16x128xf32>
    %22 = arith.addf %19, %21 : vector<16x128xf32>
    %23 = vector.extract_strided_slice %22 {offsets = [0, 0], sizes = [16, 64], strides = [1, 1]} : vector<16x128xf32> to vector<16x64xf32>
    %24 = vector.extract_strided_slice %22 {offsets = [0, 64], sizes = [16, 64], strides = [1, 1]} : vector<16x128xf32> to vector<16x64xf32>
    %25 = vector.shape_cast %17 : vector<16x64xf32> to vector<2x8x64xf32>
    %26 = vector.shape_cast %23 : vector<16x64xf32> to vector<2x8x64xf32>
    %27 = vector.shape_cast %24 : vector<16x64xf32> to vector<2x8x64xf32>
    %28 = vector.extract_strided_slice %25 {offsets = [0, 0, 0], sizes = [2, 8, 8], strides = [1, 1, 1]} : vector<2x8x64xf32> to vector<2x8x8xf32>
    %29 = vector.extract_strided_slice %26 {offsets = [0, 0, 0], sizes = [2, 8, 8], strides = [1, 1, 1]} : vector<2x8x64xf32> to vector<2x8x8xf32>
    %30 = vector.extract_strided_slice %27 {offsets = [0, 0, 0], sizes = [2, 8, 8], strides = [1, 1, 1]} : vector<2x8x64xf32> to vector<2x8x8xf32>
    "tpu.trace_start"() <{level = 10 : i32, message = "bqd,bkd->bqk"}> : () -> ()
    %cst_19 = arith.constant dense<0.000000e+00> : vector<2x8x8xf32>
    %31 = tpu.matmul %28, %29, %cst_19 {dimension_numbers = #tpu.dot_dimension_numbers<[2], [2], [1], [1], [0, 0, 0, 1, 1, 1], [0], [0]>} : vector<2x8x8xf32>, vector<2x8x8xf32>, vector<2x8x8xf32> -> vector<2x8x8xf32>
    "tpu.trace_stop"() : () -> ()
    %cst_20 = arith.constant 0.353553385 : f32
    %32 = vector.broadcast %cst_20 : f32 to vector<2x8x8xf32>
    %33 = arith.mulf %31, %32 : vector<2x8x8xf32>
    %cst_21 = arith.constant dense<0xFF800000> : vector<2x8xf32>
    %34 = vector.multi_reduction <maximumf>, %33, %cst_21 [2] : vector<2x8x8xf32> to vector<2x8xf32>
    %35 = vector.shape_cast %34 : vector<2x8xf32> to vector<2x8x1xf32>
    %36 = vector.broadcast %35 : vector<2x8x1xf32> to vector<2x8x8xf32>
    %37 = arith.subf %33, %36 : vector<2x8x8xf32>
    %38 = math.exp %37 : vector<2x8x8xf32>
    %cst_22 = arith.constant dense<0.000000e+00> : vector<2x8xf32>
    %39 = vector.multi_reduction <add>, %38, %cst_22 [2] : vector<2x8x8xf32> to vector<2x8xf32>
    %40 = vector.shape_cast %39 : vector<2x8xf32> to vector<2x8x1xf32>
    %41 = tpu.reciprocal %40 {approx = true} : vector<2x8x1xf32> -> vector<2x8x1xf32>
    %42 = vector.broadcast %41 : vector<2x8x1xf32> to vector<2x8x8xf32>
    %43 = arith.mulf %38, %42 : vector<2x8x8xf32>
    "tpu.trace_start"() <{level = 10 : i32, message = "bqk,bkd->bqd"}> : () -> ()
    %cst_23 = arith.constant dense<0.000000e+00> : vector<2x8x8xf32>
    %44 = tpu.matmul %43, %30, %cst_23 {dimension_numbers = #tpu.dot_dimension_numbers<[2], [1], [1], [2], [0, 0, 0, 1, 1, 2], [0], [0]>} : vector<2x8x8xf32>, vector<2x8x8xf32>, vector<2x8x8xf32> -> vector<2x8x8xf32>
    "tpu.trace_stop"() : () -> ()
    %45 = vector.extract_strided_slice %25 {offsets = [0, 0, 8], sizes = [2, 8, 8], strides = [1, 1, 1]} : vector<2x8x64xf32> to vector<2x8x8xf32>
    %46 = vector.extract_strided_slice %26 {offsets = [0, 0, 8], sizes = [2, 8, 8], strides = [1, 1, 1]} : vector<2x8x64xf32> to vector<2x8x8xf32>
    %47 = vector.extract_strided_slice %27 {offsets = [0, 0, 8], sizes = [2, 8, 8], strides = [1, 1, 1]} : vector<2x8x64xf32> to vector<2x8x8xf32>
    "tpu.trace_start"() <{level = 10 : i32, message = "bqd,bkd->bqk"}> : () -> ()
    %cst_24 = arith.constant dense<0.000000e+00> : vector<2x8x8xf32>
    %48 = tpu.matmul %45, %46, %cst_24 {dimension_numbers = #tpu.dot_dimension_numbers<[2], [2], [1], [1], [0, 0, 0, 1, 1, 1], [0], [0]>} : vector<2x8x8xf32>, vector<2x8x8xf32>, vector<2x8x8xf32> -> vector<2x8x8xf32>
    "tpu.trace_stop"() : () -> ()
    %cst_25 = arith.constant 0.353553385 : f32
    %49 = vector.broadcast %cst_25 : f32 to vector<2x8x8xf32>
    %50 = arith.mulf %48, %49 : vector<2x8x8xf32>
    %cst_26 = arith.constant dense<0xFF800000> : vector<2x8xf32>
    %51 = vector.multi_reduction <maximumf>, %50, %cst_26 [2] : vector<2x8x8xf32> to vector<2x8xf32>
    %52 = vector.shape_cast %51 : vector<2x8xf32> to vector<2x8x1xf32>
    %53 = vector.broadcast %52 : vector<2x8x1xf32> to vector<2x8x8xf32>
    %54 = arith.subf %50, %53 : vector<2x8x8xf32>
    %55 = math.exp %54 : vector<2x8x8xf32>
    %cst_27 = arith.constant dense<0.000000e+00> : vector<2x8xf32>
    %56 = vector.multi_reduction <add>, %55, %cst_27 [2] : vector<2x8x8xf32> to vector<2x8xf32>
    %57 = vector.shape_cast %56 : vector<2x8xf32> to vector<2x8x1xf32>
    %58 = tpu.reciprocal %57 {approx = true} : vector<2x8x1xf32> -> vector<2x8x1xf32>
    %59 = vector.broadcast %58 : vector<2x8x1xf32> to vector<2x8x8xf32>
    %60 = arith.mulf %55, %59 : vector<2x8x8xf32>
    "tpu.trace_start"() <{level = 10 : i32, message = "bqk,bkd->bqd"}> : () -> ()
    %cst_28 = arith.constant dense<0.000000e+00> : vector<2x8x8xf32>
    %61 = tpu.matmul %60, %47, %cst_28 {dimension_numbers = #tpu.dot_dimension_numbers<[2], [1], [1], [2], [0, 0, 0, 1, 1, 2], [0], [0]>} : vector<2x8x8xf32>, vector<2x8x8xf32>, vector<2x8x8xf32> -> vector<2x8x8xf32>
    "tpu.trace_stop"() : () -> ()
    %62 = vector.extract_strided_slice %25 {offsets = [0, 0, 16], sizes = [2, 8, 8], strides = [1, 1, 1]} : vector<2x8x64xf32> to vector<2x8x8xf32>
    %63 = vector.extract_strided_slice %26 {offsets = [0, 0, 16], sizes = [2, 8, 8], strides = [1, 1, 1]} : vector<2x8x64xf32> to vector<2x8x8xf32>
    %64 = vector.extract_strided_slice %27 {offsets = [0, 0, 16], sizes = [2, 8, 8], strides = [1, 1, 1]} : vector<2x8x64xf32> to vector<2x8x8xf32>
    "tpu.trace_start"() <{level = 10 : i32, message = "bqd,bkd->bqk"}> : () -> ()
    %cst_29 = arith.constant dense<0.000000e+00> : vector<2x8x8xf32>
    %65 = tpu.matmul %62, %63, %cst_29 {dimension_numbers = #tpu.dot_dimension_numbers<[2], [2], [1], [1], [0, 0, 0, 1, 1, 1], [0], [0]>} : vector<2x8x8xf32>, vector<2x8x8xf32>, vector<2x8x8xf32> -> vector<2x8x8xf32>
    "tpu.trace_stop"() : () -> ()
    %cst_30 = arith.constant 0.353553385 : f32
    %66 = vector.broadcast %cst_30 : f32 to vector<2x8x8xf32>
    %67 = arith.mulf %65, %66 : vector<2x8x8xf32>
    %cst_31 = arith.constant dense<0xFF800000> : vector<2x8xf32>
    %68 = vector.multi_reduction <maximumf>, %67, %cst_31 [2] : vector<2x8x8xf32> to vector<2x8xf32>
    %69 = vector.shape_cast %68 : vector<2x8xf32> to vector<2x8x1xf32>
    %70 = vector.broadcast %69 : vector<2x8x1xf32> to vector<2x8x8xf32>
    %71 = arith.subf %67, %70 : vector<2x8x8xf32>
    %72 = math.exp %71 : vector<2x8x8xf32>
    %cst_32 = arith.constant dense<0.000000e+00> : vector<2x8xf32>
    %73 = vector.multi_reduction <add>, %72, %cst_32 [2] : vector<2x8x8xf32> to vector<2x8xf32>
    %74 = vector.shape_cast %73 : vector<2x8xf32> to vector<2x8x1xf32>
    %75 = tpu.reciprocal %74 {approx = true} : vector<2x8x1xf32> -> vector<2x8x1xf32>
    %76 = vector.broadcast %75 : vector<2x8x1xf32> to vector<2x8x8xf32>
    %77 = arith.mulf %72, %76 : vector<2x8x8xf32>
    "tpu.trace_start"() <{level = 10 : i32, message = "bqk,bkd->bqd"}> : () -> ()
    %cst_33 = arith.constant dense<0.000000e+00> : vector<2x8x8xf32>
    %78 = tpu.matmul %77, %64, %cst_33 {dimension_numbers = #tpu.dot_dimension_numbers<[2], [1], [1], [2], [0, 0, 0, 1, 1, 2], [0], [0]>} : vector<2x8x8xf32>, vector<2x8x8xf32>, vector<2x8x8xf32> -> vector<2x8x8xf32>
    "tpu.trace_stop"() : () -> ()
    %79 = vector.extract_strided_slice %25 {offsets = [0, 0, 24], sizes = [2, 8, 8], strides = [1, 1, 1]} : vector<2x8x64xf32> to vector<2x8x8xf32>
    %80 = vector.extract_strided_slice %26 {offsets = [0, 0, 24], sizes = [2, 8, 8], strides = [1, 1, 1]} : vector<2x8x64xf32> to vector<2x8x8xf32>
    %81 = vector.extract_strided_slice %27 {offsets = [0, 0, 24], sizes = [2, 8, 8], strides = [1, 1, 1]} : vector<2x8x64xf32> to vector<2x8x8xf32>
    "tpu.trace_start"() <{level = 10 : i32, message = "bqd,bkd->bqk"}> : () -> ()
    %cst_34 = arith.constant dense<0.000000e+00> : vector<2x8x8xf32>
    %82 = tpu.matmul %79, %80, %cst_34 {dimension_numbers = #tpu.dot_dimension_numbers<[2], [2], [1], [1], [0, 0, 0, 1, 1, 1], [0], [0]>} : vector<2x8x8xf32>, vector<2x8x8xf32>, vector<2x8x8xf32> -> vector<2x8x8xf32>
    "tpu.trace_stop"() : () -> ()
    %cst_35 = arith.constant 0.353553385 : f32
    %83 = vector.broadcast %cst_35 : f32 to vector<2x8x8xf32>
    %84 = arith.mulf %82, %83 : vector<2x8x8xf32>
    %cst_36 = arith.constant dense<0xFF800000> : vector<2x8xf32>
    %85 = vector.multi_reduction <maximumf>, %84, %cst_36 [2] : vector<2x8x8xf32> to vector<2x8xf32>
    %86 = vector.shape_cast %85 : vector<2x8xf32> to vector<2x8x1xf32>
    %87 = vector.broadcast %86 : vector<2x8x1xf32> to vector<2x8x8xf32>
    %88 = arith.subf %84, %87 : vector<2x8x8xf32>
    %89 = math.exp %88 : vector<2x8x8xf32>
    %cst_37 = arith.constant dense<0.000000e+00> : vector<2x8xf32>
    %90 = vector.multi_reduction <add>, %89, %cst_37 [2] : vector<2x8x8xf32> to vector<2x8xf32>
    %91 = vector.shape_cast %90 : vector<2x8xf32> to vector<2x8x1xf32>
    %92 = tpu.reciprocal %91 {approx = true} : vector<2x8x1xf32> -> vector<2x8x1xf32>
    %93 = vector.broadcast %92 : vector<2x8x1xf32> to vector<2x8x8xf32>
    %94 = arith.mulf %89, %93 : vector<2x8x8xf32>
    "tpu.trace_start"() <{level = 10 : i32, message = "bqk,bkd->bqd"}> : () -> ()
    %cst_38 = arith.constant dense<0.000000e+00> : vector<2x8x8xf32>
    %95 = tpu.matmul %94, %81, %cst_38 {dimension_numbers = #tpu.dot_dimension_numbers<[2], [1], [1], [2], [0, 0, 0, 1, 1, 2], [0], [0]>} : vector<2x8x8xf32>, vector<2x8x8xf32>, vector<2x8x8xf32> -> vector<2x8x8xf32>
    "tpu.trace_stop"() : () -> ()
    %96 = vector.extract_strided_slice %25 {offsets = [0, 0, 32], sizes = [2, 8, 8], strides = [1, 1, 1]} : vector<2x8x64xf32> to vector<2x8x8xf32>
    %97 = vector.extract_strided_slice %26 {offsets = [0, 0, 32], sizes = [2, 8, 8], strides = [1, 1, 1]} : vector<2x8x64xf32> to vector<2x8x8xf32>
    %98 = vector.extract_strided_slice %27 {offsets = [0, 0, 32], sizes = [2, 8, 8], strides = [1, 1, 1]} : vector<2x8x64xf32> to vector<2x8x8xf32>
    "tpu.trace_start"() <{level = 10 : i32, message = "bqd,bkd->bqk"}> : () -> ()
    %cst_39 = arith.constant dense<0.000000e+00> : vector<2x8x8xf32>
    %99 = tpu.matmul %96, %97, %cst_39 {dimension_numbers = #tpu.dot_dimension_numbers<[2], [2], [1], [1], [0, 0, 0, 1, 1, 1], [0], [0]>} : vector<2x8x8xf32>, vector<2x8x8xf32>, vector<2x8x8xf32> -> vector<2x8x8xf32>
    "tpu.trace_stop"() : () -> ()
    %cst_40 = arith.constant 0.353553385 : f32
    %100 = vector.broadcast %cst_40 : f32 to vector<2x8x8xf32>
    %101 = arith.mulf %99, %100 : vector<2x8x8xf32>
    %cst_41 = arith.constant dense<0xFF800000> : vector<2x8xf32>
    %102 = vector.multi_reduction <maximumf>, %101, %cst_41 [2] : vector<2x8x8xf32> to vector<2x8xf32>
    %103 = vector.shape_cast %102 : vector<2x8xf32> to vector<2x8x1xf32>
    %104 = vector.broadcast %103 : vector<2x8x1xf32> to vector<2x8x8xf32>
    %105 = arith.subf %101, %104 : vector<2x8x8xf32>
    %106 = math.exp %105 : vector<2x8x8xf32>
    %cst_42 = arith.constant dense<0.000000e+00> : vector<2x8xf32>
    %107 = vector.multi_reduction <add>, %106, %cst_42 [2] : vector<2x8x8xf32> to vector<2x8xf32>
    %108 = vector.shape_cast %107 : vector<2x8xf32> to vector<2x8x1xf32>
    %109 = tpu.reciprocal %108 {approx = true} : vector<2x8x1xf32> -> vector<2x8x1xf32>
    %110 = vector.broadcast %109 : vector<2x8x1xf32> to vector<2x8x8xf32>
    %111 = arith.mulf %106, %110 : vector<2x8x8xf32>
    "tpu.trace_start"() <{level = 10 : i32, message = "bqk,bkd->bqd"}> : () -> ()
    %cst_43 = arith.constant dense<0.000000e+00> : vector<2x8x8xf32>
    %112 = tpu.matmul %111, %98, %cst_43 {dimension_numbers = #tpu.dot_dimension_numbers<[2], [1], [1], [2], [0, 0, 0, 1, 1, 2], [0], [0]>} : vector<2x8x8xf32>, vector<2x8x8xf32>, vector<2x8x8xf32> -> vector<2x8x8xf32>
    "tpu.trace_stop"() : () -> ()
    %113 = vector.extract_strided_slice %25 {offsets = [0, 0, 40], sizes = [2, 8, 8], strides = [1, 1, 1]} : vector<2x8x64xf32> to vector<2x8x8xf32>
    %114 = vector.extract_strided_slice %26 {offsets = [0, 0, 40], sizes = [2, 8, 8], strides = [1, 1, 1]} : vector<2x8x64xf32> to vector<2x8x8xf32>
    %115 = vector.extract_strided_slice %27 {offsets = [0, 0, 40], sizes = [2, 8, 8], strides = [1, 1, 1]} : vector<2x8x64xf32> to vector<2x8x8xf32>
    "tpu.trace_start"() <{level = 10 : i32, message = "bqd,bkd->bqk"}> : () -> ()
    %cst_44 = arith.constant dense<0.000000e+00> : vector<2x8x8xf32>
    %116 = tpu.matmul %113, %114, %cst_44 {dimension_numbers = #tpu.dot_dimension_numbers<[2], [2], [1], [1], [0, 0, 0, 1, 1, 1], [0], [0]>} : vector<2x8x8xf32>, vector<2x8x8xf32>, vector<2x8x8xf32> -> vector<2x8x8xf32>
    "tpu.trace_stop"() : () -> ()
    %cst_45 = arith.constant 0.353553385 : f32
    %117 = vector.broadcast %cst_45 : f32 to vector<2x8x8xf32>
    %118 = arith.mulf %116, %117 : vector<2x8x8xf32>
    %cst_46 = arith.constant dense<0xFF800000> : vector<2x8xf32>
    %119 = vector.multi_reduction <maximumf>, %118, %cst_46 [2] : vector<2x8x8xf32> to vector<2x8xf32>
    %120 = vector.shape_cast %119 : vector<2x8xf32> to vector<2x8x1xf32>
    %121 = vector.broadcast %120 : vector<2x8x1xf32> to vector<2x8x8xf32>
    %122 = arith.subf %118, %121 : vector<2x8x8xf32>
    %123 = math.exp %122 : vector<2x8x8xf32>
    %cst_47 = arith.constant dense<0.000000e+00> : vector<2x8xf32>
    %124 = vector.multi_reduction <add>, %123, %cst_47 [2] : vector<2x8x8xf32> to vector<2x8xf32>
    %125 = vector.shape_cast %124 : vector<2x8xf32> to vector<2x8x1xf32>
    %126 = tpu.reciprocal %125 {approx = true} : vector<2x8x1xf32> -> vector<2x8x1xf32>
    %127 = vector.broadcast %126 : vector<2x8x1xf32> to vector<2x8x8xf32>
    %128 = arith.mulf %123, %127 : vector<2x8x8xf32>
    "tpu.trace_start"() <{level = 10 : i32, message = "bqk,bkd->bqd"}> : () -> ()
    %cst_48 = arith.constant dense<0.000000e+00> : vector<2x8x8xf32>
    %129 = tpu.matmul %128, %115, %cst_48 {dimension_numbers = #tpu.dot_dimension_numbers<[2], [1], [1], [2], [0, 0, 0, 1, 1, 2], [0], [0]>} : vector<2x8x8xf32>, vector<2x8x8xf32>, vector<2x8x8xf32> -> vector<2x8x8xf32>
    "tpu.trace_stop"() : () -> ()
    %130 = vector.extract_strided_slice %25 {offsets = [0, 0, 48], sizes = [2, 8, 8], strides = [1, 1, 1]} : vector<2x8x64xf32> to vector<2x8x8xf32>
    %131 = vector.extract_strided_slice %26 {offsets = [0, 0, 48], sizes = [2, 8, 8], strides = [1, 1, 1]} : vector<2x8x64xf32> to vector<2x8x8xf32>
    %132 = vector.extract_strided_slice %27 {offsets = [0, 0, 48], sizes = [2, 8, 8], strides = [1, 1, 1]} : vector<2x8x64xf32> to vector<2x8x8xf32>
    "tpu.trace_start"() <{level = 10 : i32, message = "bqd,bkd->bqk"}> : () -> ()
    %cst_49 = arith.constant dense<0.000000e+00> : vector<2x8x8xf32>
    %133 = tpu.matmul %130, %131, %cst_49 {dimension_numbers = #tpu.dot_dimension_numbers<[2], [2], [1], [1], [0, 0, 0, 1, 1, 1], [0], [0]>} : vector<2x8x8xf32>, vector<2x8x8xf32>, vector<2x8x8xf32> -> vector<2x8x8xf32>
    "tpu.trace_stop"() : () -> ()
    %cst_50 = arith.constant 0.353553385 : f32
    %134 = vector.broadcast %cst_50 : f32 to vector<2x8x8xf32>
    %135 = arith.mulf %133, %134 : vector<2x8x8xf32>
    %cst_51 = arith.constant dense<0xFF800000> : vector<2x8xf32>
    %136 = vector.multi_reduction <maximumf>, %135, %cst_51 [2] : vector<2x8x8xf32> to vector<2x8xf32>
    %137 = vector.shape_cast %136 : vector<2x8xf32> to vector<2x8x1xf32>
    %138 = vector.broadcast %137 : vector<2x8x1xf32> to vector<2x8x8xf32>
    %139 = arith.subf %135, %138 : vector<2x8x8xf32>
    %140 = math.exp %139 : vector<2x8x8xf32>
    %cst_52 = arith.constant dense<0.000000e+00> : vector<2x8xf32>
    %141 = vector.multi_reduction <add>, %140, %cst_52 [2] : vector<2x8x8xf32> to vector<2x8xf32>
    %142 = vector.shape_cast %141 : vector<2x8xf32> to vector<2x8x1xf32>
    %143 = tpu.reciprocal %142 {approx = true} : vector<2x8x1xf32> -> vector<2x8x1xf32>
    %144 = vector.broadcast %143 : vector<2x8x1xf32> to vector<2x8x8xf32>
    %145 = arith.mulf %140, %144 : vector<2x8x8xf32>
    "tpu.trace_start"() <{level = 10 : i32, message = "bqk,bkd->bqd"}> : () -> ()
    %cst_53 = arith.constant dense<0.000000e+00> : vector<2x8x8xf32>
    %146 = tpu.matmul %145, %132, %cst_53 {dimension_numbers = #tpu.dot_dimension_numbers<[2], [1], [1], [2], [0, 0, 0, 1, 1, 2], [0], [0]>} : vector<2x8x8xf32>, vector<2x8x8xf32>, vector<2x8x8xf32> -> vector<2x8x8xf32>
    "tpu.trace_stop"() : () -> ()
    %147 = vector.extract_strided_slice %25 {offsets = [0, 0, 56], sizes = [2, 8, 8], strides = [1, 1, 1]} : vector<2x8x64xf32> to vector<2x8x8xf32>
    %148 = vector.extract_strided_slice %26 {offsets = [0, 0, 56], sizes = [2, 8, 8], strides = [1, 1, 1]} : vector<2x8x64xf32> to vector<2x8x8xf32>
    %149 = vector.extract_strided_slice %27 {offsets = [0, 0, 56], sizes = [2, 8, 8], strides = [1, 1, 1]} : vector<2x8x64xf32> to vector<2x8x8xf32>
    "tpu.trace_start"() <{level = 10 : i32, message = "bqd,bkd->bqk"}> : () -> ()
    %cst_54 = arith.constant dense<0.000000e+00> : vector<2x8x8xf32>
    %150 = tpu.matmul %147, %148, %cst_54 {dimension_numbers = #tpu.dot_dimension_numbers<[2], [2], [1], [1], [0, 0, 0, 1, 1, 1], [0], [0]>} : vector<2x8x8xf32>, vector<2x8x8xf32>, vector<2x8x8xf32> -> vector<2x8x8xf32>
    "tpu.trace_stop"() : () -> ()
    %cst_55 = arith.constant 0.353553385 : f32
    %151 = vector.broadcast %cst_55 : f32 to vector<2x8x8xf32>
    %152 = arith.mulf %150, %151 : vector<2x8x8xf32>
    %cst_56 = arith.constant dense<0xFF800000> : vector<2x8xf32>
    %153 = vector.multi_reduction <maximumf>, %152, %cst_56 [2] : vector<2x8x8xf32> to vector<2x8xf32>
    %154 = vector.shape_cast %153 : vector<2x8xf32> to vector<2x8x1xf32>
    %155 = vector.broadcast %154 : vector<2x8x1xf32> to vector<2x8x8xf32>
    %156 = arith.subf %152, %155 : vector<2x8x8xf32>
    %157 = math.exp %156 : vector<2x8x8xf32>
    %cst_57 = arith.constant dense<0.000000e+00> : vector<2x8xf32>
    %158 = vector.multi_reduction <add>, %157, %cst_57 [2] : vector<2x8x8xf32> to vector<2x8xf32>
    %159 = vector.shape_cast %158 : vector<2x8xf32> to vector<2x8x1xf32>
    %160 = tpu.reciprocal %159 {approx = true} : vector<2x8x1xf32> -> vector<2x8x1xf32>
    %161 = vector.broadcast %160 : vector<2x8x1xf32> to vector<2x8x8xf32>
    %162 = arith.mulf %157, %161 : vector<2x8x8xf32>
    "tpu.trace_start"() <{level = 10 : i32, message = "bqk,bkd->bqd"}> : () -> ()
    %cst_58 = arith.constant dense<0.000000e+00> : vector<2x8x8xf32>
    %163 = tpu.matmul %162, %149, %cst_58 {dimension_numbers = #tpu.dot_dimension_numbers<[2], [1], [1], [2], [0, 0, 0, 1, 1, 2], [0], [0]>} : vector<2x8x8xf32>, vector<2x8x8xf32>, vector<2x8x8xf32> -> vector<2x8x8xf32>
    "tpu.trace_stop"() : () -> ()
    %164 = tpu.concatenate %44, %61, %78, %95, %112, %129, %146, %163 in 2 : vector<2x8x8xf32>, vector<2x8x8xf32>, vector<2x8x8xf32>, vector<2x8x8xf32>, vector<2x8x8xf32>, vector<2x8x8xf32>, vector<2x8x8xf32>, vector<2x8x8xf32> -> vector<2x8x64xf32>
    %165 = vector.shape_cast %164 : vector<2x8x64xf32> to vector<16x64xf32>
    %cst_59 = arith.constant dense<0.000000e+00> : vector<16x64xf32>
    %166 = tpu.matmul %165, %8, %cst_59 {dimension_numbers = #tpu.dot_dimension_numbers<[1], [0], [0], [1], [0, 0, 1, 1], [], []>} : vector<16x64xf32>, vector<64x64xf32>, vector<16x64xf32> -> vector<16x64xf32>
    %167 = vector.broadcast %10 : vector<1x64xf32> to vector<16x64xf32>
    %168 = arith.addf %166, %167 : vector<16x64xf32>
    %169 = vector.shape_cast %168 : vector<16x64xf32> to vector<2x8x64xf32>
    %c0_60 = arith.constant 0 : index
    %c0_61 = arith.constant 0 : index
    %c0_62 = arith.constant 0 : index
    %c0_63 = arith.constant 0 : index
    %170 = vector.load %arg7[%c0_60, %c0_61, %c0_62, %c0_63] : memref<1x2x8x64xf32, #tpu.memory_space<vmem>>, vector<1x2x8x64xf32>
    %171 = vector.shape_cast %170 : vector<1x2x8x64xf32> to vector<2x8x64xf32>
    %172 = vector.shape_cast %169 : vector<2x8x64xf32> to vector<1x2x8x64xf32>
    tpu.vector_store %arg7[%c0_60, %c0_61, %c0_62, %c0_63], %172 {strides = array<i32>} : memref<1x2x8x64xf32, #tpu.memory_space<vmem>>, vector<1x2x8x64xf32>,
    return
  }
  func.func @transform_0(%arg0: i32) -> (i32, i32, i32) {
    %c0_i32 = arith.constant 0 : i32
    %c0_i32_0 = arith.constant 0 : i32
    %c0_i32_1 = arith.constant 0 : i32
    %c0_i32_2 = arith.constant 0 : i32
    return %c0_i32, %c0_i32_0, %c0_i32_1 : i32, i32, i32
  }
  func.func @transform_1(%arg0: i32) -> (i32, i32, i32, i32) {
    %c0_i32 = arith.constant 0 : i32
    %c0_i32_0 = arith.constant 0 : i32
    %c0_i32_1 = arith.constant 0 : i32
    %c0_i32_2 = arith.constant 0 : i32
    return %arg0, %c0_i32, %c0_i32_0, %c0_i32_1 : i32, i32, i32, i32
  }
  func.func @transform_2(%arg0: i32) -> (i32, i32, i32) {
    %c0_i32 = arith.constant 0 : i32
    %c0_i32_0 = arith.constant 0 : i32
    %c0_i32_1 = arith.constant 0 : i32
    return %arg0, %c0_i32, %c0_i32_0 : i32, i32, i32
  }
  func.func @transform_3(%arg0: i32) -> (i32, i32, i32) {
    %c0_i32 = arith.constant 0 : i32
    %c0_i32_0 = arith.constant 0 : i32
    %c0_i32_1 = arith.constant 0 : i32
    return %arg0, %c0_i32, %c0_i32_0 : i32, i32, i32
  }
  func.func @transform_4(%arg0: i32) -> (i32, i32, i32) {
    %c0_i32 = arith.constant 0 : i32
    %c0_i32_0 = arith.constant 0 : i32
    %c0_i32_1 = arith.constant 0 : i32
    return %arg0, %c0_i32, %c0_i32_0 : i32, i32, i32
  }
  func.func @transform_5(%arg0: i32) -> (i32, i32, i32) {
    %c0_i32 = arith.constant 0 : i32
    %c0_i32_0 = arith.constant 0 : i32
    %c0_i32_1 = arith.constant 0 : i32
    return %arg0, %c0_i32, %c0_i32_0 : i32, i32, i32
  }
  func.func @transform_6(%arg0: i32) -> (i32, i32, i32, i32) {
    %c0_i32 = arith.constant 0 : i32
    %c0_i32_0 = arith.constant 0 : i32
    %c0_i32_1 = arith.constant 0 : i32
    %c0_i32_2 = arith.constant 0 : i32
    return %arg0, %c0_i32, %c0_i32_0, %c0_i32_1 : i32, i32, i32, i32
  }
}

module attributes {stable_mosaic.version = 11 : i64} {
  func.func @_encoder_kernel(%arg0: i32, %arg1: memref<1x2x8x64xf32, #tpu.memory_space<vmem>>, %arg2: memref<1x64x192xf32, #tpu.memory_space<vmem>>, %arg3: memref<1x1x192xf32, #tpu.memory_space<vmem>>, %arg4: memref<1x64x64xf32, #tpu.memory_space<vmem>>, %arg5: memref<1x1x64xf32, #tpu.memory_space<vmem>>, %arg6: memref<1x1x64xf32, #tpu.memory_space<vmem>>, %arg7: memref<1x1x64xf32, #tpu.memory_space<vmem>>, %arg8: memref<1x64x128xf32, #tpu.memory_space<vmem>>, %arg9: memref<1x1x128xf32, #tpu.memory_space<vmem>>, %arg10: memref<1x128x64xf32, #tpu.memory_space<vmem>>, %arg11: memref<1x1x64xf32, #tpu.memory_space<vmem>>, %arg12: memref<1x1x64xf32, #tpu.memory_space<vmem>>, %arg13: memref<1x1x64xf32, #tpu.memory_space<vmem>>, %arg14: memref<1x2x8x64xf32, #tpu.memory_space<vmem>>) attributes {dimension_semantics = [#tpu.dimension_semantics<parallel>], iteration_bounds = array<i64: 3>, scalar_prefetch = 0 : i64, scratch_operands = 0 : i64, tpu.core_type = #tpu.core_type<tc>, window_params = [{transform_indices = @transform_0, window_bounds = array<i64: 1, 2, 8, 64>}, {transform_indices = @transform_1, window_bounds = array<i64: 1, 64, 192>}, {transform_indices = @transform_2, window_bounds = array<i64: 1, 1, 192>}, {transform_indices = @transform_3, window_bounds = array<i64: 1, 64, 64>}, {transform_indices = @transform_4, window_bounds = array<i64: 1, 1, 64>}, {transform_indices = @transform_5, window_bounds = array<i64: 1, 1, 64>}, {transform_indices = @transform_6, window_bounds = array<i64: 1, 1, 64>}, {transform_indices = @transform_7, window_bounds = array<i64: 1, 64, 128>}, {transform_indices = @transform_8, window_bounds = array<i64: 1, 1, 128>}, {transform_indices = @transform_9, window_bounds = array<i64: 1, 128, 64>}, {transform_indices = @transform_10, window_bounds = array<i64: 1, 1, 64>}, {transform_indices = @transform_11, window_bounds = array<i64: 1, 1, 64>}, {transform_indices = @transform_12, window_bounds = array<i64: 1, 1, 64>}, {transform_indices = @transform_13, window_bounds = array<i64: 1, 2, 8, 64>}]} {
    %c0 = arith.constant 0 : index
    %c0_0 = arith.constant 0 : index
    %c0_1 = arith.constant 0 : index
    %c0_2 = arith.constant 0 : index
    %0 = vector.load %arg1[%c0, %c0_0, %c0_1, %c0_2] : memref<1x2x8x64xf32, #tpu.memory_space<vmem>>, vector<1x2x8x64xf32>
    %1 = vector.shape_cast %0 : vector<1x2x8x64xf32> to vector<2x8x64xf32>
    %c0_3 = arith.constant 0 : index
    %c0_4 = arith.constant 0 : index
    %c0_5 = arith.constant 0 : index
    %2 = vector.load %arg2[%c0_3, %c0_4, %c0_5] : memref<1x64x192xf32, #tpu.memory_space<vmem>>, vector<1x64x192xf32>
    %3 = vector.shape_cast %2 : vector<1x64x192xf32> to vector<64x192xf32>
    %c0_6 = arith.constant 0 : index
    %c0_7 = arith.constant 0 : index
    %c0_8 = arith.constant 0 : index
    %4 = vector.load %arg3[%c0_6, %c0_7, %c0_8] : memref<1x1x192xf32, #tpu.memory_space<vmem>>, vector<1x1x192xf32>
    %5 = vector.shape_cast %4 : vector<1x1x192xf32> to vector<1x192xf32>
    %c0_9 = arith.constant 0 : index
    %c0_10 = arith.constant 0 : index
    %c0_11 = arith.constant 0 : index
    %6 = vector.load %arg4[%c0_9, %c0_10, %c0_11] : memref<1x64x64xf32, #tpu.memory_space<vmem>>, vector<1x64x64xf32>
    %7 = vector.shape_cast %6 : vector<1x64x64xf32> to vector<64x64xf32>
    %c0_12 = arith.constant 0 : index
    %c0_13 = arith.constant 0 : index
    %c0_14 = arith.constant 0 : index
    %8 = vector.load %arg5[%c0_12, %c0_13, %c0_14] : memref<1x1x64xf32, #tpu.memory_space<vmem>>, vector<1x1x64xf32>
    %9 = vector.shape_cast %8 : vector<1x1x64xf32> to vector<1x64xf32>
    %10 = vector.shape_cast %1 : vector<2x8x64xf32> to vector<16x64xf32>
    %cst = arith.constant dense<0.000000e+00> : vector<16x192xf32>
    %11 = tpu.matmul %10, %3, %cst {dimension_numbers = #tpu.dot_dimension_numbers<[1], [0], [0], [1], [0, 0, 1, 1], [], []>} : vector<16x64xf32>, vector<64x192xf32>, vector<16x192xf32> -> vector<16x192xf32>
    %12 = vector.broadcast %5 : vector<1x192xf32> to vector<16x192xf32>
    %13 = arith.addf %11, %12 : vector<16x192xf32>
    %14 = vector.extract_strided_slice %13 {offsets = [0, 0], sizes = [16, 64], strides = [1, 1]} : vector<16x192xf32> to vector<16x64xf32>
    %15 = vector.extract_strided_slice %13 {offsets = [0, 64], sizes = [16, 64], strides = [1, 1]} : vector<16x192xf32> to vector<16x64xf32>
    %16 = vector.extract_strided_slice %13 {offsets = [0, 128], sizes = [16, 64], strides = [1, 1]} : vector<16x192xf32> to vector<16x64xf32>
    %17 = vector.shape_cast %14 : vector<16x64xf32> to vector<2x8x64xf32>
    %18 = vector.shape_cast %15 : vector<16x64xf32> to vector<2x8x64xf32>
    %19 = vector.shape_cast %16 : vector<16x64xf32> to vector<2x8x64xf32>
    %20 = vector.extract_strided_slice %17 {offsets = [0, 0, 0], sizes = [2, 8, 8], strides = [1, 1, 1]} : vector<2x8x64xf32> to vector<2x8x8xf32>
    %21 = vector.extract_strided_slice %18 {offsets = [0, 0, 0], sizes = [2, 8, 8], strides = [1, 1, 1]} : vector<2x8x64xf32> to vector<2x8x8xf32>
    %22 = vector.extract_strided_slice %19 {offsets = [0, 0, 0], sizes = [2, 8, 8], strides = [1, 1, 1]} : vector<2x8x64xf32> to vector<2x8x8xf32>
    "tpu.trace_start"() <{level = 10 : i32, message = "bqd,bkd->bqk"}> : () -> ()
    %cst_15 = arith.constant dense<0.000000e+00> : vector<2x8x8xf32>
    %23 = tpu.matmul %20, %21, %cst_15 {dimension_numbers = #tpu.dot_dimension_numbers<[2], [2], [1], [1], [0, 0, 0, 1, 1, 1], [0], [0]>} : vector<2x8x8xf32>, vector<2x8x8xf32>, vector<2x8x8xf32> -> vector<2x8x8xf32>
    "tpu.trace_stop"() : () -> ()
    %cst_16 = arith.constant 0.353553385 : f32
    %24 = vector.broadcast %cst_16 : f32 to vector<2x8x8xf32>
    %25 = arith.mulf %23, %24 : vector<2x8x8xf32>
    %cst_17 = arith.constant dense<0xFF800000> : vector<2x8xf32>
    %26 = vector.multi_reduction <maximumf>, %25, %cst_17 [2] : vector<2x8x8xf32> to vector<2x8xf32>
    %27 = vector.shape_cast %26 : vector<2x8xf32> to vector<2x8x1xf32>
    %28 = vector.broadcast %27 : vector<2x8x1xf32> to vector<2x8x8xf32>
    %29 = arith.subf %25, %28 : vector<2x8x8xf32>
    %30 = math.exp %29 : vector<2x8x8xf32>
    %cst_18 = arith.constant dense<0.000000e+00> : vector<2x8xf32>
    %31 = vector.multi_reduction <add>, %30, %cst_18 [2] : vector<2x8x8xf32> to vector<2x8xf32>
    %32 = vector.shape_cast %31 : vector<2x8xf32> to vector<2x8x1xf32>
    %33 = tpu.reciprocal %32 {approx = true} : vector<2x8x1xf32> -> vector<2x8x1xf32>
    %34 = vector.broadcast %33 : vector<2x8x1xf32> to vector<2x8x8xf32>
    %35 = arith.mulf %30, %34 : vector<2x8x8xf32>
    "tpu.trace_start"() <{level = 10 : i32, message = "bqk,bkd->bqd"}> : () -> ()
    %cst_19 = arith.constant dense<0.000000e+00> : vector<2x8x8xf32>
    %36 = tpu.matmul %35, %22, %cst_19 {dimension_numbers = #tpu.dot_dimension_numbers<[2], [1], [1], [2], [0, 0, 0, 1, 1, 2], [0], [0]>} : vector<2x8x8xf32>, vector<2x8x8xf32>, vector<2x8x8xf32> -> vector<2x8x8xf32>
    "tpu.trace_stop"() : () -> ()
    %37 = vector.extract_strided_slice %17 {offsets = [0, 0, 8], sizes = [2, 8, 8], strides = [1, 1, 1]} : vector<2x8x64xf32> to vector<2x8x8xf32>
    %38 = vector.extract_strided_slice %18 {offsets = [0, 0, 8], sizes = [2, 8, 8], strides = [1, 1, 1]} : vector<2x8x64xf32> to vector<2x8x8xf32>
    %39 = vector.extract_strided_slice %19 {offsets = [0, 0, 8], sizes = [2, 8, 8], strides = [1, 1, 1]} : vector<2x8x64xf32> to vector<2x8x8xf32>
    "tpu.trace_start"() <{level = 10 : i32, message = "bqd,bkd->bqk"}> : () -> ()
    %cst_20 = arith.constant dense<0.000000e+00> : vector<2x8x8xf32>
    %40 = tpu.matmul %37, %38, %cst_20 {dimension_numbers = #tpu.dot_dimension_numbers<[2], [2], [1], [1], [0, 0, 0, 1, 1, 1], [0], [0]>} : vector<2x8x8xf32>, vector<2x8x8xf32>, vector<2x8x8xf32> -> vector<2x8x8xf32>
    "tpu.trace_stop"() : () -> ()
    %cst_21 = arith.constant 0.353553385 : f32
    %41 = vector.broadcast %cst_21 : f32 to vector<2x8x8xf32>
    %42 = arith.mulf %40, %41 : vector<2x8x8xf32>
    %cst_22 = arith.constant dense<0xFF800000> : vector<2x8xf32>
    %43 = vector.multi_reduction <maximumf>, %42, %cst_22 [2] : vector<2x8x8xf32> to vector<2x8xf32>
    %44 = vector.shape_cast %43 : vector<2x8xf32> to vector<2x8x1xf32>
    %45 = vector.broadcast %44 : vector<2x8x1xf32> to vector<2x8x8xf32>
    %46 = arith.subf %42, %45 : vector<2x8x8xf32>
    %47 = math.exp %46 : vector<2x8x8xf32>
    %cst_23 = arith.constant dense<0.000000e+00> : vector<2x8xf32>
    %48 = vector.multi_reduction <add>, %47, %cst_23 [2] : vector<2x8x8xf32> to vector<2x8xf32>
    %49 = vector.shape_cast %48 : vector<2x8xf32> to vector<2x8x1xf32>
    %50 = tpu.reciprocal %49 {approx = true} : vector<2x8x1xf32> -> vector<2x8x1xf32>
    %51 = vector.broadcast %50 : vector<2x8x1xf32> to vector<2x8x8xf32>
    %52 = arith.mulf %47, %51 : vector<2x8x8xf32>
    "tpu.trace_start"() <{level = 10 : i32, message = "bqk,bkd->bqd"}> : () -> ()
    %cst_24 = arith.constant dense<0.000000e+00> : vector<2x8x8xf32>
    %53 = tpu.matmul %52, %39, %cst_24 {dimension_numbers = #tpu.dot_dimension_numbers<[2], [1], [1], [2], [0, 0, 0, 1, 1, 2], [0], [0]>} : vector<2x8x8xf32>, vector<2x8x8xf32>, vector<2x8x8xf32> -> vector<2x8x8xf32>
    "tpu.trace_stop"() : () -> ()
    %54 = vector.extract_strided_slice %17 {offsets = [0, 0, 16], sizes = [2, 8, 8], strides = [1, 1, 1]} : vector<2x8x64xf32> to vector<2x8x8xf32>
    %55 = vector.extract_strided_slice %18 {offsets = [0, 0, 16], sizes = [2, 8, 8], strides = [1, 1, 1]} : vector<2x8x64xf32> to vector<2x8x8xf32>
    %56 = vector.extract_strided_slice %19 {offsets = [0, 0, 16], sizes = [2, 8, 8], strides = [1, 1, 1]} : vector<2x8x64xf32> to vector<2x8x8xf32>
    "tpu.trace_start"() <{level = 10 : i32, message = "bqd,bkd->bqk"}> : () -> ()
    %cst_25 = arith.constant dense<0.000000e+00> : vector<2x8x8xf32>
    %57 = tpu.matmul %54, %55, %cst_25 {dimension_numbers = #tpu.dot_dimension_numbers<[2], [2], [1], [1], [0, 0, 0, 1, 1, 1], [0], [0]>} : vector<2x8x8xf32>, vector<2x8x8xf32>, vector<2x8x8xf32> -> vector<2x8x8xf32>
    "tpu.trace_stop"() : () -> ()
    %cst_26 = arith.constant 0.353553385 : f32
    %58 = vector.broadcast %cst_26 : f32 to vector<2x8x8xf32>
    %59 = arith.mulf %57, %58 : vector<2x8x8xf32>
    %cst_27 = arith.constant dense<0xFF800000> : vector<2x8xf32>
    %60 = vector.multi_reduction <maximumf>, %59, %cst_27 [2] : vector<2x8x8xf32> to vector<2x8xf32>
    %61 = vector.shape_cast %60 : vector<2x8xf32> to vector<2x8x1xf32>
    %62 = vector.broadcast %61 : vector<2x8x1xf32> to vector<2x8x8xf32>
    %63 = arith.subf %59, %62 : vector<2x8x8xf32>
    %64 = math.exp %63 : vector<2x8x8xf32>
    %cst_28 = arith.constant dense<0.000000e+00> : vector<2x8xf32>
    %65 = vector.multi_reduction <add>, %64, %cst_28 [2] : vector<2x8x8xf32> to vector<2x8xf32>
    %66 = vector.shape_cast %65 : vector<2x8xf32> to vector<2x8x1xf32>
    %67 = tpu.reciprocal %66 {approx = true} : vector<2x8x1xf32> -> vector<2x8x1xf32>
    %68 = vector.broadcast %67 : vector<2x8x1xf32> to vector<2x8x8xf32>
    %69 = arith.mulf %64, %68 : vector<2x8x8xf32>
    "tpu.trace_start"() <{level = 10 : i32, message = "bqk,bkd->bqd"}> : () -> ()
    %cst_29 = arith.constant dense<0.000000e+00> : vector<2x8x8xf32>
    %70 = tpu.matmul %69, %56, %cst_29 {dimension_numbers = #tpu.dot_dimension_numbers<[2], [1], [1], [2], [0, 0, 0, 1, 1, 2], [0], [0]>} : vector<2x8x8xf32>, vector<2x8x8xf32>, vector<2x8x8xf32> -> vector<2x8x8xf32>
    "tpu.trace_stop"() : () -> ()
    %71 = vector.extract_strided_slice %17 {offsets = [0, 0, 24], sizes = [2, 8, 8], strides = [1, 1, 1]} : vector<2x8x64xf32> to vector<2x8x8xf32>
    %72 = vector.extract_strided_slice %18 {offsets = [0, 0, 24], sizes = [2, 8, 8], strides = [1, 1, 1]} : vector<2x8x64xf32> to vector<2x8x8xf32>
    %73 = vector.extract_strided_slice %19 {offsets = [0, 0, 24], sizes = [2, 8, 8], strides = [1, 1, 1]} : vector<2x8x64xf32> to vector<2x8x8xf32>
    "tpu.trace_start"() <{level = 10 : i32, message = "bqd,bkd->bqk"}> : () -> ()
    %cst_30 = arith.constant dense<0.000000e+00> : vector<2x8x8xf32>
    %74 = tpu.matmul %71, %72, %cst_30 {dimension_numbers = #tpu.dot_dimension_numbers<[2], [2], [1], [1], [0, 0, 0, 1, 1, 1], [0], [0]>} : vector<2x8x8xf32>, vector<2x8x8xf32>, vector<2x8x8xf32> -> vector<2x8x8xf32>
    "tpu.trace_stop"() : () -> ()
    %cst_31 = arith.constant 0.353553385 : f32
    %75 = vector.broadcast %cst_31 : f32 to vector<2x8x8xf32>
    %76 = arith.mulf %74, %75 : vector<2x8x8xf32>
    %cst_32 = arith.constant dense<0xFF800000> : vector<2x8xf32>
    %77 = vector.multi_reduction <maximumf>, %76, %cst_32 [2] : vector<2x8x8xf32> to vector<2x8xf32>
    %78 = vector.shape_cast %77 : vector<2x8xf32> to vector<2x8x1xf32>
    %79 = vector.broadcast %78 : vector<2x8x1xf32> to vector<2x8x8xf32>
    %80 = arith.subf %76, %79 : vector<2x8x8xf32>
    %81 = math.exp %80 : vector<2x8x8xf32>
    %cst_33 = arith.constant dense<0.000000e+00> : vector<2x8xf32>
    %82 = vector.multi_reduction <add>, %81, %cst_33 [2] : vector<2x8x8xf32> to vector<2x8xf32>
    %83 = vector.shape_cast %82 : vector<2x8xf32> to vector<2x8x1xf32>
    %84 = tpu.reciprocal %83 {approx = true} : vector<2x8x1xf32> -> vector<2x8x1xf32>
    %85 = vector.broadcast %84 : vector<2x8x1xf32> to vector<2x8x8xf32>
    %86 = arith.mulf %81, %85 : vector<2x8x8xf32>
    "tpu.trace_start"() <{level = 10 : i32, message = "bqk,bkd->bqd"}> : () -> ()
    %cst_34 = arith.constant dense<0.000000e+00> : vector<2x8x8xf32>
    %87 = tpu.matmul %86, %73, %cst_34 {dimension_numbers = #tpu.dot_dimension_numbers<[2], [1], [1], [2], [0, 0, 0, 1, 1, 2], [0], [0]>} : vector<2x8x8xf32>, vector<2x8x8xf32>, vector<2x8x8xf32> -> vector<2x8x8xf32>
    "tpu.trace_stop"() : () -> ()
    %88 = vector.extract_strided_slice %17 {offsets = [0, 0, 32], sizes = [2, 8, 8], strides = [1, 1, 1]} : vector<2x8x64xf32> to vector<2x8x8xf32>
    %89 = vector.extract_strided_slice %18 {offsets = [0, 0, 32], sizes = [2, 8, 8], strides = [1, 1, 1]} : vector<2x8x64xf32> to vector<2x8x8xf32>
    %90 = vector.extract_strided_slice %19 {offsets = [0, 0, 32], sizes = [2, 8, 8], strides = [1, 1, 1]} : vector<2x8x64xf32> to vector<2x8x8xf32>
    "tpu.trace_start"() <{level = 10 : i32, message = "bqd,bkd->bqk"}> : () -> ()
    %cst_35 = arith.constant dense<0.000000e+00> : vector<2x8x8xf32>
    %91 = tpu.matmul %88, %89, %cst_35 {dimension_numbers = #tpu.dot_dimension_numbers<[2], [2], [1], [1], [0, 0, 0, 1, 1, 1], [0], [0]>} : vector<2x8x8xf32>, vector<2x8x8xf32>, vector<2x8x8xf32> -> vector<2x8x8xf32>
    "tpu.trace_stop"() : () -> ()
    %cst_36 = arith.constant 0.353553385 : f32
    %92 = vector.broadcast %cst_36 : f32 to vector<2x8x8xf32>
    %93 = arith.mulf %91, %92 : vector<2x8x8xf32>
    %cst_37 = arith.constant dense<0xFF800000> : vector<2x8xf32>
    %94 = vector.multi_reduction <maximumf>, %93, %cst_37 [2] : vector<2x8x8xf32> to vector<2x8xf32>
    %95 = vector.shape_cast %94 : vector<2x8xf32> to vector<2x8x1xf32>
    %96 = vector.broadcast %95 : vector<2x8x1xf32> to vector<2x8x8xf32>
    %97 = arith.subf %93, %96 : vector<2x8x8xf32>
    %98 = math.exp %97 : vector<2x8x8xf32>
    %cst_38 = arith.constant dense<0.000000e+00> : vector<2x8xf32>
    %99 = vector.multi_reduction <add>, %98, %cst_38 [2] : vector<2x8x8xf32> to vector<2x8xf32>
    %100 = vector.shape_cast %99 : vector<2x8xf32> to vector<2x8x1xf32>
    %101 = tpu.reciprocal %100 {approx = true} : vector<2x8x1xf32> -> vector<2x8x1xf32>
    %102 = vector.broadcast %101 : vector<2x8x1xf32> to vector<2x8x8xf32>
    %103 = arith.mulf %98, %102 : vector<2x8x8xf32>
    "tpu.trace_start"() <{level = 10 : i32, message = "bqk,bkd->bqd"}> : () -> ()
    %cst_39 = arith.constant dense<0.000000e+00> : vector<2x8x8xf32>
    %104 = tpu.matmul %103, %90, %cst_39 {dimension_numbers = #tpu.dot_dimension_numbers<[2], [1], [1], [2], [0, 0, 0, 1, 1, 2], [0], [0]>} : vector<2x8x8xf32>, vector<2x8x8xf32>, vector<2x8x8xf32> -> vector<2x8x8xf32>
    "tpu.trace_stop"() : () -> ()
    %105 = vector.extract_strided_slice %17 {offsets = [0, 0, 40], sizes = [2, 8, 8], strides = [1, 1, 1]} : vector<2x8x64xf32> to vector<2x8x8xf32>
    %106 = vector.extract_strided_slice %18 {offsets = [0, 0, 40], sizes = [2, 8, 8], strides = [1, 1, 1]} : vector<2x8x64xf32> to vector<2x8x8xf32>
    %107 = vector.extract_strided_slice %19 {offsets = [0, 0, 40], sizes = [2, 8, 8], strides = [1, 1, 1]} : vector<2x8x64xf32> to vector<2x8x8xf32>
    "tpu.trace_start"() <{level = 10 : i32, message = "bqd,bkd->bqk"}> : () -> ()
    %cst_40 = arith.constant dense<0.000000e+00> : vector<2x8x8xf32>
    %108 = tpu.matmul %105, %106, %cst_40 {dimension_numbers = #tpu.dot_dimension_numbers<[2], [2], [1], [1], [0, 0, 0, 1, 1, 1], [0], [0]>} : vector<2x8x8xf32>, vector<2x8x8xf32>, vector<2x8x8xf32> -> vector<2x8x8xf32>
    "tpu.trace_stop"() : () -> ()
    %cst_41 = arith.constant 0.353553385 : f32
    %109 = vector.broadcast %cst_41 : f32 to vector<2x8x8xf32>
    %110 = arith.mulf %108, %109 : vector<2x8x8xf32>
    %cst_42 = arith.constant dense<0xFF800000> : vector<2x8xf32>
    %111 = vector.multi_reduction <maximumf>, %110, %cst_42 [2] : vector<2x8x8xf32> to vector<2x8xf32>
    %112 = vector.shape_cast %111 : vector<2x8xf32> to vector<2x8x1xf32>
    %113 = vector.broadcast %112 : vector<2x8x1xf32> to vector<2x8x8xf32>
    %114 = arith.subf %110, %113 : vector<2x8x8xf32>
    %115 = math.exp %114 : vector<2x8x8xf32>
    %cst_43 = arith.constant dense<0.000000e+00> : vector<2x8xf32>
    %116 = vector.multi_reduction <add>, %115, %cst_43 [2] : vector<2x8x8xf32> to vector<2x8xf32>
    %117 = vector.shape_cast %116 : vector<2x8xf32> to vector<2x8x1xf32>
    %118 = tpu.reciprocal %117 {approx = true} : vector<2x8x1xf32> -> vector<2x8x1xf32>
    %119 = vector.broadcast %118 : vector<2x8x1xf32> to vector<2x8x8xf32>
    %120 = arith.mulf %115, %119 : vector<2x8x8xf32>
    "tpu.trace_start"() <{level = 10 : i32, message = "bqk,bkd->bqd"}> : () -> ()
    %cst_44 = arith.constant dense<0.000000e+00> : vector<2x8x8xf32>
    %121 = tpu.matmul %120, %107, %cst_44 {dimension_numbers = #tpu.dot_dimension_numbers<[2], [1], [1], [2], [0, 0, 0, 1, 1, 2], [0], [0]>} : vector<2x8x8xf32>, vector<2x8x8xf32>, vector<2x8x8xf32> -> vector<2x8x8xf32>
    "tpu.trace_stop"() : () -> ()
    %122 = vector.extract_strided_slice %17 {offsets = [0, 0, 48], sizes = [2, 8, 8], strides = [1, 1, 1]} : vector<2x8x64xf32> to vector<2x8x8xf32>
    %123 = vector.extract_strided_slice %18 {offsets = [0, 0, 48], sizes = [2, 8, 8], strides = [1, 1, 1]} : vector<2x8x64xf32> to vector<2x8x8xf32>
    %124 = vector.extract_strided_slice %19 {offsets = [0, 0, 48], sizes = [2, 8, 8], strides = [1, 1, 1]} : vector<2x8x64xf32> to vector<2x8x8xf32>
    "tpu.trace_start"() <{level = 10 : i32, message = "bqd,bkd->bqk"}> : () -> ()
    %cst_45 = arith.constant dense<0.000000e+00> : vector<2x8x8xf32>
    %125 = tpu.matmul %122, %123, %cst_45 {dimension_numbers = #tpu.dot_dimension_numbers<[2], [2], [1], [1], [0, 0, 0, 1, 1, 1], [0], [0]>} : vector<2x8x8xf32>, vector<2x8x8xf32>, vector<2x8x8xf32> -> vector<2x8x8xf32>
    "tpu.trace_stop"() : () -> ()
    %cst_46 = arith.constant 0.353553385 : f32
    %126 = vector.broadcast %cst_46 : f32 to vector<2x8x8xf32>
    %127 = arith.mulf %125, %126 : vector<2x8x8xf32>
    %cst_47 = arith.constant dense<0xFF800000> : vector<2x8xf32>
    %128 = vector.multi_reduction <maximumf>, %127, %cst_47 [2] : vector<2x8x8xf32> to vector<2x8xf32>
    %129 = vector.shape_cast %128 : vector<2x8xf32> to vector<2x8x1xf32>
    %130 = vector.broadcast %129 : vector<2x8x1xf32> to vector<2x8x8xf32>
    %131 = arith.subf %127, %130 : vector<2x8x8xf32>
    %132 = math.exp %131 : vector<2x8x8xf32>
    %cst_48 = arith.constant dense<0.000000e+00> : vector<2x8xf32>
    %133 = vector.multi_reduction <add>, %132, %cst_48 [2] : vector<2x8x8xf32> to vector<2x8xf32>
    %134 = vector.shape_cast %133 : vector<2x8xf32> to vector<2x8x1xf32>
    %135 = tpu.reciprocal %134 {approx = true} : vector<2x8x1xf32> -> vector<2x8x1xf32>
    %136 = vector.broadcast %135 : vector<2x8x1xf32> to vector<2x8x8xf32>
    %137 = arith.mulf %132, %136 : vector<2x8x8xf32>
    "tpu.trace_start"() <{level = 10 : i32, message = "bqk,bkd->bqd"}> : () -> ()
    %cst_49 = arith.constant dense<0.000000e+00> : vector<2x8x8xf32>
    %138 = tpu.matmul %137, %124, %cst_49 {dimension_numbers = #tpu.dot_dimension_numbers<[2], [1], [1], [2], [0, 0, 0, 1, 1, 2], [0], [0]>} : vector<2x8x8xf32>, vector<2x8x8xf32>, vector<2x8x8xf32> -> vector<2x8x8xf32>
    "tpu.trace_stop"() : () -> ()
    %139 = vector.extract_strided_slice %17 {offsets = [0, 0, 56], sizes = [2, 8, 8], strides = [1, 1, 1]} : vector<2x8x64xf32> to vector<2x8x8xf32>
    %140 = vector.extract_strided_slice %18 {offsets = [0, 0, 56], sizes = [2, 8, 8], strides = [1, 1, 1]} : vector<2x8x64xf32> to vector<2x8x8xf32>
    %141 = vector.extract_strided_slice %19 {offsets = [0, 0, 56], sizes = [2, 8, 8], strides = [1, 1, 1]} : vector<2x8x64xf32> to vector<2x8x8xf32>
    "tpu.trace_start"() <{level = 10 : i32, message = "bqd,bkd->bqk"}> : () -> ()
    %cst_50 = arith.constant dense<0.000000e+00> : vector<2x8x8xf32>
    %142 = tpu.matmul %139, %140, %cst_50 {dimension_numbers = #tpu.dot_dimension_numbers<[2], [2], [1], [1], [0, 0, 0, 1, 1, 1], [0], [0]>} : vector<2x8x8xf32>, vector<2x8x8xf32>, vector<2x8x8xf32> -> vector<2x8x8xf32>
    "tpu.trace_stop"() : () -> ()
    %cst_51 = arith.constant 0.353553385 : f32
    %143 = vector.broadcast %cst_51 : f32 to vector<2x8x8xf32>
    %144 = arith.mulf %142, %143 : vector<2x8x8xf32>
    %cst_52 = arith.constant dense<0xFF800000> : vector<2x8xf32>
    %145 = vector.multi_reduction <maximumf>, %144, %cst_52 [2] : vector<2x8x8xf32> to vector<2x8xf32>
    %146 = vector.shape_cast %145 : vector<2x8xf32> to vector<2x8x1xf32>
    %147 = vector.broadcast %146 : vector<2x8x1xf32> to vector<2x8x8xf32>
    %148 = arith.subf %144, %147 : vector<2x8x8xf32>
    %149 = math.exp %148 : vector<2x8x8xf32>
    %cst_53 = arith.constant dense<0.000000e+00> : vector<2x8xf32>
    %150 = vector.multi_reduction <add>, %149, %cst_53 [2] : vector<2x8x8xf32> to vector<2x8xf32>
    %151 = vector.shape_cast %150 : vector<2x8xf32> to vector<2x8x1xf32>
    %152 = tpu.reciprocal %151 {approx = true} : vector<2x8x1xf32> -> vector<2x8x1xf32>
    %153 = vector.broadcast %152 : vector<2x8x1xf32> to vector<2x8x8xf32>
    %154 = arith.mulf %149, %153 : vector<2x8x8xf32>
    "tpu.trace_start"() <{level = 10 : i32, message = "bqk,bkd->bqd"}> : () -> ()
    %cst_54 = arith.constant dense<0.000000e+00> : vector<2x8x8xf32>
    %155 = tpu.matmul %154, %141, %cst_54 {dimension_numbers = #tpu.dot_dimension_numbers<[2], [1], [1], [2], [0, 0, 0, 1, 1, 2], [0], [0]>} : vector<2x8x8xf32>, vector<2x8x8xf32>, vector<2x8x8xf32> -> vector<2x8x8xf32>
    "tpu.trace_stop"() : () -> ()
    %156 = tpu.concatenate %36, %53, %70, %87, %104, %121, %138, %155 in 2 : vector<2x8x8xf32>, vector<2x8x8xf32>, vector<2x8x8xf32>, vector<2x8x8xf32>, vector<2x8x8xf32>, vector<2x8x8xf32>, vector<2x8x8xf32>, vector<2x8x8xf32> -> vector<2x8x64xf32>
    %157 = vector.shape_cast %156 : vector<2x8x64xf32> to vector<16x64xf32>
    %cst_55 = arith.constant dense<0.000000e+00> : vector<16x64xf32>
    %158 = tpu.matmul %157, %7, %cst_55 {dimension_numbers = #tpu.dot_dimension_numbers<[1], [0], [0], [1], [0, 0, 1, 1], [], []>} : vector<16x64xf32>, vector<64x64xf32>, vector<16x64xf32> -> vector<16x64xf32>
    %159 = vector.broadcast %9 : vector<1x64xf32> to vector<16x64xf32>
    %160 = arith.addf %158, %159 : vector<16x64xf32>
    %161 = vector.shape_cast %160 : vector<16x64xf32> to vector<2x8x64xf32>
    %162 = arith.addf %1, %161 : vector<2x8x64xf32>
    %163 = vector.shape_cast %162 : vector<2x8x64xf32> to vector<16x64xf32>
    %c0_56 = arith.constant 0 : index
    %c0_57 = arith.constant 0 : index
    %c0_58 = arith.constant 0 : index
    %164 = vector.load %arg6[%c0_56, %c0_57, %c0_58] : memref<1x1x64xf32, #tpu.memory_space<vmem>>, vector<1x1x64xf32>
    %165 = vector.shape_cast %164 : vector<1x1x64xf32> to vector<1x64xf32>
    %c0_59 = arith.constant 0 : index
    %c0_60 = arith.constant 0 : index
    %c0_61 = arith.constant 0 : index
    %166 = vector.load %arg7[%c0_59, %c0_60, %c0_61] : memref<1x1x64xf32, #tpu.memory_space<vmem>>, vector<1x1x64xf32>
    %167 = vector.shape_cast %166 : vector<1x1x64xf32> to vector<1x64xf32>
    %cst_62 = arith.constant dense<0.000000e+00> : vector<16xf32>
    %168 = vector.multi_reduction <add>, %163, %cst_62 [1] : vector<16x64xf32> to vector<16xf32>
    %169 = vector.shape_cast %168 : vector<16xf32> to vector<16x1xf32>
    %cst_63 = arith.constant 6.400000e+01 : f32
    %170 = vector.broadcast %cst_63 : f32 to vector<16x1xf32>
    %171 = arith.divf %169, %170 : vector<16x1xf32>
    %172 = vector.broadcast %171 : vector<16x1xf32> to vector<16x64xf32>
    %173 = arith.subf %163, %172 : vector<16x64xf32>
    %174 = arith.mulf %173, %173 : vector<16x64xf32>
    %cst_64 = arith.constant dense<0.000000e+00> : vector<16xf32>
    %175 = vector.multi_reduction <add>, %174, %cst_64 [1] : vector<16x64xf32> to vector<16xf32>
    %176 = vector.shape_cast %175 : vector<16xf32> to vector<16x1xf32>
    %cst_65 = arith.constant 6.400000e+01 : f32
    %177 = vector.broadcast %cst_65 : f32 to vector<16x1xf32>
    %178 = arith.divf %176, %177 : vector<16x1xf32>
    %cst_66 = arith.constant 9.99999974E-6 : f32
    %179 = vector.broadcast %cst_66 : f32 to vector<16x1xf32>
    %180 = arith.addf %178, %179 : vector<16x1xf32>
    %181 = math.rsqrt %180 : vector<16x1xf32>
    %182 = vector.broadcast %181 : vector<16x1xf32> to vector<16x64xf32>
    %183 = arith.mulf %173, %182 : vector<16x64xf32>
    %184 = vector.broadcast %165 : vector<1x64xf32> to vector<16x64xf32>
    %185 = arith.mulf %183, %184 : vector<16x64xf32>
    %186 = vector.broadcast %167 : vector<1x64xf32> to vector<16x64xf32>
    %187 = arith.addf %185, %186 : vector<16x64xf32>
    %c0_67 = arith.constant 0 : index
    %c0_68 = arith.constant 0 : index
    %c0_69 = arith.constant 0 : index
    %188 = vector.load %arg8[%c0_67, %c0_68, %c0_69] : memref<1x64x128xf32, #tpu.memory_space<vmem>>, vector<1x64x128xf32>
    %189 = vector.shape_cast %188 : vector<1x64x128xf32> to vector<64x128xf32>
    %cst_70 = arith.constant dense<0.000000e+00> : vector<16x128xf32>
    %190 = tpu.matmul %187, %189, %cst_70 {dimension_numbers = #tpu.dot_dimension_numbers<[1], [0], [0], [1], [0, 0, 1, 1], [], []>} : vector<16x64xf32>, vector<64x128xf32>, vector<16x128xf32> -> vector<16x128xf32>
    %c0_71 = arith.constant 0 : index
    %c0_72 = arith.constant 0 : index
    %c0_73 = arith.constant 0 : index
    %191 = vector.load %arg9[%c0_71, %c0_72, %c0_73] : memref<1x1x128xf32, #tpu.memory_space<vmem>>, vector<1x1x128xf32>
    %192 = vector.shape_cast %191 : vector<1x1x128xf32> to vector<1x128xf32>
    %193 = vector.broadcast %192 : vector<1x128xf32> to vector<16x128xf32>
    %194 = arith.addf %190, %193 : vector<16x128xf32>
    %cst_74 = arith.constant 0.000000e+00 : f32
    %195 = vector.broadcast %cst_74 : f32 to vector<16x128xf32>
    %196 = arith.maximumf %194, %195 : vector<16x128xf32>
    %c0_75 = arith.constant 0 : index
    %c0_76 = arith.constant 0 : index
    %c0_77 = arith.constant 0 : index
    %197 = vector.load %arg10[%c0_75, %c0_76, %c0_77] : memref<1x128x64xf32, #tpu.memory_space<vmem>>, vector<1x128x64xf32>
    %198 = vector.shape_cast %197 : vector<1x128x64xf32> to vector<128x64xf32>
    %cst_78 = arith.constant dense<0.000000e+00> : vector<16x64xf32>
    %199 = tpu.matmul %196, %198, %cst_78 {dimension_numbers = #tpu.dot_dimension_numbers<[1], [0], [0], [1], [0, 0, 1, 1], [], []>} : vector<16x128xf32>, vector<128x64xf32>, vector<16x64xf32> -> vector<16x64xf32>
    %c0_79 = arith.constant 0 : index
    %c0_80 = arith.constant 0 : index
    %c0_81 = arith.constant 0 : index
    %200 = vector.load %arg11[%c0_79, %c0_80, %c0_81] : memref<1x1x64xf32, #tpu.memory_space<vmem>>, vector<1x1x64xf32>
    %201 = vector.shape_cast %200 : vector<1x1x64xf32> to vector<1x64xf32>
    %202 = vector.broadcast %201 : vector<1x64xf32> to vector<16x64xf32>
    %203 = arith.addf %199, %202 : vector<16x64xf32>
    %204 = arith.addf %187, %203 : vector<16x64xf32>
    %c0_82 = arith.constant 0 : index
    %c0_83 = arith.constant 0 : index
    %c0_84 = arith.constant 0 : index
    %205 = vector.load %arg12[%c0_82, %c0_83, %c0_84] : memref<1x1x64xf32, #tpu.memory_space<vmem>>, vector<1x1x64xf32>
    %206 = vector.shape_cast %205 : vector<1x1x64xf32> to vector<1x64xf32>
    %c0_85 = arith.constant 0 : index
    %c0_86 = arith.constant 0 : index
    %c0_87 = arith.constant 0 : index
    %207 = vector.load %arg13[%c0_85, %c0_86, %c0_87] : memref<1x1x64xf32, #tpu.memory_space<vmem>>, vector<1x1x64xf32>
    %208 = vector.shape_cast %207 : vector<1x1x64xf32> to vector<1x64xf32>
    %cst_88 = arith.constant dense<0.000000e+00> : vector<16xf32>
    %209 = vector.multi_reduction <add>, %204, %cst_88 [1] : vector<16x64xf32> to vector<16xf32>
    %210 = vector.shape_cast %209 : vector<16xf32> to vector<16x1xf32>
    %cst_89 = arith.constant 6.400000e+01 : f32
    %211 = vector.broadcast %cst_89 : f32 to vector<16x1xf32>
    %212 = arith.divf %210, %211 : vector<16x1xf32>
    %213 = vector.broadcast %212 : vector<16x1xf32> to vector<16x64xf32>
    %214 = arith.subf %204, %213 : vector<16x64xf32>
    %215 = arith.mulf %214, %214 : vector<16x64xf32>
    %cst_90 = arith.constant dense<0.000000e+00> : vector<16xf32>
    %216 = vector.multi_reduction <add>, %215, %cst_90 [1] : vector<16x64xf32> to vector<16xf32>
    %217 = vector.shape_cast %216 : vector<16xf32> to vector<16x1xf32>
    %cst_91 = arith.constant 6.400000e+01 : f32
    %218 = vector.broadcast %cst_91 : f32 to vector<16x1xf32>
    %219 = arith.divf %217, %218 : vector<16x1xf32>
    %cst_92 = arith.constant 9.99999974E-6 : f32
    %220 = vector.broadcast %cst_92 : f32 to vector<16x1xf32>
    %221 = arith.addf %219, %220 : vector<16x1xf32>
    %222 = math.rsqrt %221 : vector<16x1xf32>
    %223 = vector.broadcast %222 : vector<16x1xf32> to vector<16x64xf32>
    %224 = arith.mulf %214, %223 : vector<16x64xf32>
    %225 = vector.broadcast %206 : vector<1x64xf32> to vector<16x64xf32>
    %226 = arith.mulf %224, %225 : vector<16x64xf32>
    %227 = vector.broadcast %208 : vector<1x64xf32> to vector<16x64xf32>
    %228 = arith.addf %226, %227 : vector<16x64xf32>
    %229 = vector.shape_cast %228 : vector<16x64xf32> to vector<2x8x64xf32>
    %c0_93 = arith.constant 0 : index
    %c0_94 = arith.constant 0 : index
    %c0_95 = arith.constant 0 : index
    %c0_96 = arith.constant 0 : index
    %230 = vector.load %arg14[%c0_93, %c0_94, %c0_95, %c0_96] : memref<1x2x8x64xf32, #tpu.memory_space<vmem>>, vector<1x2x8x64xf32>
    %231 = vector.shape_cast %230 : vector<1x2x8x64xf32> to vector<2x8x64xf32>
    %232 = vector.shape_cast %229 : vector<2x8x64xf32> to vector<1x2x8x64xf32>
    tpu.vector_store %arg14[%c0_93, %c0_94, %c0_95, %c0_96], %232 {strides = array<i32>} : memref<1x2x8x64xf32, #tpu.memory_space<vmem>>, vector<1x2x8x64xf32>,
    return
  }
  func.func @transform_0(%arg0: i32) -> (i32, i32, i32, i32) {
    %c0_i32 = arith.constant 0 : i32
    %c0_i32_0 = arith.constant 0 : i32
    %c0_i32_1 = arith.constant 0 : i32
    %c0_i32_2 = arith.constant 0 : i32
    return %arg0, %c0_i32, %c0_i32_0, %c0_i32_1 : i32, i32, i32, i32
  }
  func.func @transform_1(%arg0: i32) -> (i32, i32, i32) {
    %c0_i32 = arith.constant 0 : i32
    %c0_i32_0 = arith.constant 0 : i32
    %c0_i32_1 = arith.constant 0 : i32
    return %arg0, %c0_i32, %c0_i32_0 : i32, i32, i32
  }
  func.func @transform_2(%arg0: i32) -> (i32, i32, i32) {
    %c0_i32 = arith.constant 0 : i32
    %c0_i32_0 = arith.constant 0 : i32
    %c0_i32_1 = arith.constant 0 : i32
    return %arg0, %c0_i32, %c0_i32_0 : i32, i32, i32
  }
  func.func @transform_3(%arg0: i32) -> (i32, i32, i32) {
    %c0_i32 = arith.constant 0 : i32
    %c0_i32_0 = arith.constant 0 : i32
    %c0_i32_1 = arith.constant 0 : i32
    return %arg0, %c0_i32, %c0_i32_0 : i32, i32, i32
  }
  func.func @transform_4(%arg0: i32) -> (i32, i32, i32) {
    %c0_i32 = arith.constant 0 : i32
    %c0_i32_0 = arith.constant 0 : i32
    %c0_i32_1 = arith.constant 0 : i32
    return %arg0, %c0_i32, %c0_i32_0 : i32, i32, i32
  }
  func.func @transform_5(%arg0: i32) -> (i32, i32, i32) {
    %c0_i32 = arith.constant 0 : i32
    %c0_i32_0 = arith.constant 0 : i32
    %c0_i32_1 = arith.constant 0 : i32
    return %arg0, %c0_i32, %c0_i32_0 : i32, i32, i32
  }
  func.func @transform_6(%arg0: i32) -> (i32, i32, i32) {
    %c0_i32 = arith.constant 0 : i32
    %c0_i32_0 = arith.constant 0 : i32
    %c0_i32_1 = arith.constant 0 : i32
    return %arg0, %c0_i32, %c0_i32_0 : i32, i32, i32
  }
  func.func @transform_7(%arg0: i32) -> (i32, i32, i32) {
    %c0_i32 = arith.constant 0 : i32
    %c0_i32_0 = arith.constant 0 : i32
    %c0_i32_1 = arith.constant 0 : i32
    return %arg0, %c0_i32, %c0_i32_0 : i32, i32, i32
  }
  func.func @transform_8(%arg0: i32) -> (i32, i32, i32) {
    %c0_i32 = arith.constant 0 : i32
    %c0_i32_0 = arith.constant 0 : i32
    %c0_i32_1 = arith.constant 0 : i32
    return %arg0, %c0_i32, %c0_i32_0 : i32, i32, i32
  }
  func.func @transform_9(%arg0: i32) -> (i32, i32, i32) {
    %c0_i32 = arith.constant 0 : i32
    %c0_i32_0 = arith.constant 0 : i32
    %c0_i32_1 = arith.constant 0 : i32
    return %arg0, %c0_i32, %c0_i32_0 : i32, i32, i32
  }
  func.func @transform_10(%arg0: i32) -> (i32, i32, i32) {
    %c0_i32 = arith.constant 0 : i32
    %c0_i32_0 = arith.constant 0 : i32
    %c0_i32_1 = arith.constant 0 : i32
    return %arg0, %c0_i32, %c0_i32_0 : i32, i32, i32
  }
  func.func @transform_11(%arg0: i32) -> (i32, i32, i32) {
    %c0_i32 = arith.constant 0 : i32
    %c0_i32_0 = arith.constant 0 : i32
    %c0_i32_1 = arith.constant 0 : i32
    return %arg0, %c0_i32, %c0_i32_0 : i32, i32, i32
  }
  func.func @transform_12(%arg0: i32) -> (i32, i32, i32) {
    %c0_i32 = arith.constant 0 : i32
    %c0_i32_0 = arith.constant 0 : i32
    %c0_i32_1 = arith.constant 0 : i32
    return %arg0, %c0_i32, %c0_i32_0 : i32, i32, i32
  }
  func.func @transform_13(%arg0: i32) -> (i32, i32, i32, i32) {
    %c0_i32 = arith.constant 0 : i32
    %c0_i32_0 = arith.constant 0 : i32
    %c0_i32_1 = arith.constant 0 : i32
    %c0_i32_2 = arith.constant 0 : i32
    return %arg0, %c0_i32, %c0_i32_0, %c0_i32_1 : i32, i32, i32, i32
  }
}

module attributes {stable_mosaic.version = 11 : i64} {
  func.func @_head_kernel(%arg0: memref<2x8x64xf32, #tpu.memory_space<vmem>>, %arg1: memref<2x8x64xf32, #tpu.memory_space<vmem>>, %arg2: memref<2x8x64xf32, #tpu.memory_space<vmem>>, %arg3: memref<64x6xf32, #tpu.memory_space<vmem>>, %arg4: memref<1x6xf32, #tpu.memory_space<vmem>>, %arg5: memref<128x5xf32, #tpu.memory_space<vmem>>, %arg6: memref<1x5xf32, #tpu.memory_space<vmem>>, %arg7: memref<192x1xf32, #tpu.memory_space<vmem>>, %arg8: memref<1x1xf32, #tpu.memory_space<vmem>>, %arg9: memref<2x6xf32, #tpu.memory_space<vmem>>, %arg10: memref<2x5xf32, #tpu.memory_space<vmem>>, %arg11: memref<2x1xf32, #tpu.memory_space<vmem>>) attributes {dimension_semantics = [], scalar_prefetch = 0 : i64, scratch_operands = 0 : i64, tpu.core_type = #tpu.core_type<tc>} {
    %c0 = arith.constant 0 : index
    %c0_0 = arith.constant 0 : index
    %c0_1 = arith.constant 0 : index
    %0 = vector.load %arg0[%c0, %c0_0, %c0_1] : memref<2x8x64xf32, #tpu.memory_space<vmem>>, vector<2x8x64xf32>
    %cst = arith.constant dense<0.000000e+00> : vector<2x64xf32>
    %1 = vector.multi_reduction <add>, %0, %cst [1] : vector<2x8x64xf32> to vector<2x64xf32>
    %cst_2 = arith.constant 1.250000e-01 : f32
    %2 = vector.broadcast %cst_2 : f32 to vector<2x64xf32>
    %3 = arith.mulf %1, %2 : vector<2x64xf32>
    %c0_3 = arith.constant 0 : index
    %c0_4 = arith.constant 0 : index
    %c0_5 = arith.constant 0 : index
    %4 = vector.load %arg1[%c0_3, %c0_4, %c0_5] : memref<2x8x64xf32, #tpu.memory_space<vmem>>, vector<2x8x64xf32>
    %cst_6 = arith.constant dense<0.000000e+00> : vector<2x64xf32>
    %5 = vector.multi_reduction <add>, %4, %cst_6 [1] : vector<2x8x64xf32> to vector<2x64xf32>
    %cst_7 = arith.constant 1.250000e-01 : f32
    %6 = vector.broadcast %cst_7 : f32 to vector<2x64xf32>
    %7 = arith.mulf %5, %6 : vector<2x64xf32>
    %c0_8 = arith.constant 0 : index
    %c0_9 = arith.constant 0 : index
    %c0_10 = arith.constant 0 : index
    %8 = vector.load %arg2[%c0_8, %c0_9, %c0_10] : memref<2x8x64xf32, #tpu.memory_space<vmem>>, vector<2x8x64xf32>
    %cst_11 = arith.constant dense<0.000000e+00> : vector<2x64xf32>
    %9 = vector.multi_reduction <add>, %8, %cst_11 [1] : vector<2x8x64xf32> to vector<2x64xf32>
    %cst_12 = arith.constant 1.250000e-01 : f32
    %10 = vector.broadcast %cst_12 : f32 to vector<2x64xf32>
    %11 = arith.mulf %9, %10 : vector<2x64xf32>
    %c0_13 = arith.constant 0 : index
    %c0_14 = arith.constant 0 : index
    %12 = vector.load %arg3[%c0_13, %c0_14] : memref<64x6xf32, #tpu.memory_space<vmem>>, vector<64x6xf32>
    %cst_15 = arith.constant dense<0.000000e+00> : vector<2x6xf32>
    %13 = tpu.matmul %3, %12, %cst_15 {dimension_numbers = #tpu.dot_dimension_numbers<[1], [0], [0], [1], [0, 0, 1, 1], [], []>} : vector<2x64xf32>, vector<64x6xf32>, vector<2x6xf32> -> vector<2x6xf32>
    %c0_16 = arith.constant 0 : index
    %c0_17 = arith.constant 0 : index
    %14 = vector.load %arg4[%c0_16, %c0_17] : memref<1x6xf32, #tpu.memory_space<vmem>>, vector<1x6xf32>
    %15 = vector.broadcast %14 : vector<1x6xf32> to vector<2x6xf32>
    %16 = arith.addf %13, %15 : vector<2x6xf32>
    %c0_18 = arith.constant 0 : index
    %c0_19 = arith.constant 0 : index
    %17 = vector.load %arg9[%c0_18, %c0_19] : memref<2x6xf32, #tpu.memory_space<vmem>>, vector<2x6xf32>
    tpu.vector_store %arg9[%c0_18, %c0_19], %16 {strides = array<i32>} : memref<2x6xf32, #tpu.memory_space<vmem>>, vector<2x6xf32>,
    %18 = tpu.concatenate %3, %7 in 1 : vector<2x64xf32>, vector<2x64xf32> -> vector<2x128xf32>
    %c0_20 = arith.constant 0 : index
    %c0_21 = arith.constant 0 : index
    %19 = vector.load %arg5[%c0_20, %c0_21] : memref<128x5xf32, #tpu.memory_space<vmem>>, vector<128x5xf32>
    %cst_22 = arith.constant dense<0.000000e+00> : vector<2x5xf32>
    %20 = tpu.matmul %18, %19, %cst_22 {dimension_numbers = #tpu.dot_dimension_numbers<[1], [0], [0], [1], [0, 0, 1, 1], [], []>} : vector<2x128xf32>, vector<128x5xf32>, vector<2x5xf32> -> vector<2x5xf32>
    %c0_23 = arith.constant 0 : index
    %c0_24 = arith.constant 0 : index
    %21 = vector.load %arg6[%c0_23, %c0_24] : memref<1x5xf32, #tpu.memory_space<vmem>>, vector<1x5xf32>
    %22 = vector.broadcast %21 : vector<1x5xf32> to vector<2x5xf32>
    %23 = arith.addf %20, %22 : vector<2x5xf32>
    %c0_25 = arith.constant 0 : index
    %c0_26 = arith.constant 0 : index
    %24 = vector.load %arg10[%c0_25, %c0_26] : memref<2x5xf32, #tpu.memory_space<vmem>>, vector<2x5xf32>
    tpu.vector_store %arg10[%c0_25, %c0_26], %23 {strides = array<i32>} : memref<2x5xf32, #tpu.memory_space<vmem>>, vector<2x5xf32>,
    %25 = tpu.concatenate %3, %7, %11 in 1 : vector<2x64xf32>, vector<2x64xf32>, vector<2x64xf32> -> vector<2x192xf32>
    %c0_27 = arith.constant 0 : index
    %c0_28 = arith.constant 0 : index
    %26 = vector.load %arg7[%c0_27, %c0_28] : memref<192x1xf32, #tpu.memory_space<vmem>>, vector<192x1xf32>
    %cst_29 = arith.constant dense<0.000000e+00> : vector<2x1xf32>
    %27 = tpu.matmul %25, %26, %cst_29 {dimension_numbers = #tpu.dot_dimension_numbers<[1], [0], [0], [1], [0, 0, 1, 1], [], []>} : vector<2x192xf32>, vector<192x1xf32>, vector<2x1xf32> -> vector<2x1xf32>
    %c0_30 = arith.constant 0 : index
    %c0_31 = arith.constant 0 : index
    %28 = vector.load %arg8[%c0_30, %c0_31] : memref<1x1xf32, #tpu.memory_space<vmem>>, vector<1x1xf32>
    %29 = vector.broadcast %28 : vector<1x1xf32> to vector<2x1xf32>
    %30 = arith.addf %27, %29 : vector<2x1xf32>
    %c0_32 = arith.constant 0 : index
    %c0_33 = arith.constant 0 : index
    %31 = vector.load %arg11[%c0_32, %c0_33] : memref<2x1xf32, #tpu.memory_space<vmem>>, vector<2x1xf32>
    tpu.vector_store %arg11[%c0_32, %c0_33], %30 {strides = array<i32>} : memref<2x1xf32, #tpu.memory_space<vmem>>, vector<2x1xf32>,
    return
  }
}

</mosaic_0001>

<bundles_post_ra>
// kernel: forward.5
= control target key start
LH: loop header
LB: loop body
LE: loop exit
PB: predicated region body
PF: predicated region fallthrough
CT: control target
= control target key end

     0   :  { %v465_v3 = vmov 0.0   ;;  %vm120_vm0 = vcmask 785408   ;;  %s764_s1 = inlined_call_operand.vmem [shape: f32[96,768], index: 1, kind: input, shape index: {}]   ;;  %s765_s0 = inlined_call_operand.vmem [shape: f32[16,96], index: 0, kind: input, shape index: {}]   ;;  %s766_s2 = inlined_call_operand.vmem [shape: f32[1,768], index: 2, kind: input, shape index: {}]   ;;  %s767_s3 = inlined_call_operand.vmem [shape: f32[16,768], index: 3, kind: output, shape index: {}]  }
   0x1   :  { %v17_v0 = vld [vmem:[%s764_s1 + $0x8] sm:$0xff]  ;;  %v23_v1 = vld [vmem:[%s764_s1 + $0x38] sm:$0xff]  ;;  %191 = vmatprep.mubr.f32.mxu0 %v465_v3  ;;  %268 = vmatprep.mubr.f32.mxu1 %v465_v3  ;;  %v16_v6 = vld [vmem:[%s764_s1] sm:$0xff] }
   0x2   :  { %v19_v2 = vld [vmem:[%s764_s1 + $0x18] sm:$0xff]  ;;  %v380_v4 = vpack.c.bf16 %v23_v1, %v17_v0  ;;  %v25_v5 = vld [vmem:[%s764_s1 + $0x48] sm:$0xff]  ;;  %v22_v7 = vld [vmem:[%s764_s1 + $0x30] sm:$0xff] }
   0x3   :  { %v404_v8 = vpack.c.bf16 %v25_v5, %v19_v2  ;;  %v382_v9 = vpack.c.bf16 %v22_v7, %v16_v6  ;;  %v18_v10 = vld [vmem:[%s764_s1 + $0x10] sm:$0xff]  ;;  %v24_v11 = vld [vmem:[%s764_s1 + $0x40] sm:$0xff]  ;;  %v29_v12 = vld [vmem:[%s764_s1 + $0x68] sm:$0xff] }
   0x4   :  { %381 = vmatprep.subr.bf16.mxu0 %v380_v4  ;;  %v406_v13 = vpack.c.bf16 %v24_v11, %v18_v10  ;;  %v35_v14 = vld [vmem:[%s764_s1 + $0x98] sm:$0xff]  ;;  %v37_v16 = vld [vmem:[%s764_s1 + $0xa8] sm:$0xff]  ;;  %v28_v19 = vld [vmem:[%s764_s1 + $0x60] sm:$0xff] }
   0x5   :  { %v31_v15 = vld [vmem:[%s764_s1 + $0x78] sm:$0xff]  ;;  %405 = vmatprep.subr.bf16.mxu1 %v404_v8  ;;  %383 = vmatpush1.bf16.msra.mxu0 %v382_v9  ;;  %v384_v17 = vpack.c.bf16 %v35_v14, %v29_v12  ;;  %v34_v20 = vld [vmem:[%s764_s1 + $0x90] sm:$0xff]  ;;  %v36_v23 = vld [vmem:[%s764_s1 + $0xa0] sm:$0xff] }
   0x6   :  { %v408_v18 = vpack.c.bf16 %v37_v16, %v31_v15  ;;  %v30_v21 = vld [vmem:[%s764_s1 + $0x70] sm:$0xff]  ;;  %407 = vmatpush1.bf16.msra.mxu1 %v406_v13  ;;  %v386_v22 = vpack.c.bf16 %v34_v20, %v28_v19  ;;  %v41_v24 = vld [vmem:[%s764_s1 + $0xc8] sm:$0xff]  ;;  %v47_v25 = vld [vmem:[%s764_s1 + $0xf8] sm:$0xff] }
   0x7   :  { %385 = vmatprep.subr.bf16.mxu0 %v384_v17  ;;  %v410_v26 = vpack.c.bf16 %v36_v23, %v30_v21  ;;  %v388_v27 = vpack.c.bf16 %v47_v25, %v41_v24  ;;  %v43_v28 = vld [vmem:[%s764_s1 + $0xd8] sm:$0xff]  ;;  %v49_v29 = vld [vmem:[%s764_s1 + $0x108] sm:$0xff]  ;;  %v40_v30 = vld [vmem:[%s764_s1 + $0xc0] sm:$0xff] }
   0x8   :  { %409 = vmatprep.subr.bf16.mxu1 %v408_v18  ;;  %v412_v31 = vpack.c.bf16 %v49_v29, %v43_v28  ;;  %v46_v32 = vld [vmem:[%s764_s1 + $0xf0] sm:$0xff]  ;;  %v48_v34 = vld [vmem:[%s764_s1 + $0x100] sm:$0xff]  ;;  %v53_v36 = vld [vmem:[%s764_s1 + $0x128] sm:$0xff] }
   0x9   :  { %v42_v33 = vld [vmem:[%s764_s1 + $0xd0] sm:$0xff]  ;;  %387 = vmatpush1.bf16.msra.mxu0 %v386_v22  ;;  %v390_v35 = vpack.c.bf16 %v46_v32, %v40_v30  ;;  %v59_v37 = vld [vmem:[%s764_s1 + $0x158] sm:$0xff]  ;;  %v61_v41 = vld [vmem:[%s764_s1 + $0x168] sm:$0xff] }
   0xa   :  { %v55_v38 = vld [vmem:[%s764_s1 + $0x138] sm:$0xff]  ;;  %411 = vmatpush1.bf16.msra.mxu1 %v410_v26  ;;  %389 = vmatprep.subr.bf16.mxu0 %v388_v27  ;;  %v414_v39 = vpack.c.bf16 %v48_v34, %v42_v33  ;;  %v392_v40 = vpack.c.bf16 %v59_v37, %v53_v36  ;;  %v52_v42 = vld [vmem:[%s764_s1 + $0x120] sm:$0xff]  ;;  %v58_v43 = vld [vmem:[%s764_s1 + $0x150] sm:$0xff] }
   0xb   :  { %413 = vmatprep.subr.bf16.mxu1 %v412_v31  ;;  %v416_v44 = vpack.c.bf16 %v61_v41, %v55_v38  ;;  %v54_v45 = vld [vmem:[%s764_s1 + $0x130] sm:$0xff]  ;;  %v60_v46 = vld [vmem:[%s764_s1 + $0x160] sm:$0xff]  ;;  %v65_v47 = vld [vmem:[%s764_s1 + $0x188] sm:$0xff]  ;;  %v394_v51 = vpack.c.bf16 %v58_v43, %v52_v42 }
   0xc   :  { %v71_v48 = vld [vmem:[%s764_s1 + $0x1b8] sm:$0xff]  ;;  %v73_v50 = vld [vmem:[%s764_s1 + $0x1c8] sm:$0xff]  ;;  %v418_v52 = vpack.c.bf16 %v60_v46, %v54_v45  ;;  %v64_v54 = vld [vmem:[%s764_s1 + $0x180] sm:$0xff] }
   0xd   :  { %v67_v49 = vld [vmem:[%s764_s1 + $0x198] sm:$0xff]  ;;  %391 = vmatpush1.bf16.msra.mxu0 %v390_v35  ;;  %v396_v53 = vpack.c.bf16 %v71_v48, %v65_v47  ;;  %v70_v55 = vld [vmem:[%s764_s1 + $0x1b0] sm:$0xff]  ;;  %v72_v58 = vld [vmem:[%s764_s1 + $0x1c0] sm:$0xff]  ;;  %v90_v47 = vlaneseq }
   0xe   :  { %415 = vmatpush1.bf16.msra.mxu1 %v414_v39  ;;  %393 = vmatprep.subr.bf16.mxu0 %v392_v40  ;;  %v66_v56 = vld [vmem:[%s764_s1 + $0x190] sm:$0xff]  ;;  %v420_v57 = vpack.c.bf16 %v73_v50, %v67_v49  ;;  %v77_v59 = vld [vmem:[%s764_s1 + $0x1e8] sm:$0xff]  ;;  %v83_v60 = vld [vmem:[%s764_s1 + $0x218] sm:$0xff]  ;;  %v398_v63 = vpack.c.bf16 %v70_v55, %v64_v54 }
   0xf   :  { %417 = vmatprep.subr.bf16.mxu1 %v416_v44  ;;  %v79_v61 = vld [vmem:[%s764_s1 + $0x1f8] sm:$0xff]  ;;  %v85_v62 = vld [vmem:[%s764_s1 + $0x228] sm:$0xff]  ;;  %v422_v0 = vpack.c.bf16 %v72_v58, %v66_v56  ;;  %v400_v1 = vpack.c.bf16 %v83_v60, %v77_v59  ;;  %v76_v2 = vld [vmem:[%s764_s1 + $0x1e0] sm:$0xff]  ;;  %v91_v48 = vshrl.u32 %v90_v47, 7 }
  0x10   :  { %v82_v4 = vld [vmem:[%s764_s1 + $0x210] sm:$0xff]  ;;  %v424_v6 = vpack.c.bf16 %v85_v62, %v79_v61  ;;  %v84_v7 = vld [vmem:[%s764_s1 + $0x220] sm:$0xff]  ;;  %v21_v8 = vld [vmem:[%s764_s1 + $0x28] sm:$0xff] }
  0x11   :  { %395 = vmatpush1.bf16.msra.mxu0 %v394_v51  ;;  %v78_v5 = vld [vmem:[%s764_s1 + $0x1f0] sm:$0xff]  ;;  %v27_v9 = vld [vmem:[%s764_s1 + $0x58] sm:$0xff]  ;;  %v402_v10 = vpack.c.bf16 %v82_v4, %v76_v2  ;;  %v20_v13 = vld [vmem:[%s764_s1 + $0x20] sm:$0xff]  ;;  %v92_v49 = vsub.s32 0, %v91_v48  ;;  %v100_v51 = vsub.s32 2, %v91_v48 }
  0x12   :  { %419 = vmatpush1.bf16.msra.mxu1 %v418_v52  ;;  %397 = vmatprep.subr.bf16.mxu0 %v396_v53  ;;  %v426_v11 = vpack.c.bf16 %v84_v7, %v78_v5  ;;  %v428_v12 = vpack.c.bf16 %v27_v9, %v21_v8  ;;  %v26_v14 = vld [vmem:[%s764_s1 + $0x50] sm:$0xff]  ;;  %v33_v15 = vld [vmem:[%s764_s1 + $0x88] sm:$0xff]  ;;  %v39_v16 = vld [vmem:[%s764_s1 + $0xb8] sm:$0xff]  ;;  %v96_v52 = vsub.s32 1, %v91_v48  ;;  %v104_v53 = vsub.s32 3, %v91_v48 }
  0x13   :  { %421 = vmatprep.subr.bf16.mxu1 %v420_v57  ;;  %v653_v17 = vld [vmem:[%s765_s0] sm:$0xff]  ;;  %v430_v18 = vpack.c.bf16 %v26_v14, %v20_v13  ;;  %v432_v19 = vpack.c.bf16 %v39_v16, %v33_v15  ;;  %v38_v21 = vld [vmem:[%s764_s1 + $0xb0] sm:$0xff]  ;;  %v45_v22 = vld [vmem:[%s764_s1 + $0xe8] sm:$0xff] }
  0x14   :  { %v32_v20 = vld [vmem:[%s764_s1 + $0x80] sm:$0xff]  ;;  %v51_v23 = vld [vmem:[%s764_s1 + $0x118] sm:$0xff]  ;;  %v15_v25 = vld [vmem:[%s765_s0 + $0x8] sm:$0xff] }
  0x15   :  { %399 = vmatpush1.bf16.msra.mxu0 %v398_v63  ;;  %v434_v24 = vpack.c.bf16 %v38_v21, %v32_v20  ;;  %v436_v26 = vpack.c.bf16 %v51_v23, %v45_v22  ;;  %v44_v27 = vld [vmem:[%s764_s1 + $0xe0] sm:$0xff]  ;;  %v50_v28 = vld [vmem:[%s764_s1 + $0x110] sm:$0xff]  ;;  %v57_v29 = vld [vmem:[%s764_s1 + $0x148] sm:$0xff] }
  0x16   :  { %423 = vmatpush1.bf16.msra.mxu1 %v422_v0  ;;  %401 = vmatprep.subr.bf16.mxu0 %v400_v1  ;;  %v63_v30 = vld [vmem:[%s764_s1 + $0x178] sm:$0xff]  ;;  %v438_v31 = vpack.c.bf16 %v50_v28, %v44_v27  ;;  %v56_v33 = vld [vmem:[%s764_s1 + $0x140] sm:$0xff]  ;;  %v62_v34 = vld [vmem:[%s764_s1 + $0x170] sm:$0xff] }
  0x17   :  { %425 = vmatprep.subr.bf16.mxu1 %v424_v6  ;;  %v440_v32 = vpack.c.bf16 %v63_v30, %v57_v29  ;;  %v69_v35 = vld [vmem:[%s764_s1 + $0x1a8] sm:$0xff]  ;;  %v75_v36 = vld [vmem:[%s764_s1 + $0x1d8] sm:$0xff]  ;;  %v442_v37 = vpack.c.bf16 %v62_v34, %v56_v33  ;;  %v68_v39 = vld [vmem:[%s764_s1 + $0x1a0] sm:$0xff] }
  0x18   :  { %v444_v38 = vpack.c.bf16 %v75_v36, %v69_v35  ;;  %v74_v40 = vld [vmem:[%s764_s1 + $0x1d0] sm:$0xff]  ;;  %v81_v41 = vld [vmem:[%s764_s1 + $0x208] sm:$0xff]  ;;  %v80_v44 = vld [vmem:[%s764_s1 + $0x200] sm:$0xff] }
  0x19   :  { %403 = vmatpush1.bf16.msra.mxu0 %v402_v10  ;;  %v446_v42 = vpack.c.bf16 %v74_v40, %v68_v39  ;;  %v86_v45 = vld [vmem:[%s764_s1 + $0x230] sm:$0xff]  ;;  %v88_v50 = vld [vmem:[%s766_s2] sm:$0x3f] }
  0x1a   :  { %427 = vmatpush1.bf16.msra.mxu1 %v426_v11  ;;  %429 = vmatprep.subr.bf16.mxu0 %v428_v12  ;;  %v450_v46 = vpack.c.bf16 %v86_v45, %v80_v44  ;;  %v93_v54 = vrot.slane %v88_v50, %v92_v49  ;;  %v101_v55 = vrot.slane %v88_v50, %v100_v51  ;;  %v108_v11 = vsub.s32 4, %v91_v48 }
  0x1b   :  { %452 = vmatprep.subr.bf16.mxu1 %v428_v12  ;;  %v97_v56 = vrot.slane %v88_v50, %v96_v52  ;;  %v105_v57 = vrot.slane %v88_v50, %v104_v53  ;;  %v112_v12 = vsub.s32 5, %v91_v48 }
  0x1c   :  { %374 = vmatmul.mubr.msk.f32.vlgmr.msra.gmra.mrb[0].mxu0 %vm120_vm0, %v653_v17  ;;  %v109_v13 = vrot.slane %v88_v50, %v108_v11 }
  0x1d   :  { %376 = vmatmul.mubr.msk.f32.vlgmr.msra.gmra.mrb[0].mxu1 %vm120_vm0, %v653_v17  ;;  %431 = vmatpush1.bf16.msra.mxu0 %v430_v18  ;;  %v113_v14 = vrot.slane %v88_v50, %v112_v12 }
  0x1e   :  { %458 = vmatpush1.bf16.msra.mxu1 %v430_v18  ;;  %433 = vmatprep.subr.bf16.mxu0 %v432_v19 }
  0x1f   :  { %453 = vmatprep.subr.bf16.mxu1 %v432_v19  ;;  %197 = vmatprep.mubr.f32.mxu0 %v465_v3 }
  0x20   :  { %274 = vmatprep.mubr.f32.mxu1 %v465_v3  ;;  %375 = vmatmul.mubr.msk.f32.gmra.mrb[2].mxu0 %vm120_vm0, %v15_v25 }
  0x21   :  { %435 = vmatpush1.bf16.msra.mxu0 %v434_v24  ;;  %377 = vmatmul.mubr.msk.f32.gmra.mrb[2].mxu1 %vm120_vm0, %v15_v25 }
  0x22   :  { %459 = vmatpush1.bf16.msra.mxu1 %v434_v24  ;;  %437 = vmatprep.subr.bf16.mxu0 %v436_v26 }
  0x23   :  { %454 = vmatprep.subr.bf16.mxu1 %v436_v26  ;;  %345 = vmatprep.mubr.f32.mxu0 %v465_v3 }
  0x24   :  { %351 = vmatprep.mubr.f32.mxu1 %v465_v3  ;;  %v87_v3 = vld [vmem:[%s764_s1 + $0x238] sm:$0xff] }
  0x25   :  { %439 = vmatpush1.bf16.msra.mxu0 %v438_v31  ;;  %v448_v43 = vpack.c.bf16 %v87_v3, %v81_v41 }
  0x26   :  { %460 = vmatpush1.bf16.msra.mxu1 %v438_v31  ;;  %441 = vmatprep.subr.bf16.mxu0 %v440_v32 }
  0x27   :  { %455 = vmatprep.subr.bf16.mxu1 %v440_v32 }
  0x29   :  { %443 = vmatpush1.bf16.msra.mxu0 %v442_v37 }
  0x2a   :  { %461 = vmatpush1.bf16.msra.mxu1 %v442_v37  ;;  %445 = vmatprep.subr.bf16.mxu0 %v444_v38 }
  0x2b   :  { %456 = vmatprep.subr.bf16.mxu1 %v444_v38 }
  0x2d   :  { %447 = vmatpush1.bf16.msra.mxu0 %v446_v42 }
  0x2e   :  { %462 = vmatpush1.bf16.msra.mxu1 %v446_v42  ;;  %449 = vmatprep.subr.bf16.mxu0 %v448_v43 }
  0x2f   :  { %457 = vmatprep.subr.bf16.mxu1 %v448_v43 }
  0x31   :  { %451 = vmatpush1.bf16.msra.mxu0 %v450_v46 }
  0x32   :  { %463 = vmatpush1.bf16.msra.mxu1 %v450_v46 }
  0x34   :  { %378 = vmatmul.mubr.msk.f32.vlgmr.msra.gmra.mrb[4].mxu0 %vm120_vm0, %v653_v17 }
  0x35   :  { %379 = vmatmul.mubr.msk.f32.vlgmr.msra.gmra.mrb[4].mxu1 %vm120_vm0, %v15_v25 }
  0xef   :  { %v193_v58 = vpop.f32.mrb[0].mxu0 }
  0xf0   :  { %v194_v59 = vadd.f32 %v193_v58, %v93_v54  ;;  %v270_v60 = vpop.f32.mrb[0].mxu1  ;;  %v195_v61 = vpop.f32.mrb[1].mxu0 }
  0xf1   :  { %v271_v62 = vadd.f32 %v270_v60, %v101_v55  ;;  %v196_v63 = vadd.f32 %v195_v61, %v97_v56  ;;  %v272_v0 = vpop.f32.mrb[1].mxu1 }
  0xf2   :  { %358 = vst [vmem:[%s767_s3] sm:$0xff] %v194_v59  ;;  %v273_v1 = vadd.f32 %v272_v0, %v105_v57 }
  0xf3   :  { %360 = vst [vmem:[%s767_s3 + $0x10] sm:$0xff] %v271_v62  ;;  %359 = vst [vmem:[%s767_s3 + $0x8] sm:$0xff] %v196_v63  ;;  %v199_v2 = vpop.f32.mrb[2].mxu0 }
  0xf4   :  { %361 = vst [vmem:[%s767_s3 + $0x18] sm:$0xff] %v273_v1  ;;  %v200_v4 = vadd.f32 %v199_v2, %v93_v54  ;;  %v276_v5 = vpop.f32.mrb[2].mxu1  ;;  %v201_v6 = vpop.f32.mrb[3].mxu0 }
  0xf5   :  { %v277_v7 = vadd.f32 %v276_v5, %v101_v55  ;;  %v202_v8 = vadd.f32 %v201_v6, %v97_v56  ;;  %v278_v9 = vpop.f32.mrb[3].mxu1 }
  0xf6   :  { %364 = vst [vmem:[%s767_s3 + $0x30] sm:$0xff] %v200_v4  ;;  %v279_v10 = vadd.f32 %v278_v9, %v105_v57 }
  0xf7   :  { %366 = vst [vmem:[%s767_s3 + $0x40] sm:$0xff] %v277_v7  ;;  %365 = vst [vmem:[%s767_s3 + $0x38] sm:$0xff] %v202_v8 }
  0xf8   :  { %367 = vst [vmem:[%s767_s3 + $0x48] sm:$0xff] %v279_v10 }
 0x107   :  { %v347_v15 = vpop.f32.mrb[4].mxu0 }
 0x108   :  { %v348_v16 = vadd.f32 %v347_v15, %v109_v13  ;;  %v353_v17 = vpop.f32.mrb[4].mxu1  ;;  %v349_v18 = vpop.f32.mrb[5].mxu0 }
 0x109   :  { %v354_v19 = vadd.f32 %v353_v17, %v109_v13  ;;  %v350_v20 = vadd.f32 %v349_v18, %v113_v14  ;;  %v355_v21 = vpop.f32.mrb[5].mxu1 }
 0x10a   :  { %362 = vst [vmem:[%s767_s3 + $0x20] sm:$0xff] %v348_v16  ;;  %v356_v22 = vadd.f32 %v355_v21, %v113_v14 }
 0x10b   :  { %368 = vst [vmem:[%s767_s3 + $0x50] sm:$0xff] %v354_v19  ;;  %363 = vst [vmem:[%s767_s3 + $0x28] sm:$0xff] %v350_v20 }
 0x10c   :  { %369 = vst [vmem:[%s767_s3 + $0x58] sm:$0xff] %v356_v22 }

// kernel: forward.9
= control target key start
LH: loop header
LB: loop body
LE: loop exit
PB: predicated region body
PF: predicated region fallthrough
CT: control target
= control target key end

     0   :  { %s949_s0 = inlined_call_operand.vmem [shape: f32[2,8,64], index: 0, kind: input, shape index: {}]   ;;  %s950_s1 = inlined_call_operand.vmem [shape: f32[2,8,64], index: 1, kind: input, shape index: {}]   ;;  %s951_s2 = inlined_call_operand.vmem [shape: f32[2,8,64], index: 2, kind: input, shape index: {}]   ;;  %s952_s3 = inlined_call_operand.vmem [shape: f32[64,6], index: 3, kind: input, shape index: {}]   ;;  %s953_s4 = inlined_call_operand.vmem [shape: f32[1,6], index: 4, kind: input, shape index: {}]   ;;  %s954_s5 = inlined_call_operand.vmem [shape: f32[128,5], index: 5, kind: input, shape index: {}]   ;;  %s955_s6 = inlined_call_operand.vmem [shape: f32[1,5], index: 6, kind: input, shape index: {}]   ;;  %s956_s7 = inlined_call_operand.vmem [shape: f32[192,1], index: 7, kind: input, shape index: {}]   ;;  %s957_s8 = inlined_call_operand.<no memory space> [shape: f32[1,1], index: 8, kind: input, shape index: {}]   ;;  %s958_s9 = inlined_call_operand.hbm [shape: f32[2,6], index: 9, kind: output, shape index: {0}]   ;;  %s959_s10 = inlined_call_operand.hbm [shape: f32[2,5], index: 10, kind: output, shape index: {1}]   ;;  %s960_s11 = inlined_call_operand.vmem [shape: f32[2,1], index: 11, kind: output, shape index: {2}]  }
   0x1   :  { %v17_v0 = vstv %s957_s8 }
   0x2   :  { %18 = vst [vmem:[#allocation2] sm:$0x1] %v17_v0 }
   0x3   :  { %19 = vsyncpa [#allocation4], 0  ;;  %vm41_vm0 = vcmask 523264   ;;  %v58_v1 = vld [vmem:[%s950_s1] sm:$0xff]  ;;  %v59_v2 = vld [vmem:[%s950_s1 + $0x8] sm:$0xff]  ;;  %v641_v5 = vmov 0.0|0.0  }
   0x4   :  { %v60_v3 = vsel %vm41_vm0, %v58_v1, 0.0  ;;  %v67_v4 = vsel %vm41_vm0, %v59_v2, 0.0  ;;  %515 = vmatprep.subr.bf16.mxu1 %v641_v5  ;;  %551 = vmatprep.subr.bf16.mxu0 %v641_v5  ;;  %v94_v6 = vld [vmem:[%s952_s3] sm:$0xff]  ;;  %v95_v7 = vld [vmem:[%s952_s3 + $0x8] sm:$0xff]  ;;  %v96_v13 = vld [vmem:[%s952_s3 + $0x10] sm:$0xff]  ;;  %vm642_vm1 = vmmov 0  }
   0x5   :  { %v293_v8 = vld [vmem:[%s956_s7] sm:$0xff]  ;;  %v61_v9 = vrot.slane %v60_v3, 4  ;;  %v68_v10 = vrot.slane %v67_v4, 4  ;;  %v516_v11 = vpack.c.bf16 %v95_v7, %v94_v6  ;;  %v294_v12 = vld [vmem:[%s956_s7 + $0x8] sm:$0xff]  ;;  %v97_v14 = vld [vmem:[%s952_s3 + $0x18] sm:$0xff]  ;;  %v643_v18 = vmov 0.0  }
   0x6   :  { %v552_v15 = vpack.c.bf16 %v294_v12, %v293_v8  ;;  %v295_v16 = vld [vmem:[%s956_s7 + $0x10] sm:$0xff]  ;;  %v296_v17 = vld [vmem:[%s956_s7 + $0x18] sm:$0xff]  ;;  %477 = vmatprep.mubr.msk.f32.mxu1 %vm642_vm1, %v643_v18  ;;  %v519_v21 = vpack.c.bf16 %v97_v14, %v96_v13  ;;  %v98_v22 = vld [vmem:[%s952_s3 + $0x20] sm:$0xff]  ;;  %vm111_vm2 = vcmask 1041409   ;;  %s644_s21 = smov 64  }
   0x7   :  { %v62_v19 = vadd.f32 %v61_v9, %v60_v3  ;;  %v69_v20 = vadd.f32 %v68_v10, %v67_v4  ;;  %517 = vmatpush3.bf16.msra.mxu1 %v516_v11  ;;  %v99_v23 = vld [vmem:[%s952_s3 + $0x28] sm:$0xff]  ;;  %v555_v24 = vpack.c.bf16 %v296_v17, %v295_v16  ;;  %v297_v25 = vld [vmem:[%s956_s7 + $0x20] sm:$0xff]  ;;  %v100_v36 = vld [vmem:[%s952_s3 + $0x30] sm:$0xff] }
   0x8   :  { %553 = vmatpush1.bf16.msra.mxu0 %v552_v15  ;;  %518 = vmatprep.subr.bf16.mxu1 %v641_v5  ;;  %v298_v28 = vld [vmem:[%s956_s7 + $0x28] sm:$0xff]  ;;  %v39_v29 = vld [vmem:[%s949_s0] sm:$0xff]  ;;  %v522_v31 = vpack.c.bf16 %v99_v23, %v98_v22  ;;  %v101_v37 = vld [vmem:[%s952_s3 + $0x38] sm:$0xff] }
   0x9   :  { %v63_v26 = vrot.slane %v62_v19, 2  ;;  %v70_v27 = vrot.slane %v69_v20, 2  ;;  %554 = vmatprep.subr.bf16.mxu0 %v641_v5  ;;  %v40_v30 = vld [vmem:[%s949_s0 + $0x8] sm:$0xff]  ;;  %v42_v32 = vsel %vm41_vm0, %v39_v29, 0.0  ;;  %v558_v40 = vpack.c.bf16 %v298_v28, %v297_v25  ;;  %v299_v43 = vld [vmem:[%s956_s7 + $0x30] sm:$0xff]  ;;  %v300_v44 = vld [vmem:[%s956_s7 + $0x38] sm:$0xff] }
   0xa   :  { %v49_v33 = vsel %vm41_vm0, %v40_v30, 0.0  ;;  %v43_v38 = vrot.slane %v42_v32, 4  ;;  %v525_v47 = vpack.c.bf16 %v101_v37, %v100_v36  ;;  %v561_v52 = vpack.c.bf16 %v300_v44, %v299_v43  ;;  %v301_v57 = vld [vmem:[%s956_s7 + $0x40] sm:$0xff]  ;;  %v302_v58 = vld [vmem:[%s956_s7 + $0x48] sm:$0xff]  ;;  %v303_v1 = vld [vmem:[%s956_s7 + $0x50] sm:$0xff] }
   0xb   :  { %v64_v34 = vadd.f32 %v63_v26, %v62_v19  ;;  %v71_v35 = vadd.f32 %v70_v27, %v69_v20  ;;  %520 = vmatpush3.bf16.msra.mxu1 %v519_v21  ;;  %v50_v39 = vrot.slane %v49_v33, 4  ;;  %v195_v62 = vld [vmem:[%s954_s5] sm:$0xff]  ;;  %v196_v63 = vld [vmem:[%s954_s5 + $0x8] sm:$0xff]  ;;  %v564_v0 = vpack.c.bf16 %v302_v58, %v301_v57  ;;  %v304_v6 = vld [vmem:[%s956_s7 + $0x58] sm:$0xff] }
   0xc   :  { %556 = vmatpush1.bf16.msra.mxu0 %v555_v24  ;;  %521 = vmatprep.subr.bf16.mxu1 %v641_v5  ;;  %v44_v45 = vadd.f32 %v43_v38, %v42_v32  ;;  %v76_v2 = vld [vmem:[%s951_s2] sm:$0xff]  ;;  %v77_v7 = vld [vmem:[%s951_s2 + $0x8] sm:$0xff] }
   0xd   :  { %v65_v41 = vrot.slane %v64_v34, 1  ;;  %v72_v42 = vrot.slane %v71_v35, 1  ;;  %557 = vmatprep.subr.bf16.mxu0 %v641_v5  ;;  %v51_v46 = vadd.f32 %v50_v39, %v49_v33  ;;  %v78_v8 = vsel %vm41_vm0, %v76_v2, 0.0 }
   0xe   :  { %v45_v50 = vrot.slane %v44_v45, 2 }
   0xf   :  { %v66_v48 = vadd.f32 %v65_v41, %v64_v34  ;;  %v73_v49 = vadd.f32 %v72_v42, %v71_v35  ;;  %523 = vmatpush3.bf16.msra.mxu1 %v522_v31  ;;  %v52_v51 = vrot.slane %v51_v46, 2 }
  0x10   :  { %559 = vmatpush1.bf16.msra.mxu0 %v558_v40  ;;  %524 = vmatprep.subr.bf16.mxu1 %v641_v5  ;;  %v46_v55 = vadd.f32 %v45_v50, %v44_v45 }
  0x11   :  { %v74_v53 = vmul.f32 0.125, %v66_v48  ;;  %v75_v54 = vmul.f32 0.125, %v73_v49  ;;  %560 = vmatprep.subr.bf16.mxu0 %v641_v5  ;;  %v53_v56 = vadd.f32 %v52_v51, %v51_v46 }
  0x12   :  { %v47_v60 = vrot.slane %v46_v55, 1 }
  0x13   :  { %v190_v59 = vsel %vm111_vm2, %v75_v54, %v74_v53  ;;  %526 = vmatpush3.bf16.msra.mxu1 %v525_v47  ;;  %v54_v61 = vrot.slane %v53_v56, 1 }
  0x14   :  { %191 = vrot.lane.b32.xlu0 %v190_v59, %s644_s21  ;;  %562 = vmatpush1.bf16.msra.mxu0 %v561_v52  ;;  %v48_v3 = vadd.f32 %v47_v60, %v46_v55 }
  0x15   :  { %v55_v4 = vadd.f32 %v54_v61, %v53_v56  ;;  %527 = vmatprep.subr.bf16.mxu1 %v641_v5  ;;  %563 = vmatprep.subr.bf16.mxu0 %v641_v5 }
  0x16   :  { %20 = vsyncpa [#allocation6], 0  ;;  %v79_v9 = vrot.slane %v78_v8, 4  ;;  %v85_v10 = vsel %vm41_vm0, %v77_v7, 0.0  ;;  %v56_v11 = vmul.f32 0.125, %v48_v3  ;;  %v528_v13 = vpack.c.bf16 %v196_v63, %v195_v62  ;;  %v197_v15 = vld [vmem:[%s954_s5 + $0x10] sm:$0xff] }
  0x17   :  { %v57_v12 = vmul.f32 0.125, %v55_v4  ;;  %v86_v14 = vrot.slane %v85_v10, 4  ;;  %v198_v16 = vld [vmem:[%s954_s5 + $0x18] sm:$0xff]  ;;  %v567_v17 = vpack.c.bf16 %v304_v6, %v303_v1  ;;  %v305_v21 = vld [vmem:[%s956_s7 + $0x60] sm:$0xff]  ;;  %v306_v22 = vld [vmem:[%s956_s7 + $0x68] sm:$0xff]  ;;  %vm185_vm3 = vcmask 41984  }
  0x18   :  { %565 = vmatpush1.bf16.msra.mxu0 %v564_v0  ;;  %v80_v19 = vadd.f32 %v79_v9, %v78_v8  ;;  %v531_v25 = vpack.c.bf16 %v198_v16, %v197_v15  ;;  %v199_v27 = vld [vmem:[%s954_s5 + $0x20] sm:$0xff]  ;;  %v200_v28 = vld [vmem:[%s954_s5 + $0x28] sm:$0xff]  ;;  %v570_v29 = vpack.c.bf16 %v306_v22, %v305_v21  ;;  %v308_v31 = vld [vmem:[%s956_s7 + $0x78] sm:$0xff] }
  0x19   :  { %v820_v20 = vsel %vm111_vm2, %v57_v12, %v56_v11  ;;  %566 = vmatprep.subr.bf16.mxu0 %v641_v5  ;;  %v87_v23 = vadd.f32 %v86_v14, %v85_v10  ;;  %v534_v34 = vpack.c.bf16 %v200_v28, %v199_v27  ;;  %v201_v36 = vld [vmem:[%s954_s5 + $0x30] sm:$0xff]  ;;  %v202_v37 = vld [vmem:[%s954_s5 + $0x38] sm:$0xff]  ;;  %v309_v40 = vld [vmem:[%s956_s7 + $0x80] sm:$0xff] }
  0x1a   :  { %478 = vmatmul.mubr.msk.f32.vlgmr.msra.gmra.mrb[0].mxu1 %vm41_vm0, %v820_v20  ;;  %v81_v24 = vrot.slane %v80_v19, 2  ;;  %v310_v41 = vld [vmem:[%s956_s7 + $0x88] sm:$0xff]  ;;  %v537_v44 = vpack.c.bf16 %v202_v37, %v201_v36  ;;  %v203_v46 = vld [vmem:[%s954_s5 + $0x40] sm:$0xff]  ;;  %v311_v49 = vld [vmem:[%s956_s7 + $0x90] sm:$0xff] }
  0x1b   :  { %529 = vmatpush3.bf16.msra.mxu1 %v528_v13  ;;  %512 = vmatprep.mubr.msk.f32.mxu1 %vm642_vm1, %v643_v18  ;;  %v88_v26 = vrot.slane %v87_v23, 2  ;;  %v307_v18 = vld [vmem:[%s956_s7 + $0x70] sm:$0xff]  ;;  %v204_v47 = vld [vmem:[%s954_s5 + $0x48] sm:$0xff]  ;;  %v576_v48 = vpack.c.bf16 %v310_v41, %v309_v40  ;;  %v312_v50 = vld [vmem:[%s956_s7 + $0x98] sm:$0xff] }
  0x1c   :  { %530 = vmatprep.subr.bf16.mxu1 %v641_v5  ;;  %568 = vmatpush1.bf16.msra.mxu0 %v567_v17  ;;  %v82_v30 = vadd.f32 %v81_v24, %v80_v19  ;;  %v573_v38 = vpack.c.bf16 %v308_v31, %v307_v18  ;;  %v540_v52 = vpack.c.bf16 %v204_v47, %v203_v46  ;;  %v205_v53 = vld [vmem:[%s954_s5 + $0x50] sm:$0xff]  ;;  %v206_v54 = vld [vmem:[%s954_s5 + $0x58] sm:$0xff]  ;;  %v313_v56 = vld [vmem:[%s956_s7 + $0xa0] sm:$0xff] }
  0x1d   :  { %569 = vmatprep.subr.bf16.mxu0 %v641_v5  ;;  %v89_v32 = vadd.f32 %v88_v26, %v87_v23  ;;  %v579_v55 = vpack.c.bf16 %v312_v50, %v311_v49  ;;  %v314_v57 = vld [vmem:[%s956_s7 + $0xa8] sm:$0xff]  ;;  %v543_v58 = vpack.c.bf16 %v206_v54, %v205_v53  ;;  %v207_v59 = vld [vmem:[%s954_s5 + $0x60] sm:$0xff]  ;;  %v315_v62 = vld [vmem:[%s956_s7 + $0xb0] sm:$0xff] }
  0x1e   :  { %v83_v33 = vrot.slane %v82_v30, 1  ;;  %v208_v60 = vld [vmem:[%s954_s5 + $0x68] sm:$0xff]  ;;  %v582_v61 = vpack.c.bf16 %v314_v57, %v313_v56  ;;  %v316_v63 = vld [vmem:[%s956_s7 + $0xb8] sm:$0xff]  ;;  %v209_v1 = vld [vmem:[%s954_s5 + $0x70] sm:$0xff] }
  0x1f   :  { %532 = vmatpush3.bf16.msra.mxu1 %v531_v25  ;;  %v90_v35 = vrot.slane %v89_v32, 1  ;;  %v546_v0 = vpack.c.bf16 %v208_v60, %v207_v59  ;;  %v210_v2 = vld [vmem:[%s954_s5 + $0x78] sm:$0xff]  ;;  %v585_v3 = vpack.c.bf16 %v316_v63, %v315_v62  ;;  %v430_v8 = vld [vmem:[%s953_s4] ss:$0 sm:$0xff]  ;;  %s645_s5 = smov [#allocation3]  }
  0x20   :  { %533 = vmatprep.subr.bf16.mxu1 %v641_v5  ;;  %571 = vmatpush1.bf16.msra.mxu0 %v570_v29  ;;  %v84_v39 = vadd.f32 %v83_v33, %v82_v30  ;;  %v549_v4 = vpack.c.bf16 %v210_v2, %v209_v1  ;;  %s404_s14 = sshll.u32 %s645_s5, 4  ;;  %s405_s14 = int_to_ptr.vmem [resolvable:$true] %s404_s14 }
  0x21   :  { %572 = vmatprep.subr.bf16.mxu0 %v641_v5  ;;  %v91_v42 = vadd.f32 %v90_v35, %v89_v32  ;;  %s593_s15 = scalar_lea.vmem %s405_s14, 32  ;;  %p598_p1 = scmp.lt.s32.totalorder %s405_s14, %s405_s14 }
  0x22   :  { %v92_v43 = vmul.f32 0.125, %v84_v39  ;;  %p594_p0 = scmp.ne.s32.totalorder %s405_s14, %s593_s15  ;;  %p599_p2 = scmp.lt.s32.totalorder %s593_s15, %s593_s15 }
  0x23   :  { %535 = vmatpush3.bf16.msra.mxu1 %v534_v34  ;;  %v93_v45 = vmul.f32 0.125, %v91_v42 }
  0x24   :  { %536 = vmatprep.subr.bf16.mxu1 %v641_v5  ;;  %574 = vmatpush1.bf16.msra.mxu0 %v573_v38  ;;  %p600_p3 = por %p599_p2, %p598_p1 }
  0x25   :  { %575 = vmatprep.subr.bf16.mxu0 %v641_v5  ;;  %v292_v51 = vsel %vm111_vm2, %v93_v45, %v92_v43 }
  0x26   :  { %434 = vmatprep.mubr.msk.f32.mxu0 %vm41_vm0, %v292_v51  ;;  %p601_p4 = pnand %p600_p3, %p594_p0 }
  0x27   :  { %538 = vmatpush3.bf16.msra.mxu1 %v537_v44 }
  0x28   :  { %539 = vmatprep.subr.bf16.mxu1 %v641_v5  ;;  %577 = vmatpush1.bf16.msra.mxu0 %v576_v48 }
  0x29   :  { %578 = vmatprep.subr.bf16.mxu0 %v641_v5 }
  0x2b   :  { %541 = vmatpush3.bf16.msra.mxu1 %v540_v52 }
  0x2c   :  { %542 = vmatprep.subr.bf16.mxu1 %v641_v5  ;;  %580 = vmatpush1.bf16.msra.mxu0 %v579_v55 }
  0x2d   :  { %581 = vmatprep.subr.bf16.mxu0 %v641_v5 }
  0x2f   :  { %544 = vmatpush3.bf16.msra.mxu1 %v543_v58 }
  0x30   :  { %545 = vmatprep.subr.bf16.mxu1 %v641_v5  ;;  %583 = vmatpush1.bf16.msra.mxu0 %v582_v61 }
  0x31   :  { %584 = vmatprep.subr.bf16.mxu0 %v641_v5 }
  0x33   :  { %547 = vmatpush3.bf16.msra.mxu1 %v546_v0 }
  0x34   :  { %548 = vmatprep.subr.bf16.mxu1 %v641_v5  ;;  %586 = vmatpush1.bf16.msra.mxu0 %v585_v3 }
  0x37   :  { %550 = vmatpush3.bf16.msra.mxu1 %v549_v4 }
  0x86   :  { %v192_v6 = vpop.permute.xlu0 %191 }
  0x87   :  { %v194_v7 = vsel %vm41_vm0, %v820_v20, %v192_v6 }
  0x88   :  { %513 = vmatmul.mubr.f32.vlgmr.msra.gmra.mrb[2].mxu1 %v194_v7  ;;  %391 = vmatmul.mubr.f32.vlgmr.msra.gmra.mrb[0].mxu0 %v194_v7 }
  0xed   :  { %v181_v9 = vpop.f32.mrb[0].mxu1 }
  0xee   :  { %v182_v10 = vadd.f32 %v430_v8, %v181_v9  ;;  %v479_v11 = vpop.f32.mrb[1].mxu1 }
  0xf0   :  { %186 = vst.msk [vmem:[#allocation3] sm:$0x3] %vm185_vm3, %v182_v10 }
  0xf1   :  { %604 = shalt.err (!%p601_p4)
}
  0xf2   :  { %s605_s17 = scalar_lea.hbm %s958_s9, 32 }
  0xf3   :  { %p606_p5 = scmp.ne.s32.totalorder %s958_s9, %s605_s17  ;;  %p609_p6 = scmp.lt.u32.totalorder %s605_s17, %s958_s9 }
  0xf5   :  { %p611_p7 = pnand %p609_p6, %p606_p5 }
  0xf7   :  { %614 = shalt.err (!%p611_p7)
}
  0xf8   :  { %407 = dma.vmem_to_hbm [thread:$0]  %s405_s14, 32, %s958_s9, [#allocation4]   ;;  %v432_v5 = vld [vmem:[%s955_s6] ss:$0 sm:$0xff]  ;;  %vm396_vm4 = vcmask 1024   ;;  %vm288_vm5 = vcmask 33792  }
  0xf9   :  { %v433_v12 = vld [vmem:[#allocation2] ss:$0 sm:$0xff]  ;;  %s646_s24 = smov [#allocation5]  }
  0xfa   :  { %s414_s25 = sshll.u32 %s646_s24, 4  ;;  %s415_s25 = int_to_ptr.vmem [resolvable:$true] %s414_s25 }
  0xfb   :  { %s615_s9 = scalar_lea.vmem %s415_s25, 32  ;;  %p620_p9 = scmp.lt.s32.totalorder %s415_s25, %s415_s25 }
  0xfc   :  { %p616_p8 = scmp.ne.s32.totalorder %s415_s25, %s615_s9  ;;  %p621_p10 = scmp.lt.s32.totalorder %s615_s9, %s615_s9 }
  0xfe   :  { %p622_p11 = por %p621_p10, %p620_p9 }
 0x100   :  { %p623_p12 = pnand %p622_p11, %p616_p8 }
 0x15b   :  { %v284_v13 = vpop.f32.mrb[2].mxu1  ;;  %v392_v14 = vpop.f32.mrb[0].mxu0 }
 0x15c   :  { %v285_v15 = vadd.f32 %v432_v5, %v284_v13  ;;  %v393_v16 = vadd.f32 %v433_v12, %v392_v14  ;;  %v514_v17 = vpop.f32.mrb[3].mxu1  ;;  %v394_v19 = vpop.f32.mrb[1].mxu0 }
 0x15e   :  { %397 = vst.msk [vmem:[%s960_s11] sm:$0x3] %vm396_vm4, %v393_v16 }
 0x15f   :  { %289 = vst.msk [vmem:[#allocation5] sm:$0x3] %vm288_vm5, %v285_v15 }
 0x160   :  { %626 = shalt.err (!%p623_p12)
}
 0x161   :  { %s627_s28 = scalar_lea.hbm %s959_s10, 32 }
 0x162   :  { %p628_p13 = scmp.ne.s32.totalorder %s959_s10, %s627_s28  ;;  %p631_p0 = scmp.lt.u32.totalorder %s627_s28, %s959_s10 }
 0x164   :  { %p633_p1 = pnand %p631_p0, %p628_p13 }
 0x166   :  { %636 = shalt.err (!%p633_p1)
}
 0x167   :  { %417 = dma.vmem_to_hbm [thread:$0]  %s415_s25, 32, %s959_s10, [#allocation6]  }
 0x168   :  { %637 = dma.done.wait [#allocation4], 32  }
 0x169   :  { %638 = vsyncadd [#allocation4], 4294967264 }
 0x16a   :  { %639 = dma.done.wait [#allocation6], 32  }
 0x16b   :  { %640 = vsyncadd [#allocation6], 4294967264 }
 0x16c   :  { %428 = vsyncpa [#allocation4], 1 }
 0x16d   :  { %429 = vsyncpa [#allocation6], 1 }

// kernel: forward.7
= control target key start
LH: loop header
LB: loop body
LE: loop exit
PB: predicated region body
PF: predicated region fallthrough
CT: control target
= control target key end

     0   :  { %s4137_s21 = smov 0   ;;  %s4541_s0 = inlined_call_operand.vmem [shape: f32[2,8,64], index: 0, kind: input, shape index: {}]   ;;  %s4542_s1 = inlined_call_operand.vmem [shape: f32[2,2,8,64], index: 1, kind: input, shape index: {}]   ;;  %s4543_s2 = inlined_call_operand.vmem [shape: f32[2,64,192], index: 2, kind: input, shape index: {}]   ;;  %s4544_s3 = inlined_call_operand.vmem [shape: f32[2,1,192], index: 3, kind: input, shape index: {}]   ;;  %s4545_s4 = inlined_call_operand.vmem [shape: f32[2,64,64], index: 4, kind: input, shape index: {}]   ;;  %s4546_s5 = inlined_call_operand.vmem [shape: f32[2,1,64], index: 5, kind: input, shape index: {}]   ;;  %s4547_s6 = inlined_call_operand.vmem [shape: f32[2,2,8,64], index: 6, kind: output, shape index: {}]  }
   0x1 LB: > { %s3514_s22 = sadd.s32 4294967295, %s4083_s21   ;;  %p3518_p0 = scmp.ge.s32.totalorder %s4083_s21, 1  ;;  %s4083_s21 = sphi %s4137_s21, %s16_s21  }
   0x2   : > { %p249_p1 = scmp.lt.s32.totalorder %s4083_s21, 3 }
   0x4   : > { %p250_p2 = pnand %p3518_p0, %p249_p1 }
   0x5   : > { %p296_p3 = scmp.lt.s32.totalorder (!%p250_p2), %s3514_s22, 1  ;;  %s4085_s27 = smov (!%p250_p2), 64   ;;  %vm359_vm0 = vcmask (!%p250_p2), 523264   ;;  %v323_v29 = vld [vmem:[%s4541_s0] sm:$0xff] (!%p250_p2)  ;;  %v354_v30 = vlaneseq (!%p250_p2)  ;;  %v324_v31 = vld [vmem:[%s4541_s0 + $0x8] sm:$0xff] (!%p250_p2)  ;;  %vm4087_vm1 = vmmov (!%p250_p2), 0  }
   0x6   : > { %253 = sbr.rel (%p250_p2) target bundleno = 5467 (0x155b), region = 44  ;;  %3699 = vmatprep.mubr.msk.f32.mxu0 (!%p250_p2), %vm359_vm0, %v323_v29  ;;  %vm596_vm2 = vcmask (!%p250_p2), 64512   ;;  %s4088_s16 = smov (!%p250_p2), 120   ;;  %vm3307_vm3 = vcmask (!%p250_p2), 130048   ;;  %vm3310_vm4 = vcmask (!%p250_p2), 195584   ;;  %vm3313_vm5 = vcmask (!%p250_p2), 261120  }
   0x7   : > { %v355_v32 = vshrl.u32 (!%p250_p2), %v354_v30, 7  ;;  %s4089_s17 = smov (!%p250_p2), 56   ;;  %s4090_s18 = smov (!%p250_p2), 112   ;;  %vm3316_vm6 = vcmask (!%p250_p2), 326656   ;;  %vm3322_vm7 = vcmask (!%p250_p2), 457728   ;;  %vm3319_vm8 = vcmask (!%p250_p2), 392192  }
   0x8   : > { %s4091_s19 = smov (!%p250_p2), 48   ;;  %s4092_s20 = smov (!%p250_p2), 104  }
   0x9   : > { %v443_v34 = vsub.s32 (!%p250_p2), 1, %v355_v32  ;;  %v356_v35 = vsub.s32 (!%p250_p2), 0, %v355_v32  ;;  %s4094_s24 = smov (!%p250_p2), 96   ;;  %s4095_s25 = smov (!%p250_p2), 32  }
   0xa   : > { %s4098_s29 = smov (!%p250_p2), 80   ;;  %s4099_s30 = smov (!%p250_p2), 16  }
   0xb   : > { %s4101_s8 = smov (!%p250_p2), 8  }
   0xd   : > { %s4549_s22 = smov (!%p296_p3, %s3514_s22), 1 }
   0xe   : > { %s3586_s23 = sshll.u32 %s4549_s22, 7  ;;  %s3585_s28 = sshll.u32 %s4549_s22, 4 }
   0xf   : > { %s4151_s26 = scalar_lea.vmem %s4543_s2, %s3586_s23  ;;  %s4181_s7 = scalar_lea.vmem %s4542_s1, %s3585_s28 }
  0x10   : > { %v331_v0 = vld [vmem:[%s4151_s26 + $0x20] sm:$0xff]  ;;  %v332_v1 = vld [vmem:[%s4151_s26 + $0x28] sm:$0xff]  ;;  %v333_v2 = vld [vmem:[%s4151_s26 + $0x30] sm:$0xff]  ;;  %s3523_s10 = sshll.u32 %s4549_s22, 1  ;;  %s4093_s23 = smov 40  }
  0x11   : > { %v3983_v3 = vpack.i.bf16 %v332_v1, %v331_v0  ;;  %v327_v4 = vld [vmem:[%s4151_s26] sm:$0xff]  ;;  %v328_v5 = vld [vmem:[%s4151_s26 + $0x8] sm:$0xff]  ;;  %v334_v6 = vld [vmem:[%s4151_s26 + $0x38] sm:$0xff]  ;;  %v3904_v10 = vpack.c.bf16 %v333_v2, %v331_v0  ;;  %s309_s13 = scalar_lea.vmem %s4544_s3, %s3523_s10  ;;  %s3587_s9 = sshll.u32 %s4549_s22, 6 }
  0x12   : > { %v3973_v7 = vpack.i.bf16 %v328_v5, %v327_v4  ;;  %v329_v8 = vld [vmem:[%s4151_s26 + $0x10] sm:$0xff]  ;;  %v330_v9 = vld [vmem:[%s4151_s26 + $0x18] sm:$0xff]  ;;  %v3988_v11 = vpack.i.bf16 %v334_v6, %v333_v2  ;;  %v335_v16 = vld [vmem:[%s4151_s26 + $0x40] sm:$0xff]  ;;  %s314_s12 = scalar_lea.vmem %s4545_s4, %s3587_s9  ;;  %s317_s15 = scalar_lea.vmem %s4546_s5, %s4549_s22 }
  0x13   : > { %3984 = vrot.lane.b32.xlu1 %v3983_v3, %s4085_s27  ;;  %v3900_v12 = vpack.c.bf16 %v329_v8, %v327_v4  ;;  %v3978_v13 = vpack.i.bf16 %v330_v9, %v329_v8  ;;  %v337_v14 = vld [vmem:[%s4151_s26 + $0x50] sm:$0xff]  ;;  %v338_v15 = vld [vmem:[%s4151_s26 + $0x58] sm:$0xff]  ;;  %v336_v17 = vld [vmem:[%s4151_s26 + $0x48] sm:$0xff] }
  0x14   : > { %3974 = vrot.lane.b32.xlu0 %v3973_v7, %s4085_s27  ;;  %v3998_v18 = vpack.i.bf16 %v338_v15, %v337_v14  ;;  %v3993_v19 = vpack.i.bf16 %v336_v17, %v335_v16  ;;  %v341_v20 = vld [vmem:[%s4151_s26 + $0x70] sm:$0xff]  ;;  %v342_v21 = vld [vmem:[%s4151_s26 + $0x78] sm:$0xff]  ;;  %v3908_v22 = vpack.c.bf16 %v337_v14, %v335_v16  ;;  %v339_v23 = vld [vmem:[%s4151_s26 + $0x60] sm:$0xff] }
  0x15   : > { %3901 = vmatprep.subr.bf16.mxu0 %v3900_v12  ;;  %v340_v24 = vld [vmem:[%s4151_s26 + $0x68] sm:$0xff]  ;;  %v4008_v25 = vpack.i.bf16 %v342_v21, %v341_v20  ;;  %v3912_v27 = vpack.c.bf16 %v341_v20, %v339_v23  ;;  %v325_v28 = vld [vmem:[%s4181_s7] sm:$0xff]  ;;  %s4096_s26 = smov 88  }
  0x16   : > { %3903 = vmatpush3.bf16.msra.mxu0 %v3900_v12  ;;  %v4003_v26 = vpack.i.bf16 %v340_v24, %v339_v23  ;;  %3718 = vmatprep.mubr.msk.f32.mxu1 %vm359_vm0, %v325_v28  ;;  %v343_v33 = vld [vmem:[%s309_s13] sm:$0x3] }
  0x17   : > { %3989 = vrot.lane.b32.xlu1 %v3988_v11, %s4085_s27  ;;  %3905 = vmatprep.subr.bf16.mxu0 %v3904_v10  ;;  %v444_v36 = vrot.slane %v343_v33, %v443_v34  ;;  %v4199_v37 = vrot.slane %v343_v33, %v356_v35  ;;  %v4086_v11 = vmov 0.0  }
  0x18   : > { %3979 = vrot.lane.b32.xlu0 %v3978_v13, %s4085_s27 }
  0x1a   : > { %3907 = vmatpush3.bf16.msra.mxu0 %v3904_v10  ;;  %v326_v10 = vld [vmem:[%s4181_s7 + $0x8] sm:$0xff]  ;;  %s4100_s7 = smov 72  }
  0x1b   : > { %3999 = vrot.lane.b32.xlu1 %v3998_v18, %s4085_s27  ;;  %3909 = vmatprep.subr.bf16.mxu0 %v3908_v22 }
  0x1c   : > { %3994 = vrot.lane.b32.xlu0 %v3993_v19, %s4085_s27 }
  0x1e   : > { %3911 = vmatpush3.bf16.msra.mxu0 %v3908_v22 }
  0x1f   : > { %4009 = vrot.lane.b32.xlu1 %v4008_v25, %s4085_s27  ;;  %3913 = vmatprep.subr.bf16.mxu0 %v3912_v27 }
  0x20   : > { %4004 = vrot.lane.b32.xlu0 %v4003_v26, %s4085_s27 }
  0x22   : > { %3915 = vmatpush3.bf16.msra.mxu0 %v3912_v27 }
  0x23   : > { %511 = vrot.lane.b32.xlu1 %v444_v36, %s4085_s27  ;;  %3741 = vmatprep.subr.mxu0 %v4086_v11 }
  0x24   : > { %509 = vrot.lane.b32.xlu0 %v4199_v37, %s4085_s27 }
  0x25   : > { %3700 = vmatmul.mubr.msk.f32.vlgmr.msra.gmra.mrb[0].mxu0 %vm359_vm0, %v324_v31 }
  0x26   : > { %3743 = vmatprep.mubr.msk.f32.mxu0 %vm4087_vm1, %v4086_v11 }
  0x85   : > { %v3985_v38 = vpop.permute.xlu1 %3984 }
  0x86   : > { %v3975_v39 = vpop.permute.xlu0 %3974  ;;  %v3987_v40 = vunpack.i.h.bf16 %v3985_v38  ;;  %v3986_v41 = vunpack.i.l.bf16 %v3985_v38 }
  0x87   : > { %v3977_v42 = vunpack.i.h.bf16 %v3975_v39  ;;  %v3976_v43 = vunpack.i.l.bf16 %v3975_v39 }
  0x88   : > { %v495_v53 = vsel %vm359_vm0, %v3986_v41, %v3987_v40 }
  0x89   : > { %v3990_v44 = vpop.permute.xlu1 %3989  ;;  %v493_v50 = vsel %vm359_vm0, %v3976_v43, %v3977_v42 }
  0x8a   : > { %v3992_v45 = vunpack.i.h.bf16 %v3990_v44  ;;  %v3991_v46 = vunpack.i.l.bf16 %v3990_v44  ;;  %v3980_v47 = vpop.permute.xlu0 %3979 }
  0x8b   : > { %v3982_v48 = vunpack.i.h.bf16 %v3980_v47  ;;  %v3981_v49 = vunpack.i.l.bf16 %v3980_v47 }
  0x8c   : > { %v496_v54 = vsel %vm359_vm0, %v3991_v46, %v3992_v45 }
  0x8d   : > { %v494_v51 = vsel %vm359_vm0, %v3981_v49, %v3982_v48  ;;  %v4000_v52 = vpop.permute.xlu1 %3999  ;;  %v3920_v61 = vpack.c.bf16 %v496_v54, %v495_v53 }
  0x8e   : > { %v3916_v55 = vpack.c.bf16 %v494_v51, %v493_v50  ;;  %v4002_v56 = vunpack.i.h.bf16 %v4000_v52  ;;  %v4001_v57 = vunpack.i.l.bf16 %v4000_v52  ;;  %v3995_v58 = vpop.permute.xlu0 %3994 }
  0x8f   : > { %v3997_v59 = vunpack.i.h.bf16 %v3995_v58  ;;  %v3996_v60 = vunpack.i.l.bf16 %v3995_v58 }
  0x90   : > { %3917 = vmatprep.subr.bf16.mxu1 %v3916_v55  ;;  %v498_v62 = vsel %vm359_vm0, %v4001_v57, %v4002_v56 }
  0x91   : > { %3919 = vmatpush3.bf16.msra.mxu1 %v3916_v55  ;;  %v4010_v63 = vpop.permute.xlu1 %4009  ;;  %v497_v0 = vsel %vm359_vm0, %v3996_v60, %v3997_v59 }
  0x92   : > { %3921 = vmatprep.subr.bf16.mxu1 %v3920_v61  ;;  %v4012_v1 = vunpack.i.h.bf16 %v4010_v63  ;;  %v4011_v2 = vunpack.i.l.bf16 %v4010_v63  ;;  %v4005_v3 = vpop.permute.xlu0 %4004  ;;  %v3924_v4 = vpack.c.bf16 %v498_v62, %v497_v0 }
  0x93   : > { %v4007_v5 = vunpack.i.h.bf16 %v4005_v3  ;;  %v4006_v6 = vunpack.i.l.bf16 %v4005_v3 }
  0x94   : > { %v500_v7 = vsel %vm359_vm0, %v4011_v2, %v4012_v1 }
  0x95   : > { %3923 = vmatpush3.bf16.msra.mxu1 %v3920_v61  ;;  %v499_v8 = vsel %vm359_vm0, %v4006_v6, %v4007_v5  ;;  %v512_v14 = vpop.permute.xlu1 %511 }
  0x96   : > { %3925 = vmatprep.subr.bf16.mxu1 %v3924_v4  ;;  %v3928_v9 = vpack.c.bf16 %v500_v7, %v499_v8  ;;  %v510_v15 = vpop.permute.xlu0 %509 }
  0x97   : > { %v513_v16 = vsel %vm359_vm0, %v510_v15, %v512_v14 }
  0x99   : > { %3927 = vmatpush3.bf16.msra.mxu1 %v3924_v4 }
  0x9a   : > { %3929 = vmatprep.subr.bf16.mxu1 %v3928_v9 }
  0x9d   : > { %3931 = vmatpush3.bf16.msra.mxu1 %v3928_v9 }
  0x9e   : > { %3721 = vmatprep.subr.mxu1 %v4086_v11 }
  0xa0   : > { %3719 = vmatmul.mubr.msk.f32.vlgmr.msra.gmra.mrb[0].mxu1 %vm359_vm0, %v326_v10 }
  0xa1   : > { %3723 = vmatprep.mubr.msk.f32.mxu1 %vm4087_vm1, %v4086_v11 }
  0xf8   : > { %v3701_v12 = vpop.f32.mrb[0].mxu0 }
  0xf9   : > { %v432_v13 = vpop.f32.mrb[1].mxu0  ;;  %v4238_v22 = vadd.f32 %v3701_v12, %v4199_v37 }
  0xfa   : > { %v4224_v20 = vadd.f32 %v432_v13, %v4199_v37 }
 0x173   : > { %v3720_v17 = vpop.f32.mrb[0].mxu1 }
 0x174   : > { %v587_v18 = vpop.f32.mrb[1].mxu1  ;;  %v4229_v21 = vadd.f32 %v3720_v17, %v513_v16 }
 0x175   : > { %v4221_v19 = vadd.f32 %v587_v18, %v513_v16 }
 0x177   : > { %3722 = vmatpush3.xpose.msk.msra.mxu1 %vm596_vm2, %v4221_v19 }
 0x178   : > { %3726 = vmatprep.subr.mxu1 %v4086_v11 }
 0x17a   : > { %3724 = vmatmul.mubr.msk.f32.vlgmr.msra.gmra.mrb[2].mxu1 %vm596_vm2, %v4224_v20 }
 0x17b   : > { %3727 = vmatpush3.xpose.msk.msra.mxu1 %vm596_vm2, %v4229_v21  ;;  %3728 = vmatprep.mubr.msk.f32.mxu1 %vm4087_vm1, %v4086_v11 }
 0x17c   : > { %3731 = vmatprep.subr.mxu1 %v4086_v11 }
 0x17e   : > { %3729 = vmatmul.mubr.msk.f32.vlgmr.msra.gmra.mrb[4].mxu1 %vm596_vm2, %v4238_v22 }
 0x17f   : > { %3733 = vmatprep.mubr.msk.f32.mxu1 %vm4087_vm1, %v4086_v11 }
 0x24d   : > { %v669_v23 = vpop.f32.mrb[2].mxu1 }
 0x24e   : > { %v749_v24 = vmul.f32 0.35355338, %v669_v23  ;;  %v3725_v25 = vpop.f32.mrb[3].mxu1 }
 0x250   : > { %v751_v26 = vsel %vm596_vm2, %v749_v24, -inf }
 0x251   : > { %752 = vmax.xlane.f32.xlu0 %v751_v26  ;;  %v745_v27 = vpop.f32.mrb[4].mxu1 }
 0x252   : > { %v750_v28 = vmul.f32 0.35355338, %v745_v27  ;;  %v3730_v29 = vpop.f32.mrb[5].mxu1 }
 0x254   : > { %v754_v30 = vsel %vm596_vm2, %v750_v28, -inf }
 0x255   : > { %755 = vmax.xlane.f32.xlu1 %v754_v30 }
 0x266   : > { %773 = vrot.lane.b32.xlu1 %v4221_v19, %s4085_s27 }
 0x26a   : > { %927 = vrot.lane.b32.xlu1 %v4221_v19, %s4088_s16 }
 0x26e   : > { %1005 = vrot.lane.b32.xlu1 %v4229_v21, %s4088_s16 }
 0x272   : > { %1003 = vrot.lane.b32.xlu1 %v4238_v22, %s4088_s16 }
 0x2de   : > { %v753_v31 = vpop.xlane.xlu0 %752 }
 0x2df   : > { %v757_v32 = vsub.f32 %v749_v24, %v753_v31 }
 0x2e1   : > { %v759_v33 = vmul.f32 1.442695, %v757_v32 }
 0x2e2   : > { %v756_v34 = vpop.xlane.xlu1 %755 }
 0x2e3   : > { %4013 = vpow2.f32 %v759_v33  ;;  %v758_v39 = vsub.f32 %v750_v28, %v756_v34 }
 0x2e5   : > { %v761_v40 = vmul.f32 1.442695, %v758_v39 }
 0x2e6   : > { %v774_v35 = vpop.permute.xlu1 %773 }
 0x2e7   : > { %3732 = vmatpush3.msra.mxu1 %v774_v35  ;;  %4015 = vpow2.f32 %v761_v40 }
 0x2e8   : > { %3736 = vmatprep.subr.mxu1 %v4086_v11 }
 0x2ea   : > { %v928_v36 = vpop.permute.xlu1 %927 }
 0x2eb   : > { %3742 = vmatpush3.xpose.msk.msra.mxu0 %vm596_vm2, %v928_v36 }
 0x2ec   : > { %3751 = vmatprep.subr.mxu0 %v4086_v11 }
 0x2ed   : > { %v4014_v37 = vpop.eup %4013 }
 0x2ee   : > { %v763_v38 = vsel %vm596_vm2, %v4014_v37, 0.0  ;;  %v1006_v50 = vpop.permute.xlu1 %1005 }
 0x2ef   : > { %764 = vadd.xlane.f32.xlu0 %v763_v38 }
 0x2f1   : > { %v4016_v41 = vpop.eup %4015 }
 0x2f2   : > { %v766_v42 = vsel %vm596_vm2, %v4016_v41, 0.0  ;;  %v1004_v52 = vpop.permute.xlu1 %1003 }
 0x305   : > { %849 = vrot.lane.b32.xlu0 %v4229_v21, %s4085_s27  ;;  %s4097_s27 = smov 24  }
 0x324   : > { %767 = vadd.xlane.f32.xlu0 %v766_v42 }
 0x33a   : > { %925 = vrot.lane.b32.xlu0 %v4224_v20, %s4088_s16 }
 0x37c   : > { %v765_v43 = vpop.xlane.xlu0 %764 }
 0x37d   : > { %4017 = vrcp.f32 %v765_v43 }
 0x380   : > { %v850_v46 = vpop.permute.xlu0 %849 }
 0x387   : > { %v4018_v44 = vpop.eup %4017 }
 0x388   : > { %v771_v45 = vmul.f32 %v4018_v44, %v4014_v37 }
 0x38a   : > { %3734 = vmatmul.mubr.msk.f32.vlgmr.msra.gmra.mrb[6].mxu1 %vm596_vm2, %v771_v45 }
 0x38b   : > { %3737 = vmatpush3.msra.mxu1 %v850_v46  ;;  %3738 = vmatprep.mubr.msk.f32.mxu1 %vm4087_vm1, %v4086_v11 }
 0x38c   : > { %3746 = vmatprep.subr.mxu1 %v4086_v11 }
 0x3b1   : > { %v768_v47 = vpop.xlane.xlu0 %767 }
 0x3b2   : > { %4019 = vrcp.f32 %v768_v47 }
 0x3b5   : > { %v926_v48 = vpop.permute.xlu0 %925 }
 0x3b6   : > { %3744 = vmatmul.mubr.msk.f32.vlgmr.msra.gmra.mrb[2].mxu0 %vm596_vm2, %v926_v48 }
 0x3b7   : > { %3753 = vmatprep.mubr.msk.f32.mxu0 %vm4087_vm1, %v4086_v11 }
 0x3bc   : > { %v4020_v49 = vpop.eup %4019 }
 0x3bd   : > { %v772_v51 = vmul.f32 %v4020_v49, %v4016_v41 }
 0x3bf   : > { %3739 = vmatmul.mubr.msk.f32.vlgmr.msra.gmra.mrb[8].mxu1 %vm596_vm2, %v772_v51 }
 0x3c0   : > { %3747 = vmatpush3.xpose.msk.msra.mxu1 %vm596_vm2, %v1006_v50  ;;  %3748 = vmatprep.mubr.msk.f32.mxu1 %vm4087_vm1, %v4086_v11 }
 0x3c1   : > { %3756 = vmatprep.subr.mxu1 %v4086_v11 }
 0x3c3   : > { %3749 = vmatmul.mubr.msk.f32.vlgmr.msra.gmra.mrb[10].mxu1 %vm596_vm2, %v1004_v52 }
 0x3c4   : > { %3758 = vmatprep.mubr.msk.f32.mxu1 %vm4087_vm1, %v4086_v11 }
 0x45d   : > { %v4275_v53 = vpop.f32.mrb[6].mxu1 }
 0x45e   : > { %v3735_v54 = vpop.f32.mrb[7].mxu1 }
 0x489   : > { %v999_v55 = vpop.f32.mrb[2].mxu0 }
 0x48a   : > { %v1081_v56 = vmul.f32 0.35355338, %v999_v55  ;;  %v3745_v57 = vpop.f32.mrb[3].mxu0 }
 0x48c   : > { %v1083_v58 = vsel %vm596_vm2, %v1081_v56, -inf }
 0x48d   : > { %1084 = vmax.xlane.f32.xlu0 %v1083_v58 }
 0x492   : > { %v4278_v59 = vpop.f32.mrb[8].mxu1 }
 0x493   : > { %v3740_v60 = vpop.f32.mrb[9].mxu1 }
 0x496   : > { %v1077_v61 = vpop.f32.mrb[10].mxu1 }
 0x497   : > { %v1082_v62 = vmul.f32 0.35355338, %v1077_v61  ;;  %v3750_v63 = vpop.f32.mrb[11].mxu1 }
 0x499   : > { %v1086_v0 = vsel %vm596_vm2, %v1082_v62, -inf }
 0x49a   : > { %1087 = vmax.xlane.f32.xlu1 %v1086_v0 }
 0x4ab   : > { %1105 = vrot.lane.b32.xlu1 %v4221_v19, %s4089_s17 }
 0x4af   : > { %1259 = vrot.lane.b32.xlu1 %v4221_v19, %s4090_s18 }
 0x4b3   : > { %1337 = vrot.lane.b32.xlu1 %v4229_v21, %s4090_s18 }
 0x4b7   : > { %1335 = vrot.lane.b32.xlu1 %v4238_v22, %s4090_s18 }
 0x51a   : > { %v1085_v1 = vpop.xlane.xlu0 %1084 }
 0x51b   : > { %v1089_v2 = vsub.f32 %v1081_v56, %v1085_v1 }
 0x51d   : > { %v1091_v3 = vmul.f32 1.442695, %v1089_v2 }
 0x51f   : > { %4021 = vpow2.f32 %v1091_v3 }
 0x527   : > { %v1088_v4 = vpop.xlane.xlu1 %1087 }
 0x528   : > { %v1090_v8 = vsub.f32 %v1082_v62, %v1088_v4 }
 0x529   : > { %v4022_v5 = vpop.eup %4021 }
 0x52a   : > { %v1095_v6 = vsel %vm596_vm2, %v4022_v5, 0.0  ;;  %v1093_v9 = vmul.f32 1.442695, %v1090_v8 }
 0x52b   : > { %1096 = vadd.xlane.f32.xlu0 %v1095_v6  ;;  %v1106_v7 = vpop.permute.xlu1 %1105 }
 0x52c   : > { %3752 = vmatpush3.msra.mxu0 %v1106_v7  ;;  %4023 = vpow2.f32 %v1093_v9 }
 0x52d   : > { %3761 = vmatprep.subr.mxu0 %v4086_v11 }
 0x52f   : > { %v1260_v17 = vpop.permute.xlu1 %1259 }
 0x533   : > { %v1338_v25 = vpop.permute.xlu1 %1337 }
 0x536   : > { %v4024_v10 = vpop.eup %4023 }
 0x537   : > { %v1098_v12 = vsel %vm596_vm2, %v4024_v10, 0.0  ;;  %v1336_v27 = vpop.permute.xlu1 %1335 }
 0x541   : > { %1181 = vrot.lane.b32.xlu0 %v4229_v21, %s4089_s17 }
 0x560   : > { %1099 = vadd.xlane.f32.xlu0 %v1098_v12 }
 0x576   : > { %1257 = vrot.lane.b32.xlu0 %v4224_v20, %s4090_s18  ;;  %s322_s18 = scalar_lea.vmem %s4547_s6, %s3585_s28 }
 0x5b8   : > { %v1097_v13 = vpop.xlane.xlu0 %1096 }
 0x5b9   : > { %4025 = vrcp.f32 %v1097_v13 }
 0x5bc   : > { %v1182_v14 = vpop.permute.xlu0 %1181 }
 0x5bd   : > { %3757 = vmatpush3.msra.mxu1 %v1182_v14 }
 0x5be   : > { %3766 = vmatprep.subr.mxu1 %v4086_v11 }
 0x5c3   : > { %v4026_v15 = vpop.eup %4025 }
 0x5c4   : > { %v1103_v16 = vmul.f32 %v4026_v15, %v4022_v5 }
 0x5c6   : > { %3754 = vmatmul.mubr.msk.f32.vlgmr.msra.gmra.mrb[4].mxu0 %vm596_vm2, %v1103_v16 }
 0x5c7   : > { %3762 = vmatpush3.xpose.msk.msra.mxu0 %vm596_vm2, %v1260_v17  ;;  %3763 = vmatprep.mubr.msk.f32.mxu0 %vm4087_vm1, %v4086_v11 }
 0x5c8   : > { %3771 = vmatprep.subr.mxu0 %v4086_v11 }
 0x5ed   : > { %v1100_v18 = vpop.xlane.xlu0 %1099 }
 0x5ee   : > { %4027 = vrcp.f32 %v1100_v18 }
 0x5f1   : > { %v1258_v23 = vpop.permute.xlu0 %1257 }
 0x5f2   : > { %3764 = vmatmul.mubr.msk.f32.vlgmr.msra.gmra.mrb[6].mxu0 %vm596_vm2, %v1258_v23 }
 0x5f3   : > { %3773 = vmatprep.mubr.msk.f32.mxu0 %vm4087_vm1, %v4086_v11 }
 0x5f8   : > { %v4028_v24 = vpop.eup %4027 }
 0x5f9   : > { %v1104_v26 = vmul.f32 %v4028_v24, %v4024_v10 }
 0x5fb   : > { %3759 = vmatmul.mubr.msk.f32.vlgmr.msra.gmra.mrb[12].mxu1 %vm596_vm2, %v1104_v26 }
 0x5fc   : > { %3767 = vmatpush3.xpose.msk.msra.mxu1 %vm596_vm2, %v1338_v25  ;;  %3768 = vmatprep.mubr.msk.f32.mxu1 %vm4087_vm1, %v4086_v11 }
 0x5fd   : > { %3776 = vmatprep.subr.mxu1 %v4086_v11 }
 0x5ff   : > { %3769 = vmatmul.mubr.msk.f32.vlgmr.msra.gmra.mrb[14].mxu1 %vm596_vm2, %v1336_v27 }
 0x600   : > { %3778 = vmatprep.mubr.msk.f32.mxu1 %vm4087_vm1, %v4086_v11 }
 0x699   : > { %v4309_v28 = vpop.f32.mrb[4].mxu0 }
 0x69a   : > { %v3755_v29 = vpop.f32.mrb[5].mxu0 }
 0x6c5   : > { %v1331_v30 = vpop.f32.mrb[6].mxu0 }
 0x6c6   : > { %v1413_v31 = vmul.f32 0.35355338, %v1331_v30  ;;  %v3765_v32 = vpop.f32.mrb[7].mxu0 }
 0x6c8   : > { %v1415_v33 = vsel %vm596_vm2, %v1413_v31, -inf }
 0x6c9   : > { %1416 = vmax.xlane.f32.xlu0 %v1415_v33 }
 0x6ce   : > { %v4312_v34 = vpop.f32.mrb[12].mxu1 }
 0x6cf   : > { %v3760_v35 = vpop.f32.mrb[13].mxu1 }
 0x6d2   : > { %v1409_v36 = vpop.f32.mrb[14].mxu1 }
 0x6d3   : > { %v1414_v37 = vmul.f32 0.35355338, %v1409_v36  ;;  %v3770_v38 = vpop.f32.mrb[15].mxu1 }
 0x6d5   : > { %v1418_v39 = vsel %vm596_vm2, %v1414_v37, -inf }
 0x6d6   : > { %1419 = vmax.xlane.f32.xlu1 %v1418_v39 }
 0x6e7   : > { %1437 = vrot.lane.b32.xlu1 %v4221_v19, %s4091_s19 }
 0x6eb   : > { %1591 = vrot.lane.b32.xlu1 %v4221_v19, %s4092_s20 }
 0x6ef   : > { %1669 = vrot.lane.b32.xlu1 %v4229_v21, %s4092_s20 }
 0x6f3   : > { %1667 = vrot.lane.b32.xlu1 %v4238_v22, %s4092_s20 }
 0x756   : > { %v1417_v40 = vpop.xlane.xlu0 %1416 }
 0x757   : > { %v1421_v41 = vsub.f32 %v1413_v31, %v1417_v40 }
 0x759   : > { %v1423_v42 = vmul.f32 1.442695, %v1421_v41 }
 0x75b   : > { %4029 = vpow2.f32 %v1423_v42 }
 0x763   : > { %v1420_v43 = vpop.xlane.xlu1 %1419 }
 0x764   : > { %v1422_v47 = vsub.f32 %v1414_v37, %v1420_v43 }
 0x765   : > { %v4030_v44 = vpop.eup %4029 }
 0x766   : > { %v1427_v45 = vsel %vm596_vm2, %v4030_v44, 0.0  ;;  %v1425_v48 = vmul.f32 1.442695, %v1422_v47 }
 0x767   : > { %1428 = vadd.xlane.f32.xlu0 %v1427_v45  ;;  %v1438_v46 = vpop.permute.xlu1 %1437 }
 0x768   : > { %3772 = vmatpush3.msra.mxu0 %v1438_v46  ;;  %4031 = vpow2.f32 %v1425_v48 }
 0x769   : > { %3781 = vmatprep.subr.mxu0 %v4086_v11 }
 0x76b   : > { %v1592_v56 = vpop.permute.xlu1 %1591 }
 0x76f   : > { %v1670_v61 = vpop.permute.xlu1 %1669 }
 0x772   : > { %v4032_v49 = vpop.eup %4031 }
 0x773   : > { %v1430_v50 = vsel %vm596_vm2, %v4032_v49, 0.0  ;;  %v1668_v63 = vpop.permute.xlu1 %1667 }
 0x77d   : > { %1513 = vrot.lane.b32.xlu0 %v4229_v21, %s4091_s19 }
 0x79c   : > { %1431 = vadd.xlane.f32.xlu0 %v1430_v50 }
 0x7b2   : > { %1589 = vrot.lane.b32.xlu0 %v4224_v20, %s4092_s20 }
 0x7f4   : > { %v1429_v51 = vpop.xlane.xlu0 %1428 }
 0x7f5   : > { %4033 = vrcp.f32 %v1429_v51 }
 0x7f8   : > { %v1514_v52 = vpop.permute.xlu0 %1513 }
 0x7f9   : > { %3777 = vmatpush3.msra.mxu1 %v1514_v52 }
 0x7fa   : > { %3786 = vmatprep.subr.mxu1 %v4086_v11 }
 0x7ff   : > { %v4034_v54 = vpop.eup %4033 }
 0x800   : > { %v1435_v55 = vmul.f32 %v4034_v54, %v4030_v44 }
 0x802   : > { %3774 = vmatmul.mubr.msk.f32.vlgmr.msra.gmra.mrb[8].mxu0 %vm596_vm2, %v1435_v55 }
 0x803   : > { %3782 = vmatpush3.xpose.msk.msra.mxu0 %vm596_vm2, %v1592_v56  ;;  %3783 = vmatprep.mubr.msk.f32.mxu0 %vm4087_vm1, %v4086_v11 }
 0x804   : > { %3791 = vmatprep.subr.mxu0 %v4086_v11 }
 0x829   : > { %v1432_v57 = vpop.xlane.xlu0 %1431 }
 0x82a   : > { %4035 = vrcp.f32 %v1432_v57 }
 0x82d   : > { %v1590_v58 = vpop.permute.xlu0 %1589 }
 0x82e   : > { %3784 = vmatmul.mubr.msk.f32.vlgmr.msra.gmra.mrb[10].mxu0 %vm596_vm2, %v1590_v58 }
 0x82f   : > { %3793 = vmatprep.mubr.msk.f32.mxu0 %vm4087_vm1, %v4086_v11 }
 0x834   : > { %v4036_v60 = vpop.eup %4035 }
 0x835   : > { %v1436_v62 = vmul.f32 %v4036_v60, %v4032_v49 }
 0x837   : > { %3779 = vmatmul.mubr.msk.f32.vlgmr.msra.gmra.mrb[16].mxu1 %vm596_vm2, %v1436_v62 }
 0x838   : > { %3787 = vmatpush3.xpose.msk.msra.mxu1 %vm596_vm2, %v1670_v61  ;;  %3788 = vmatprep.mubr.msk.f32.mxu1 %vm4087_vm1, %v4086_v11 }
 0x839   : > { %3796 = vmatprep.subr.mxu1 %v4086_v11 }
 0x83b   : > { %3789 = vmatmul.mubr.msk.f32.vlgmr.msra.gmra.mrb[18].mxu1 %vm596_vm2, %v1668_v63 }
 0x83c   : > { %3798 = vmatprep.mubr.msk.f32.mxu1 %vm4087_vm1, %v4086_v11 }
 0x8d5   : > { %v4343_v0 = vpop.f32.mrb[8].mxu0 }
 0x8d6   : > { %v3775_v1 = vpop.f32.mrb[9].mxu0 }
 0x901   : > { %v1663_v2 = vpop.f32.mrb[10].mxu0 }
 0x902   : > { %v1745_v3 = vmul.f32 0.35355338, %v1663_v2  ;;  %v3785_v4 = vpop.f32.mrb[11].mxu0 }
 0x904   : > { %v1747_v5 = vsel %vm596_vm2, %v1745_v3, -inf }
 0x905   : > { %1748 = vmax.xlane.f32.xlu0 %v1747_v5 }
 0x90a   : > { %v4346_v6 = vpop.f32.mrb[16].mxu1 }
 0x90b   : > { %v3780_v7 = vpop.f32.mrb[17].mxu1 }
 0x90e   : > { %v1741_v8 = vpop.f32.mrb[18].mxu1 }
 0x90f   : > { %v1746_v9 = vmul.f32 0.35355338, %v1741_v8  ;;  %v3790_v10 = vpop.f32.mrb[19].mxu1 }
 0x911   : > { %v1750_v12 = vsel %vm596_vm2, %v1746_v9, -inf }
 0x912   : > { %1751 = vmax.xlane.f32.xlu1 %v1750_v12 }
 0x923   : > { %1769 = vrot.lane.b32.xlu1 %v4221_v19, %s4093_s23 }
 0x927   : > { %1923 = vrot.lane.b32.xlu1 %v4221_v19, %s4094_s24 }
 0x92b   : > { %2001 = vrot.lane.b32.xlu1 %v4229_v21, %s4094_s24 }
 0x92f   : > { %1999 = vrot.lane.b32.xlu1 %v4238_v22, %s4094_s24 }
 0x992   : > { %v1749_v13 = vpop.xlane.xlu0 %1748 }
 0x993   : > { %v1753_v14 = vsub.f32 %v1745_v3, %v1749_v13 }
 0x995   : > { %v1755_v15 = vmul.f32 1.442695, %v1753_v14 }
 0x997   : > { %4037 = vpow2.f32 %v1755_v15 }
 0x99f   : > { %v1752_v16 = vpop.xlane.xlu1 %1751 }
 0x9a0   : > { %v1754_v24 = vsub.f32 %v1746_v9, %v1752_v16 }
 0x9a1   : > { %v4038_v17 = vpop.eup %4037 }
 0x9a2   : > { %v1759_v18 = vsel %vm596_vm2, %v4038_v17, 0.0  ;;  %v1757_v25 = vmul.f32 1.442695, %v1754_v24 }
 0x9a3   : > { %1760 = vadd.xlane.f32.xlu0 %v1759_v18  ;;  %v1770_v23 = vpop.permute.xlu1 %1769 }
 0x9a4   : > { %3792 = vmatpush3.msra.mxu0 %v1770_v23  ;;  %4039 = vpow2.f32 %v1757_v25 }
 0x9a5   : > { %3801 = vmatprep.subr.mxu0 %v4086_v11 }
 0x9a7   : > { %v1924_v33 = vpop.permute.xlu1 %1923 }
 0x9ab   : > { %v2002_v38 = vpop.permute.xlu1 %2001 }
 0x9ae   : > { %v4040_v26 = vpop.eup %4039 }
 0x9af   : > { %v1762_v27 = vsel %vm596_vm2, %v4040_v26, 0.0  ;;  %v2000_v40 = vpop.permute.xlu1 %1999 }
 0x9b9   : > { %1845 = vrot.lane.b32.xlu0 %v4229_v21, %s4093_s23 }
 0x9d8   : > { %1763 = vadd.xlane.f32.xlu0 %v1762_v27 }
 0x9ee   : > { %1921 = vrot.lane.b32.xlu0 %v4224_v20, %s4094_s24 }
 0xa30   : > { %v1761_v29 = vpop.xlane.xlu0 %1760 }
 0xa31   : > { %4041 = vrcp.f32 %v1761_v29 }
 0xa34   : > { %v1846_v30 = vpop.permute.xlu0 %1845 }
 0xa35   : > { %3797 = vmatpush3.msra.mxu1 %v1846_v30 }
 0xa36   : > { %3806 = vmatprep.subr.mxu1 %v4086_v11 }
 0xa3b   : > { %v4042_v31 = vpop.eup %4041 }
 0xa3c   : > { %v1767_v32 = vmul.f32 %v4042_v31, %v4038_v17 }
 0xa3e   : > { %3794 = vmatmul.mubr.msk.f32.vlgmr.msra.gmra.mrb[12].mxu0 %vm596_vm2, %v1767_v32 }
 0xa3f   : > { %3802 = vmatpush3.xpose.msk.msra.mxu0 %vm596_vm2, %v1924_v33  ;;  %3803 = vmatprep.mubr.msk.f32.mxu0 %vm4087_vm1, %v4086_v11 }
 0xa40   : > { %3811 = vmatprep.subr.mxu0 %v4086_v11 }
 0xa65   : > { %v1764_v35 = vpop.xlane.xlu0 %1763 }
 0xa66   : > { %4043 = vrcp.f32 %v1764_v35 }
 0xa69   : > { %v1922_v36 = vpop.permute.xlu0 %1921 }
 0xa6a   : > { %3804 = vmatmul.mubr.msk.f32.vlgmr.msra.gmra.mrb[14].mxu0 %vm596_vm2, %v1922_v36 }
 0xa6b   : > { %3813 = vmatprep.mubr.msk.f32.mxu0 %vm4087_vm1, %v4086_v11 }
 0xa70   : > { %v4044_v37 = vpop.eup %4043 }
 0xa71   : > { %v1768_v39 = vmul.f32 %v4044_v37, %v4040_v26 }
 0xa73   : > { %3799 = vmatmul.mubr.msk.f32.vlgmr.msra.gmra.mrb[20].mxu1 %vm596_vm2, %v1768_v39 }
 0xa74   : > { %3807 = vmatpush3.xpose.msk.msra.mxu1 %vm596_vm2, %v2002_v38  ;;  %3808 = vmatprep.mubr.msk.f32.mxu1 %vm4087_vm1, %v4086_v11 }
 0xa75   : > { %3816 = vmatprep.subr.mxu1 %v4086_v11 }
 0xa77   : > { %3809 = vmatmul.mubr.msk.f32.vlgmr.msra.gmra.mrb[22].mxu1 %vm596_vm2, %v2000_v40 }
 0xa78   : > { %3818 = vmatprep.mubr.msk.f32.mxu1 %vm4087_vm1, %v4086_v11 }
 0xb11   : > { %v4377_v41 = vpop.f32.mrb[12].mxu0 }
 0xb12   : > { %v3795_v42 = vpop.f32.mrb[13].mxu0 }
 0xb3d   : > { %v1995_v43 = vpop.f32.mrb[14].mxu0 }
 0xb3e   : > { %v2077_v44 = vmul.f32 0.35355338, %v1995_v43  ;;  %v3805_v45 = vpop.f32.mrb[15].mxu0 }
 0xb40   : > { %v2079_v46 = vsel %vm596_vm2, %v2077_v44, -inf }
 0xb41   : > { %2080 = vmax.xlane.f32.xlu0 %v2079_v46 }
 0xb46   : > { %v4380_v47 = vpop.f32.mrb[20].mxu1 }
 0xb47   : > { %v3800_v48 = vpop.f32.mrb[21].mxu1 }
 0xb4a   : > { %v2073_v49 = vpop.f32.mrb[22].mxu1 }
 0xb4b   : > { %v2078_v50 = vmul.f32 0.35355338, %v2073_v49  ;;  %v3810_v51 = vpop.f32.mrb[23].mxu1 }
 0xb4d   : > { %v2082_v52 = vsel %vm596_vm2, %v2078_v50, -inf }
 0xb4e   : > { %2083 = vmax.xlane.f32.xlu1 %v2082_v52 }
 0xb5f   : > { %2101 = vrot.lane.b32.xlu1 %v4221_v19, %s4095_s25 }
 0xb63   : > { %2255 = vrot.lane.b32.xlu1 %v4221_v19, %s4096_s26 }
 0xb67   : > { %2333 = vrot.lane.b32.xlu1 %v4229_v21, %s4096_s26 }
 0xb6b   : > { %2331 = vrot.lane.b32.xlu1 %v4238_v22, %s4096_s26 }
 0xbce   : > { %v2081_v54 = vpop.xlane.xlu0 %2080 }
 0xbcf   : > { %v2085_v55 = vsub.f32 %v2077_v44, %v2081_v54 }
 0xbd1   : > { %v2087_v56 = vmul.f32 1.442695, %v2085_v55 }
 0xbd3   : > { %4045 = vpow2.f32 %v2087_v56 }
 0xbdb   : > { %v2084_v57 = vpop.xlane.xlu1 %2083 }
 0xbdc   : > { %v2086_v62 = vsub.f32 %v2078_v50, %v2084_v57 }
 0xbdd   : > { %v4046_v58 = vpop.eup %4045 }
 0xbde   : > { %v2091_v60 = vsel %vm596_vm2, %v4046_v58, 0.0  ;;  %v2089_v63 = vmul.f32 1.442695, %v2086_v62 }
 0xbdf   : > { %2092 = vadd.xlane.f32.xlu0 %v2091_v60  ;;  %v2102_v61 = vpop.permute.xlu1 %2101 }
 0xbe0   : > { %3812 = vmatpush3.msra.mxu0 %v2102_v61  ;;  %4047 = vpow2.f32 %v2089_v63 }
 0xbe1   : > { %3821 = vmatprep.subr.mxu0 %v4086_v11 }
 0xbe3   : > { %v2256_v8 = vpop.permute.xlu1 %2255 }
 0xbe7   : > { %v2334_v13 = vpop.permute.xlu1 %2333 }
 0xbea   : > { %v4048_v1 = vpop.eup %4047 }
 0xbeb   : > { %v2094_v2 = vsel %vm596_vm2, %v4048_v1, 0.0  ;;  %v2332_v15 = vpop.permute.xlu1 %2331 }
 0xbf5   : > { %2177 = vrot.lane.b32.xlu0 %v4229_v21, %s4095_s25 }
 0xc14   : > { %2095 = vadd.xlane.f32.xlu0 %v2094_v2 }
 0xc2a   : > { %2253 = vrot.lane.b32.xlu0 %v4224_v20, %s4096_s26 }
 0xc6c   : > { %v2093_v3 = vpop.xlane.xlu0 %2092 }
 0xc6d   : > { %4049 = vrcp.f32 %v2093_v3 }
 0xc70   : > { %v2178_v4 = vpop.permute.xlu0 %2177 }
 0xc71   : > { %3817 = vmatpush3.msra.mxu1 %v2178_v4 }
 0xc72   : > { %3826 = vmatprep.subr.mxu1 %v4086_v11 }
 0xc77   : > { %v4050_v5 = vpop.eup %4049 }
 0xc78   : > { %v2099_v7 = vmul.f32 %v4050_v5, %v4046_v58 }
 0xc7a   : > { %3814 = vmatmul.mubr.msk.f32.vlgmr.msra.gmra.mrb[16].mxu0 %vm596_vm2, %v2099_v7 }
 0xc7b   : > { %3822 = vmatpush3.xpose.msk.msra.mxu0 %vm596_vm2, %v2256_v8  ;;  %3823 = vmatprep.mubr.msk.f32.mxu0 %vm4087_vm1, %v4086_v11 }
 0xc7c   : > { %3831 = vmatprep.subr.mxu0 %v4086_v11 }
 0xca1   : > { %v2096_v9 = vpop.xlane.xlu0 %2095 }
 0xca2   : > { %4051 = vrcp.f32 %v2096_v9 }
 0xca5   : > { %v2254_v10 = vpop.permute.xlu0 %2253 }
 0xca6   : > { %3824 = vmatmul.mubr.msk.f32.vlgmr.msra.gmra.mrb[18].mxu0 %vm596_vm2, %v2254_v10 }
 0xca7   : > { %3833 = vmatprep.mubr.msk.f32.mxu0 %vm4087_vm1, %v4086_v11 }
 0xcac   : > { %v4052_v12 = vpop.eup %4051 }
 0xcad   : > { %v2100_v14 = vmul.f32 %v4052_v12, %v4048_v1 }
 0xcaf   : > { %3819 = vmatmul.mubr.msk.f32.vlgmr.msra.gmra.mrb[24].mxu1 %vm596_vm2, %v2100_v14 }
 0xcb0   : > { %3827 = vmatpush3.xpose.msk.msra.mxu1 %vm596_vm2, %v2334_v13  ;;  %3828 = vmatprep.mubr.msk.f32.mxu1 %vm4087_vm1, %v4086_v11 }
 0xcb1   : > { %3836 = vmatprep.subr.mxu1 %v4086_v11 }
 0xcb3   : > { %3829 = vmatmul.mubr.msk.f32.vlgmr.msra.gmra.mrb[26].mxu1 %vm596_vm2, %v2332_v15 }
 0xcb4   : > { %3838 = vmatprep.mubr.msk.f32.mxu1 %vm4087_vm1, %v4086_v11 }
 0xd4d   : > { %v4411_v16 = vpop.f32.mrb[16].mxu0 }
 0xd4e   : > { %v3815_v17 = vpop.f32.mrb[17].mxu0 }
 0xd79   : > { %v2327_v18 = vpop.f32.mrb[18].mxu0 }
 0xd7a   : > { %v2409_v23 = vmul.f32 0.35355338, %v2327_v18  ;;  %v3825_v24 = vpop.f32.mrb[19].mxu0 }
 0xd7c   : > { %v2411_v25 = vsel %vm596_vm2, %v2409_v23, -inf }
 0xd7d   : > { %2412 = vmax.xlane.f32.xlu0 %v2411_v25 }
 0xd82   : > { %v4414_v26 = vpop.f32.mrb[24].mxu1 }
 0xd83   : > { %v3820_v27 = vpop.f32.mrb[25].mxu1 }
 0xd86   : > { %v2405_v29 = vpop.f32.mrb[26].mxu1 }
 0xd87   : > { %v2410_v30 = vmul.f32 0.35355338, %v2405_v29  ;;  %v3830_v31 = vpop.f32.mrb[27].mxu1 }
 0xd89   : > { %v2414_v32 = vsel %vm596_vm2, %v2410_v30, -inf }
 0xd8a   : > { %2415 = vmax.xlane.f32.xlu1 %v2414_v32 }
 0xd9b   : > { %2433 = vrot.lane.b32.xlu1 %v4221_v19, %s4097_s27 }
 0xd9f   : > { %2587 = vrot.lane.b32.xlu1 %v4221_v19, %s4098_s29 }
 0xda3   : > { %2665 = vrot.lane.b32.xlu1 %v4229_v21, %s4098_s29 }
 0xda7   : > { %2663 = vrot.lane.b32.xlu1 %v4238_v22, %s4098_s29 }
 0xe0a   : > { %v2413_v33 = vpop.xlane.xlu0 %2412 }
 0xe0b   : > { %v2417_v35 = vsub.f32 %v2409_v23, %v2413_v33 }
 0xe0d   : > { %v2419_v36 = vmul.f32 1.442695, %v2417_v35 }
 0xe0f   : > { %4053 = vpow2.f32 %v2419_v36 }
 0xe17   : > { %v2416_v37 = vpop.xlane.xlu1 %2415 }
 0xe18   : > { %v2418_v42 = vsub.f32 %v2410_v30, %v2416_v37 }
 0xe19   : > { %v4054_v38 = vpop.eup %4053 }
 0xe1a   : > { %v2423_v39 = vsel %vm596_vm2, %v4054_v38, 0.0  ;;  %v2421_v43 = vmul.f32 1.442695, %v2418_v42 }
 0xe1b   : > { %2424 = vadd.xlane.f32.xlu0 %v2423_v39  ;;  %v2434_v40 = vpop.permute.xlu1 %2433 }
 0xe1c   : > { %3832 = vmatpush3.msra.mxu0 %v2434_v40  ;;  %4055 = vpow2.f32 %v2421_v43 }
 0xe1d   : > { %3841 = vmatprep.subr.mxu0 %v4086_v11 }
 0xe1f   : > { %v2588_v51 = vpop.permute.xlu1 %2587 }
 0xe23   : > { %v2666_v56 = vpop.permute.xlu1 %2665 }
 0xe26   : > { %v4056_v44 = vpop.eup %4055 }
 0xe27   : > { %v2426_v45 = vsel %vm596_vm2, %v4056_v44, 0.0  ;;  %v2664_v58 = vpop.permute.xlu1 %2663 }
 0xe31   : > { %2509 = vrot.lane.b32.xlu0 %v4229_v21, %s4097_s27 }
 0xe50   : > { %2427 = vadd.xlane.f32.xlu0 %v2426_v45 }
 0xe66   : > { %2585 = vrot.lane.b32.xlu0 %v4224_v20, %s4098_s29 }
 0xea8   : > { %v2425_v46 = vpop.xlane.xlu0 %2424 }
 0xea9   : > { %4057 = vrcp.f32 %v2425_v46 }
 0xeac   : > { %v2510_v48 = vpop.permute.xlu0 %2509 }
 0xead   : > { %3837 = vmatpush3.msra.mxu1 %v2510_v48 }
 0xeae   : > { %3846 = vmatprep.subr.mxu1 %v4086_v11 }
 0xeb3   : > { %v4058_v49 = vpop.eup %4057 }
 0xeb4   : > { %v2431_v50 = vmul.f32 %v4058_v49, %v4054_v38 }
 0xeb6   : > { %3834 = vmatmul.mubr.msk.f32.vlgmr.msra.gmra.mrb[20].mxu0 %vm596_vm2, %v2431_v50 }
 0xeb7   : > { %3842 = vmatpush3.xpose.msk.msra.mxu0 %vm596_vm2, %v2588_v51  ;;  %3843 = vmatprep.mubr.msk.f32.mxu0 %vm4087_vm1, %v4086_v11 }
 0xeb8   : > { %3851 = vmatprep.subr.mxu0 %v4086_v11 }
 0xedd   : > { %v2428_v52 = vpop.xlane.xlu0 %2427 }
 0xede   : > { %4059 = vrcp.f32 %v2428_v52 }
 0xee1   : > { %v2586_v54 = vpop.permute.xlu0 %2585 }
 0xee2   : > { %3844 = vmatmul.mubr.msk.f32.vlgmr.msra.gmra.mrb[22].mxu0 %vm596_vm2, %v2586_v54 }
 0xee3   : > { %3853 = vmatprep.mubr.msk.f32.mxu0 %vm4087_vm1, %v4086_v11 }
 0xee8   : > { %v4060_v55 = vpop.eup %4059 }
 0xee9   : > { %v2432_v57 = vmul.f32 %v4060_v55, %v4056_v44 }
 0xeeb   : > { %3839 = vmatmul.mubr.msk.f32.vlgmr.msra.gmra.mrb[28].mxu1 %vm596_vm2, %v2432_v57 }
 0xeec   : > { %3847 = vmatpush3.xpose.msk.msra.mxu1 %vm596_vm2, %v2666_v56  ;;  %3848 = vmatprep.mubr.msk.f32.mxu1 %vm4087_vm1, %v4086_v11 }
 0xeed   : > { %3856 = vmatprep.subr.mxu1 %v4086_v11 }
 0xeef   : > { %3849 = vmatmul.mubr.msk.f32.vlgmr.msra.gmra.mrb[30].mxu1 %vm596_vm2, %v2664_v58 }
 0xef0   : > { %3858 = vmatprep.mubr.msk.f32.mxu1 %vm4087_vm1, %v4086_v11 }
 0xf89   : > { %v4445_v60 = vpop.f32.mrb[20].mxu0 }
 0xf8a   : > { %v3835_v61 = vpop.f32.mrb[21].mxu0 }
 0xfb5   : > { %v2659_v62 = vpop.f32.mrb[22].mxu0 }
 0xfb6   : > { %v2741_v63 = vmul.f32 0.35355338, %v2659_v62  ;;  %v3845_v1 = vpop.f32.mrb[23].mxu0 }
 0xfb8   : > { %v2743_v2 = vsel %vm596_vm2, %v2741_v63, -inf }
 0xfb9   : > { %2744 = vmax.xlane.f32.xlu0 %v2743_v2  ;;  %v346_v2 = vld [vmem:[%s314_s12 + $0x10] sm:$0xff] }
 0xfbe   : > { %v4448_v3 = vpop.f32.mrb[28].mxu1 }
 0xfbf   : > { %v3840_v4 = vpop.f32.mrb[29].mxu1 }
 0xfc2   : > { %v2737_v5 = vpop.f32.mrb[30].mxu1 }
 0xfc3   : > { %v2742_v7 = vmul.f32 0.35355338, %v2737_v5  ;;  %v3850_v8 = vpop.f32.mrb[31].mxu1  ;;  %v348_v5 = vld [vmem:[%s314_s12 + $0x20] sm:$0xff] }
 0xfc5   : > { %v2746_v9 = vsel %vm596_vm2, %v2742_v7, -inf }
 0xfc6   : > { %2747 = vmax.xlane.f32.xlu1 %v2746_v9  ;;  %v350_v9 = vld [vmem:[%s314_s12 + $0x30] sm:$0xff] }
 0xfd7   : > { %2765 = vrot.lane.b32.xlu1 %v4221_v19, %s4099_s30 }
 0xfdb   : > { %2919 = vrot.lane.b32.xlu1 %v4221_v19, %s4100_s7 }
 0xfdf   : > { %2997 = vrot.lane.b32.xlu1 %v4229_v21, %s4100_s7 }
 0xfe3   : > { %2995 = vrot.lane.b32.xlu1 %v4238_v22, %s4100_s7 }
0x1046   : > { %v2745_v10 = vpop.xlane.xlu0 %2744 }
0x1047   : > { %v2749_v12 = vsub.f32 %v2741_v63, %v2745_v10  ;;  %v351_v10 = vld [vmem:[%s314_s12 + $0x38] sm:$0xff] }
0x1049   : > { %v2751_v13 = vmul.f32 1.442695, %v2749_v12  ;;  %v3944_v12 = vpack.c.bf16 %v351_v10, %v350_v9 }
0x104b   : > { %4061 = vpow2.f32 %v2751_v13 }
0x1053   : > { %v2748_v14 = vpop.xlane.xlu1 %2747 }
0x1054   : > { %v2750_v23 = vsub.f32 %v2742_v7, %v2748_v14  ;;  %v349_v7 = vld [vmem:[%s314_s12 + $0x28] sm:$0xff] }
0x1055   : > { %v4062_v15 = vpop.eup %4061  ;;  %v3940_v8 = vpack.c.bf16 %v349_v7, %v348_v5 }
0x1056   : > { %v2755_v17 = vsel %vm596_vm2, %v4062_v15, 0.0  ;;  %v2753_v24 = vmul.f32 1.442695, %v2750_v23 }
0x1057   : > { %2756 = vadd.xlane.f32.xlu0 %v2755_v17  ;;  %v2766_v18 = vpop.permute.xlu1 %2765 }
0x1058   : > { %3852 = vmatpush3.msra.mxu0 %v2766_v18  ;;  %4063 = vpow2.f32 %v2753_v24 }
0x1059   : > { %3861 = vmatprep.subr.mxu0 %v4086_v11 }
0x105b   : > { %v2920_v32 = vpop.permute.xlu1 %2919 }
0x105f   : > { %v2998_v36 = vpop.permute.xlu1 %2997 }
0x1062   : > { %v4064_v22 = vpop.eup %4063 }
0x1063   : > { %v2758_v25 = vsel %vm596_vm2, %v4064_v22, 0.0  ;;  %v2996_v38 = vpop.permute.xlu1 %2995 }
0x106d   : > { %2841 = vrot.lane.b32.xlu0 %v4229_v21, %s4099_s30 }
0x108c   : > { %2759 = vadd.xlane.f32.xlu0 %v2758_v25 }
0x10a2   : > { %2917 = vrot.lane.b32.xlu0 %v4224_v20, %s4100_s7 }
0x10e4   : > { %v2757_v27 = vpop.xlane.xlu0 %2756 }
0x10e5   : > { %4065 = vrcp.f32 %v2757_v27 }
0x10e8   : > { %v2842_v29 = vpop.permute.xlu0 %2841 }
0x10e9   : > { %3857 = vmatpush3.msra.mxu1 %v2842_v29 }
0x10ea   : > { %3866 = vmatprep.subr.mxu1 %v4086_v11 }
0x10ef   : > { %v4066_v30 = vpop.eup %4065 }
0x10f0   : > { %v2763_v31 = vmul.f32 %v4066_v30, %v4062_v15 }
0x10f2   : > { %3854 = vmatmul.mubr.msk.f32.vlgmr.msra.gmra.mrb[24].mxu0 %vm596_vm2, %v2763_v31 }
0x10f3   : > { %3862 = vmatpush3.xpose.msk.msra.mxu0 %vm596_vm2, %v2920_v32  ;;  %3863 = vmatprep.mubr.msk.f32.mxu0 %vm4087_vm1, %v4086_v11 }
0x10f4   : > { %3871 = vmatprep.subr.mxu0 %v4086_v11 }
0x1119   : > { %v2760_v33 = vpop.xlane.xlu0 %2759 }
0x111a   : > { %4067 = vrcp.f32 %v2760_v33 }
0x111d   : > { %v2918_v20 = vpop.permute.xlu0 %2917 }
0x111e   : > { %3864 = vmatmul.mubr.msk.f32.vlgmr.msra.gmra.mrb[26].mxu0 %vm596_vm2, %v2918_v20 }
0x111f   : > { %3873 = vmatprep.mubr.msk.f32.mxu0 %vm4087_vm1, %v4086_v11 }
0x1124   : > { %v4068_v35 = vpop.eup %4067 }
0x1125   : > { %v2764_v37 = vmul.f32 %v4068_v35, %v4064_v22 }
0x1127   : > { %3859 = vmatmul.mubr.msk.f32.vlgmr.msra.gmra.mrb[32].mxu1 %vm596_vm2, %v2764_v37 }
0x1128   : > { %3867 = vmatpush3.xpose.msk.msra.mxu1 %vm596_vm2, %v2998_v36  ;;  %3868 = vmatprep.mubr.msk.f32.mxu1 %vm4087_vm1, %v4086_v11 }
0x1129   : > { %3876 = vmatprep.subr.mxu1 %v4086_v11 }
0x112b   : > { %3869 = vmatmul.mubr.msk.f32.vlgmr.msra.gmra.mrb[34].mxu1 %vm596_vm2, %v2996_v38 }
0x112c   : > { %3878 = vmatprep.mubr.msk.f32.mxu1 %vm4087_vm1, %v4086_v11 }
0x11c5   : > { %v2837_v39 = vpop.f32.mrb[24].mxu0 }
0x11c6   : > { %v3855_v40 = vpop.f32.mrb[25].mxu0 }
0x11f1   : > { %v2991_v42 = vpop.f32.mrb[26].mxu0 }
0x11f2   : > { %v3073_v43 = vmul.f32 0.35355338, %v2991_v42  ;;  %v3865_v44 = vpop.f32.mrb[27].mxu0 }
0x11f4   : > { %v3075_v45 = vsel %vm596_vm2, %v3073_v43, -inf }
0x11f5   : > { %3076 = vmax.xlane.f32.xlu0 %v3075_v45 }
0x11fa   : > { %v2913_v46 = vpop.f32.mrb[32].mxu1 }
0x11fb   : > { %v3860_v48 = vpop.f32.mrb[33].mxu1 }
0x11fe   : > { %v3069_v49 = vpop.f32.mrb[34].mxu1 }
0x11ff   : > { %v3074_v50 = vmul.f32 0.35355338, %v3069_v49  ;;  %v3870_v51 = vpop.f32.mrb[35].mxu1 }
0x1201   : > { %v3078_v52 = vsel %vm596_vm2, %v3074_v50, -inf }
0x1202   : > { %3079 = vmax.xlane.f32.xlu1 %v3078_v52  ;;  %v3580_v52 = vld [vmem:[%s317_s15] ss:$0 sm:$0xff] }
0x1213   : > { %3097 = vrot.lane.b32.xlu1 %v4221_v19, %s4101_s8 }
0x1217   : > { %3251 = vrot.lane.b32.xlu1 %v4309_v28, %s4101_s8 }
0x121b   : > { %3253 = vrot.lane.b32.xlu1 %v4312_v34, %s4101_s8 }
0x121f   : > { %3261 = vrot.lane.b32.xlu1 %v4346_v6, %s4099_s30 }
0x1223   : > { %3269 = vrot.lane.b32.xlu1 %v4380_v47, %s4097_s27 }
0x1227   : > { %3277 = vrot.lane.b32.xlu1 %v4414_v26, %s4095_s25 }
0x122b   : > { %3285 = vrot.lane.b32.xlu1 %v4448_v3, %s4093_s23  ;;  %v347_v3 = vld [vmem:[%s314_s12 + $0x18] sm:$0xff] }
0x122c   : > { %v3936_v4 = vpack.c.bf16 %v347_v3, %v346_v2 }
0x122f   : > { %3293 = vrot.lane.b32.xlu1 %v2913_v46, %s4091_s19 }
0x1282   : > { %v3077_v11 = vpop.xlane.xlu0 %3076 }
0x1283   : > { %v3081_v19 = vsub.f32 %v3073_v43, %v3077_v11 }
0x1285   : > { %v3083_v54 = vmul.f32 1.442695, %v3081_v19 }
0x1287   : > { %4069 = vpow2.f32 %v3083_v54 }
0x128f   : > { %v3080_v28 = vpop.xlane.xlu1 %3079 }
0x1290   : > { %v3082_v34 = vsub.f32 %v3074_v50, %v3080_v28 }
0x1291   : > { %v4070_v55 = vpop.eup %4069 }
0x1292   : > { %v3085_v56 = vmul.f32 1.442695, %v3082_v34  ;;  %v3087_v6 = vsel %vm596_vm2, %v4070_v55, 0.0 }
0x1293   : > { %3088 = vadd.xlane.f32.xlu0 %v3087_v6  ;;  %v3098_v47 = vpop.permute.xlu1 %3097 }
0x1294   : > { %4071 = vpow2.f32 %v3085_v56  ;;  %3872 = vmatpush3.msra.mxu0 %v3098_v47 }
0x1297   : > { %v3252_v23 = vpop.permute.xlu1 %3251 }
0x1298   : > { %v3305_v31 = vsel %vm596_vm2, %v4275_v53, %v3252_v23 }
0x129b   : > { %v3254_v22 = vpop.permute.xlu1 %3253 }
0x129c   : > { %v3306_v42 = vsel %vm596_vm2, %v4278_v59, %v3254_v22 }
0x129e   : > { %v4072_v26 = vpop.eup %4071 }
0x129f   : > { %v3090_v57 = vsel %vm596_vm2, %v4072_v26, 0.0  ;;  %v3262_v27 = vpop.permute.xlu1 %3261 }
0x12a0   : > { %3091 = vadd.xlane.f32.xlu0 %v3090_v57  ;;  %v3309_v43 = vsel %vm3307_vm3, %v3306_v42, %v3262_v27 }
0x12a3   : > { %v3270_v30 = vpop.permute.xlu1 %3269 }
0x12a4   : > { %v3312_v45 = vsel %vm3310_vm4, %v3309_v43, %v3270_v30 }
0x12a7   : > { %v3278_v20 = vpop.permute.xlu1 %3277 }
0x12a8   : > { %v3315_v46 = vsel %vm3313_vm5, %v3312_v45, %v3278_v20 }
0x12ab   : > { %v3286_v40 = vpop.permute.xlu1 %3285 }
0x12ac   : > { %v3318_v48 = vsel %vm3316_vm6, %v3315_v46, %v3286_v40 }
0x12af   : > { %v3294_v44 = vpop.permute.xlu1 %3293 }
0x12b0   : > { %v3321_v49 = vsel %vm3319_vm8, %v3318_v48, %v3294_v44 }
0x12b6   : > { %3173 = vrot.lane.b32.xlu0 %v4229_v21, %s4101_s8 }
0x12ba   : > { %3259 = vrot.lane.b32.xlu0 %v4343_v0, %s4099_s30 }
0x12be   : > { %3267 = vrot.lane.b32.xlu0 %v4377_v41, %s4097_s27 }
0x12c2   : > { %3275 = vrot.lane.b32.xlu0 %v4411_v16, %s4095_s25  ;;  %v344_v16 = vld [vmem:[%s314_s12] sm:$0xff] }
0x12c6   : > { %3283 = vrot.lane.b32.xlu0 %v4445_v60, %s4093_s23  ;;  %v345_v60 = vld [vmem:[%s314_s12 + $0x8] sm:$0xff] }
0x12c7   : > { %v3932_v1 = vpack.c.bf16 %v345_v60, %v344_v16 }
0x12c9   : > { %3933 = vmatprep.subr.bf16.mxu0 %v3932_v1 }
0x12ca   : > { %3291 = vrot.lane.b32.xlu0 %v2837_v39, %s4091_s19 }
0x1320   : > { %v3089_v58 = vpop.xlane.xlu0 %3088 }
0x1321   : > { %4073 = vrcp.f32 %v3089_v58 }
0x132b   : > { %v4074_v61 = vpop.eup %4073 }
0x132c   : > { %v3095_v62 = vmul.f32 %v4074_v61, %v4070_v55 }
0x132d   : > { %v3092_v21 = vpop.xlane.xlu0 %3091 }
0x132e   : > { %4075 = vrcp.f32 %v3092_v21  ;;  %3874 = vmatmul.mubr.msk.f32.vlgmr.msra.gmra.mrb[28].mxu0 %vm596_vm2, %v3095_v62 }
0x132f   : > { %3935 = vmatpush3.bf16.msra.mxu0 %v3932_v1 }
0x1330   : > { %3937 = vmatprep.subr.bf16.mxu0 %v3936_v4 }
0x1331   : > { %v3174_v0 = vpop.permute.xlu0 %3173 }
0x1332   : > { %3877 = vmatpush3.msra.mxu1 %v3174_v0 }
0x1333   : > { %3939 = vmatpush3.bf16.msra.mxu0 %v3936_v4 }
0x1334   : > { %3941 = vmatprep.subr.bf16.mxu0 %v3940_v8 }
0x1335   : > { %v3260_v18 = vpop.permute.xlu0 %3259 }
0x1336   : > { %v3308_v32 = vsel %vm3307_vm3, %v3305_v31, %v3260_v18 }
0x1337   : > { %3943 = vmatpush3.bf16.msra.mxu0 %v3940_v8 }
0x1338   : > { %v4076_v41 = vpop.eup %4075  ;;  %3945 = vmatprep.subr.bf16.mxu0 %v3944_v12 }
0x1339   : > { %v3096_v63 = vmul.f32 %v4076_v41, %v4072_v26  ;;  %v3268_v24 = vpop.permute.xlu0 %3267 }
0x133a   : > { %v3311_v35 = vsel %vm3310_vm4, %v3308_v32, %v3268_v24 }
0x133b   : > { %3879 = vmatmul.mubr.msk.f32.vlgmr.msra.gmra.mrb[36].mxu1 %vm596_vm2, %v3096_v63  ;;  %3947 = vmatpush3.bf16.msra.mxu0 %v3944_v12 }
0x133d   : > { %v3276_v25 = vpop.permute.xlu0 %3275 }
0x133e   : > { %v3314_v36 = vsel %vm3313_vm5, %v3311_v35, %v3276_v25 }
0x1341   : > { %v3284_v29 = vpop.permute.xlu0 %3283 }
0x1342   : > { %v3317_v37 = vsel %vm3316_vm6, %v3314_v36, %v3284_v29 }
0x1345   : > { %v3292_v33 = vpop.permute.xlu0 %3291 }
0x1346   : > { %v3320_v38 = vsel %vm3319_vm8, %v3317_v37, %v3292_v33 }
0x1401   : > { %v3169_v13 = vpop.f32.mrb[28].mxu0 }
0x1402   : > { %3299 = vrot.lane.b32.xlu0 %v3169_v13, %s4089_s17  ;;  %v3875_v14 = vpop.f32.mrb[29].mxu0 }
0x140e   : > { %v3245_v15 = vpop.f32.mrb[36].mxu1 }
0x140f   : > { %3301 = vrot.lane.b32.xlu1 %v3245_v15, %s4089_s17  ;;  %v3880_v17 = vpop.f32.mrb[37].mxu1 }
0x1474   : > { %v3300_v39 = vpop.permute.xlu0 %3299 }
0x1475   : > { %v3323_v53 = vsel %vm3322_vm7, %v3320_v38, %v3300_v39 }
0x1476   : > { %3897 = vmatprep.mubr.msk.f32.mxu0 %vm359_vm0, %v3323_v53 }
0x1481   : > { %v3302_v50 = vpop.permute.xlu1 %3301 }
0x1482   : > { %v3324_v51 = vsel %vm3322_vm7, %v3321_v49, %v3302_v50 }
0x1483   : > { %3898 = vmatmul.mubr.msk.f32.vlgmr.msra.gmra.mrb[30].mxu0 %vm359_vm0, %v3324_v51 }
0x1556   : > { %v3899_v59 = vpop.f32.mrb[30].mxu0 }
0x1557   : > { %v3409_v11 = vadd.f32 %v3899_v59, %v3580_v52  ;;  %v3403_v19 = vpop.f32.mrb[31].mxu0 }
0x1558   : > { %v3404_v54 = vadd.f32 %v3580_v52, %v3403_v19 }
0x1559   : > { %3413 = vst.msk [vmem:[%s322_s18 + $0x8] sm:$0xff] %vm359_vm0, %v3409_v11 }
0x155a   : > { %3412 = vst.msk [vmem:[%s322_s18] sm:$0xff] %vm359_vm0, %v3404_v54 }
0x155b PF: > { %s16_s21 = sadd.s32 1, %s4083_s21  }
0x155c   : > { %p13_p4 = scmp.ge.s32.totalorder %s16_s21, 4  }
0x155e   :  { %15 = sbr.rel (!%p13_p4) target bundleno = 1 (0x1), region = 86 }

// kernel: forward.8
= control target key start
LH: loop header
LB: loop body
LE: loop exit
PB: predicated region body
PF: predicated region fallthrough
CT: control target
= control target key end

     0   :  { %s4738_s25 = smov 0   ;;  %s5194_s0 = inlined_call_operand.vmem [shape: f32[3,2,8,64], index: 0, kind: input, shape index: {}]   ;;  %s5195_s1 = inlined_call_operand.vmem [shape: f32[3,64,192], index: 1, kind: input, shape index: {}]   ;;  %s5196_s2 = inlined_call_operand.vmem [shape: f32[3,1,192], index: 2, kind: input, shape index: {}]   ;;  %s5197_s3 = inlined_call_operand.vmem [shape: f32[3,64,64], index: 3, kind: input, shape index: {}]   ;;  %s5198_s4 = inlined_call_operand.vmem [shape: f32[3,1,64], index: 4, kind: input, shape index: {}]   ;;  %s5199_s5 = inlined_call_operand.vmem [shape: f32[3,1,64], index: 5, kind: input, shape index: {}]   ;;  %s5200_s6 = inlined_call_operand.vmem [shape: f32[3,1,64], index: 6, kind: input, shape index: {}]   ;;  %s5201_s7 = inlined_call_operand.vmem [shape: f32[3,64,128], index: 7, kind: input, shape index: {}]   ;;  %s5202_s8 = inlined_call_operand.vmem [shape: f32[3,1,128], index: 8, kind: input, shape index: {}]   ;;  %s5203_s9 = inlined_call_operand.vmem [shape: f32[3,128,64], index: 9, kind: input, shape index: {}]   ;;  %s5204_s10 = inlined_call_operand.vmem [shape: f32[3,1,64], index: 10, kind: input, shape index: {}]   ;;  %s5205_s11 = inlined_call_operand.vmem [shape: f32[3,1,64], index: 11, kind: input, shape index: {}]   ;;  %s5206_s12 = inlined_call_operand.vmem [shape: f32[3,1,64], index: 12, kind: input, shape index: {}]   ;;  %s5207_s13 = inlined_call_operand.vmem [shape: f32[3,2,8,64], index: 13, kind: output, shape index: {}]  }
   0x1 LB: > { %s4042_s26 = sadd.s32 4294967295, %s4649_s25   ;;  %p4046_p0 = scmp.ge.s32.totalorder %s4649_s25, 1  ;;  %s4649_s25 = sphi %s4738_s25, %s23_s25  }
   0x2   : > { %p492_p1 = scmp.lt.s32.totalorder %s4649_s25, 4 }
   0x4   : > { %p493_p2 = pnand %p4046_p0, %p492_p1 }
   0x5   : > { %p581_p3 = scmp.lt.s32.totalorder (!%p493_p2), %s4042_s26, 2  ;;  %v4651_v0 = vmov (!%p493_p2), 0.0   ;;  %vm675_vm0 = vcmask (!%p493_p2), 523264   ;;  %v665_v27 = vlaneseq (!%p493_p2)  ;;  %vm4652_vm1 = vmmov (!%p493_p2), 0   ;;  %s4653_s22 = smov (!%p493_p2), 64  }
   0x6   : > { %496 = sbr.rel (%p493_p2) target bundleno = 6324 (0x18b4), region = 72  ;;  %746 = vmatprep.mubr.f32.mxu0 (!%p493_p2), %v4651_v0  ;;  %4231 = vmatprep.subr.mxu1 (!%p493_p2), %v4651_v0  ;;  %vm762_vm2 = vcmask (!%p493_p2), 64512   ;;  %s4654_s23 = smov (!%p493_p2), 56   ;;  %vm3468_vm3 = vcmask (!%p493_p2), 130048   ;;  %vm3471_vm4 = vcmask (!%p493_p2), 195584   ;;  %vm3474_vm5 = vcmask (!%p493_p2), 261120  }
   0x7   : > { %v666_v28 = vshrl.u32 (!%p493_p2), %v665_v27, 7  ;;  %4233 = vmatprep.mubr.msk.f32.mxu1 (!%p493_p2), %vm4652_vm1, %v4651_v0  ;;  %s4655_s24 = smov (!%p493_p2), 120   ;;  %s4656_s28 = smov (!%p493_p2), 48   ;;  %vm3477_vm6 = vcmask (!%p493_p2), 326656   ;;  %vm3480_vm7 = vcmask (!%p493_p2), 392192   ;;  %vm3483_vm8 = vcmask (!%p493_p2), 457728  }
   0x8   : > { %s4657_s29 = smov (!%p493_p2), 112   ;;  %s4659_s15 = smov (!%p493_p2), 104  }
   0x9   : > { %v667_v29 = vsub.s32 (!%p493_p2), 0, %v666_v28  ;;  %v671_v33 = vsub.s32 (!%p493_p2), 1, %v666_v28  ;;  %s4660_s16 = smov (!%p493_p2), 32   ;;  %s4662_s19 = smov (!%p493_p2), 24  }
   0xa   : > { %s4663_s20 = smov (!%p493_p2), 88  }
   0xd   : > { %s5209_s26 = smov (!%p581_p3, %s4042_s26), 2 }
   0xe   : > { %s4124_s27 = sshll.u32 %s5209_s26, 7  ;;  %s4123_s14 = sshll.u32 %s5209_s26, 4 }
   0xf   : > { %s590_s30 = scalar_lea.vmem %s5195_s1, %s4124_s27  ;;  %s4762_s17 = scalar_lea.vmem %s5194_s0, %s4123_s14 }
  0x10   : > { %v639_v1 = vld [vmem:[%s590_s30 + $0x8] sm:$0xff]  ;;  %v641_v2 = vld [vmem:[%s590_s30 + $0x18] sm:$0xff]  ;;  %v638_v3 = vld [vmem:[%s590_s30] sm:$0xff]  ;;  %s4051_s18 = sshll.u32 %s5209_s26, 1 }
  0x11   : > { %v4464_v4 = vpack.c.bf16 %v641_v2, %v639_v1  ;;  %v640_v5 = vld [vmem:[%s590_s30 + $0x10] sm:$0xff]  ;;  %v643_v6 = vld [vmem:[%s590_s30 + $0x28] sm:$0xff]  ;;  %v645_v7 = vld [vmem:[%s590_s30 + $0x38] sm:$0xff]  ;;  %s594_s21 = scalar_lea.vmem %s5196_s2, %s4051_s18  ;;  %s4661_s18 = smov 96  }
  0x12   : > { %v4466_v8 = vpack.c.bf16 %v640_v5, %v638_v3  ;;  %v4468_v9 = vpack.c.bf16 %v645_v7, %v643_v6  ;;  %v642_v10 = vld [vmem:[%s590_s30 + $0x20] sm:$0xff]  ;;  %v644_v11 = vld [vmem:[%s590_s30 + $0x30] sm:$0xff]  ;;  %v647_v12 = vld [vmem:[%s590_s30 + $0x48] sm:$0xff] }
  0x13   : > { %4465 = vmatprep.subr.bf16.mxu0 %v4464_v4  ;;  %v649_v13 = vld [vmem:[%s590_s30 + $0x58] sm:$0xff]  ;;  %v4470_v14 = vpack.c.bf16 %v644_v11, %v642_v10  ;;  %v646_v16 = vld [vmem:[%s590_s30 + $0x40] sm:$0xff]  ;;  %v648_v17 = vld [vmem:[%s590_s30 + $0x50] sm:$0xff] }
  0x14   : > { %4467 = vmatpush1.bf16.msra.mxu0 %v4466_v8  ;;  %v4472_v15 = vpack.c.bf16 %v649_v13, %v647_v12  ;;  %v651_v18 = vld [vmem:[%s590_s30 + $0x68] sm:$0xff]  ;;  %v653_v19 = vld [vmem:[%s590_s30 + $0x78] sm:$0xff]  ;;  %v4474_v20 = vpack.c.bf16 %v648_v17, %v646_v16  ;;  %v650_v22 = vld [vmem:[%s590_s30 + $0x60] sm:$0xff] }
  0x15   : > { %4469 = vmatprep.subr.bf16.mxu0 %v4468_v9  ;;  %v4476_v21 = vpack.c.bf16 %v653_v19, %v651_v18  ;;  %v652_v23 = vld [vmem:[%s590_s30 + $0x70] sm:$0xff]  ;;  %v636_v25 = vld [vmem:[%s4762_s17] sm:$0xff]  ;;  %v637_v26 = vld [vmem:[%s4762_s17 + $0x8] sm:$0xff]  ;;  %s4658_s30 = smov 40  }
  0x16   : > { %v4478_v24 = vpack.c.bf16 %v652_v23, %v650_v22  ;;  %v654_v30 = vld [vmem:[%s594_s21] sm:$0x3]  ;;  %s4664_s21 = smov 16  }
  0x17   : > { %v668_v31 = vrot.slane %v654_v30, %v667_v29  ;;  %v672_v36 = vrot.slane %v654_v30, %v671_v33 }
  0x18   : > { %4471 = vmatpush1.bf16.msra.mxu0 %v4470_v14 }
  0x19   : > { %4473 = vmatprep.subr.bf16.mxu0 %v4472_v15 }
  0x1c   : > { %4475 = vmatpush1.bf16.msra.mxu0 %v4474_v20 }
  0x1d   : > { %4477 = vmatprep.subr.bf16.mxu0 %v4476_v21 }
  0x20   : > { %4479 = vmatpush1.bf16.msra.mxu0 %v4478_v24 }
  0x21   : > { %4256 = vmatprep.subr.mxu0 %v4651_v0 }
  0x23   : > { %4060 = vmatmul.mubr.msk.f32.vlgmr.msra.gmra.mrb[0].mxu0 %vm675_vm0, %v636_v25 }
  0x24   : > { %752 = vmatprep.mubr.f32.mxu0 %v4651_v0 }
  0x27   : > { %4061 = vmatmul.mubr.msk.f32.gmra.mrb[2].mxu0 %vm675_vm0, %v637_v26 }
  0x28   : > { %4258 = vmatprep.mubr.msk.f32.mxu0 %vm4652_vm1, %v4651_v0 }
  0xf6   : > { %v748_v32 = vpop.f32.mrb[0].mxu0 }
  0xf7   : > { %v4778_v34 = vadd.f32 %v748_v32, %v668_v31  ;;  %v750_v35 = vpop.f32.mrb[1].mxu0 }
  0xf8   : > { %v4794_v43 = vadd.f32 %v750_v35, %v672_v36 }
  0xf9   : > { %760 = vrot.lane.b32.xlu0 %v4778_v34, %s4653_s22 }
  0xfa   : > { %v754_v37 = vpop.f32.mrb[2].mxu0 }
  0xfb   : > { %v4781_v38 = vadd.f32 %v754_v37, %v668_v31  ;;  %v756_v39 = vpop.f32.mrb[3].mxu0 }
  0xfc   : > { %v4783_v40 = vadd.f32 %v756_v39, %v672_v36 }
  0xfd   : > { %838 = vrot.lane.b32.xlu0 %v4781_v38, %s4653_s22  ;;  %s4665_s22 = smov 80  }
 0x16b   : > { %v761_v41 = vpop.permute.xlu0 %760 }
 0x16c   : > { %4232 = vmatpush3.xpose.msk.msra.mxu1 %vm762_vm2, %v761_v41 }
 0x16d   : > { %4236 = vmatprep.subr.mxu1 %v4651_v0 }
 0x16f   : > { %4234 = vmatmul.mubr.msk.f32.vlgmr.msra.gmra.mrb[0].mxu1 %vm762_vm2, %v4778_v34  ;;  %v839_v42 = vpop.permute.xlu0 %838 }
 0x170   : > { %4237 = vmatpush3.xpose.msk.msra.mxu1 %vm762_vm2, %v839_v42  ;;  %4238 = vmatprep.mubr.msk.f32.mxu1 %vm4652_vm1, %v4651_v0 }
 0x171   : > { %4241 = vmatprep.subr.mxu1 %v4651_v0 }
 0x173   : > { %4239 = vmatmul.mubr.msk.f32.vlgmr.msra.gmra.mrb[2].mxu1 %vm762_vm2, %v4781_v38 }
 0x174   : > { %4242 = vmatpush3.msra.mxu1 %v4794_v43  ;;  %4243 = vmatprep.mubr.msk.f32.mxu1 %vm4652_vm1, %v4651_v0 }
 0x175   : > { %4246 = vmatprep.subr.mxu1 %v4651_v0 }
 0x242   : > { %v833_v44 = vpop.f32.mrb[0].mxu1 }
 0x243   : > { %v914_v45 = vmul.f32 0.35355338, %v833_v44  ;;  %v4235_v46 = vpop.f32.mrb[1].mxu1 }
 0x245   : > { %v916_v47 = vsel %vm762_vm2, %v914_v45, -inf }
 0x246   : > { %917 = vmax.xlane.f32.xlu1 %v916_v47  ;;  %v910_v48 = vpop.f32.mrb[2].mxu1 }
 0x247   : > { %v915_v49 = vmul.f32 0.35355338, %v910_v48  ;;  %v4240_v50 = vpop.f32.mrb[3].mxu1 }
 0x249   : > { %v919_v51 = vsel %vm762_vm2, %v915_v49, -inf }
 0x24a   : > { %920 = vmax.xlane.f32.xlu1 %v919_v51 }
 0x25b   : > { %1086 = vrot.lane.b32.xlu1 %v4778_v34, %s4654_s23 }
 0x25f   : > { %1164 = vrot.lane.b32.xlu1 %v4781_v38, %s4654_s23 }
 0x263   : > { %1084 = vrot.lane.b32.xlu1 %v4778_v34, %s4655_s24 }
 0x2d3   : > { %v918_v52 = vpop.xlane.xlu1 %917 }
 0x2d4   : > { %v922_v53 = vsub.f32 %v914_v45, %v918_v52 }
 0x2d6   : > { %v924_v54 = vmul.f32 1.442695, %v922_v53 }
 0x2d7   : > { %v921_v55 = vpop.xlane.xlu1 %920 }
 0x2d8   : > { %4569 = vpow2.f32 %v924_v54  ;;  %v923_v56 = vsub.f32 %v915_v49, %v921_v55 }
 0x2da   : > { %v926_v57 = vmul.f32 1.442695, %v923_v56 }
 0x2db   : > { %v1087_v58 = vpop.permute.xlu1 %1086 }
 0x2dc   : > { %4571 = vpow2.f32 %v926_v57 }
 0x2df   : > { %v1165_v59 = vpop.permute.xlu1 %1164 }
 0x2e0   : > { %4257 = vmatpush3.xpose.msk.msra.mxu0 %vm762_vm2, %v1165_v59 }
 0x2e1   : > { %4266 = vmatprep.subr.mxu0 %v4651_v0 }
 0x2e2   : > { %v4570_v60 = vpop.eup %4569 }
 0x2e3   : > { %v928_v61 = vsel %vm762_vm2, %v4570_v60, 0.0  ;;  %v1085_v1 = vpop.permute.xlu1 %1084 }
 0x2e4   : > { %929 = vadd.xlane.f32.xlu0 %v928_v61 }
 0x2e6   : > { %v4572_v62 = vpop.eup %4571 }
 0x2e7   : > { %v931_v63 = vsel %vm762_vm2, %v4572_v62, 0.0 }
 0x2e8   : > { %932 = vadd.xlane.f32.xlu1 %v931_v63 }
 0x2f9   : > { %1162 = vrot.lane.b32.xlu1 %v4781_v38, %s4655_s24 }
 0x371   : > { %v930_v2 = vpop.xlane.xlu0 %929 }
 0x372   : > { %4573 = vrcp.f32 %v930_v2 }
 0x375   : > { %v933_v3 = vpop.xlane.xlu1 %932 }
 0x376   : > { %4575 = vrcp.f32 %v933_v3 }
 0x379   : > { %v1163_v4 = vpop.permute.xlu1 %1162 }
 0x37a   : > { %4259 = vmatmul.mubr.msk.f32.vlgmr.msra.gmra.mrb[4].mxu0 %vm762_vm2, %v1163_v4 }
 0x37b   : > { %4268 = vmatprep.mubr.msk.f32.mxu0 %vm4652_vm1, %v4651_v0 }
 0x37c   : > { %v4574_v5 = vpop.eup %4573 }
 0x37d   : > { %v936_v6 = vmul.f32 %v4574_v5, %v4570_v60 }
 0x37f   : > { %4244 = vmatmul.mubr.msk.f32.vlgmr.msra.gmra.mrb[4].mxu1 %vm762_vm2, %v936_v6 }
 0x380   : > { %v4576_v7 = vpop.eup %4575  ;;  %4247 = vmatpush3.msra.mxu1 %v4783_v40  ;;  %4248 = vmatprep.mubr.msk.f32.mxu1 %vm4652_vm1, %v4651_v0 }
 0x381   : > { %v937_v8 = vmul.f32 %v4576_v7, %v4572_v62  ;;  %4251 = vmatprep.subr.mxu1 %v4651_v0 }
 0x383   : > { %4249 = vmatmul.mubr.msk.f32.vlgmr.msra.gmra.mrb[6].mxu1 %vm762_vm2, %v937_v8 }
 0x384   : > { %4253 = vmatprep.mubr.msk.f32.mxu1 %vm4652_vm1, %v4651_v0 }
 0x387   : > { %4252 = vmatpush3.xpose.msk.msra.mxu1 %vm762_vm2, %v1087_v58 }
 0x388   : > { %4261 = vmatprep.subr.mxu1 %v4651_v0 }
 0x38a   : > { %4254 = vmatmul.mubr.msk.f32.vlgmr.msra.gmra.mrb[8].mxu1 %vm762_vm2, %v1085_v1 }
 0x38b   : > { %4263 = vmatprep.mubr.msk.f32.mxu1 %vm4652_vm1, %v4651_v0 }
 0x44d   : > { %v1236_v9 = vpop.f32.mrb[4].mxu0 }
 0x44e   : > { %v1241_v10 = vmul.f32 0.35355338, %v1236_v9  ;;  %v4260_v11 = vpop.f32.mrb[5].mxu0 }
 0x450   : > { %v1245_v12 = vsel %vm762_vm2, %v1241_v10, -inf }
 0x451   : > { %1246 = vmax.xlane.f32.xlu1 %v1245_v12 }
 0x452   : > { %v4833_v13 = vpop.f32.mrb[4].mxu1 }
 0x453   : > { %v4245_v14 = vpop.f32.mrb[5].mxu1 }
 0x456   : > { %v4835_v15 = vpop.f32.mrb[6].mxu1 }
 0x457   : > { %v4250_v16 = vpop.f32.mrb[7].mxu1 }
 0x45d   : > { %v1158_v17 = vpop.f32.mrb[8].mxu1 }
 0x45e   : > { %v1240_v18 = vmul.f32 0.35355338, %v1158_v17  ;;  %v4255_v19 = vpop.f32.mrb[9].mxu1 }
 0x460   : > { %v1242_v20 = vsel %vm762_vm2, %v1240_v18, -inf }
 0x461   : > { %1243 = vmax.xlane.f32.xlu0 %v1242_v20 }
 0x462   : > { %1498 = vrot.lane.b32.xlu1 %v4781_v38, %s4656_s28 }
 0x4de   : > { %v1247_v21 = vpop.xlane.xlu1 %1246 }
 0x4df   : > { %v1249_v22 = vsub.f32 %v1241_v10, %v1247_v21 }
 0x4e1   : > { %v1252_v23 = vmul.f32 1.442695, %v1249_v22 }
 0x4e2   : > { %v1499_v37 = vpop.permute.xlu1 %1498 }
 0x4e3   : > { %4577 = vpow2.f32 %v1252_v23 }
 0x4ed   : > { %v4578_v24 = vpop.eup %4577 }
 0x4ee   : > { %v1257_v25 = vsel %vm762_vm2, %v4578_v24, 0.0  ;;  %v1244_v26 = vpop.xlane.xlu0 %1243 }
 0x4ef   : > { %1258 = vadd.xlane.f32.xlu0 %v1257_v25  ;;  %v1248_v27 = vsub.f32 %v1240_v18, %v1244_v26 }
 0x4f1   : > { %v1250_v28 = vmul.f32 1.442695, %v1248_v27 }
 0x4f3   : > { %4579 = vpow2.f32 %v1250_v28 }
 0x4fd   : > { %v4580_v29 = vpop.eup %4579 }
 0x4fe   : > { %v1254_v30 = vsel %vm762_vm2, %v4580_v29, 0.0 }
 0x505   : > { %1265 = vrot.lane.b32.xlu0 %v4794_v43, %s4655_s24 }
 0x509   : > { %1342 = vrot.lane.b32.xlu0 %v4783_v40, %s4655_s24  ;;  %s4666_s24 = smov 8  }
 0x50d   : > { %1420 = vrot.lane.b32.xlu0 %v4778_v34, %s4656_s28 }
 0x52c   : > { %1255 = vadd.xlane.f32.xlu0 %v1254_v30 }
 0x542   : > { %1418 = vrot.lane.b32.xlu0 %v4778_v34, %s4657_s29 }
 0x546   : > { %1496 = vrot.lane.b32.xlu0 %v4781_v38, %s4657_s29 }
 0x57c   : > { %v1259_v31 = vpop.xlane.xlu0 %1258 }
 0x57d   : > { %4581 = vrcp.f32 %v1259_v31 }
 0x580   : > { %v1266_v32 = vpop.permute.xlu0 %1265 }
 0x581   : > { %4262 = vmatpush3.msra.mxu1 %v1266_v32 }
 0x582   : > { %4271 = vmatprep.subr.mxu1 %v4651_v0 }
 0x584   : > { %v1343_v33 = vpop.permute.xlu0 %1342 }
 0x585   : > { %4267 = vmatpush3.msra.mxu0 %v1343_v33 }
 0x586   : > { %4276 = vmatprep.subr.mxu0 %v4651_v0 }
 0x587   : > { %v4582_v35 = vpop.eup %4581 }
 0x588   : > { %v1263_v36 = vmul.f32 %v4582_v35, %v4578_v24  ;;  %v1421_v39 = vpop.permute.xlu0 %1420 }
 0x58a   : > { %4269 = vmatmul.mubr.msk.f32.vlgmr.msra.gmra.mrb[6].mxu0 %vm762_vm2, %v1263_v36 }
 0x58b   : > { %4278 = vmatprep.mubr.msk.f32.mxu0 %vm4652_vm1, %v4651_v0 }
 0x58c   : > { %4277 = vmatpush3.xpose.msk.msra.mxu0 %vm762_vm2, %v1499_v37 }
 0x58d   : > { %4286 = vmatprep.subr.mxu0 %v4651_v0 }
 0x5b9   : > { %v1256_v41 = vpop.xlane.xlu0 %1255 }
 0x5ba   : > { %4583 = vrcp.f32 %v1256_v41 }
 0x5bd   : > { %v1419_v42 = vpop.permute.xlu0 %1418 }
 0x5c1   : > { %v1497_v44 = vpop.permute.xlu0 %1496 }
 0x5c2   : > { %4279 = vmatmul.mubr.msk.f32.vlgmr.msra.gmra.mrb[8].mxu0 %vm762_vm2, %v1497_v44 }
 0x5c3   : > { %4288 = vmatprep.mubr.msk.f32.mxu0 %vm4652_vm1, %v4651_v0 }
 0x5c4   : > { %v4584_v45 = vpop.eup %4583 }
 0x5c5   : > { %v1262_v46 = vmul.f32 %v4584_v45, %v4580_v29 }
 0x5c7   : > { %4264 = vmatmul.mubr.msk.f32.vlgmr.msra.gmra.mrb[10].mxu1 %vm762_vm2, %v1262_v46 }
 0x5c8   : > { %4272 = vmatpush3.xpose.msk.msra.mxu1 %vm762_vm2, %v1421_v39  ;;  %4273 = vmatprep.mubr.msk.f32.mxu1 %vm4652_vm1, %v4651_v0 }
 0x5c9   : > { %4281 = vmatprep.subr.mxu1 %v4651_v0 }
 0x5cb   : > { %4274 = vmatmul.mubr.msk.f32.vlgmr.msra.gmra.mrb[12].mxu1 %vm762_vm2, %v1419_v42 }
 0x5cc   : > { %4283 = vmatprep.mubr.msk.f32.mxu1 %vm4652_vm1, %v4651_v0 }
 0x65d   : > { %v4870_v47 = vpop.f32.mrb[6].mxu0 }
 0x65e   : > { %v4270_v48 = vpop.f32.mrb[7].mxu0 }
 0x695   : > { %v1570_v49 = vpop.f32.mrb[8].mxu0 }
 0x696   : > { %v1575_v50 = vmul.f32 0.35355338, %v1570_v49  ;;  %v4280_v51 = vpop.f32.mrb[9].mxu0 }
 0x698   : > { %v1579_v52 = vsel %vm762_vm2, %v1575_v50, -inf }
 0x699   : > { %1580 = vmax.xlane.f32.xlu1 %v1579_v52 }
 0x69a   : > { %v4873_v53 = vpop.f32.mrb[10].mxu1 }
 0x69b   : > { %v4265_v54 = vpop.f32.mrb[11].mxu1 }
 0x69e   : > { %v1492_v55 = vpop.f32.mrb[12].mxu1 }
 0x69f   : > { %v1574_v56 = vmul.f32 0.35355338, %v1492_v55  ;;  %v4275_v57 = vpop.f32.mrb[13].mxu1 }
 0x6a1   : > { %v1576_v58 = vsel %vm762_vm2, %v1574_v56, -inf }
 0x6a2   : > { %1577 = vmax.xlane.f32.xlu0 %v1576_v58 }
 0x6aa   : > { %1674 = vrot.lane.b32.xlu1 %v4783_v40, %s4657_s29 }
 0x6ae   : > { %1752 = vrot.lane.b32.xlu1 %v4778_v34, %s4658_s30 }
 0x6b2   : > { %1750 = vrot.lane.b32.xlu1 %v4778_v34, %s4659_s15 }
 0x726   : > { %v1581_v59 = vpop.xlane.xlu1 %1580 }
 0x727   : > { %v1583_v60 = vsub.f32 %v1575_v50, %v1581_v59 }
 0x729   : > { %v1586_v61 = vmul.f32 1.442695, %v1583_v60 }
 0x72a   : > { %v1675_v62 = vpop.permute.xlu1 %1674 }
 0x72b   : > { %4585 = vpow2.f32 %v1586_v61  ;;  %4287 = vmatpush3.msra.mxu0 %v1675_v62 }
 0x72c   : > { %4296 = vmatprep.subr.mxu0 %v4651_v0 }
 0x72e   : > { %v1753_v17 = vpop.permute.xlu1 %1752 }
 0x72f   : > { %v1578_v2 = vpop.xlane.xlu0 %1577 }
 0x730   : > { %v1582_v3 = vsub.f32 %v1574_v56, %v1578_v2 }
 0x732   : > { %v1584_v4 = vmul.f32 1.442695, %v1582_v3  ;;  %v1751_v19 = vpop.permute.xlu1 %1750 }
 0x734   : > { %4587 = vpow2.f32 %v1584_v4 }
 0x735   : > { %v4586_v63 = vpop.eup %4585 }
 0x736   : > { %v1591_v1 = vsel %vm762_vm2, %v4586_v63, 0.0 }
 0x737   : > { %1592 = vadd.xlane.f32.xlu0 %v1591_v1 }
 0x73e   : > { %v4588_v5 = vpop.eup %4587 }
 0x73f   : > { %v1588_v6 = vsel %vm762_vm2, %v4588_v5, 0.0 }
 0x74d   : > { %1598 = vrot.lane.b32.xlu0 %v4794_v43, %s4657_s29  ;;  %s4667_s29 = smov 72  }
 0x76c   : > { %1589 = vadd.xlane.f32.xlu0 %v1588_v6 }
 0x782   : > { %1830 = vrot.lane.b32.xlu0 %v4781_v38, %s4658_s30 }
 0x786   : > { %1828 = vrot.lane.b32.xlu0 %v4781_v38, %s4659_s15 }
 0x7c4   : > { %v1593_v7 = vpop.xlane.xlu0 %1592 }
 0x7c5   : > { %4589 = vrcp.f32 %v1593_v7 }
 0x7c8   : > { %v1599_v8 = vpop.permute.xlu0 %1598 }
 0x7c9   : > { %4282 = vmatpush3.msra.mxu1 %v1599_v8 }
 0x7ca   : > { %4291 = vmatprep.subr.mxu1 %v4651_v0 }
 0x7cf   : > { %v4590_v9 = vpop.eup %4589 }
 0x7d0   : > { %v1597_v10 = vmul.f32 %v4590_v9, %v4586_v63 }
 0x7d2   : > { %4289 = vmatmul.mubr.msk.f32.vlgmr.msra.gmra.mrb[10].mxu0 %vm762_vm2, %v1597_v10 }
 0x7d3   : > { %4298 = vmatprep.mubr.msk.f32.mxu0 %vm4652_vm1, %v4651_v0 }
 0x7f9   : > { %v1590_v11 = vpop.xlane.xlu0 %1589 }
 0x7fa   : > { %4591 = vrcp.f32 %v1590_v11 }
 0x7fd   : > { %v1831_v12 = vpop.permute.xlu0 %1830 }
 0x7fe   : > { %4297 = vmatpush3.xpose.msk.msra.mxu0 %vm762_vm2, %v1831_v12 }
 0x7ff   : > { %4306 = vmatprep.subr.mxu0 %v4651_v0 }
 0x801   : > { %v1829_v14 = vpop.permute.xlu0 %1828 }
 0x802   : > { %4299 = vmatmul.mubr.msk.f32.vlgmr.msra.gmra.mrb[12].mxu0 %vm762_vm2, %v1829_v14 }
 0x803   : > { %4308 = vmatprep.mubr.msk.f32.mxu0 %vm4652_vm1, %v4651_v0 }
 0x804   : > { %v4592_v16 = vpop.eup %4591 }
 0x805   : > { %v1596_v18 = vmul.f32 %v4592_v16, %v4588_v5 }
 0x807   : > { %4284 = vmatmul.mubr.msk.f32.vlgmr.msra.gmra.mrb[14].mxu1 %vm762_vm2, %v1596_v18 }
 0x808   : > { %4292 = vmatpush3.xpose.msk.msra.mxu1 %vm762_vm2, %v1753_v17  ;;  %4293 = vmatprep.mubr.msk.f32.mxu1 %vm4652_vm1, %v4651_v0 }
 0x809   : > { %4301 = vmatprep.subr.mxu1 %v4651_v0 }
 0x80b   : > { %4294 = vmatmul.mubr.msk.f32.vlgmr.msra.gmra.mrb[16].mxu1 %vm762_vm2, %v1751_v19 }
 0x80c   : > { %4303 = vmatprep.mubr.msk.f32.mxu1 %vm4652_vm1, %v4651_v0 }
 0x8a5   : > { %v4908_v20 = vpop.f32.mrb[10].mxu0 }
 0x8a6   : > { %v4290_v21 = vpop.f32.mrb[11].mxu0 }
 0x8d5   : > { %v1902_v22 = vpop.f32.mrb[12].mxu0 }
 0x8d6   : > { %v1907_v23 = vmul.f32 0.35355338, %v1902_v22  ;;  %v4300_v24 = vpop.f32.mrb[13].mxu0 }
 0x8d8   : > { %v1911_v25 = vsel %vm762_vm2, %v1907_v23, -inf }
 0x8d9   : > { %1912 = vmax.xlane.f32.xlu0 %v1911_v25 }
 0x8da   : > { %v4911_v26 = vpop.f32.mrb[14].mxu1 }
 0x8db   : > { %v4285_v27 = vpop.f32.mrb[15].mxu1 }
 0x8de   : > { %v1824_v28 = vpop.f32.mrb[16].mxu1 }
 0x8df   : > { %v1906_v29 = vmul.f32 0.35355338, %v1824_v28  ;;  %v4295_v30 = vpop.f32.mrb[17].mxu1 }
 0x8e1   : > { %v1908_v31 = vsel %vm762_vm2, %v1906_v29, -inf }
 0x8e2   : > { %1909 = vmax.xlane.f32.xlu1 %v1908_v31 }
 0x8ef   : > { %1930 = vrot.lane.b32.xlu0 %v4794_v43, %s4659_s15 }
 0x966   : > { %v1913_v32 = vpop.xlane.xlu0 %1912 }
 0x967   : > { %v1915_v33 = vsub.f32 %v1907_v23, %v1913_v32 }
 0x969   : > { %v1918_v35 = vmul.f32 1.442695, %v1915_v33 }
 0x96a   : > { %v1931_v36 = vpop.permute.xlu0 %1930 }
 0x96b   : > { %4593 = vpow2.f32 %v1918_v35  ;;  %4302 = vmatpush3.msra.mxu1 %v1931_v36 }
 0x96c   : > { %4311 = vmatprep.subr.mxu1 %v4651_v0 }
 0x96f   : > { %v1910_v37 = vpop.xlane.xlu1 %1909 }
 0x970   : > { %v1914_v39 = vsub.f32 %v1906_v29, %v1910_v37 }
 0x972   : > { %v1916_v41 = vmul.f32 1.442695, %v1914_v39 }
 0x974   : > { %4595 = vpow2.f32 %v1916_v41 }
 0x975   : > { %v4594_v42 = vpop.eup %4593 }
 0x976   : > { %v1923_v44 = vsel %vm762_vm2, %v4594_v42, 0.0 }
 0x977   : > { %1924 = vadd.xlane.f32.xlu1 %v1923_v44 }
 0x97e   : > { %v4596_v45 = vpop.eup %4595 }
 0x97f   : > { %v1920_v46 = vsel %vm762_vm2, %v4596_v45, 0.0 }
 0x980   : > { %1921 = vadd.xlane.f32.xlu0 %v1920_v46 }
 0x988   : > { %2006 = vrot.lane.b32.xlu1 %v4783_v40, %s4659_s15  ;;  %s630_s15 = scalar_lea.vmem %s5206_s12, %s5209_s26 }
 0x98c   : > { %2084 = vrot.lane.b32.xlu1 %v4778_v34, %s4660_s16 }
 0x990   : > { %2082 = vrot.lane.b32.xlu1 %v4778_v34, %s4661_s18 }
 0x996   : > { %2162 = vrot.lane.b32.xlu0 %v4781_v38, %s4660_s16 }
 0x99a   : > { %2160 = vrot.lane.b32.xlu0 %v4781_v38, %s4661_s18 }
 0xa04   : > { %v1925_v48 = vpop.xlane.xlu1 %1924 }
 0xa05   : > { %4597 = vrcp.f32 %v1925_v48 }
 0xa08   : > { %v2007_v49 = vpop.permute.xlu1 %2006 }
 0xa09   : > { %4307 = vmatpush3.msra.mxu0 %v2007_v49 }
 0xa0a   : > { %4316 = vmatprep.subr.mxu0 %v4651_v0 }
 0xa0c   : > { %v2085_v57 = vpop.permute.xlu1 %2084 }
 0xa0d   : > { %v1922_v50 = vpop.xlane.xlu0 %1921 }
 0xa0e   : > { %4599 = vrcp.f32 %v1922_v50 }
 0xa0f   : > { %v4598_v51 = vpop.eup %4597 }
 0xa10   : > { %v1929_v52 = vmul.f32 %v4598_v51, %v4594_v42  ;;  %v2083_v59 = vpop.permute.xlu1 %2082 }
 0xa11   : > { %v2163_v54 = vpop.permute.xlu0 %2162 }
 0xa12   : > { %4309 = vmatmul.mubr.msk.f32.vlgmr.msra.gmra.mrb[14].mxu0 %vm762_vm2, %v1929_v52 }
 0xa13   : > { %4317 = vmatpush3.xpose.msk.msra.mxu0 %vm762_vm2, %v2163_v54  ;;  %4318 = vmatprep.mubr.msk.f32.mxu0 %vm4652_vm1, %v4651_v0 }
 0xa14   : > { %4326 = vmatprep.subr.mxu0 %v4651_v0 }
 0xa15   : > { %v2161_v55 = vpop.permute.xlu0 %2160 }
 0xa16   : > { %4319 = vmatmul.mubr.msk.f32.vlgmr.msra.gmra.mrb[16].mxu0 %vm762_vm2, %v2161_v55 }
 0xa17   : > { %4328 = vmatprep.mubr.msk.f32.mxu0 %vm4652_vm1, %v4651_v0 }
 0xa18   : > { %v4600_v56 = vpop.eup %4599 }
 0xa19   : > { %v1928_v58 = vmul.f32 %v4600_v56, %v4596_v45 }
 0xa1b   : > { %4304 = vmatmul.mubr.msk.f32.vlgmr.msra.gmra.mrb[18].mxu1 %vm762_vm2, %v1928_v58 }
 0xa1c   : > { %4312 = vmatpush3.xpose.msk.msra.mxu1 %vm762_vm2, %v2085_v57  ;;  %4313 = vmatprep.mubr.msk.f32.mxu1 %vm4652_vm1, %v4651_v0 }
 0xa1d   : > { %4321 = vmatprep.subr.mxu1 %v4651_v0 }
 0xa1f   : > { %4314 = vmatmul.mubr.msk.f32.vlgmr.msra.gmra.mrb[20].mxu1 %vm762_vm2, %v2083_v59 }
 0xa20   : > { %4323 = vmatprep.mubr.msk.f32.mxu1 %vm4652_vm1, %v4651_v0 }
 0xae5   : > { %v4946_v60 = vpop.f32.mrb[14].mxu0 }
 0xae6   : > { %v4310_v61 = vpop.f32.mrb[15].mxu0 }
 0xae9   : > { %v2234_v62 = vpop.f32.mrb[16].mxu0 }
 0xaea   : > { %v2239_v63 = vmul.f32 0.35355338, %v2234_v62  ;;  %v4320_v1 = vpop.f32.mrb[17].mxu0 }
 0xaec   : > { %v2243_v2 = vsel %vm762_vm2, %v2239_v63, -inf }
 0xaed   : > { %2244 = vmax.xlane.f32.xlu0 %v2243_v2 }
 0xaee   : > { %v4949_v3 = vpop.f32.mrb[18].mxu1 }
 0xaef   : > { %v4305_v4 = vpop.f32.mrb[19].mxu1 }
 0xaf2   : > { %v2156_v5 = vpop.f32.mrb[20].mxu1 }
 0xaf3   : > { %v2238_v6 = vmul.f32 0.35355338, %v2156_v5  ;;  %v4315_v7 = vpop.f32.mrb[21].mxu1 }
 0xaf5   : > { %v2240_v8 = vsel %vm762_vm2, %v2238_v6, -inf }
 0xaf6   : > { %2241 = vmax.xlane.f32.xlu1 %v2240_v8 }
 0xb03   : > { %2262 = vrot.lane.b32.xlu0 %v4794_v43, %s4661_s18 }
 0xb7a   : > { %v2245_v9 = vpop.xlane.xlu0 %2244 }
 0xb7b   : > { %v2247_v10 = vsub.f32 %v2239_v63, %v2245_v9 }
 0xb7d   : > { %v2250_v11 = vmul.f32 1.442695, %v2247_v10 }
 0xb7e   : > { %v2263_v12 = vpop.permute.xlu0 %2262 }
 0xb7f   : > { %4601 = vpow2.f32 %v2250_v11  ;;  %4322 = vmatpush3.msra.mxu1 %v2263_v12 }
 0xb80   : > { %4331 = vmatprep.subr.mxu1 %v4651_v0 }
 0xb83   : > { %v2242_v14 = vpop.xlane.xlu1 %2241 }
 0xb84   : > { %v2246_v16 = vsub.f32 %v2238_v6, %v2242_v14 }
 0xb86   : > { %v2248_v17 = vmul.f32 1.442695, %v2246_v16 }
 0xb88   : > { %4603 = vpow2.f32 %v2248_v17 }
 0xb89   : > { %v4602_v18 = vpop.eup %4601 }
 0xb8a   : > { %v2255_v19 = vsel %vm762_vm2, %v4602_v18, 0.0 }
 0xb8b   : > { %2256 = vadd.xlane.f32.xlu1 %v2255_v19 }
 0xb92   : > { %v4604_v21 = vpop.eup %4603 }
 0xb93   : > { %v2252_v22 = vsel %vm762_vm2, %v4604_v21, 0.0 }
 0xb94   : > { %2253 = vadd.xlane.f32.xlu0 %v2252_v22 }
 0xb9c   : > { %2338 = vrot.lane.b32.xlu1 %v4783_v40, %s4661_s18  ;;  %s635_s18 = scalar_lea.vmem %s5207_s13, %s4123_s14 }
 0xba0   : > { %2416 = vrot.lane.b32.xlu1 %v4778_v34, %s4662_s19 }
 0xba4   : > { %2414 = vrot.lane.b32.xlu1 %v4778_v34, %s4663_s20 }
 0xbaa   : > { %2494 = vrot.lane.b32.xlu0 %v4781_v38, %s4662_s19 }
 0xbae   : > { %2492 = vrot.lane.b32.xlu0 %v4781_v38, %s4663_s20 }
 0xc18   : > { %v2257_v23 = vpop.xlane.xlu1 %2256 }
 0xc19   : > { %4605 = vrcp.f32 %v2257_v23 }
 0xc1c   : > { %v2339_v24 = vpop.permute.xlu1 %2338 }
 0xc1d   : > { %4327 = vmatpush3.msra.mxu0 %v2339_v24 }
 0xc1e   : > { %4336 = vmatprep.subr.mxu0 %v4651_v0 }
 0xc20   : > { %v2417_v32 = vpop.permute.xlu1 %2416 }
 0xc21   : > { %v2254_v25 = vpop.xlane.xlu0 %2253 }
 0xc22   : > { %4607 = vrcp.f32 %v2254_v25 }
 0xc23   : > { %v4606_v27 = vpop.eup %4605 }
 0xc24   : > { %v2261_v28 = vmul.f32 %v4606_v27, %v4602_v18  ;;  %v2415_v35 = vpop.permute.xlu1 %2414 }
 0xc25   : > { %v2495_v29 = vpop.permute.xlu0 %2494 }
 0xc26   : > { %4329 = vmatmul.mubr.msk.f32.vlgmr.msra.gmra.mrb[18].mxu0 %vm762_vm2, %v2261_v28 }
 0xc27   : > { %4337 = vmatpush3.xpose.msk.msra.mxu0 %vm762_vm2, %v2495_v29  ;;  %4338 = vmatprep.mubr.msk.f32.mxu0 %vm4652_vm1, %v4651_v0 }
 0xc28   : > { %4346 = vmatprep.subr.mxu0 %v4651_v0 }
 0xc29   : > { %v2493_v30 = vpop.permute.xlu0 %2492 }
 0xc2a   : > { %4339 = vmatmul.mubr.msk.f32.vlgmr.msra.gmra.mrb[20].mxu0 %vm762_vm2, %v2493_v30 }
 0xc2b   : > { %4348 = vmatprep.mubr.msk.f32.mxu0 %vm4652_vm1, %v4651_v0 }
 0xc2c   : > { %v4608_v31 = vpop.eup %4607 }
 0xc2d   : > { %v2260_v33 = vmul.f32 %v4608_v31, %v4604_v21 }
 0xc2f   : > { %4324 = vmatmul.mubr.msk.f32.vlgmr.msra.gmra.mrb[22].mxu1 %vm762_vm2, %v2260_v33 }
 0xc30   : > { %4332 = vmatpush3.xpose.msk.msra.mxu1 %vm762_vm2, %v2417_v32  ;;  %4333 = vmatprep.mubr.msk.f32.mxu1 %vm4652_vm1, %v4651_v0 }
 0xc31   : > { %4341 = vmatprep.subr.mxu1 %v4651_v0 }
 0xc33   : > { %4334 = vmatmul.mubr.msk.f32.vlgmr.msra.gmra.mrb[24].mxu1 %vm762_vm2, %v2415_v35 }
 0xc34   : > { %4343 = vmatprep.mubr.msk.f32.mxu1 %vm4652_vm1, %v4651_v0 }
 0xcf9   : > { %v4984_v36 = vpop.f32.mrb[18].mxu0 }
 0xcfa   : > { %v4330_v37 = vpop.f32.mrb[19].mxu0 }
 0xcfd   : > { %v2566_v39 = vpop.f32.mrb[20].mxu0 }
 0xcfe   : > { %v2571_v41 = vmul.f32 0.35355338, %v2566_v39  ;;  %v4340_v42 = vpop.f32.mrb[21].mxu0 }
 0xd00   : > { %v2575_v44 = vsel %vm762_vm2, %v2571_v41, -inf }
 0xd01   : > { %2576 = vmax.xlane.f32.xlu0 %v2575_v44 }
 0xd02   : > { %v4987_v45 = vpop.f32.mrb[22].mxu1 }
 0xd03   : > { %v4325_v46 = vpop.f32.mrb[23].mxu1 }
 0xd06   : > { %v2488_v48 = vpop.f32.mrb[24].mxu1 }
 0xd07   : > { %v2570_v49 = vmul.f32 0.35355338, %v2488_v48  ;;  %v4335_v50 = vpop.f32.mrb[25].mxu1 }
 0xd09   : > { %v2572_v51 = vsel %vm762_vm2, %v2570_v49, -inf }
 0xd0a   : > { %2573 = vmax.xlane.f32.xlu1 %v2572_v51 }
 0xd17   : > { %2594 = vrot.lane.b32.xlu0 %v4794_v43, %s4663_s20 }
 0xd8e   : > { %v2577_v52 = vpop.xlane.xlu0 %2576 }
 0xd8f   : > { %v2579_v54 = vsub.f32 %v2571_v41, %v2577_v52 }
 0xd91   : > { %v2582_v55 = vmul.f32 1.442695, %v2579_v54 }
 0xd92   : > { %v2595_v56 = vpop.permute.xlu0 %2594 }
 0xd93   : > { %4609 = vpow2.f32 %v2582_v55  ;;  %4342 = vmatpush3.msra.mxu1 %v2595_v56 }
 0xd94   : > { %4351 = vmatprep.subr.mxu1 %v4651_v0 }
 0xd97   : > { %v2574_v57 = vpop.xlane.xlu1 %2573 }
 0xd98   : > { %v2578_v58 = vsub.f32 %v2570_v49, %v2574_v57 }
 0xd9a   : > { %v2580_v59 = vmul.f32 1.442695, %v2578_v58 }
 0xd9c   : > { %4611 = vpow2.f32 %v2580_v59 }
 0xd9d   : > { %v4610_v61 = vpop.eup %4609 }
 0xd9e   : > { %v2587_v62 = vsel %vm762_vm2, %v4610_v61, 0.0 }
 0xd9f   : > { %2588 = vadd.xlane.f32.xlu1 %v2587_v62 }
 0xda6   : > { %v4612_v63 = vpop.eup %4611 }
 0xda7   : > { %v2584_v1 = vsel %vm762_vm2, %v4612_v63, 0.0 }
 0xda8   : > { %2585 = vadd.xlane.f32.xlu0 %v2584_v1 }
 0xdb0   : > { %2670 = vrot.lane.b32.xlu1 %v4783_v40, %s4663_s20 }
 0xdb4   : > { %2748 = vrot.lane.b32.xlu1 %v4778_v34, %s4664_s21 }
 0xdb8   : > { %2746 = vrot.lane.b32.xlu1 %v4778_v34, %s4665_s22 }
 0xdbe   : > { %2826 = vrot.lane.b32.xlu0 %v4781_v38, %s4664_s21 }
 0xdc2   : > { %2824 = vrot.lane.b32.xlu0 %v4781_v38, %s4665_s22 }
 0xe2c   : > { %v2589_v2 = vpop.xlane.xlu1 %2588 }
 0xe2d   : > { %4613 = vrcp.f32 %v2589_v2 }
 0xe30   : > { %v2671_v4 = vpop.permute.xlu1 %2670 }
 0xe31   : > { %4347 = vmatpush3.msra.mxu0 %v2671_v4 }
 0xe32   : > { %4356 = vmatprep.subr.mxu0 %v4651_v0 }
 0xe34   : > { %v2749_v11 = vpop.permute.xlu1 %2748 }
 0xe35   : > { %v2586_v5 = vpop.xlane.xlu0 %2585 }
 0xe36   : > { %4615 = vrcp.f32 %v2586_v5 }
 0xe37   : > { %v4614_v6 = vpop.eup %4613 }
 0xe38   : > { %v2593_v7 = vmul.f32 %v4614_v6, %v4610_v61  ;;  %v2747_v14 = vpop.permute.xlu1 %2746 }
 0xe39   : > { %v2827_v8 = vpop.permute.xlu0 %2826 }
 0xe3a   : > { %4349 = vmatmul.mubr.msk.f32.vlgmr.msra.gmra.mrb[22].mxu0 %vm762_vm2, %v2593_v7 }
 0xe3b   : > { %4357 = vmatpush3.xpose.msk.msra.mxu0 %vm762_vm2, %v2827_v8  ;;  %4358 = vmatprep.mubr.msk.f32.mxu0 %vm4652_vm1, %v4651_v0 }
 0xe3c   : > { %4366 = vmatprep.subr.mxu0 %v4651_v0 }
 0xe3d   : > { %v2825_v9 = vpop.permute.xlu0 %2824 }
 0xe3e   : > { %4359 = vmatmul.mubr.msk.f32.vlgmr.msra.gmra.mrb[24].mxu0 %vm762_vm2, %v2825_v9 }
 0xe3f   : > { %4368 = vmatprep.mubr.msk.f32.mxu0 %vm4652_vm1, %v4651_v0 }
 0xe40   : > { %v4616_v10 = vpop.eup %4615 }
 0xe41   : > { %v2592_v12 = vmul.f32 %v4616_v10, %v4612_v63 }
 0xe43   : > { %4344 = vmatmul.mubr.msk.f32.vlgmr.msra.gmra.mrb[26].mxu1 %vm762_vm2, %v2592_v12 }
 0xe44   : > { %4352 = vmatpush3.xpose.msk.msra.mxu1 %vm762_vm2, %v2749_v11  ;;  %4353 = vmatprep.mubr.msk.f32.mxu1 %vm4652_vm1, %v4651_v0 }
 0xe45   : > { %4361 = vmatprep.subr.mxu1 %v4651_v0 }
 0xe47   : > { %4354 = vmatmul.mubr.msk.f32.vlgmr.msra.gmra.mrb[28].mxu1 %vm762_vm2, %v2747_v14 }
 0xe48   : > { %4363 = vmatprep.mubr.msk.f32.mxu1 %vm4652_vm1, %v4651_v0 }
 0xf0d   : > { %v5022_v16 = vpop.f32.mrb[22].mxu0 }
 0xf0e   : > { %v4350_v17 = vpop.f32.mrb[23].mxu0 }
 0xf11   : > { %v2898_v18 = vpop.f32.mrb[24].mxu0 }
 0xf12   : > { %v2903_v19 = vmul.f32 0.35355338, %v2898_v18  ;;  %v4360_v21 = vpop.f32.mrb[25].mxu0 }
 0xf14   : > { %v2907_v22 = vsel %vm762_vm2, %v2903_v19, -inf }
 0xf15   : > { %2908 = vmax.xlane.f32.xlu0 %v2907_v22 }
 0xf16   : > { %v5025_v23 = vpop.f32.mrb[26].mxu1 }
 0xf17   : > { %v4345_v24 = vpop.f32.mrb[27].mxu1 }
 0xf1a   : > { %v2820_v25 = vpop.f32.mrb[28].mxu1 }
 0xf1b   : > { %v2902_v27 = vmul.f32 0.35355338, %v2820_v25  ;;  %v4355_v28 = vpop.f32.mrb[29].mxu1 }
 0xf1d   : > { %v2904_v29 = vsel %vm762_vm2, %v2902_v27, -inf }
 0xf1e   : > { %2905 = vmax.xlane.f32.xlu1 %v2904_v29 }
 0xf2b   : > { %2926 = vrot.lane.b32.xlu0 %v4794_v43, %s4665_s22 }
 0xfa2   : > { %v2909_v30 = vpop.xlane.xlu0 %2908 }
 0xfa3   : > { %v2911_v31 = vsub.f32 %v2903_v19, %v2909_v30 }
 0xfa5   : > { %v2914_v32 = vmul.f32 1.442695, %v2911_v31 }
 0xfa6   : > { %v2927_v33 = vpop.permute.xlu0 %2926 }
 0xfa7   : > { %4617 = vpow2.f32 %v2914_v32  ;;  %4362 = vmatpush3.msra.mxu1 %v2927_v33 }
 0xfa8   : > { %4371 = vmatprep.subr.mxu1 %v4651_v0 }
 0xfab   : > { %v2906_v35 = vpop.xlane.xlu1 %2905 }
 0xfac   : > { %v2910_v37 = vsub.f32 %v2902_v27, %v2906_v35 }
 0xfae   : > { %v2912_v39 = vmul.f32 1.442695, %v2910_v37 }
 0xfb0   : > { %4619 = vpow2.f32 %v2912_v39 }
 0xfb1   : > { %v4618_v41 = vpop.eup %4617 }
 0xfb2   : > { %v2919_v42 = vsel %vm762_vm2, %v4618_v41, 0.0 }
 0xfb3   : > { %2920 = vadd.xlane.f32.xlu1 %v2919_v42 }
 0xfba   : > { %v4620_v44 = vpop.eup %4619 }
 0xfbb   : > { %v2916_v46 = vsel %vm762_vm2, %v4620_v44, 0.0 }
 0xfbc   : > { %2917 = vadd.xlane.f32.xlu0 %v2916_v46 }
 0xfc4   : > { %3002 = vrot.lane.b32.xlu1 %v4783_v40, %s4665_s22  ;;  %s624_s22 = scalar_lea.vmem %s5204_s10, %s5209_s26 }
 0xfc8   : > { %3080 = vrot.lane.b32.xlu1 %v4778_v34, %s4666_s24 }
 0xfcc   : > { %3078 = vrot.lane.b32.xlu1 %v4778_v34, %s4667_s29 }
 0xfd2   : > { %3158 = vrot.lane.b32.xlu0 %v4781_v38, %s4666_s24 }
 0xfd6   : > { %3156 = vrot.lane.b32.xlu0 %v4781_v38, %s4667_s29 }
0x1040   : > { %v2921_v48 = vpop.xlane.xlu1 %2920 }
0x1041   : > { %4621 = vrcp.f32 %v2921_v48 }
0x1044   : > { %v3003_v49 = vpop.permute.xlu1 %3002 }
0x1045   : > { %4367 = vmatpush3.msra.mxu0 %v3003_v49 }
0x1046   : > { %4376 = vmatprep.subr.mxu0 %v4651_v0 }
0x1048   : > { %v3081_v55 = vpop.permute.xlu1 %3080 }
0x1049   : > { %v2918_v50 = vpop.xlane.xlu0 %2917 }
0x104a   : > { %4623 = vrcp.f32 %v2918_v50 }
0x104b   : > { %v4622_v51 = vpop.eup %4621 }
0x104c   : > { %v2925_v52 = vmul.f32 %v4622_v51, %v4618_v41  ;;  %v3079_v57 = vpop.permute.xlu1 %3078 }
0x104d   : > { %v3159_v54 = vpop.permute.xlu0 %3158 }
0x104e   : > { %4369 = vmatmul.mubr.msk.f32.vlgmr.msra.gmra.mrb[26].mxu0 %vm762_vm2, %v2925_v52 }
0x104f   : > { %4377 = vmatpush3.xpose.msk.msra.mxu0 %vm762_vm2, %v3159_v54  ;;  %4378 = vmatprep.mubr.msk.f32.mxu0 %vm4652_vm1, %v4651_v0 }
0x1050   : > { %4386 = vmatprep.subr.mxu0 %v4651_v0 }
0x1051   : > { %v3157_v34 = vpop.permute.xlu0 %3156 }
0x1052   : > { %4379 = vmatmul.mubr.msk.f32.vlgmr.msra.gmra.mrb[28].mxu0 %vm762_vm2, %v3157_v34 }
0x1053   : > { %4388 = vmatprep.mubr.msk.f32.mxu0 %vm4652_vm1, %v4651_v0 }
0x1054   : > { %v4624_v38 = vpop.eup %4623 }
0x1055   : > { %v2924_v56 = vmul.f32 %v4624_v38, %v4620_v44 }
0x1057   : > { %4364 = vmatmul.mubr.msk.f32.vlgmr.msra.gmra.mrb[30].mxu1 %vm762_vm2, %v2924_v56 }
0x1058   : > { %4372 = vmatpush3.xpose.msk.msra.mxu1 %vm762_vm2, %v3081_v55  ;;  %4373 = vmatprep.mubr.msk.f32.mxu1 %vm4652_vm1, %v4651_v0 }
0x1059   : > { %4381 = vmatprep.subr.mxu1 %v4651_v0 }
0x105b   : > { %4374 = vmatmul.mubr.msk.f32.vlgmr.msra.gmra.mrb[32].mxu1 %vm762_vm2, %v3079_v57 }
0x105c   : > { %4383 = vmatprep.mubr.msk.f32.mxu1 %vm4652_vm1, %v4651_v0 }
0x1121   : > { %v3074_v58 = vpop.f32.mrb[26].mxu0 }
0x1122   : > { %v4370_v59 = vpop.f32.mrb[27].mxu0 }
0x1125   : > { %v3230_v61 = vpop.f32.mrb[28].mxu0 }
0x1126   : > { %v3235_v62 = vmul.f32 0.35355338, %v3230_v61  ;;  %v4380_v63 = vpop.f32.mrb[29].mxu0 }
0x1128   : > { %v3239_v1 = vsel %vm762_vm2, %v3235_v62, -inf }
0x1129   : > { %3240 = vmax.xlane.f32.xlu0 %v3239_v1 }
0x112a   : > { %v2998_v2 = vpop.f32.mrb[30].mxu1 }
0x112b   : > { %v4365_v4 = vpop.f32.mrb[31].mxu1 }
0x112e   : > { %v3152_v5 = vpop.f32.mrb[32].mxu1 }
0x112f   : > { %v3234_v6 = vmul.f32 0.35355338, %v3152_v5  ;;  %v4375_v7 = vpop.f32.mrb[33].mxu1 }
0x1131   : > { %v3236_v8 = vsel %vm762_vm2, %v3234_v6, -inf }
0x1132   : > { %3237 = vmax.xlane.f32.xlu1 %v3236_v8 }
0x11b6   : > { %v3241_v9 = vpop.xlane.xlu0 %3240 }
0x11b7   : > { %v3243_v10 = vsub.f32 %v3235_v62, %v3241_v9 }
0x11b9   : > { %v3246_v11 = vmul.f32 1.442695, %v3243_v10 }
0x11bb   : > { %4625 = vpow2.f32 %v3246_v11 }
0x11bf   : > { %v3238_v0 = vpop.xlane.xlu1 %3237 }
0x11c0   : > { %v3242_v12 = vsub.f32 %v3234_v6, %v3238_v0  ;;  %v4641_v0 = vld [vmem:[%s4762_s17 + $0x8] sm:$0xff] }
0x11c2   : > { %v3244_v14 = vmul.f32 1.442695, %v3242_v12 }
0x11c4   : > { %4627 = vpow2.f32 %v3244_v14  ;;  %v4642_v14 = vld [vmem:[%s4762_s17] sm:$0xff]  ;;  %s616_s17 = scalar_lea.vmem %s5202_s8, %s5209_s26 }
0x11c5   : > { %v4626_v17 = vpop.eup %4625 }
0x11c6   : > { %v3251_v18 = vsel %vm762_vm2, %v4626_v17, 0.0 }
0x11c7   : > { %3252 = vadd.xlane.f32.xlu1 %v3251_v18 }
0x11ce   : > { %v4628_v19 = vpop.eup %4627 }
0x11cf   : > { %v3248_v21 = vsel %vm762_vm2, %v4628_v19, 0.0 }
0x11d0   : > { %3249 = vadd.xlane.f32.xlu0 %v3248_v21 }
0x11d8   : > { %3334 = vrot.lane.b32.xlu1 %v4783_v40, %s4667_s29 }
0x11dc   : > { %3412 = vrot.lane.b32.xlu1 %v4873_v53, %s4666_s24 }
0x11e0   : > { %3420 = vrot.lane.b32.xlu1 %v4911_v26, %s4664_s21 }
0x11e4   : > { %3428 = vrot.lane.b32.xlu1 %v4949_v3, %s4662_s19 }
0x11e6   : > { %3258 = vrot.lane.b32.xlu0 %v4794_v43, %s4667_s29  ;;  %s5134_s29 = scalar_lea.vmem %s5203_s9, %s4124_s27  ;;  %s627_s27 = scalar_lea.vmem %s5205_s11, %s5209_s26 }
0x11e8   : > { %3436 = vrot.lane.b32.xlu1 %v4987_v45, %s4660_s16 }
0x11ea   : > { %3414 = vrot.lane.b32.xlu0 %v4870_v47, %s4666_s24 }
0x11ec   : > { %3444 = vrot.lane.b32.xlu1 %v5025_v23, %s4658_s30 }
0x11ee   : > { %3422 = vrot.lane.b32.xlu0 %v4908_v20, %s4664_s21 }
0x11f0   : > { %3452 = vrot.lane.b32.xlu1 %v2998_v2, %s4656_s28 }
0x11f2   : > { %3430 = vrot.lane.b32.xlu0 %v4946_v60, %s4662_s19  ;;  %s602_s19 = scalar_lea.vmem %s5198_s4, %s5209_s26 }
0x11f3   : > { %v4110_v7 = vld [vmem:[%s602_s19] ss:$0 sm:$0xff] }
0x11f6   : > { %3438 = vrot.lane.b32.xlu0 %v4984_v36, %s4660_s16 }
0x11fa   : > { %3446 = vrot.lane.b32.xlu0 %v5022_v16, %s4658_s30  ;;  %s4125_s30 = sshll.u32 %s5209_s26, 6 }
0x11fb   : > { %s599_s16 = scalar_lea.vmem %s5197_s3, %s4125_s30  ;;  %s613_s21 = scalar_lea.vmem %s5201_s7, %s4125_s30 }
0x11fc   : > { %v655_v36 = vld [vmem:[%s599_s16] sm:$0xff]  ;;  %v656_v45 = vld [vmem:[%s599_s16 + $0x8] sm:$0xff]  ;;  %v657_v16 = vld [vmem:[%s599_s16 + $0x10] sm:$0xff] }
0x11fd   : > { %v4480_v22 = vpack.c.bf16 %v656_v45, %v655_v36  ;;  %v658_v23 = vld [vmem:[%s599_s16 + $0x18] sm:$0xff]  ;;  %v659_v25 = vld [vmem:[%s599_s16 + $0x20] sm:$0xff]  ;;  %v660_v27 = vld [vmem:[%s599_s16 + $0x28] sm:$0xff] }
0x11fe   : > { %3454 = vrot.lane.b32.xlu0 %v3074_v58, %s4656_s28  ;;  %v4484_v24 = vpack.c.bf16 %v658_v23, %v657_v16  ;;  %v661_v28 = vld [vmem:[%s599_s16 + $0x30] sm:$0xff]  ;;  %v4488_v29 = vpack.c.bf16 %v660_v27, %v659_v25  ;;  %v662_v30 = vld [vmem:[%s599_s16 + $0x38] sm:$0xff]  ;;  %v3620_v45 = vld [vmem:[%s613_s21] sm:$0xff]  ;;  %s605_s28 = scalar_lea.vmem %s5199_s5, %s5209_s26 }
0x11ff   : > { %v4492_v31 = vpack.c.bf16 %v662_v30, %v661_v28  ;;  %v3621_v16 = vld [vmem:[%s613_s21 + $0x8] sm:$0xff]  ;;  %v3622_v23 = vld [vmem:[%s613_s21 + $0x10] sm:$0xff]  ;;  %v3624_v27 = vld [vmem:[%s613_s21 + $0x20] sm:$0xff] }
0x1200   : > { %v3625_v28 = vld [vmem:[%s613_s21 + $0x28] sm:$0xff]  ;;  %v3626_v30 = vld [vmem:[%s613_s21 + $0x30] sm:$0xff] }
0x1254   : > { %v3253_v40 = vpop.xlane.xlu1 %3252 }
0x1255   : > { %4629 = vrcp.f32 %v3253_v40 }
0x1258   : > { %v3335_v43 = vpop.permute.xlu1 %3334 }
0x1259   : > { %4387 = vmatpush3.msra.mxu0 %v3335_v43 }
0x125a   : > { %4481 = vmatprep.subr.bf16.mxu0 %v4480_v22 }
0x125c   : > { %v3413_v41 = vpop.permute.xlu1 %3412 }
0x125d   : > { %v3250_v47 = vpop.xlane.xlu0 %3249  ;;  %v3466_v54 = vsel %vm762_vm2, %v4833_v13, %v3413_v41  ;;  %v3721_v41 = vld [vmem:[%s5134_s29 + $0x18] sm:$0xff] }
0x125e   : > { %4631 = vrcp.f32 %v3250_v47 }
0x125f   : > { %v4630_v53 = vpop.eup %4629 }
0x1260   : > { %v3257_v20 = vmul.f32 %v4630_v53, %v4626_v17  ;;  %v3421_v44 = vpop.permute.xlu1 %3420 }
0x1261   : > { %v3259_v26 = vpop.permute.xlu0 %3258  ;;  %v3469_v38 = vsel %vm3468_vm3, %v3466_v54, %v3421_v44  ;;  %v3722_v44 = vld [vmem:[%s5134_s29 + $0x20] sm:$0xff]  ;;  %v3727_v54 = vld [vmem:[%s5134_s29 + $0x48] sm:$0xff] }
0x1262   : > { %4382 = vmatpush3.msra.mxu1 %v3259_v26  ;;  %4389 = vmatmul.mubr.msk.f32.vlgmr.msra.gmra.mrb[30].mxu0 %vm762_vm2, %v3257_v20 }
0x1263   : > { %4483 = vmatpush3.bf16.msra.mxu0 %v4480_v22  ;;  %v4496_v22 = vpack.c.bf16 %v3621_v16, %v3620_v45 }
0x1264   : > { %4485 = vmatprep.subr.bf16.mxu0 %v4484_v24  ;;  %v3429_v48 = vpop.permute.xlu1 %3428 }
0x1265   : > { %v3415_v39 = vpop.permute.xlu0 %3414  ;;  %v3472_v57 = vsel %vm3471_vm4, %v3469_v38, %v3429_v48  ;;  %v3728_v38 = vld [vmem:[%s5134_s29 + $0x50] sm:$0xff] }
0x1266   : > { %v3467_v55 = vsel %vm762_vm2, %v4835_v15, %v3415_v39 }
0x1267   : > { %4487 = vmatpush3.bf16.msra.mxu0 %v4484_v24  ;;  %v3623_v24 = vld [vmem:[%s613_s21 + $0x18] sm:$0xff] }
0x1268   : > { %v4632_v60 = vpop.eup %4631  ;;  %4489 = vmatprep.subr.bf16.mxu0 %v4488_v29  ;;  %v3437_v50 = vpop.permute.xlu1 %3436  ;;  %v4500_v25 = vpack.c.bf16 %v3623_v24, %v3622_v23 }
0x1269   : > { %v3256_v3 = vmul.f32 %v4632_v60, %v4628_v19  ;;  %v3423_v42 = vpop.permute.xlu0 %3422  ;;  %v3475_v59 = vsel %vm3474_vm5, %v3472_v57, %v3437_v50  ;;  %v3725_v50 = vld [vmem:[%s5134_s29 + $0x38] sm:$0xff]  ;;  %v3730_v57 = vld [vmem:[%s5134_s29 + $0x60] sm:$0xff] }
0x126a   : > { %v3470_v58 = vsel %vm3468_vm3, %v3467_v55, %v3423_v42  ;;  %v3729_v55 = vld [vmem:[%s5134_s29 + $0x58] sm:$0xff] }
0x126b   : > { %4384 = vmatmul.mubr.msk.f32.vlgmr.msra.gmra.mrb[34].mxu1 %vm762_vm2, %v3256_v3  ;;  %4491 = vmatpush3.bf16.msra.mxu0 %v4488_v29  ;;  %v4504_v29 = vpack.c.bf16 %v3625_v28, %v3624_v27 }
0x126c   : > { %4493 = vmatprep.subr.bf16.mxu0 %v4492_v31  ;;  %v3445_v52 = vpop.permute.xlu1 %3444 }
0x126d   : > { %v3431_v46 = vpop.permute.xlu0 %3430  ;;  %v3478_v62 = vsel %vm3477_vm6, %v3475_v59, %v3445_v52  ;;  %v3726_v52 = vld [vmem:[%s5134_s29 + $0x40] sm:$0xff] }
0x126e   : > { %v3473_v61 = vsel %vm3471_vm4, %v3470_v58, %v3431_v46  ;;  %v3723_v46 = vld [vmem:[%s5134_s29 + $0x28] sm:$0xff] }
0x126f   : > { %4495 = vmatpush3.bf16.msra.mxu0 %v4492_v31  ;;  %v3627_v31 = vld [vmem:[%s613_s21 + $0x38] sm:$0xff]  ;;  %v4520_v48 = vpack.c.bf16 %v3723_v46, %v3722_v44  ;;  %v3731_v58 = vld [vmem:[%s5134_s29 + $0x68] sm:$0xff] }
0x1270   : > { %v3453_v56 = vpop.permute.xlu1 %3452  ;;  %4497 = vmatprep.subr.bf16.mxu0 %v4496_v22  ;;  %v4536_v59 = vpack.c.bf16 %v3731_v58, %v3730_v57 }
0x1271   : > { %v3439_v49 = vpop.permute.xlu0 %3438  ;;  %v3481_v13 = vsel %vm3480_vm7, %v3478_v62, %v3453_v56  ;;  %v4532_v56 = vpack.c.bf16 %v3729_v55, %v3728_v38 }
0x1272   : > { %v3476_v63 = vsel %vm3474_vm5, %v3473_v61, %v3439_v49  ;;  %v3724_v49 = vld [vmem:[%s5134_s29 + $0x30] sm:$0xff] }
0x1275   : > { %v3447_v51 = vpop.permute.xlu0 %3446 }
0x1276   : > { %v3479_v2 = vsel %vm3477_vm6, %v3476_v63, %v3447_v51  ;;  %v4524_v51 = vpack.c.bf16 %v3725_v50, %v3724_v49  ;;  %v4119_v49 = vld [vmem:[%s627_s27] ss:$0 sm:$0xff] }
0x1279   : > { %v3455_v34 = vpop.permute.xlu0 %3454 }
0x127a   : > { %v3482_v5 = vsel %vm3480_vm7, %v3479_v2, %v3455_v34  ;;  %v4528_v34 = vpack.c.bf16 %v3727_v54, %v3726_v52  ;;  %v4120_v52 = vld [vmem:[%s630_s15] ss:$0 sm:$0xff] }
0x1335   : > { %v3406_v32 = vpop.f32.mrb[30].mxu0 }
0x1336   : > { %3462 = vrot.lane.b32.xlu0 %v3406_v32, %s4654_s23  ;;  %v4390_v33 = vpop.f32.mrb[31].mxu0  ;;  %v4508_v32 = vpack.c.bf16 %v3627_v31, %v3626_v30 }
0x1337   : > { %v3718_v33 = vld [vmem:[%s5134_s29] sm:$0xff] }
0x133e   : > { %v3330_v35 = vpop.f32.mrb[34].mxu1 }
0x133f   : > { %3460 = vrot.lane.b32.xlu1 %v3330_v35, %s4654_s23  ;;  %v4385_v37 = vpop.f32.mrb[35].mxu1  ;;  %v3719_v35 = vld [vmem:[%s5134_s29 + $0x8] sm:$0xff]  ;;  %s608_s23 = scalar_lea.vmem %s5200_s6, %s5209_s26 }
0x1340   : > { %v3720_v37 = vld [vmem:[%s5134_s29 + $0x10] sm:$0xff]  ;;  %v4512_v39 = vpack.c.bf16 %v3719_v35, %v3718_v33 }
0x1341   : > { %v4516_v42 = vpack.c.bf16 %v3721_v41, %v3720_v37 }
0x1342   : > { %4513 = vmatprep.subr.bf16.mxu1 %v4512_v39 }
0x1343   : > { %4515 = vmatpush3.bf16.msra.mxu1 %v4512_v39 }
0x1344   : > { %4517 = vmatprep.subr.bf16.mxu1 %v4516_v42 }
0x1347   : > { %4519 = vmatpush3.bf16.msra.mxu1 %v4516_v42 }
0x1348   : > { %4521 = vmatprep.subr.bf16.mxu1 %v4520_v48 }
0x134b   : > { %4523 = vmatpush3.bf16.msra.mxu1 %v4520_v48 }
0x134c   : > { %4525 = vmatprep.subr.bf16.mxu1 %v4524_v51 }
0x134f   : > { %4527 = vmatpush3.bf16.msra.mxu1 %v4524_v51 }
0x1350   : > { %4529 = vmatprep.subr.bf16.mxu1 %v4528_v34 }
0x1353   : > { %4531 = vmatpush3.bf16.msra.mxu1 %v4528_v34 }
0x1354   : > { %4533 = vmatprep.subr.bf16.mxu1 %v4532_v56 }
0x1357   : > { %4535 = vmatpush3.bf16.msra.mxu1 %v4532_v56 }
0x1358   : > { %4537 = vmatprep.subr.bf16.mxu1 %v4536_v59 }
0x135b   : > { %4539 = vmatpush3.bf16.msra.mxu1 %v4536_v59 }
0x13a8   : > { %v3463_v1 = vpop.permute.xlu0 %3462 }
0x13a9   : > { %v3485_v15 = vsel %vm3483_vm8, %v3482_v5, %v3463_v1  ;;  %v4113_v5 = vld [vmem:[%s605_s28] ss:$0 sm:$0xff] }
0x13b1   : > { %v3461_v4 = vpop.permute.xlu1 %3460 }
0x13b2   : > { %v3484_v6 = vsel %vm3483_vm8, %v3481_v13, %v3461_v4 }
0x13b3   : > { %4407 = vmatprep.mubr.msk.f32.mxu0 %vm675_vm0, %v3484_v6 }
0x13b4   : > { %4408 = vmatmul.mubr.msk.f32.vlgmr.msra.gmra.mrb[32].mxu0 %vm675_vm0, %v3485_v15 }
0x13b5   : > { %4499 = vmatpush3.bf16.msra.mxu0 %v4496_v22 }
0x13b6   : > { %4501 = vmatprep.subr.bf16.mxu0 %v4500_v25 }
0x13b9   : > { %4503 = vmatpush3.bf16.msra.mxu0 %v4500_v25 }
0x13ba   : > { %4505 = vmatprep.subr.bf16.mxu0 %v4504_v29 }
0x13bd   : > { %4507 = vmatpush3.bf16.msra.mxu0 %v4504_v29 }
0x13be   : > { %4509 = vmatprep.subr.bf16.mxu0 %v4508_v32 }
0x13c1   : > { %4511 = vmatpush3.bf16.msra.mxu0 %v4508_v32 }
0x1487   : > { %v4409_v8 = vpop.f32.mrb[32].mxu0 }
0x1488   : > { %v3570_v9 = vadd.f32 %v4409_v8, %v4110_v7  ;;  %v3564_v10 = vpop.f32.mrb[33].mxu0  ;;  %v4114_v8 = vld [vmem:[%s608_s23] ss:$0 sm:$0xff] }
0x1489   : > { %v3565_v11 = vadd.f32 %v4110_v7, %v3564_v10 }
0x148a   : > { %v3574_v12 = vadd.f32 %v4641_v0, %v3570_v9 }
0x148b   : > { %v3573_v17 = vadd.f32 %v4642_v14, %v3565_v11  ;;  %v3733_v14 = vld [vmem:[%s5134_s29 + $0x78] sm:$0xff] }
0x148c   : > { %v3580_v18 = vsel %vm675_vm0, %v3574_v12, 0.0 }
0x148d   : > { %3581 = vadd.xlane.f32.xlu0 %v3580_v18  ;;  %v3577_v19 = vsel %vm675_vm0, %v3573_v17, 0.0  ;;  %v4115_v18 = vld [vmem:[%s616_s17] ss:$0 sm:$0xff] }
0x148e   : > { %3578 = vadd.xlane.f32.xlu1 %v3577_v19 }
0x151a   : > { %v3582_v21 = vpop.xlane.xlu0 %3581 }
0x151b   : > { %v3585_v40 = vmul.f32 0.015625, %v3582_v21  ;;  %v3579_v43 = vpop.xlane.xlu1 %3578 }
0x151c   : > { %v3584_v47 = vmul.f32 0.015625, %v3579_v43 }
0x151d   : > { %v5114_v53 = vsub.f32 %v3574_v12, %v3585_v40  ;;  %v3732_v12 = vld [vmem:[%s5134_s29 + $0x70] sm:$0xff] }
0x151e   : > { %v5116_v20 = vsub.f32 %v3573_v17, %v3584_v47  ;;  %v4540_v17 = vpack.c.bf16 %v3733_v14, %v3732_v12 }
0x151f   : > { %v3589_v26 = vmul.f32 %v5114_v53, %v5114_v53 }
0x1520   : > { %v3588_v60 = vmul.f32 %v5116_v20, %v5116_v20  ;;  %4541 = vmatprep.subr.bf16.mxu1 %v4540_v17 }
0x1521   : > { %v3593_v3 = vsel %vm675_vm0, %v3589_v26, 0.0  ;;  %4543 = vmatpush3.bf16.msra.mxu1 %v4540_v17 }
0x1522   : > { %3594 = vadd.xlane.f32.xlu1 %v3593_v3  ;;  %v3590_v36 = vsel %vm675_vm0, %v3588_v60, 0.0 }
0x1523   : > { %3591 = vadd.xlane.f32.xlu0 %v3590_v36 }
0x15af   : > { %v3595_v61 = vpop.xlane.xlu1 %3594 }
0x15b0   : > { %v3597_v62 = vmul.f32 0.015625, %v3595_v61  ;;  %v3592_v63 = vpop.xlane.xlu0 %3591 }
0x15b1   : > { %v3596_v1 = vmul.f32 0.015625, %v3592_v63 }
0x15b2   : > { %v3599_v13 = vadd.f32 1e-05, %v3597_v62 }
0x15b3   : > { %v3598_v2 = vadd.f32 1e-05, %v3596_v1 }
0x15b4   : > { %4633 = vrsqrt.f32 %v3599_v13 }
0x15b5   : > { %4635 = vrsqrt.f32 %v3598_v2 }
0x15be   : > { %v4634_v4 = vpop.eup %4633 }
0x15bf   : > { %v4636_v6 = vpop.eup %4635  ;;  %v3603_v15 = vmul.f32 %v4634_v4, %v5114_v53 }
0x15c0   : > { %v3602_v7 = vmul.f32 %v4636_v6, %v5116_v20  ;;  %v4118_v20 = vld [vmem:[%s624_s22] ss:$0 sm:$0xff] }
0x15c1   : > { %v3611_v9 = vmul.f32 %v4113_v5, %v3603_v15 }
0x15c2   : > { %v3610_v10 = vmul.f32 %v4113_v5, %v3602_v7 }
0x15c3   : > { %v3619_v0 = vadd.f32 %v4114_v8, %v3611_v9 }
0x15c4   : > { %v3618_v11 = vadd.f32 %v4114_v8, %v3610_v10 }
0x15c6   : > { %4426 = vmatprep.mubr.msk.f32.mxu0 %vm675_vm0, %v3618_v11 }
0x15c7   : > { %4427 = vmatmul.mubr.msk.f32.vlgmr.msra.gmra.mrb[34].mxu0 %vm675_vm0, %v3619_v0 }
0x169a   : > { %v4428_v19 = vpop.f32.mrb[34].mxu0 }
0x169b   : > { %v3713_v21 = vadd.f32 %v4428_v19, %v4115_v18  ;;  %v3707_v40 = vpop.f32.mrb[35].mxu0 }
0x169c   : > { %v3708_v43 = vadd.f32 %v4115_v18, %v3707_v40 }
0x169d   : > { %v3717_v53 = vmax.f32 %v3713_v21, 0.0 }
0x169e   : > { %v3716_v47 = vmax.f32 %v3708_v43, 0.0 }
0x16a0   : > { %4461 = vmatprep.mubr.f32.mxu1 %v3716_v47 }
0x16a1   : > { %4462 = vmatmul.mubr.f32.vlgmr.msra.gmra.mrb[36].mxu1 %v3717_v53 }
0x1774   : > { %v4463_v26 = vpop.f32.mrb[36].mxu1 }
0x1775   : > { %v3813_v60 = vadd.f32 %v4463_v26, %v4118_v20  ;;  %v3807_v3 = vpop.f32.mrb[37].mxu1 }
0x1776   : > { %v3808_v36 = vadd.f32 %v4118_v20, %v3807_v3 }
0x1777   : > { %v3817_v45 = vadd.f32 %v3813_v60, %v3619_v0 }
0x1778   : > { %v3816_v16 = vadd.f32 %v3808_v36, %v3618_v11 }
0x1779   : > { %v3823_v22 = vsel %vm675_vm0, %v3817_v45, 0.0 }
0x177a   : > { %3824 = vadd.xlane.f32.xlu1 %v3823_v22  ;;  %v3820_v23 = vsel %vm675_vm0, %v3816_v16, 0.0 }
0x177b   : > { %3821 = vadd.xlane.f32.xlu0 %v3820_v23 }
0x1807   : > { %v3825_v24 = vpop.xlane.xlu1 %3824 }
0x1808   : > { %v3827_v25 = vmul.f32 0.015625, %v3825_v24  ;;  %v3822_v27 = vpop.xlane.xlu0 %3821 }
0x1809   : > { %v3826_v28 = vmul.f32 0.015625, %v3822_v27 }
0x180a   : > { %v3829_v29 = vsub.f32 %v3817_v45, %v3827_v25 }
0x180b   : > { %v3828_v30 = vsub.f32 %v3816_v16, %v3826_v28 }
0x180c   : > { %v3831_v31 = vmul.f32 %v3829_v29, %v3829_v29 }
0x180d   : > { %v3830_v32 = vmul.f32 %v3828_v30, %v3828_v30 }
0x180e   : > { %v3835_v33 = vsel %vm675_vm0, %v3831_v31, 0.0 }
0x180f   : > { %3836 = vadd.xlane.f32.xlu1 %v3835_v33  ;;  %v3832_v35 = vsel %vm675_vm0, %v3830_v32, 0.0 }
0x1810   : > { %3833 = vadd.xlane.f32.xlu0 %v3832_v35 }
0x189c   : > { %v3837_v37 = vpop.xlane.xlu1 %3836 }
0x189d   : > { %v3839_v39 = vmul.f32 0.015625, %v3837_v37  ;;  %v3834_v41 = vpop.xlane.xlu0 %3833 }
0x189e   : > { %v3838_v42 = vmul.f32 0.015625, %v3834_v41 }
0x189f   : > { %v3841_v44 = vadd.f32 1e-05, %v3839_v39 }
0x18a0   : > { %v3840_v46 = vadd.f32 1e-05, %v3838_v42 }
0x18a1   : > { %4637 = vrsqrt.f32 %v3841_v44 }
0x18a2   : > { %4639 = vrsqrt.f32 %v3840_v46 }
0x18ab   : > { %v4638_v48 = vpop.eup %4637 }
0x18ac   : > { %v4640_v50 = vpop.eup %4639  ;;  %v3845_v51 = vmul.f32 %v4638_v48, %v3829_v29 }
0x18ad   : > { %v3844_v54 = vmul.f32 %v4640_v50, %v3828_v30 }
0x18ae   : > { %v3853_v34 = vmul.f32 %v4119_v49, %v3845_v51 }
0x18af   : > { %v3852_v38 = vmul.f32 %v4119_v49, %v3844_v54 }
0x18b0   : > { %v3861_v55 = vadd.f32 %v4120_v52, %v3853_v34 }
0x18b1   : > { %v3860_v56 = vadd.f32 %v4120_v52, %v3852_v38 }
0x18b2   : > { %3863 = vst.msk [vmem:[%s635_s18 + $0x8] sm:$0xff] %vm675_vm0, %v3861_v55 }
0x18b3   : > { %3862 = vst.msk [vmem:[%s635_s18] sm:$0xff] %vm675_vm0, %v3860_v56 }
0x18b4 PF: > { %s23_s25 = sadd.s32 1, %s4649_s25  }
0x18b5   : > { %p20_p4 = scmp.ge.s32.totalorder %s23_s25, 5  }
0x18b7   :  { %22 = sbr.rel (!%p20_p4) target bundleno = 1 (0x1), region = 138 }

// kernel: forward.6
= control target key start
LH: loop header
LB: loop body
LE: loop exit
PB: predicated region body
PF: predicated region fallthrough
CT: control target
= control target key end

     0   :  { %vm11_vm0 = vcmask 1041408   ;;  %vm12_vm1 = vcmask 519170   ;;  %vm173_vm3 = vcmask 523264   ;;  %s5069_s19 = smov 64   ;;  %s8240_s1 = inlined_call_operand.vmem [shape: f32[192,768], index: 1, kind: input, shape index: {}]   ;;  %s8241_s0 = inlined_call_operand.vmem [shape: f32[8,2,768], index: 0, kind: input, shape index: {}]   ;;  %s8242_s2 = inlined_call_operand.vmem [shape: f32[8,2,192], index: 2, kind: output, shape index: {}]  }
   0x1   :  { %v20_v0 = vld [vmem:[%s8240_s1 + $0x8] sm:$0xff]  ;;  %v26_v1 = vld [vmem:[%s8240_s1 + $0x38] sm:$0xff]  ;;  %v19_v5 = vld [vmem:[%s8240_s1] sm:$0xff] }
   0x2   :  { %v22_v2 = vld [vmem:[%s8240_s1 + $0x18] sm:$0xff]  ;;  %v5094_v3 = vpack.c.bf16 %v26_v1, %v20_v0  ;;  %v28_v4 = vld [vmem:[%s8240_s1 + $0x48] sm:$0xff]  ;;  %v25_v6 = vld [vmem:[%s8240_s1 + $0x30] sm:$0xff] }
   0x3   :  { %v5105_v7 = vpack.c.bf16 %v28_v4, %v22_v2  ;;  %v5107_v8 = vpack.c.bf16 %v25_v6, %v19_v5  ;;  %v21_v9 = vld [vmem:[%s8240_s1 + $0x10] sm:$0xff]  ;;  %v27_v10 = vld [vmem:[%s8240_s1 + $0x40] sm:$0xff]  ;;  %v32_v11 = vld [vmem:[%s8240_s1 + $0x68] sm:$0xff] }
   0x4   :  { %3785 = vmatprep.subr.bf16.mxu0 %v5094_v3  ;;  %v5119_v12 = vpack.c.bf16 %v27_v10, %v21_v9  ;;  %v38_v13 = vld [vmem:[%s8240_s1 + $0x98] sm:$0xff]  ;;  %v40_v15 = vld [vmem:[%s8240_s1 + $0xa8] sm:$0xff]  ;;  %v31_v18 = vld [vmem:[%s8240_s1 + $0x60] sm:$0xff] }
   0x5   :  { %v34_v14 = vld [vmem:[%s8240_s1 + $0x78] sm:$0xff]  ;;  %3833 = vmatprep.subr.bf16.mxu1 %v5105_v7  ;;  %3787 = vmatpush1.bf16.msra.mxu0 %v5107_v8  ;;  %v5132_v16 = vpack.c.bf16 %v38_v13, %v32_v11  ;;  %v37_v19 = vld [vmem:[%s8240_s1 + $0x90] sm:$0xff]  ;;  %v39_v22 = vld [vmem:[%s8240_s1 + $0xa0] sm:$0xff] }
   0x6   :  { %v5134_v17 = vpack.c.bf16 %v40_v15, %v34_v14  ;;  %v33_v20 = vld [vmem:[%s8240_s1 + $0x70] sm:$0xff]  ;;  %3835 = vmatpush1.bf16.msra.mxu1 %v5119_v12  ;;  %v5146_v21 = vpack.c.bf16 %v37_v19, %v31_v18  ;;  %v44_v23 = vld [vmem:[%s8240_s1 + $0xc8] sm:$0xff]  ;;  %v50_v24 = vld [vmem:[%s8240_s1 + $0xf8] sm:$0xff] }
   0x7   :  { %3789 = vmatprep.subr.bf16.mxu0 %v5132_v16  ;;  %v5159_v25 = vpack.c.bf16 %v39_v22, %v33_v20  ;;  %v5161_v26 = vpack.c.bf16 %v50_v24, %v44_v23  ;;  %v46_v27 = vld [vmem:[%s8240_s1 + $0xd8] sm:$0xff]  ;;  %v52_v28 = vld [vmem:[%s8240_s1 + $0x108] sm:$0xff]  ;;  %v43_v29 = vld [vmem:[%s8240_s1 + $0xc0] sm:$0xff] }
   0x8   :  { %3837 = vmatprep.subr.bf16.mxu1 %v5134_v17  ;;  %v5172_v30 = vpack.c.bf16 %v52_v28, %v46_v27  ;;  %v49_v31 = vld [vmem:[%s8240_s1 + $0xf0] sm:$0xff]  ;;  %v51_v33 = vld [vmem:[%s8240_s1 + $0x100] sm:$0xff]  ;;  %v56_v35 = vld [vmem:[%s8240_s1 + $0x128] sm:$0xff] }
   0x9   :  { %v45_v32 = vld [vmem:[%s8240_s1 + $0xd0] sm:$0xff]  ;;  %3791 = vmatpush1.bf16.msra.mxu0 %v5146_v21  ;;  %v5184_v34 = vpack.c.bf16 %v49_v31, %v43_v29  ;;  %v62_v36 = vld [vmem:[%s8240_s1 + $0x158] sm:$0xff]  ;;  %v64_v40 = vld [vmem:[%s8240_s1 + $0x168] sm:$0xff] }
   0xa   :  { %v58_v37 = vld [vmem:[%s8240_s1 + $0x138] sm:$0xff]  ;;  %3839 = vmatpush1.bf16.msra.mxu1 %v5159_v25  ;;  %3793 = vmatprep.subr.bf16.mxu0 %v5161_v26  ;;  %v5197_v38 = vpack.c.bf16 %v51_v33, %v45_v32  ;;  %v5199_v39 = vpack.c.bf16 %v62_v36, %v56_v35  ;;  %v55_v41 = vld [vmem:[%s8240_s1 + $0x120] sm:$0xff]  ;;  %v61_v42 = vld [vmem:[%s8240_s1 + $0x150] sm:$0xff] }
   0xb   :  { %3841 = vmatprep.subr.bf16.mxu1 %v5172_v30  ;;  %v5211_v43 = vpack.c.bf16 %v64_v40, %v58_v37  ;;  %v57_v44 = vld [vmem:[%s8240_s1 + $0x130] sm:$0xff]  ;;  %v63_v45 = vld [vmem:[%s8240_s1 + $0x160] sm:$0xff]  ;;  %v68_v46 = vld [vmem:[%s8240_s1 + $0x188] sm:$0xff]  ;;  %v5232_v50 = vpack.c.bf16 %v61_v42, %v55_v41 }
   0xc   :  { %v74_v47 = vld [vmem:[%s8240_s1 + $0x1b8] sm:$0xff]  ;;  %v76_v49 = vld [vmem:[%s8240_s1 + $0x1c8] sm:$0xff]  ;;  %v5236_v51 = vpack.c.bf16 %v63_v45, %v57_v44  ;;  %v67_v53 = vld [vmem:[%s8240_s1 + $0x180] sm:$0xff] }
   0xd   :  { %v70_v48 = vld [vmem:[%s8240_s1 + $0x198] sm:$0xff]  ;;  %3795 = vmatpush1.bf16.msra.mxu0 %v5184_v34  ;;  %v5238_v52 = vpack.c.bf16 %v74_v47, %v68_v46  ;;  %v73_v54 = vld [vmem:[%s8240_s1 + $0x1b0] sm:$0xff]  ;;  %v75_v57 = vld [vmem:[%s8240_s1 + $0x1c0] sm:$0xff] }
   0xe   :  { %3843 = vmatpush1.bf16.msra.mxu1 %v5197_v38  ;;  %3797 = vmatprep.subr.bf16.mxu0 %v5199_v39  ;;  %v69_v55 = vld [vmem:[%s8240_s1 + $0x190] sm:$0xff]  ;;  %v5250_v56 = vpack.c.bf16 %v76_v49, %v70_v48  ;;  %v80_v58 = vld [vmem:[%s8240_s1 + $0x1e8] sm:$0xff]  ;;  %v86_v59 = vld [vmem:[%s8240_s1 + $0x218] sm:$0xff]  ;;  %v5268_v62 = vpack.c.bf16 %v73_v54, %v67_v53 }
   0xf   :  { %3845 = vmatprep.subr.bf16.mxu1 %v5211_v43  ;;  %v82_v60 = vld [vmem:[%s8240_s1 + $0x1f8] sm:$0xff]  ;;  %v88_v61 = vld [vmem:[%s8240_s1 + $0x228] sm:$0xff]  ;;  %v5272_v63 = vpack.c.bf16 %v75_v57, %v69_v55  ;;  %v5274_v0 = vpack.c.bf16 %v86_v59, %v80_v58  ;;  %v79_v1 = vld [vmem:[%s8240_s1 + $0x1e0] sm:$0xff] }
  0x10   :  { %v85_v2 = vld [vmem:[%s8240_s1 + $0x210] sm:$0xff]  ;;  %v5286_v5 = vpack.c.bf16 %v88_v61, %v82_v60  ;;  %v87_v6 = vld [vmem:[%s8240_s1 + $0x220] sm:$0xff]  ;;  %v92_v9 = vld [vmem:[%s8240_s1 + $0x248] sm:$0xff] }
  0x11   :  { %3799 = vmatpush1.bf16.msra.mxu0 %v5232_v50  ;;  %v81_v4 = vld [vmem:[%s8240_s1 + $0x1f0] sm:$0xff]  ;;  %v98_v10 = vld [vmem:[%s8240_s1 + $0x278] sm:$0xff]  ;;  %v100_v13 = vld [vmem:[%s8240_s1 + $0x288] sm:$0xff]  ;;  %v5304_v14 = vpack.c.bf16 %v85_v2, %v79_v1 }
  0x12   :  { %3847 = vmatpush1.bf16.msra.mxu1 %v5236_v51  ;;  %3801 = vmatprep.subr.bf16.mxu0 %v5238_v52  ;;  %v94_v11 = vld [vmem:[%s8240_s1 + $0x258] sm:$0xff]  ;;  %v5308_v15 = vpack.c.bf16 %v87_v6, %v81_v4  ;;  %v5310_v18 = vpack.c.bf16 %v98_v10, %v92_v9  ;;  %v91_v19 = vld [vmem:[%s8240_s1 + $0x240] sm:$0xff]  ;;  %v97_v20 = vld [vmem:[%s8240_s1 + $0x270] sm:$0xff] }
  0x13   :  { %3849 = vmatprep.subr.bf16.mxu1 %v5250_v56  ;;  %v93_v22 = vld [vmem:[%s8240_s1 + $0x250] sm:$0xff]  ;;  %v5322_v23 = vpack.c.bf16 %v100_v13, %v94_v11  ;;  %v99_v24 = vld [vmem:[%s8240_s1 + $0x280] sm:$0xff]  ;;  %v104_v27 = vld [vmem:[%s8240_s1 + $0x2a8] sm:$0xff]  ;;  %v5340_v32 = vpack.c.bf16 %v97_v20, %v91_v19  ;;  %v5067_v20 = vmov 0.0  }
  0x14   :  { %v110_v28 = vld [vmem:[%s8240_s1 + $0x2d8] sm:$0xff]  ;;  %v112_v31 = vld [vmem:[%s8240_s1 + $0x2e8] sm:$0xff]  ;;  %v5344_v33 = vpack.c.bf16 %v99_v24, %v93_v22  ;;  %v103_v36 = vld [vmem:[%s8240_s1 + $0x2a0] sm:$0xff] }
  0x15   :  { %3803 = vmatpush1.bf16.msra.mxu0 %v5268_v62  ;;  %v106_v29 = vld [vmem:[%s8240_s1 + $0x2b8] sm:$0xff]  ;;  %v5346_v35 = vpack.c.bf16 %v110_v28, %v104_v27  ;;  %v109_v37 = vld [vmem:[%s8240_s1 + $0x2d0] sm:$0xff]  ;;  %v111_v42 = vld [vmem:[%s8240_s1 + $0x2e0] sm:$0xff] }
  0x16   :  { %3851 = vmatpush1.bf16.msra.mxu1 %v5272_v63  ;;  %3805 = vmatprep.subr.bf16.mxu0 %v5274_v0  ;;  %v105_v40 = vld [vmem:[%s8240_s1 + $0x2b0] sm:$0xff]  ;;  %v5358_v41 = vpack.c.bf16 %v112_v31, %v106_v29  ;;  %v116_v44 = vld [vmem:[%s8240_s1 + $0x308] sm:$0xff]  ;;  %v122_v45 = vld [vmem:[%s8240_s1 + $0x338] sm:$0xff]  ;;  %v5376_v48 = vpack.c.bf16 %v109_v37, %v103_v36 }
  0x17   :  { %3853 = vmatprep.subr.bf16.mxu1 %v5286_v5  ;;  %v118_v46 = vld [vmem:[%s8240_s1 + $0x318] sm:$0xff]  ;;  %v124_v47 = vld [vmem:[%s8240_s1 + $0x348] sm:$0xff]  ;;  %v5380_v49 = vpack.c.bf16 %v111_v42, %v105_v40  ;;  %v5382_v53 = vpack.c.bf16 %v122_v45, %v116_v44  ;;  %v115_v54 = vld [vmem:[%s8240_s1 + $0x300] sm:$0xff] }
  0x18   :  { %v121_v55 = vld [vmem:[%s8240_s1 + $0x330] sm:$0xff]  ;;  %v5394_v58 = vpack.c.bf16 %v124_v47, %v118_v46  ;;  %v123_v59 = vld [vmem:[%s8240_s1 + $0x340] sm:$0xff]  ;;  %v128_v60 = vld [vmem:[%s8240_s1 + $0x368] sm:$0xff] }
  0x19   :  { %3807 = vmatpush1.bf16.msra.mxu0 %v5304_v14  ;;  %v117_v57 = vld [vmem:[%s8240_s1 + $0x310] sm:$0xff]  ;;  %v134_v61 = vld [vmem:[%s8240_s1 + $0x398] sm:$0xff]  ;;  %v136_v2 = vld [vmem:[%s8240_s1 + $0x3a8] sm:$0xff]  ;;  %v5412_v4 = vpack.c.bf16 %v121_v55, %v115_v54 }
  0x1a   :  { %3855 = vmatpush1.bf16.msra.mxu1 %v5308_v15  ;;  %3809 = vmatprep.subr.bf16.mxu0 %v5310_v18  ;;  %v130_v1 = vld [vmem:[%s8240_s1 + $0x378] sm:$0xff]  ;;  %vm5415_vm2 = vmor %vm12_vm1, %vm11_vm0  ;;  %v5421_v9 = vpack.c.bf16 %v123_v59, %v117_v57  ;;  %v5423_v10 = vpack.c.bf16 %v134_v61, %v128_v60  ;;  %v127_v11 = vld [vmem:[%s8240_s1 + $0x360] sm:$0xff] }
  0x1b   :  { %3857 = vmatprep.subr.bf16.mxu1 %v5322_v23  ;;  %v133_v13 = vld [vmem:[%s8240_s1 + $0x390] sm:$0xff]  ;;  %14 = vst.msk [vmem:[#allocation2] sm:$0xf] %vm5415_vm2, %v5067_v20  ;;  %15 = vst.msk [vmem:[#allocation3] sm:$0xf] %vm5415_vm2, %v5067_v20  ;;  %v5439_v22 = vpack.c.bf16 %v136_v2, %v130_v1  ;;  %v135_v24 = vld [vmem:[%s8240_s1 + $0x3a0] sm:$0xff] }
  0x1c   :  { %v129_v19 = vld [vmem:[%s8240_s1 + $0x370] sm:$0xff]  ;;  %v140_v27 = vld [vmem:[%s8240_s1 + $0x3c8] sm:$0xff]  ;;  %v146_v28 = vld [vmem:[%s8240_s1 + $0x3f8] sm:$0xff]  ;;  %v5457_v36 = vpack.c.bf16 %v133_v13, %v127_v11 }
  0x1d   :  { %3811 = vmatpush1.bf16.msra.mxu0 %v5340_v32  ;;  %v142_v29 = vld [vmem:[%s8240_s1 + $0x3d8] sm:$0xff]  ;;  %v148_v31 = vld [vmem:[%s8240_s1 + $0x408] sm:$0xff]  ;;  %v5461_v37 = vpack.c.bf16 %v135_v24, %v129_v19  ;;  %v5463_v40 = vpack.c.bf16 %v146_v28, %v140_v27  ;;  %v139_v42 = vld [vmem:[%s8240_s1 + $0x3c0] sm:$0xff] }
  0x1e   :  { %3859 = vmatpush1.bf16.msra.mxu1 %v5344_v33  ;;  %3813 = vmatprep.subr.bf16.mxu0 %v5346_v35  ;;  %v145_v44 = vld [vmem:[%s8240_s1 + $0x3f0] sm:$0xff]  ;;  %v5475_v46 = vpack.c.bf16 %v148_v31, %v142_v29  ;;  %v147_v47 = vld [vmem:[%s8240_s1 + $0x400] sm:$0xff]  ;;  %v152_v54 = vld [vmem:[%s8240_s1 + $0x428] sm:$0xff] }
  0x1f   :  { %3861 = vmatprep.subr.bf16.mxu1 %v5358_v41  ;;  %v141_v45 = vld [vmem:[%s8240_s1 + $0x3d0] sm:$0xff]  ;;  %v158_v55 = vld [vmem:[%s8240_s1 + $0x458] sm:$0xff]  ;;  %v160_v59 = vld [vmem:[%s8240_s1 + $0x468] sm:$0xff]  ;;  %v5493_v60 = vpack.c.bf16 %v145_v44, %v139_v42 }
  0x20   :  { %v154_v57 = vld [vmem:[%s8240_s1 + $0x438] sm:$0xff]  ;;  %v5499_v1 = vpack.c.bf16 %v147_v47, %v141_v45  ;;  %v5501_v2 = vpack.c.bf16 %v158_v55, %v152_v54  ;;  %v151_v11 = vld [vmem:[%s8240_s1 + $0x420] sm:$0xff]  ;;  %v157_v13 = vld [vmem:[%s8240_s1 + $0x450] sm:$0xff] }
  0x21   :  { %3815 = vmatpush1.bf16.msra.mxu0 %v5376_v48  ;;  %v153_v19 = vld [vmem:[%s8240_s1 + $0x430] sm:$0xff]  ;;  %v5515_v24 = vpack.c.bf16 %v160_v59, %v154_v57  ;;  %v159_v27 = vld [vmem:[%s8240_s1 + $0x460] sm:$0xff]  ;;  %v24_v28 = vld [vmem:[%s8240_s1 + $0x28] sm:$0xff]  ;;  %v5529_v31 = vpack.c.bf16 %v157_v13, %v151_v11 }
  0x22   :  { %3863 = vmatpush1.bf16.msra.mxu1 %v5380_v49  ;;  %3817 = vmatprep.subr.bf16.mxu0 %v5382_v53  ;;  %v5495_v61 = vld.sshfl [vmem:[#allocation2] sm:$0x33 pattern:$0x76325410]  ;;  %v30_v29 = vld [vmem:[%s8240_s1 + $0x58] sm:$0xff]  ;;  %v5533_v42 = vpack.c.bf16 %v159_v27, %v153_v19  ;;  %v29_v47 = vld [vmem:[%s8240_s1 + $0x50] sm:$0xff] }
  0x23   :  { %3865 = vmatprep.subr.bf16.mxu1 %v5394_v58  ;;  %v171_v20 = vcombine.high %v5495_v61, %v5495_v61  ;;  %v5535_v44 = vpack.c.bf16 %v30_v29, %v24_v28  ;;  %v23_v45 = vld [vmem:[%s8240_s1 + $0x20] sm:$0xff]  ;;  %v36_v54 = vld [vmem:[%s8240_s1 + $0x88] sm:$0xff]  ;;  %v42_v55 = vld [vmem:[%s8240_s1 + $0xb8] sm:$0xff] }
  0x24   :  { %v5551_v57 = vpack.c.bf16 %v29_v47, %v23_v45  ;;  %v5555_v59 = vpack.c.bf16 %v42_v55, %v36_v54  ;;  %v35_v11 = vld [vmem:[%s8240_s1 + $0x80] sm:$0xff]  ;;  %v41_v13 = vld [vmem:[%s8240_s1 + $0xb0] sm:$0xff]  ;;  %v48_v19 = vld [vmem:[%s8240_s1 + $0xe8] sm:$0xff] }
  0x25   :  { %3819 = vmatpush1.bf16.msra.mxu0 %v5412_v4  ;;  %3708 = vmatprep.mubr.msk.f32.mxu0 %vm173_vm3, %v171_v20  ;;  %v54_v27 = vld [vmem:[%s8240_s1 + $0x118] sm:$0xff]  ;;  %v5573_v28 = vpack.c.bf16 %v41_v13, %v35_v11  ;;  %v47_v45 = vld [vmem:[%s8240_s1 + $0xe0] sm:$0xff]  ;;  %v60_v47 = vld [vmem:[%s8240_s1 + $0x148] sm:$0xff] }
  0x26   :  { %3867 = vmatpush1.bf16.msra.mxu1 %v5421_v9  ;;  %3821 = vmatprep.subr.bf16.mxu0 %v5423_v10  ;;  %v5576_v29 = vpack.c.bf16 %v54_v27, %v48_v19  ;;  %v66_v54 = vld [vmem:[%s8240_s1 + $0x178] sm:$0xff]  ;;  %v65_v13 = vld [vmem:[%s8240_s1 + $0x170] sm:$0xff] }
  0x27   :  { %3869 = vmatprep.subr.bf16.mxu1 %v5439_v22  ;;  %3709 = vmatprep.mubr.msk.f32.mxu1 %vm173_vm3, %v171_v20  ;;  %v5597_v11 = vpack.c.bf16 %v66_v54, %v60_v47 }
  0x29   :  { %3823 = vmatpush1.bf16.msra.mxu0 %v5457_v36 }
  0x2a   :  { %3871 = vmatpush1.bf16.msra.mxu1 %v5461_v37  ;;  %3825 = vmatprep.subr.bf16.mxu0 %v5463_v40 }
  0x2b   :  { %3873 = vmatprep.subr.bf16.mxu1 %v5475_v46 }
  0x2d   :  { %3827 = vmatpush1.bf16.msra.mxu0 %v5493_v60 }
  0x2e   :  { %3875 = vmatpush1.bf16.msra.mxu1 %v5499_v1  ;;  %3829 = vmatprep.subr.bf16.mxu0 %v5501_v2 }
  0x2f   :  { %3877 = vmatprep.subr.bf16.mxu1 %v5515_v24 }
  0x31   :  { %3831 = vmatpush1.bf16.msra.mxu0 %v5529_v31 }
  0x32   :  { %3879 = vmatpush1.bf16.msra.mxu1 %v5533_v42  ;;  %3881 = vmatprep.subr.bf16.mxu0 %v5535_v44 }
  0x33   :  { %3929 = vmatprep.subr.bf16.mxu1 %v5094_v3  ;;  %v53_v3 = vld [vmem:[%s8240_s1 + $0x110] sm:$0xff] }
  0x34   :  { %241 = vmatmul.mubr.f32.vlgmr.msra.gmra.mrb[0].mxu0 %v5495_v61  ;;  %v5594_v55 = vpack.c.bf16 %v53_v3, %v47_v45  ;;  %v71_v45 = vld [vmem:[%s8240_s1 + $0x1a0] sm:$0xff]  ;;  %v77_v3 = vld [vmem:[%s8240_s1 + $0x1d0] sm:$0xff] }
  0x35   :  { %312 = vmatmul.mubr.f32.vlgmr.msra.gmra.mrb[0].mxu1 %v5495_v61  ;;  %3883 = vmatpush1.bf16.msra.mxu0 %v5551_v57  ;;  %v5634_v47 = vpack.c.bf16 %v77_v3, %v71_v45  ;;  %v95_v45 = vld [vmem:[%s8240_s1 + $0x260] sm:$0xff]  ;;  %v101_v3 = vld [vmem:[%s8240_s1 + $0x290] sm:$0xff] }
  0x36   :  { %3885 = vmatprep.subr.bf16.mxu0 %v5555_v59  ;;  %3710 = vmatprep.mubr.msk.f32.mxu0 %vm173_vm3, %v171_v20  ;;  %v59_v20 = vld [vmem:[%s8240_s1 + $0x140] sm:$0xff] }
  0x37   :  { %3931 = vmatpush1.bf16.msra.mxu1 %v5107_v8  ;;  %v72_v8 = vld [vmem:[%s8240_s1 + $0x1a8] sm:$0xff]  ;;  %v5614_v19 = vpack.c.bf16 %v65_v13, %v59_v20  ;;  %v83_v20 = vld [vmem:[%s8240_s1 + $0x200] sm:$0xff]  ;;  %v89_v13 = vld [vmem:[%s8240_s1 + $0x230] sm:$0xff] }
  0x38   :  { %3933 = vmatprep.subr.bf16.mxu1 %v5132_v16  ;;  %v78_v16 = vld [vmem:[%s8240_s1 + $0x1d8] sm:$0xff] }
  0x39   :  { %3887 = vmatpush1.bf16.msra.mxu0 %v5573_v28  ;;  %v5617_v27 = vpack.c.bf16 %v78_v16, %v72_v8  ;;  %v5654_v8 = vpack.c.bf16 %v89_v13, %v83_v20  ;;  %v107_v20 = vld [vmem:[%s8240_s1 + $0x2c0] sm:$0xff]  ;;  %v113_v13 = vld [vmem:[%s8240_s1 + $0x2f0] sm:$0xff] }
  0x3a   :  { %3889 = vmatprep.subr.bf16.mxu0 %v5576_v29 }
  0x3b   :  { %3935 = vmatpush1.bf16.msra.mxu1 %v5146_v21  ;;  %v84_v21 = vld [vmem:[%s8240_s1 + $0x208] sm:$0xff] }
  0x3c   :  { %3937 = vmatprep.subr.bf16.mxu1 %v5161_v26  ;;  %v90_v26 = vld [vmem:[%s8240_s1 + $0x238] sm:$0xff] }
  0x3d   :  { %3891 = vmatpush1.bf16.msra.mxu0 %v5594_v55  ;;  %v5637_v54 = vpack.c.bf16 %v90_v26, %v84_v21  ;;  %v5674_v21 = vpack.c.bf16 %v101_v3, %v95_v45  ;;  %v119_v45 = vld [vmem:[%s8240_s1 + $0x320] sm:$0xff]  ;;  %v125_v3 = vld [vmem:[%s8240_s1 + $0x350] sm:$0xff] }
  0x3e   :  { %3893 = vmatprep.subr.bf16.mxu0 %v5597_v11 }
  0x3f   :  { %3939 = vmatpush1.bf16.msra.mxu1 %v5184_v34  ;;  %v96_v34 = vld [vmem:[%s8240_s1 + $0x268] sm:$0xff] }
  0x40   :  { %3941 = vmatprep.subr.bf16.mxu1 %v5199_v39  ;;  %v102_v39 = vld [vmem:[%s8240_s1 + $0x298] sm:$0xff] }
  0x41   :  { %3895 = vmatpush1.bf16.msra.mxu0 %v5614_v19  ;;  %v5657_v16 = vpack.c.bf16 %v102_v39, %v96_v34  ;;  %v5694_v34 = vpack.c.bf16 %v113_v13, %v107_v20  ;;  %v131_v20 = vld [vmem:[%s8240_s1 + $0x380] sm:$0xff]  ;;  %v137_v13 = vld [vmem:[%s8240_s1 + $0x3b0] sm:$0xff] }
  0x42   :  { %3897 = vmatprep.subr.bf16.mxu0 %v5617_v27 }
  0x43   :  { %3943 = vmatpush1.bf16.msra.mxu1 %v5232_v50  ;;  %v108_v50 = vld [vmem:[%s8240_s1 + $0x2c8] sm:$0xff] }
  0x44   :  { %3945 = vmatprep.subr.bf16.mxu1 %v5238_v52  ;;  %v114_v52 = vld [vmem:[%s8240_s1 + $0x2f8] sm:$0xff] }
  0x45   :  { %3899 = vmatpush1.bf16.msra.mxu0 %v5634_v47  ;;  %v5677_v26 = vpack.c.bf16 %v114_v52, %v108_v50  ;;  %v5714_v50 = vpack.c.bf16 %v125_v3, %v119_v45  ;;  %v143_v45 = vld [vmem:[%s8240_s1 + $0x3e0] sm:$0xff]  ;;  %v149_v3 = vld [vmem:[%s8240_s1 + $0x410] sm:$0xff] }
  0x46   :  { %3901 = vmatprep.subr.bf16.mxu0 %v5637_v54 }
  0x47   :  { %3947 = vmatpush1.bf16.msra.mxu1 %v5268_v62  ;;  %v120_v62 = vld [vmem:[%s8240_s1 + $0x328] sm:$0xff] }
  0x48   :  { %3949 = vmatprep.subr.bf16.mxu1 %v5274_v0  ;;  %v126_v0 = vld [vmem:[%s8240_s1 + $0x358] sm:$0xff] }
  0x49   :  { %3903 = vmatpush1.bf16.msra.mxu0 %v5654_v8  ;;  %v5697_v39 = vpack.c.bf16 %v126_v0, %v120_v62  ;;  %v5734_v62 = vpack.c.bf16 %v137_v13, %v131_v20  ;;  %v155_v20 = vld [vmem:[%s8240_s1 + $0x440] sm:$0xff]  ;;  %v161_v13 = vld [vmem:[%s8240_s1 + $0x470] sm:$0xff] }
  0x4a   :  { %3905 = vmatprep.subr.bf16.mxu0 %v5657_v16 }
  0x4b   :  { %3951 = vmatpush1.bf16.msra.mxu1 %v5304_v14  ;;  %v132_v14 = vld [vmem:[%s8240_s1 + $0x388] sm:$0xff] }
  0x4c   :  { %3953 = vmatprep.subr.bf16.mxu1 %v5310_v18  ;;  %v138_v18 = vld [vmem:[%s8240_s1 + $0x3b8] sm:$0xff] }
  0x4d   :  { %3907 = vmatpush1.bf16.msra.mxu0 %v5674_v21  ;;  %v5717_v52 = vpack.c.bf16 %v138_v18, %v132_v14  ;;  %v5754_v14 = vpack.c.bf16 %v149_v3, %v143_v45 }
  0x4e   :  { %3909 = vmatprep.subr.bf16.mxu0 %v5677_v26 }
  0x4f   :  { %3955 = vmatpush1.bf16.msra.mxu1 %v5340_v32  ;;  %v144_v32 = vld [vmem:[%s8240_s1 + $0x3e8] sm:$0xff] }
  0x50   :  { %3957 = vmatprep.subr.bf16.mxu1 %v5346_v35  ;;  %v150_v35 = vld [vmem:[%s8240_s1 + $0x418] sm:$0xff] }
  0x51   :  { %3911 = vmatpush1.bf16.msra.mxu0 %v5694_v34  ;;  %v5737_v0 = vpack.c.bf16 %v150_v35, %v144_v32 }
  0x52   :  { %3913 = vmatprep.subr.bf16.mxu0 %v5697_v39 }
  0x53   :  { %3959 = vmatpush1.bf16.msra.mxu1 %v5376_v48  ;;  %v156_v48 = vld [vmem:[%s8240_s1 + $0x448] sm:$0xff] }
  0x54   :  { %3961 = vmatprep.subr.bf16.mxu1 %v5382_v53  ;;  %v162_v53 = vld [vmem:[%s8240_s1 + $0x478] sm:$0xff] }
  0x55   :  { %3915 = vmatpush1.bf16.msra.mxu0 %v5714_v50  ;;  %v5757_v18 = vpack.c.bf16 %v162_v53, %v156_v48 }
  0x56   :  { %3917 = vmatprep.subr.bf16.mxu0 %v5717_v52 }
  0x57   :  { %3963 = vmatpush1.bf16.msra.mxu1 %v5412_v4  ;;  %v5768_v4 = vpack.c.bf16 %v161_v13, %v155_v20  ;;  %v455_v13 = vld [vmem:[#allocation3] sm:$0xf] }
  0x58   :  { %3965 = vmatprep.subr.bf16.mxu1 %v5423_v10 }
  0x59   :  { %3919 = vmatpush1.bf16.msra.mxu0 %v5734_v62 }
  0x5a   :  { %3921 = vmatprep.subr.bf16.mxu0 %v5737_v0 }
  0x5b   :  { %3967 = vmatpush1.bf16.msra.mxu1 %v5457_v36 }
  0x5c   :  { %3969 = vmatprep.subr.bf16.mxu1 %v5463_v40  ;;  %v17_v40 = vld [vmem:[%s8241_s0 + $0x8] sm:$0xf] }
  0x5d   :  { %3923 = vmatpush1.bf16.msra.mxu0 %v5754_v14 }
  0x5e   :  { %3925 = vmatprep.subr.bf16.mxu0 %v5757_v18 }
  0x5f   :  { %3971 = vmatpush1.bf16.msra.mxu1 %v5493_v60 }
  0x60   :  { %3973 = vmatprep.subr.bf16.mxu1 %v5501_v2 }
  0x61   :  { %3927 = vmatpush1.bf16.msra.mxu0 %v5768_v4 }
  0x62   :  { %3977 = vmatprep.subr.bf16.mxu0 %v5105_v7  ;;  %v5068_v7 = vmov 1983009808  }
  0x63   :  { %3975 = vmatpush1.bf16.msra.mxu1 %v5529_v31 }
  0x64   :  { %383 = vmatmul.mubr.f32.vlgmr.msra.gmra.mrb[2].mxu0 %v5495_v61  ;;  %4025 = vmatprep.subr.bf16.mxu1 %v5535_v44 }
  0x65   :  { %3979 = vmatpush1.bf16.msra.mxu0 %v5119_v12  ;;  %v398_v12 = vunpack.c.l.s4 %v5068_v7 }
  0x66   :  { %3981 = vmatprep.subr.bf16.mxu0 %v5134_v17  ;;  %v400_v17 = vlaneseq }
  0x69   :  { %3983 = vmatpush1.bf16.msra.mxu0 %v5159_v25  ;;  %v399_v25 = vunpack.c.0.s8 %v398_v12 }
  0x6a   :  { %3985 = vmatprep.subr.bf16.mxu0 %v5172_v30  ;;  %v401_v30 = vshrl.u32 %v400_v17, 7 }
  0x6d   :  { %3987 = vmatpush1.bf16.msra.mxu0 %v5197_v38 }
  0x6e   :  { %3989 = vmatprep.subr.bf16.mxu0 %v5211_v43  ;;  %v5801_v43 = vsub.s32 %v399_v25, %v401_v30 }
  0x71   :  { %3991 = vmatpush1.bf16.msra.mxu0 %v5236_v51 }
  0x72   :  { %3993 = vmatprep.subr.bf16.mxu0 %v5250_v56 }
  0x75   :  { %3995 = vmatpush1.bf16.msra.mxu0 %v5272_v63 }
  0x76   :  { %3997 = vmatprep.subr.bf16.mxu0 %v5286_v5 }
  0x79   :  { %3999 = vmatpush1.bf16.msra.mxu0 %v5308_v15 }
  0x7a   :  { %4001 = vmatprep.subr.bf16.mxu0 %v5322_v23 }
  0x7d   :  { %4003 = vmatpush1.bf16.msra.mxu0 %v5344_v33 }
  0x7e   :  { %4005 = vmatprep.subr.bf16.mxu0 %v5358_v41  ;;  %v16_v41 = vld [vmem:[%s8241_s0] sm:$0xff] }
  0x81   :  { %4007 = vmatpush1.bf16.msra.mxu0 %v5380_v49 }
  0x82   :  { %4009 = vmatprep.subr.bf16.mxu0 %v5394_v58 }
  0x85   :  { %4011 = vmatpush1.bf16.msra.mxu0 %v5421_v9 }
  0x86   :  { %4013 = vmatprep.subr.bf16.mxu0 %v5439_v22 }
  0x89   :  { %4015 = vmatpush1.bf16.msra.mxu0 %v5461_v37 }
  0x8a   :  { %4017 = vmatprep.subr.bf16.mxu0 %v5475_v46 }
  0x8d   :  { %4019 = vmatpush1.bf16.msra.mxu0 %v5499_v1 }
  0x8e   :  { %4021 = vmatprep.subr.bf16.mxu0 %v5515_v24 }
  0x91   :  { %4023 = vmatpush1.bf16.msra.mxu0 %v5533_v42 }
 0x107   :  { %v242_v38 = vpop.f32.mrb[0].mxu0 }
 0x108   :  { %v313_v51 = vpop.f32.mrb[0].mxu1  ;;  %v244_v56 = vpop.f32.mrb[1].mxu0 }
 0x109   :  { %v395_v63 = vcombine.low %v242_v38, %v244_v56  ;;  %v315_v5 = vpop.f32.mrb[1].mxu1 }
 0x10a   :  { %v396_v15 = vcombine.low %v313_v51, %v315_v5 }
 0x10b   :  { %v403_v23 = vrot.slane %v395_v63, %v5801_v43 }
 0x10c   :  { %v410_v33 = vrot.slane %v396_v15, %v5801_v43 }
 0x10e   :  { %v411_v49 = vcombine.low %v403_v23, %v410_v33 }
 0x110   :  { %v422_v58 = vadd.f32 %v411_v49, %v16_v41 }
 0x112   :  { %431 = vrot.lane.b32.xlu0 %v422_v58, %s5069_s19  ;;  %v3711_v9 = vmul.f32 -1.442695, %v422_v58  ;;  %v444_v1 = vrot.slane %v422_v58, 6 }
 0x114   :  { %4939 = vpow2.f32 %v3711_v9 }
 0x11e   :  { %v4940_v37 = vpop.eup %4939 }
 0x11f   :  { %v427_v60 = vadd.f32 1.0, %v4940_v37 }
 0x121   :  { %4941 = vrcp.f32 %v427_v60 }
 0x12b   :  { %v4942_v31 = vpop.eup %4941 }
 0x137   :  { %v384_v10 = vpop.f32.mrb[2].mxu0 }
 0x138   :  { %v386_v22 = vpop.f32.mrb[3].mxu0 }
 0x139   :  { %v412_v36 = vcombine.low %v384_v10, %v386_v22 }
 0x13b   :  { %v419_v46 = vrot.slane %v412_v36, %v5801_v43 }
 0x13d   :  { %v423_v61 = vadd.f32 %v419_v46, %v17_v40 }
 0x13f   :  { %v445_v2 = vrot.slane %v423_v61, 6  ;;  %v3713_v30 = vmul.f32 -1.442695, %v423_v61 }
 0x141   :  { %v446_v24 = vsel %vm11_vm0, %v444_v1, %v445_v2 }
 0x142   :  { %4943 = vtanh.f32 %v446_v24 }
 0x14c   :  { %v4944_v42 = vpop.eup %4943 }
 0x14d   :  { %v457_v44 = vmul.f32 %v4944_v42, %v4942_v31 }
 0x184   :  { %v432_v32 = vpop.permute.xlu0 %431 }
 0x185   :  { %v433_v35 = vrot.slane %v432_v32, 2  ;;  %v434_v45 = vrot.slane %v432_v32, 4  ;;  %v942_v32 = vld [vmem:[%s8240_s1 + $0x8] sm:$0xff] }
 0x187   :  { %v435_v3 = vsel %vm173_vm3, %v433_v35, %v434_v45  ;;  %v948_v35 = vld [vmem:[%s8240_s1 + $0x38] sm:$0xff]  ;;  %v941_v45 = vld [vmem:[%s8240_s1] sm:$0xff] }
 0x188   :  { %v3712_v48 = vmul.f32 -1.442695, %v435_v3  ;;  %v5880_v3 = vpack.c.bf16 %v948_v35, %v942_v32  ;;  %v1004_v32 = vld [vmem:[%s8240_s1 + $0x1f8] sm:$0xff]  ;;  %v1010_v35 = vld [vmem:[%s8240_s1 + $0x228] sm:$0xff] }
 0x18a   :  { %4945 = vpow2.f32 %v3712_v48  ;;  %v947_v48 = vld [vmem:[%s8240_s1 + $0x30] sm:$0xff]  ;;  %4073 = vmatprep.subr.bf16.mxu0 %v5880_v3 }
 0x194   :  { %v4946_v53 = vpop.eup %4945 }
 0x195   :  { %v440_v20 = vadd.f32 1.0, %v4946_v53  ;;  %v944_v53 = vld [vmem:[%s8240_s1 + $0x18] sm:$0xff] }
 0x197   :  { %4947 = vrcp.f32 %v440_v20  ;;  %v950_v20 = vld [vmem:[%s8240_s1 + $0x48] sm:$0xff] }
 0x1a1   :  { %v4948_v7 = vpop.eup %4947 }
 0x1a2   :  { %v456_v12 = vmul.f32 %v4948_v7, %v455_v13  ;;  %v5891_v13 = vpack.c.bf16 %v947_v48, %v941_v45  ;;  %v5893_v7 = vpack.c.bf16 %v950_v20, %v944_v53  ;;  %v1001_v20 = vld [vmem:[%s8240_s1 + $0x1e0] sm:$0xff] }
 0x1a4   :  { %v458_v17 = vadd.f32 %v457_v44, %v456_v12  ;;  %v943_v12 = vld [vmem:[%s8240_s1 + $0x10] sm:$0xff] }
 0x1a6   :  { %467 = vst.msk [vmem:[#allocation3] sm:$0xf] %vm5415_vm2, %v458_v17  ;;  %4949 = vtanh.f32 %v458_v17  ;;  %v949_v17 = vld [vmem:[%s8240_s1 + $0x40] sm:$0xff] }
 0x1a7   :  { %4951 = vpow2.f32 %v3713_v30  ;;  %v5905_v30 = vpack.c.bf16 %v949_v17, %v943_v12  ;;  %v1007_v12 = vld [vmem:[%s8240_s1 + $0x210] sm:$0xff] }
 0x1a8   :  { %v1003_v17 = vld [vmem:[%s8240_s1 + $0x1f0] sm:$0xff] }
 0x1ad   :  { %v915_v31 = vld [vmem:[#allocation3] sm:$0xf] }
 0x1b0   :  { %v4950_v25 = vpop.eup %4949 }
 0x1b1   :  { %461 = vrot.lane.b32.xlu0 %v4950_v25, %s5069_s19  ;;  %v4952_v38 = vpop.eup %4951  ;;  %v954_v25 = vld [vmem:[%s8240_s1 + $0x68] sm:$0xff] }
 0x1b2   :  { %v452_v51 = vadd.f32 1.0, %v4952_v38  ;;  %v960_v38 = vld [vmem:[%s8240_s1 + $0x98] sm:$0xff] }
 0x1b4   :  { %4953 = vrcp.f32 %v452_v51  ;;  %v953_v51 = vld [vmem:[%s8240_s1 + $0x60] sm:$0xff] }
 0x1be   :  { %v4954_v5 = vpop.eup %4953 }
 0x223   :  { %v462_v56 = vpop.permute.xlu0 %461 }
 0x224   :  { %v463_v63 = vrot.slane %v462_v56, 6 }
 0x226   :  { %v464_v15 = vsel %vm173_vm3, %v463_v63, %v462_v56  ;;  %v959_v56 = vld [vmem:[%s8240_s1 + $0x90] sm:$0xff]  ;;  %v5918_v63 = vpack.c.bf16 %v960_v38, %v954_v25  ;;  %v6073_v25 = vpack.c.bf16 %v1010_v35, %v1004_v32  ;;  %v1009_v38 = vld [vmem:[%s8240_s1 + $0x220] sm:$0xff] }
 0x227   :  { %v466_v23 = vmul.f32 %v4954_v5, %v464_v15  ;;  %v5920_v5 = vpack.c.bf16 %v959_v56, %v953_v51  ;;  %v956_v15 = vld [vmem:[%s8240_s1 + $0x78] sm:$0xff]  ;;  %v1014_v51 = vld [vmem:[%s8240_s1 + $0x248] sm:$0xff]  ;;  %v1039_v35 = vld [vmem:[%s8240_s1 + $0x310] sm:$0xff] }
 0x228   :  { %v1020_v56 = vld [vmem:[%s8240_s1 + $0x278] sm:$0xff] }
 0x229   :  { %469 = vrot.lane.b32.xlu1 %v466_v23, %s5069_s19  ;;  %v962_v23 = vld [vmem:[%s8240_s1 + $0xa8] sm:$0xff] }
 0x29b   :  { %v470_v33 = vpop.permute.xlu1 %469 }
 0x29c   :  { %v471_v41 = vrot.slane %v470_v33, 2 }
 0x29e   :  { %v472_v49 = vsel %vm173_vm3, %v470_v33, %v471_v41  ;;  %v955_v33 = vld [vmem:[%s8240_s1 + $0x70] sm:$0xff]  ;;  %v5932_v41 = vpack.c.bf16 %v962_v23, %v956_v15  ;;  %v1016_v15 = vld [vmem:[%s8240_s1 + $0x258] sm:$0xff]  ;;  %v1022_v23 = vld [vmem:[%s8240_s1 + $0x288] sm:$0xff] }
 0x29f   :  { %474 = vst.msk [vmem:[#allocation2] sm:$0xf] %vm5415_vm2, %v472_v49  ;;  %475 = vst.msk [vmem:[%s8242_s2] sm:$0xf] %vm5415_vm2, %v472_v49  ;;  %v961_v49 = vld [vmem:[%s8240_s1 + $0xa0] sm:$0xff] }
 0x2a6   :  { %v3716_v58 = vld.sshfl [vmem:[#allocation2] sm:$0x33 pattern:$0x76325410] }
 0x2a7   :  { %v632_v9 = vcombine.high %v3716_v58, %v3716_v58 }
 0x2a9   :  { %3717 = vmatprep.mubr.msk.f32.mxu1 %vm173_vm3, %v632_v9  ;;  %3718 = vmatprep.mubr.msk.f32.mxu0 %vm173_vm3, %v632_v9 }
 0x2aa   :  { %701 = vmatmul.mubr.f32.vlgmr.msra.gmra.mrb[2].mxu1 %v3716_v58  ;;  %772 = vmatmul.mubr.f32.vlgmr.msra.gmra.mrb[4].mxu0 %v3716_v58 }
 0x2ab   :  { %4027 = vmatpush1.bf16.msra.mxu1 %v5551_v57  ;;  %3719 = vmatprep.mubr.msk.f32.mxu1 %vm173_vm3, %v632_v9  ;;  %v972_v9 = vld [vmem:[%s8240_s1 + $0xf8] sm:$0xff] }
 0x2ac   :  { %4029 = vmatprep.subr.bf16.mxu1 %v5555_v59  ;;  %4075 = vmatpush1.bf16.msra.mxu0 %v5891_v13 }
 0x2ad   :  { %4077 = vmatprep.subr.bf16.mxu0 %v5918_v63 }
 0x2af   :  { %4031 = vmatpush1.bf16.msra.mxu1 %v5573_v28 }
 0x2b0   :  { %4033 = vmatprep.subr.bf16.mxu1 %v5576_v29  ;;  %4079 = vmatpush1.bf16.msra.mxu0 %v5920_v5 }
 0x2b3   :  { %4035 = vmatpush1.bf16.msra.mxu1 %v5594_v55 }
 0x2b4   :  { %4037 = vmatprep.subr.bf16.mxu1 %v5597_v11 }
 0x2b7   :  { %4039 = vmatpush1.bf16.msra.mxu1 %v5614_v19 }
 0x2b8   :  { %4041 = vmatprep.subr.bf16.mxu1 %v5617_v27 }
 0x2bb   :  { %4043 = vmatpush1.bf16.msra.mxu1 %v5634_v47  ;;  %v3714_v47 = vld [vmem:[%s8241_s0 + $0xc] sm:$0xff] }
 0x2bc   :  { %4045 = vmatprep.subr.bf16.mxu1 %v5637_v54 }
 0x2bf   :  { %4047 = vmatpush1.bf16.msra.mxu1 %v5654_v8 }
 0x2c0   :  { %4049 = vmatprep.subr.bf16.mxu1 %v5657_v16 }
 0x2c3   :  { %4051 = vmatpush1.bf16.msra.mxu1 %v5674_v21 }
 0x2c4   :  { %4053 = vmatprep.subr.bf16.mxu1 %v5677_v26 }
 0x2c7   :  { %4055 = vmatpush1.bf16.msra.mxu1 %v5694_v34 }
 0x2c8   :  { %4057 = vmatprep.subr.bf16.mxu1 %v5697_v39 }
 0x2cb   :  { %4059 = vmatpush1.bf16.msra.mxu1 %v5714_v50  ;;  %v3715_v50 = vld [vmem:[%s8241_s0 + $0x14] sm:$0xf] }
 0x2cc   :  { %4061 = vmatprep.subr.bf16.mxu1 %v5717_v52 }
 0x2cf   :  { %4063 = vmatpush1.bf16.msra.mxu1 %v5734_v62 }
 0x2d0   :  { %4065 = vmatprep.subr.bf16.mxu1 %v5737_v0 }
 0x2d3   :  { %4067 = vmatpush1.bf16.msra.mxu1 %v5754_v14 }
 0x2d4   :  { %4069 = vmatprep.subr.bf16.mxu1 %v5757_v18 }
 0x2d7   :  { %4071 = vmatpush1.bf16.msra.mxu1 %v5768_v4 }
 0x2d8   :  { %4121 = vmatprep.subr.bf16.mxu1 %v5893_v7 }
 0x2da   :  { %843 = vmatmul.mubr.f32.vlgmr.msra.gmra.mrb[4].mxu1 %v3716_v58  ;;  %v966_v58 = vld [vmem:[%s8240_s1 + $0xc8] sm:$0xff] }
 0x2db   :  { %4123 = vmatpush1.bf16.msra.mxu1 %v5905_v30 }
 0x2dc   :  { %4125 = vmatprep.subr.bf16.mxu1 %v5932_v41 }
 0x37d   :  { %v702_v57 = vpop.f32.mrb[2].mxu1  ;;  %v773_v59 = vpop.f32.mrb[4].mxu0 }
 0x37e   :  { %v704_v28 = vpop.f32.mrb[3].mxu1  ;;  %v775_v29 = vpop.f32.mrb[5].mxu0 }
 0x37f   :  { %v855_v55 = vcombine.low %v702_v57, %v704_v28  ;;  %v856_v11 = vcombine.low %v773_v59, %v775_v29  ;;  %v5944_v57 = vpack.c.bf16 %v961_v49, %v955_v33  ;;  %v5946_v59 = vpack.c.bf16 %v972_v9, %v966_v58  ;;  %v965_v28 = vld [vmem:[%s8240_s1 + $0xc0] sm:$0xff]  ;;  %v971_v29 = vld [vmem:[%s8240_s1 + $0xf0] sm:$0xff] }
 0x380   :  { %v6091_v33 = vpack.c.bf16 %v1007_v12, %v1001_v20  ;;  %v6095_v49 = vpack.c.bf16 %v1009_v38, %v1003_v17  ;;  %v6097_v58 = vpack.c.bf16 %v1020_v56, %v1014_v51  ;;  %v1013_v9 = vld [vmem:[%s8240_s1 + $0x240] sm:$0xff] }
 0x381   :  { %v863_v19 = vrot.slane %v855_v55, %v5801_v43  ;;  %v870_v27 = vrot.slane %v856_v11, %v5801_v43  ;;  %v968_v55 = vld [vmem:[%s8240_s1 + $0xd8] sm:$0xff]  ;;  %4127 = vmatpush1.bf16.msra.mxu1 %v5944_v57  ;;  %4081 = vmatprep.subr.bf16.mxu0 %v5946_v59  ;;  %v1045_v20 = vld [vmem:[%s8240_s1 + $0x340] sm:$0xff] }
 0x382   :  { %v6191_v17 = vpack.c.bf16 %v1045_v20, %v1039_v35  ;;  %v1063_v35 = vld [vmem:[%s8240_s1 + $0x3d0] sm:$0xff]  ;;  %v1069_v20 = vld [vmem:[%s8240_s1 + $0x400] sm:$0xff] }
 0x383   :  { %v871_v54 = vcombine.low %v863_v19, %v870_v27  ;;  %v974_v19 = vld [vmem:[%s8240_s1 + $0x108] sm:$0xff]  ;;  %v967_v27 = vld [vmem:[%s8240_s1 + $0xd0] sm:$0xff] }
 0x385   :  { %v882_v8 = vadd.f32 %v3714_v47, %v871_v54  ;;  %v973_v47 = vld [vmem:[%s8240_s1 + $0x100] sm:$0xff]  ;;  %v5969_v54 = vpack.c.bf16 %v971_v29, %v965_v28  ;;  %v1019_v28 = vld [vmem:[%s8240_s1 + $0x270] sm:$0xff] }
 0x386   :  { %v1015_v29 = vld [vmem:[%s8240_s1 + $0x250] sm:$0xff] }
 0x387   :  { %891 = vrot.lane.b32.xlu1 %v882_v8, %s5069_s19  ;;  %v3720_v16 = vmul.f32 -1.442695, %v882_v8  ;;  %v904_v14 = vrot.slane %v882_v8, 6  ;;  %v5971_v8 = vpack.c.bf16 %v974_v19, %v968_v55  ;;  %4083 = vmatpush1.bf16.msra.mxu0 %v5969_v54  ;;  %v6109_v55 = vpack.c.bf16 %v1022_v23, %v1016_v15  ;;  %v1026_v19 = vld [vmem:[%s8240_s1 + $0x2a8] sm:$0xff]  ;;  %v1056_v23 = vld [vmem:[%s8240_s1 + $0x398] sm:$0xff] }
 0x388   :  { %v1050_v15 = vld [vmem:[%s8240_s1 + $0x368] sm:$0xff] }
 0x389   :  { %4955 = vpow2.f32 %v3720_v16  ;;  %v978_v16 = vld [vmem:[%s8240_s1 + $0x128] sm:$0xff]  ;;  %4129 = vmatprep.subr.bf16.mxu1 %v5971_v8 }
 0x393   :  { %v4956_v39 = vpop.eup %4955 }
 0x394   :  { %v887_v62 = vadd.f32 1.0, %v4956_v39 }
 0x396   :  { %4957 = vrcp.f32 %v887_v62  ;;  %v986_v62 = vld [vmem:[%s8240_s1 + $0x168] sm:$0xff] }
 0x3a0   :  { %v4958_v10 = vpop.eup %4957 }
 0x3ad   :  { %v844_v21 = vpop.f32.mrb[4].mxu1 }
 0x3ae   :  { %v846_v26 = vpop.f32.mrb[5].mxu1 }
 0x3af   :  { %v872_v34 = vcombine.low %v844_v21, %v846_v26  ;;  %v984_v21 = vld [vmem:[%s8240_s1 + $0x158] sm:$0xff]  ;;  %v977_v26 = vld [vmem:[%s8240_s1 + $0x120] sm:$0xff] }
 0x3b0   :  { %v5986_v39 = vpack.c.bf16 %v984_v21, %v978_v16  ;;  %v1034_v16 = vld [vmem:[%s8240_s1 + $0x2e8] sm:$0xff]  ;;  %v6127_v21 = vpack.c.bf16 %v1019_v28, %v1013_v9  ;;  %v6203_v9 = vpack.c.bf16 %v1056_v23, %v1050_v15  ;;  %v1049_v28 = vld [vmem:[%s8240_s1 + $0x360] sm:$0xff]  ;;  %v1079_v23 = vld [vmem:[%s8240_s1 + $0x450] sm:$0xff] }
 0x3b1   :  { %v879_v52 = vrot.slane %v872_v34, %v5801_v43  ;;  %v5984_v34 = vpack.c.bf16 %v973_v47, %v967_v27  ;;  %v1032_v27 = vld [vmem:[%s8240_s1 + $0x2d8] sm:$0xff]  ;;  %v1073_v15 = vld [vmem:[%s8240_s1 + $0x420] sm:$0xff] }
 0x3b2   :  { %4085 = vmatprep.subr.bf16.mxu0 %v5986_v39  ;;  %v1028_v47 = vld [vmem:[%s8240_s1 + $0x2b8] sm:$0xff] }
 0x3b3   :  { %v5864_v0 = vadd.f32 %v3715_v50, %v879_v52  ;;  %v983_v50 = vld [vmem:[%s8240_s1 + $0x150] sm:$0xff]  ;;  %v980_v52 = vld [vmem:[%s8240_s1 + $0x138] sm:$0xff]  ;;  %4131 = vmatpush1.bf16.msra.mxu1 %v5984_v34 }
 0x3b5   :  { %v905_v18 = vrot.slane %v5864_v0, 6  ;;  %v3722_v38 = vmul.f32 -1.442695, %v5864_v0  ;;  %v1055_v0 = vld [vmem:[%s8240_s1 + $0x390] sm:$0xff] }
 0x3b7   :  { %v906_v4 = vsel %vm11_vm0, %v904_v14, %v905_v18  ;;  %v5998_v14 = vpack.c.bf16 %v986_v62, %v980_v52  ;;  %v979_v18 = vld [vmem:[%s8240_s1 + $0x130] sm:$0xff]  ;;  %v1025_v52 = vld [vmem:[%s8240_s1 + $0x2a0] sm:$0xff] }
 0x3b8   :  { %4959 = vtanh.f32 %v906_v4  ;;  %v985_v4 = vld [vmem:[%s8240_s1 + $0x160] sm:$0xff]  ;;  %v1031_v62 = vld [vmem:[%s8240_s1 + $0x2d0] sm:$0xff] }
 0x3b9   :  { %4133 = vmatprep.subr.bf16.mxu1 %v5998_v14 }
 0x3c2   :  { %v4960_v22 = vpop.eup %4959 }
 0x3c3   :  { %v917_v36 = vmul.f32 %v4960_v22, %v4958_v10  ;;  %v990_v10 = vld [vmem:[%s8240_s1 + $0x188] sm:$0xff]  ;;  %v996_v22 = vld [vmem:[%s8240_s1 + $0x1b8] sm:$0xff] }
 0x3f9   :  { %v892_v37 = vpop.permute.xlu1 %891 }
 0x3fa   :  { %v893_v40 = vrot.slane %v892_v37, 2  ;;  %v894_v46 = vrot.slane %v892_v37, 4  ;;  %v992_v37 = vld [vmem:[%s8240_s1 + $0x198] sm:$0xff] }
 0x3fc   :  { %v895_v60 = vsel %vm173_vm3, %v893_v40, %v894_v46  ;;  %v998_v40 = vld [vmem:[%s8240_s1 + $0x1c8] sm:$0xff]  ;;  %v6023_v46 = vpack.c.bf16 %v985_v4, %v979_v18  ;;  %v1027_v18 = vld [vmem:[%s8240_s1 + $0x2b0] sm:$0xff]  ;;  %v6145_v4 = vpack.c.bf16 %v1034_v16, %v1028_v47  ;;  %v1057_v47 = vld [vmem:[%s8240_s1 + $0x3a0] sm:$0xff] }
 0x3fd   :  { %v3721_v61 = vmul.f32 -1.442695, %v895_v60  ;;  %v6025_v60 = vpack.c.bf16 %v996_v22, %v990_v10  ;;  %v1033_v10 = vld [vmem:[%s8240_s1 + $0x2e0] sm:$0xff]  ;;  %v1038_v22 = vld [vmem:[%s8240_s1 + $0x308] sm:$0xff] }
 0x3fe   :  { %4135 = vmatpush1.bf16.msra.mxu1 %v6023_v46 }
 0x3ff   :  { %4961 = vpow2.f32 %v3721_v61  ;;  %v989_v61 = vld [vmem:[%s8240_s1 + $0x180] sm:$0xff] }
 0x409   :  { %v4962_v1 = vpop.eup %4961 }
 0x40a   :  { %v900_v2 = vadd.f32 1.0, %v4962_v1  ;;  %v995_v1 = vld [vmem:[%s8240_s1 + $0x1b0] sm:$0xff] }
 0x40b   :  { %v6055_v45 = vpack.c.bf16 %v995_v1, %v989_v61  ;;  %v1046_v61 = vld [vmem:[%s8240_s1 + $0x348] sm:$0xff]  ;;  %v6163_v1 = vpack.c.bf16 %v1031_v62, %v1025_v52 }
 0x40c   :  { %4963 = vrcp.f32 %v900_v2  ;;  %v991_v2 = vld [vmem:[%s8240_s1 + $0x190] sm:$0xff]  ;;  %v1062_v62 = vld [vmem:[%s8240_s1 + $0x3c8] sm:$0xff] }
 0x416   :  { %v4964_v24 = vpop.eup %4963 }
 0x417   :  { %v916_v42 = vmul.f32 %v4964_v24, %v915_v31  ;;  %v6037_v24 = vpack.c.bf16 %v998_v40, %v992_v37  ;;  %v997_v31 = vld [vmem:[%s8240_s1 + $0x1c0] sm:$0xff]  ;;  %v1044_v37 = vld [vmem:[%s8240_s1 + $0x338] sm:$0xff] }
 0x418   :  { %v6059_v48 = vpack.c.bf16 %v997_v31, %v991_v2  ;;  %v1040_v40 = vld [vmem:[%s8240_s1 + $0x318] sm:$0xff]  ;;  %v6167_v2 = vpack.c.bf16 %v1033_v10, %v1027_v18  ;;  %v6169_v31 = vpack.c.bf16 %v1044_v37, %v1038_v22  ;;  %v1061_v10 = vld [vmem:[%s8240_s1 + $0x3c0] sm:$0xff]  ;;  %v1067_v37 = vld [vmem:[%s8240_s1 + $0x3f0] sm:$0xff] }
 0x419   :  { %v918_v44 = vadd.f32 %v917_v36, %v916_v42  ;;  %v6013_v36 = vpack.c.bf16 %v983_v50, %v977_v26  ;;  %v1002_v42 = vld [vmem:[%s8240_s1 + $0x1e8] sm:$0xff]  ;;  %4137 = vmatprep.subr.bf16.mxu1 %v6037_v24  ;;  %v6133_v50 = vpack.c.bf16 %v1032_v27, %v1026_v19  ;;  %v6178_v32 = vpack.c.bf16 %v1046_v61, %v1040_v40  ;;  %v1051_v27 = vld [vmem:[%s8240_s1 + $0x370] sm:$0xff]  ;;  %v1068_v18 = vld [vmem:[%s8240_s1 + $0x3f8] sm:$0xff] }
 0x41a   :  { %4139 = vmatpush1.bf16.msra.mxu1 %v6059_v48  ;;  %v1058_v19 = vld [vmem:[%s8240_s1 + $0x3a8] sm:$0xff]  ;;  %v6228_v52 = vpack.c.bf16 %v1057_v47, %v1051_v27  ;;  %v6241_v22 = vpack.c.bf16 %v1068_v18, %v1062_v62  ;;  %v1064_v40 = vld [vmem:[%s8240_s1 + $0x3d8] sm:$0xff]  ;;  %v1075_v47 = vld [vmem:[%s8240_s1 + $0x430] sm:$0xff] }
 0x41b   :  { %927 = vst.msk [vmem:[#allocation3] sm:$0xf] %vm5415_vm2, %v918_v44  ;;  %4965 = vtanh.f32 %v918_v44  ;;  %v1008_v44 = vld [vmem:[%s8240_s1 + $0x218] sm:$0xff]  ;;  %4087 = vmatpush1.bf16.msra.mxu0 %v6013_v36  ;;  %4141 = vmatprep.subr.bf16.mxu1 %v6073_v25  ;;  %v1070_v61 = vld [vmem:[%s8240_s1 + $0x408] sm:$0xff] }
 0x41c   :  { %4089 = vmatprep.subr.bf16.mxu0 %v6025_v60  ;;  %v6061_v53 = vpack.c.bf16 %v1008_v44, %v1002_v42  ;;  %v1037_v42 = vld [vmem:[%s8240_s1 + $0x300] sm:$0xff]  ;;  %v1043_v44 = vld [vmem:[%s8240_s1 + $0x330] sm:$0xff]  ;;  %4967 = vpow2.f32 %v3722_v38  ;;  %v1074_v38 = vld [vmem:[%s8240_s1 + $0x428] sm:$0xff] }
 0x41d   :  { %v6187_v12 = vpack.c.bf16 %v1043_v44, %v1037_v42  ;;  %v6253_v42 = vpack.c.bf16 %v1067_v37, %v1061_v10  ;;  %v6255_v44 = vpack.c.bf16 %v1070_v61, %v1064_v40  ;;  %v1082_v27 = vld [vmem:[%s8240_s1 + $0x468] sm:$0xff]  ;;  %v1081_v10 = vld [vmem:[%s8240_s1 + $0x460] sm:$0xff] }
 0x41e   :  { %4143 = vmatpush1.bf16.msra.mxu1 %v6095_v49  ;;  %v6300_v37 = vpack.c.bf16 %v1081_v10, %v1075_v47  ;;  %v964_v47 = vld [vmem:[%s8240_s1 + $0xb8] sm:$0xff] }
 0x41f   :  { %4091 = vmatpush1.bf16.msra.mxu0 %v6055_v45  ;;  %4145 = vmatprep.subr.bf16.mxu1 %v6109_v55 }
 0x420   :  { %4093 = vmatprep.subr.bf16.mxu0 %v6061_v53 }
 0x423   :  { %4095 = vmatpush1.bf16.msra.mxu0 %v6091_v33 }
 0x424   :  { %4097 = vmatprep.subr.bf16.mxu0 %v6097_v58 }
 0x425   :  { %v4966_v11 = vpop.eup %4965 }
 0x426   :  { %921 = vrot.lane.b32.xlu0 %v4966_v11, %s5069_s19  ;;  %v1021_v11 = vld [vmem:[%s8240_s1 + $0x280] sm:$0xff]  ;;  %v4968_v51 = vpop.eup %4967 }
 0x427   :  { %v6131_v26 = vpack.c.bf16 %v1021_v11, %v1015_v29  ;;  %4099 = vmatpush1.bf16.msra.mxu0 %v6127_v21  ;;  %v912_v56 = vadd.f32 1.0, %v4968_v51  ;;  %v1052_v29 = vld [vmem:[%s8240_s1 + $0x378] sm:$0xff]  ;;  %v6214_v11 = vpack.c.bf16 %v1055_v0, %v1049_v28  ;;  %v6267_v51 = vpack.c.bf16 %v1069_v20, %v1063_v35  ;;  %v946_v20 = vld [vmem:[%s8240_s1 + $0x28] sm:$0xff] }
 0x428   :  { %4101 = vmatprep.subr.bf16.mxu0 %v6133_v50  ;;  %v6226_v16 = vpack.c.bf16 %v1058_v19, %v1052_v29  ;;  %v6282_v29 = vpack.c.bf16 %v1079_v23, %v1073_v15  ;;  %v1076_v19 = vld [vmem:[%s8240_s1 + $0x438] sm:$0xff] }
 0x429   :  { %4147 = vmatpush1.bf16.msra.mxu1 %v6131_v26  ;;  %4969 = vrcp.f32 %v912_v56  ;;  %v1080_v56 = vld [vmem:[%s8240_s1 + $0x458] sm:$0xff]  ;;  %v6293_v18 = vpack.c.bf16 %v1082_v27, %v1076_v19  ;;  %v945_v19 = vld [vmem:[%s8240_s1 + $0x20] sm:$0xff]  ;;  %v958_v27 = vld [vmem:[%s8240_s1 + $0x88] sm:$0xff] }
 0x42a   :  { %4149 = vmatprep.subr.bf16.mxu1 %v6145_v4  ;;  %v6280_v0 = vpack.c.bf16 %v1080_v56, %v1074_v38  ;;  %v952_v38 = vld [vmem:[%s8240_s1 + $0x58] sm:$0xff] }
 0x42b   :  { %4103 = vmatpush1.bf16.msra.mxu0 %v6163_v1  ;;  %v6311_v56 = vpack.c.bf16 %v952_v38, %v946_v20  ;;  %v963_v20 = vld [vmem:[%s8240_s1 + $0xb0] sm:$0xff]  ;;  %v970_v38 = vld [vmem:[%s8240_s1 + $0xe8] sm:$0xff] }
 0x42c   :  { %4105 = vmatprep.subr.bf16.mxu0 %v6169_v31 }
 0x42d   :  { %4151 = vmatpush1.bf16.msra.mxu1 %v6167_v2 }
 0x42e   :  { %4153 = vmatprep.subr.bf16.mxu1 %v6178_v32 }
 0x42f   :  { %4107 = vmatpush1.bf16.msra.mxu0 %v6187_v12 }
 0x430   :  { %4109 = vmatprep.subr.bf16.mxu0 %v6203_v9 }
 0x431   :  { %4155 = vmatpush1.bf16.msra.mxu1 %v6191_v17 }
 0x432   :  { %4157 = vmatprep.subr.bf16.mxu1 %v6226_v16 }
 0x433   :  { %4111 = vmatpush1.bf16.msra.mxu0 %v6214_v11  ;;  %v4970_v40 = vpop.eup %4969 }
 0x434   :  { %4113 = vmatprep.subr.bf16.mxu0 %v6241_v22 }
 0x435   :  { %4159 = vmatpush1.bf16.msra.mxu1 %v6228_v52 }
 0x436   :  { %4161 = vmatprep.subr.bf16.mxu1 %v6255_v44 }
 0x437   :  { %4115 = vmatpush1.bf16.msra.mxu0 %v6253_v42 }
 0x438   :  { %4117 = vmatprep.subr.bf16.mxu0 %v6280_v0 }
 0x439   :  { %4163 = vmatpush1.bf16.msra.mxu1 %v6267_v51 }
 0x43a   :  { %4165 = vmatprep.subr.bf16.mxu1 %v6293_v18 }
 0x43b   :  { %4119 = vmatpush1.bf16.msra.mxu0 %v6282_v29 }
 0x43c   :  { %4169 = vmatprep.subr.bf16.mxu0 %v6311_v56 }
 0x43d   :  { %4167 = vmatpush1.bf16.msra.mxu1 %v6300_v37 }
 0x43e   :  { %4217 = vmatprep.subr.bf16.mxu1 %v5880_v3  ;;  %v951_v3 = vld [vmem:[%s8240_s1 + $0x50] sm:$0xff] }
 0x498   :  { %v922_v28 = vpop.permute.xlu0 %921 }
 0x499   :  { %v923_v62 = vrot.slane %v922_v28, 6 }
 0x49b   :  { %v924_v61 = vsel %vm173_vm3, %v923_v62, %v922_v28 }
 0x49c   :  { %v926_v35 = vmul.f32 %v4970_v40, %v924_v61  ;;  %v6341_v40 = vpack.c.bf16 %v951_v3, %v945_v19  ;;  %v6343_v61 = vpack.c.bf16 %v964_v47, %v958_v27  ;;  %v969_v19 = vld [vmem:[%s8240_s1 + $0xe0] sm:$0xff]  ;;  %v975_v3 = vld [vmem:[%s8240_s1 + $0x110] sm:$0xff]  ;;  %v982_v27 = vld [vmem:[%s8240_s1 + $0x148] sm:$0xff] }
 0x49d   :  { %v988_v47 = vld [vmem:[%s8240_s1 + $0x178] sm:$0xff] }
 0x49e   :  { %929 = vrot.lane.b32.xlu1 %v926_v35, %s5069_s19  ;;  %v957_v35 = vld [vmem:[%s8240_s1 + $0x80] sm:$0xff] }
 0x510   :  { %v930_v15 = vpop.permute.xlu1 %929 }
 0x511   :  { %v931_v23 = vrot.slane %v930_v15, 2 }
 0x513   :  { %v932_v28 = vsel %vm173_vm3, %v930_v15, %v931_v23  ;;  %v976_v15 = vld [vmem:[%s8240_s1 + $0x118] sm:$0xff]  ;;  %v6363_v23 = vpack.c.bf16 %v963_v20, %v957_v35  ;;  %v6386_v35 = vpack.c.bf16 %v988_v47, %v982_v27  ;;  %v987_v20 = vld [vmem:[%s8240_s1 + $0x170] sm:$0xff] }
 0x514   :  { %934 = vst.msk [vmem:[#allocation2] sm:$0xf] %vm5415_vm2, %v932_v28  ;;  %3723 = vst.msk [vmem:[%s8242_s2 + $0x4] sm:$0xf] %vm5415_vm2, %v932_v28  ;;  %v6366_v28 = vpack.c.bf16 %v976_v15, %v970_v38  ;;  %v1000_v38 = vld [vmem:[%s8240_s1 + $0x1d8] sm:$0xff] }
 0x515   :  { %v1012_v27 = vld [vmem:[%s8240_s1 + $0x238] sm:$0xff] }
 0x51b   :  { %v6337_v62 = vld.sshfl [vmem:[#allocation2] sm:$0x33 pattern:$0x76325410] }
 0x51c   :  { %v1093_v10 = vcombine.high %v6337_v62, %v6337_v62 }
 0x51e   :  { %3727 = vmatprep.mubr.msk.f32.mxu0 %vm173_vm3, %v1093_v10  ;;  %3728 = vmatprep.mubr.msk.f32.mxu1 %vm173_vm3, %v1093_v10 }
 0x51f   :  { %1162 = vmatmul.mubr.f32.vlgmr.msra.gmra.mrb[6].mxu0 %v6337_v62  ;;  %1233 = vmatmul.mubr.f32.vlgmr.msra.gmra.mrb[6].mxu1 %v6337_v62 }
 0x520   :  { %4171 = vmatpush1.bf16.msra.mxu0 %v6341_v40  ;;  %3729 = vmatprep.mubr.msk.f32.mxu0 %vm173_vm3, %v1093_v10  ;;  %v6383_v10 = vpack.c.bf16 %v975_v3, %v969_v19  ;;  %v999_v3 = vld [vmem:[%s8240_s1 + $0x1d0] sm:$0xff] }
 0x521   :  { %4173 = vmatprep.subr.bf16.mxu0 %v6343_v61  ;;  %4219 = vmatpush1.bf16.msra.mxu1 %v5891_v13  ;;  %v981_v13 = vld [vmem:[%s8240_s1 + $0x140] sm:$0xff] }
 0x522   :  { %4221 = vmatprep.subr.bf16.mxu1 %v5918_v63  ;;  %v994_v63 = vld [vmem:[%s8240_s1 + $0x1a8] sm:$0xff]  ;;  %v6403_v15 = vpack.c.bf16 %v987_v20, %v981_v13  ;;  %v1011_v20 = vld [vmem:[%s8240_s1 + $0x230] sm:$0xff] }
 0x523   :  { %v6406_v19 = vpack.c.bf16 %v1000_v38, %v994_v63  ;;  %v1024_v63 = vld [vmem:[%s8240_s1 + $0x298] sm:$0xff] }
 0x524   :  { %4175 = vmatpush1.bf16.msra.mxu0 %v6363_v23 }
 0x525   :  { %4177 = vmatprep.subr.bf16.mxu0 %v6366_v28  ;;  %4223 = vmatpush1.bf16.msra.mxu1 %v5920_v5  ;;  %v993_v5 = vld [vmem:[%s8240_s1 + $0x1a0] sm:$0xff] }
 0x526   :  { %4225 = vmatprep.subr.bf16.mxu1 %v5946_v59  ;;  %v1006_v59 = vld [vmem:[%s8240_s1 + $0x208] sm:$0xff]  ;;  %v6423_v47 = vpack.c.bf16 %v999_v3, %v993_v5  ;;  %v1023_v3 = vld [vmem:[%s8240_s1 + $0x290] sm:$0xff] }
 0x527   :  { %v6426_v13 = vpack.c.bf16 %v1012_v27, %v1006_v59  ;;  %v1036_v59 = vld [vmem:[%s8240_s1 + $0x2f8] sm:$0xff] }
 0x528   :  { %4179 = vmatpush1.bf16.msra.mxu0 %v6383_v10 }
 0x529   :  { %4181 = vmatprep.subr.bf16.mxu0 %v6386_v35  ;;  %4227 = vmatpush1.bf16.msra.mxu1 %v5969_v54  ;;  %v1005_v54 = vld [vmem:[%s8240_s1 + $0x200] sm:$0xff] }
 0x52a   :  { %4229 = vmatprep.subr.bf16.mxu1 %v5986_v39  ;;  %v1018_v39 = vld [vmem:[%s8240_s1 + $0x268] sm:$0xff]  ;;  %v6443_v38 = vpack.c.bf16 %v1011_v20, %v1005_v54  ;;  %v1035_v20 = vld [vmem:[%s8240_s1 + $0x2f0] sm:$0xff] }
 0x52b   :  { %v6446_v5 = vpack.c.bf16 %v1024_v63, %v1018_v39  ;;  %v1048_v39 = vld [vmem:[%s8240_s1 + $0x358] sm:$0xff] }
 0x52c   :  { %4183 = vmatpush1.bf16.msra.mxu0 %v6403_v15 }
 0x52d   :  { %4185 = vmatprep.subr.bf16.mxu0 %v6406_v19  ;;  %4231 = vmatpush1.bf16.msra.mxu1 %v6013_v36  ;;  %v1017_v36 = vld [vmem:[%s8240_s1 + $0x260] sm:$0xff] }
 0x52e   :  { %4233 = vmatprep.subr.bf16.mxu1 %v6025_v60  ;;  %v1030_v60 = vld [vmem:[%s8240_s1 + $0x2c8] sm:$0xff]  ;;  %v6463_v27 = vpack.c.bf16 %v1023_v3, %v1017_v36  ;;  %v1047_v3 = vld [vmem:[%s8240_s1 + $0x350] sm:$0xff] }
 0x52f   :  { %v6466_v54 = vpack.c.bf16 %v1036_v59, %v1030_v60  ;;  %v1060_v60 = vld [vmem:[%s8240_s1 + $0x3b8] sm:$0xff] }
 0x530   :  { %4187 = vmatpush1.bf16.msra.mxu0 %v6423_v47 }
 0x531   :  { %4189 = vmatprep.subr.bf16.mxu0 %v6426_v13  ;;  %4235 = vmatpush1.bf16.msra.mxu1 %v6055_v45  ;;  %v1029_v45 = vld [vmem:[%s8240_s1 + $0x2c0] sm:$0xff] }
 0x532   :  { %4237 = vmatprep.subr.bf16.mxu1 %v6061_v53  ;;  %v1042_v53 = vld [vmem:[%s8240_s1 + $0x328] sm:$0xff]  ;;  %v6483_v63 = vpack.c.bf16 %v1035_v20, %v1029_v45  ;;  %v1059_v20 = vld [vmem:[%s8240_s1 + $0x3b0] sm:$0xff] }
 0x533   :  { %v6486_v36 = vpack.c.bf16 %v1048_v39, %v1042_v53  ;;  %v1072_v53 = vld [vmem:[%s8240_s1 + $0x418] sm:$0xff] }
 0x534   :  { %4191 = vmatpush1.bf16.msra.mxu0 %v6443_v38 }
 0x535   :  { %4193 = vmatprep.subr.bf16.mxu0 %v6446_v5  ;;  %4239 = vmatpush1.bf16.msra.mxu1 %v6091_v33  ;;  %v1041_v33 = vld [vmem:[%s8240_s1 + $0x320] sm:$0xff] }
 0x536   :  { %4241 = vmatprep.subr.bf16.mxu1 %v6097_v58  ;;  %v1054_v58 = vld [vmem:[%s8240_s1 + $0x388] sm:$0xff]  ;;  %v6503_v59 = vpack.c.bf16 %v1047_v3, %v1041_v33  ;;  %v1071_v3 = vld [vmem:[%s8240_s1 + $0x410] sm:$0xff] }
 0x537   :  { %v6506_v45 = vpack.c.bf16 %v1060_v60, %v1054_v58  ;;  %v1084_v58 = vld [vmem:[%s8240_s1 + $0x478] sm:$0xff] }
 0x538   :  { %4195 = vmatpush1.bf16.msra.mxu0 %v6463_v27 }
 0x539   :  { %4197 = vmatprep.subr.bf16.mxu0 %v6466_v54  ;;  %4243 = vmatpush1.bf16.msra.mxu1 %v6127_v21  ;;  %v1053_v21 = vld [vmem:[%s8240_s1 + $0x380] sm:$0xff] }
 0x53a   :  { %4245 = vmatprep.subr.bf16.mxu1 %v6133_v50  ;;  %v1066_v50 = vld [vmem:[%s8240_s1 + $0x3e8] sm:$0xff]  ;;  %v6523_v39 = vpack.c.bf16 %v1059_v20, %v1053_v21  ;;  %v1083_v20 = vld [vmem:[%s8240_s1 + $0x470] sm:$0xff] }
 0x53b   :  { %v6526_v33 = vpack.c.bf16 %v1072_v53, %v1066_v50 }
 0x53c   :  { %4199 = vmatpush1.bf16.msra.mxu0 %v6483_v63 }
 0x53d   :  { %4201 = vmatprep.subr.bf16.mxu0 %v6486_v36  ;;  %4247 = vmatpush1.bf16.msra.mxu1 %v6163_v1  ;;  %v1065_v1 = vld [vmem:[%s8240_s1 + $0x3e0] sm:$0xff] }
 0x53e   :  { %4249 = vmatprep.subr.bf16.mxu1 %v6169_v31  ;;  %v1078_v31 = vld [vmem:[%s8240_s1 + $0x448] sm:$0xff]  ;;  %v6543_v60 = vpack.c.bf16 %v1071_v3, %v1065_v1  ;;  %v1376_v3 = vld [vmem:[#allocation3] sm:$0xf] }
 0x53f   :  { %v6546_v21 = vpack.c.bf16 %v1084_v58, %v1078_v31 }
 0x540   :  { %4203 = vmatpush1.bf16.msra.mxu0 %v6503_v59 }
 0x541   :  { %4205 = vmatprep.subr.bf16.mxu0 %v6506_v45  ;;  %4251 = vmatpush1.bf16.msra.mxu1 %v6187_v12  ;;  %v1077_v12 = vld [vmem:[%s8240_s1 + $0x440] sm:$0xff] }
 0x542   :  { %4253 = vmatprep.subr.bf16.mxu1 %v6203_v9  ;;  %v6557_v9 = vpack.c.bf16 %v1083_v20, %v1077_v12 }
 0x544   :  { %4207 = vmatpush1.bf16.msra.mxu0 %v6523_v39 }
 0x545   :  { %4209 = vmatprep.subr.bf16.mxu0 %v6526_v33  ;;  %4255 = vmatpush1.bf16.msra.mxu1 %v6214_v11 }
 0x546   :  { %4257 = vmatprep.subr.bf16.mxu1 %v6241_v22 }
 0x548   :  { %4211 = vmatpush1.bf16.msra.mxu0 %v6543_v60 }
 0x549   :  { %4213 = vmatprep.subr.bf16.mxu0 %v6546_v21  ;;  %4259 = vmatpush1.bf16.msra.mxu1 %v6253_v42 }
 0x54a   :  { %4261 = vmatprep.subr.bf16.mxu1 %v6280_v0 }
 0x54c   :  { %4215 = vmatpush1.bf16.msra.mxu0 %v6557_v9 }
 0x54d   :  { %4265 = vmatprep.subr.bf16.mxu0 %v5893_v7  ;;  %4263 = vmatpush1.bf16.msra.mxu1 %v6282_v29 }
 0x54e   :  { %4313 = vmatprep.subr.bf16.mxu1 %v6311_v56 }
 0x54f   :  { %1304 = vmatmul.mubr.f32.vlgmr.msra.gmra.mrb[8].mxu0 %v6337_v62 }
 0x550   :  { %4267 = vmatpush1.bf16.msra.mxu0 %v5905_v30 }
 0x551   :  { %4269 = vmatprep.subr.bf16.mxu0 %v5932_v41 }
 0x554   :  { %4271 = vmatpush1.bf16.msra.mxu0 %v5944_v57 }
 0x555   :  { %4273 = vmatprep.subr.bf16.mxu0 %v5971_v8 }
 0x558   :  { %4275 = vmatpush1.bf16.msra.mxu0 %v5984_v34 }
 0x559   :  { %4277 = vmatprep.subr.bf16.mxu0 %v5998_v14 }
 0x55c   :  { %4279 = vmatpush1.bf16.msra.mxu0 %v6023_v46 }
 0x55d   :  { %4281 = vmatprep.subr.bf16.mxu0 %v6037_v24  ;;  %v3724_v24 = vld [vmem:[%s8241_s0 + $0x18] sm:$0xff] }
 0x560   :  { %4283 = vmatpush1.bf16.msra.mxu0 %v6059_v48 }
 0x561   :  { %4285 = vmatprep.subr.bf16.mxu0 %v6073_v25 }
 0x564   :  { %4287 = vmatpush1.bf16.msra.mxu0 %v6095_v49 }
 0x565   :  { %4289 = vmatprep.subr.bf16.mxu0 %v6109_v55 }
 0x568   :  { %4291 = vmatpush1.bf16.msra.mxu0 %v6131_v26 }
 0x569   :  { %4293 = vmatprep.subr.bf16.mxu0 %v6145_v4 }
 0x56c   :  { %4295 = vmatpush1.bf16.msra.mxu0 %v6167_v2 }
 0x56d   :  { %4297 = vmatprep.subr.bf16.mxu0 %v6178_v32  ;;  %v3725_v32 = vld [vmem:[%s8241_s0 + $0x20] sm:$0xf] }
 0x570   :  { %4299 = vmatpush1.bf16.msra.mxu0 %v6191_v17 }
 0x571   :  { %4301 = vmatprep.subr.bf16.mxu0 %v6226_v16 }
 0x574   :  { %4303 = vmatpush1.bf16.msra.mxu0 %v6228_v52 }
 0x575   :  { %4305 = vmatprep.subr.bf16.mxu0 %v6255_v44 }
 0x578   :  { %4307 = vmatpush1.bf16.msra.mxu0 %v6267_v51 }
 0x579   :  { %4309 = vmatprep.subr.bf16.mxu0 %v6293_v18 }
 0x57c   :  { %4311 = vmatpush1.bf16.msra.mxu0 %v6300_v37 }
 0x5f2   :  { %v1163_v7 = vpop.f32.mrb[6].mxu0  ;;  %v1234_v30 = vpop.f32.mrb[6].mxu1 }
 0x5f3   :  { %v1165_v41 = vpop.f32.mrb[7].mxu0  ;;  %v1236_v57 = vpop.f32.mrb[7].mxu1 }
 0x5f4   :  { %v1316_v8 = vcombine.low %v1163_v7, %v1165_v41  ;;  %v1317_v34 = vcombine.low %v1234_v30, %v1236_v57 }
 0x5f6   :  { %v1324_v14 = vrot.slane %v1316_v8, %v5801_v43  ;;  %v1331_v46 = vrot.slane %v1317_v34, %v5801_v43 }
 0x5f8   :  { %v1332_v48 = vcombine.low %v1324_v14, %v1331_v46 }
 0x5fa   :  { %v1343_v25 = vadd.f32 %v3724_v24, %v1332_v48 }
 0x5fc   :  { %1352 = vrot.lane.b32.xlu0 %v1343_v25, %s5069_s19  ;;  %v3730_v49 = vmul.f32 -1.442695, %v1343_v25  ;;  %v1365_v52 = vrot.slane %v1343_v25, 6 }
 0x5fe   :  { %4971 = vpow2.f32 %v3730_v49 }
 0x608   :  { %v4972_v2 = vpop.eup %4971 }
 0x609   :  { %v1348_v11 = vadd.f32 1.0, %v4972_v2 }
 0x60b   :  { %4973 = vrcp.f32 %v1348_v11 }
 0x615   :  { %v4974_v44 = vpop.eup %4973 }
 0x622   :  { %v1305_v55 = vpop.f32.mrb[8].mxu0 }
 0x623   :  { %v1307_v26 = vpop.f32.mrb[9].mxu0 }
 0x624   :  { %v1333_v4 = vcombine.low %v1305_v55, %v1307_v26 }
 0x626   :  { %v1340_v17 = vrot.slane %v1333_v4, %v5801_v43 }
 0x628   :  { %v1344_v16 = vadd.f32 %v3725_v32, %v1340_v17 }
 0x62a   :  { %v1366_v22 = vrot.slane %v1344_v16, 6  ;;  %v3732_v20 = vmul.f32 -1.442695, %v1344_v16 }
 0x62c   :  { %v1367_v42 = vsel %vm11_vm0, %v1365_v52, %v1366_v22 }
 0x62d   :  { %4975 = vtanh.f32 %v1367_v42 }
 0x637   :  { %v4976_v51 = vpop.eup %4975 }
 0x638   :  { %v1378_v0 = vmul.f32 %v4976_v51, %v4974_v44 }
 0x66e   :  { %v1353_v29 = vpop.permute.xlu0 %1352 }
 0x66f   :  { %v1354_v18 = vrot.slane %v1353_v29, 2  ;;  %v1355_v37 = vrot.slane %v1353_v29, 4  ;;  %v1864_v29 = vld [vmem:[%s8240_s1 + $0x8] sm:$0xff] }
 0x671   :  { %v1356_v56 = vsel %vm173_vm3, %v1354_v18, %v1355_v37  ;;  %v1870_v18 = vld [vmem:[%s8240_s1 + $0x38] sm:$0xff]  ;;  %v1863_v37 = vld [vmem:[%s8240_s1] sm:$0xff] }
 0x672   :  { %v3731_v62 = vmul.f32 -1.442695, %v1356_v56  ;;  %v6667_v56 = vpack.c.bf16 %v1870_v18, %v1864_v29  ;;  %v1926_v29 = vld [vmem:[%s8240_s1 + $0x1f8] sm:$0xff]  ;;  %v1932_v18 = vld [vmem:[%s8240_s1 + $0x228] sm:$0xff] }
 0x674   :  { %4977 = vpow2.f32 %v3731_v62  ;;  %v1869_v62 = vld [vmem:[%s8240_s1 + $0x30] sm:$0xff]  ;;  %4361 = vmatprep.subr.bf16.mxu0 %v6667_v56 }
 0x67e   :  { %v4978_v50 = vpop.eup %4977 }
 0x67f   :  { %v1361_v53 = vadd.f32 1.0, %v4978_v50  ;;  %v1866_v50 = vld [vmem:[%s8240_s1 + $0x18] sm:$0xff] }
 0x681   :  { %4979 = vrcp.f32 %v1361_v53  ;;  %v1872_v53 = vld [vmem:[%s8240_s1 + $0x48] sm:$0xff] }
 0x68b   :  { %v4980_v1 = vpop.eup %4979 }
 0x68c   :  { %v1377_v31 = vmul.f32 %v4980_v1, %v1376_v3  ;;  %v6678_v1 = vpack.c.bf16 %v1869_v62, %v1863_v37  ;;  %v6680_v3 = vpack.c.bf16 %v1872_v53, %v1866_v50  ;;  %v1923_v53 = vld [vmem:[%s8240_s1 + $0x1e0] sm:$0xff] }
 0x68e   :  { %v1379_v58 = vadd.f32 %v1378_v0, %v1377_v31  ;;  %v1865_v31 = vld [vmem:[%s8240_s1 + $0x10] sm:$0xff] }
 0x690   :  { %1388 = vst.msk [vmem:[#allocation3] sm:$0xf] %vm5415_vm2, %v1379_v58  ;;  %4981 = vtanh.f32 %v1379_v58  ;;  %v1871_v58 = vld [vmem:[%s8240_s1 + $0x40] sm:$0xff] }
 0x691   :  { %4983 = vpow2.f32 %v3732_v20  ;;  %v6692_v20 = vpack.c.bf16 %v1871_v58, %v1865_v31  ;;  %v1929_v31 = vld [vmem:[%s8240_s1 + $0x210] sm:$0xff] }
 0x692   :  { %v1925_v58 = vld [vmem:[%s8240_s1 + $0x1f0] sm:$0xff] }
 0x697   :  { %v1837_v44 = vld [vmem:[#allocation3] sm:$0xf] }
 0x69a   :  { %v4982_v12 = vpop.eup %4981 }
 0x69b   :  { %1382 = vrot.lane.b32.xlu1 %v4982_v12, %s5069_s19  ;;  %v4984_v7 = vpop.eup %4983  ;;  %v1876_v12 = vld [vmem:[%s8240_s1 + $0x68] sm:$0xff] }
 0x69c   :  { %v1373_v30 = vadd.f32 1.0, %v4984_v7  ;;  %v1882_v7 = vld [vmem:[%s8240_s1 + $0x98] sm:$0xff] }
 0x69e   :  { %4985 = vrcp.f32 %v1373_v30  ;;  %v1875_v30 = vld [vmem:[%s8240_s1 + $0x60] sm:$0xff] }
 0x6a8   :  { %v4986_v8 = vpop.eup %4985 }
 0x70d   :  { %v1383_v41 = vpop.permute.xlu1 %1382 }
 0x70e   :  { %v1384_v57 = vrot.slane %v1383_v41, 6 }
 0x710   :  { %v1385_v34 = vsel %vm173_vm3, %v1384_v57, %v1383_v41  ;;  %v1881_v41 = vld [vmem:[%s8240_s1 + $0x90] sm:$0xff]  ;;  %v6705_v57 = vpack.c.bf16 %v1882_v7, %v1876_v12  ;;  %v6860_v12 = vpack.c.bf16 %v1932_v18, %v1926_v29  ;;  %v1931_v7 = vld [vmem:[%s8240_s1 + $0x220] sm:$0xff] }
 0x711   :  { %v1387_v14 = vmul.f32 %v4986_v8, %v1385_v34  ;;  %v6707_v8 = vpack.c.bf16 %v1881_v41, %v1875_v30  ;;  %v1878_v34 = vld [vmem:[%s8240_s1 + $0x78] sm:$0xff]  ;;  %v1936_v30 = vld [vmem:[%s8240_s1 + $0x248] sm:$0xff]  ;;  %v1961_v18 = vld [vmem:[%s8240_s1 + $0x310] sm:$0xff] }
 0x712   :  { %v1942_v41 = vld [vmem:[%s8240_s1 + $0x278] sm:$0xff] }
 0x713   :  { %1390 = vrot.lane.b32.xlu0 %v1387_v14, %s5069_s19  ;;  %v1884_v14 = vld [vmem:[%s8240_s1 + $0xa8] sm:$0xff] }
 0x785   :  { %v1391_v46 = vpop.permute.xlu0 %1390 }
 0x786   :  { %v1392_v24 = vrot.slane %v1391_v46, 2 }
 0x788   :  { %v1393_v48 = vsel %vm173_vm3, %v1391_v46, %v1392_v24  ;;  %v1877_v46 = vld [vmem:[%s8240_s1 + $0x70] sm:$0xff]  ;;  %v6719_v24 = vpack.c.bf16 %v1884_v14, %v1878_v34  ;;  %v1938_v34 = vld [vmem:[%s8240_s1 + $0x258] sm:$0xff]  ;;  %v1944_v14 = vld [vmem:[%s8240_s1 + $0x288] sm:$0xff] }
 0x789   :  { %1395 = vst.msk [vmem:[#allocation2] sm:$0xf] %vm5415_vm2, %v1393_v48  ;;  %3733 = vst.msk [vmem:[%s8242_s2 + $0x8] sm:$0xf] %vm5415_vm2, %v1393_v48  ;;  %v1883_v48 = vld [vmem:[%s8240_s1 + $0xa0] sm:$0xff] }
 0x790   :  { %v3736_v25 = vld.sshfl [vmem:[#allocation2] sm:$0x33 pattern:$0x76325410] }
 0x791   :  { %v1554_v49 = vcombine.high %v3736_v25, %v3736_v25 }
 0x793   :  { %3737 = vmatprep.mubr.msk.f32.mxu1 %vm173_vm3, %v1554_v49  ;;  %3738 = vmatprep.mubr.msk.f32.mxu0 %vm173_vm3, %v1554_v49 }
 0x794   :  { %1623 = vmatmul.mubr.f32.vlgmr.msra.gmra.mrb[8].mxu1 %v3736_v25  ;;  %1694 = vmatmul.mubr.f32.vlgmr.msra.gmra.mrb[10].mxu0 %v3736_v25 }
 0x795   :  { %4315 = vmatpush1.bf16.msra.mxu1 %v6341_v40  ;;  %3739 = vmatprep.mubr.msk.f32.mxu1 %vm173_vm3, %v1554_v49  ;;  %v1894_v49 = vld [vmem:[%s8240_s1 + $0xf8] sm:$0xff] }
 0x796   :  { %4317 = vmatprep.subr.bf16.mxu1 %v6343_v61  ;;  %4363 = vmatpush1.bf16.msra.mxu0 %v6678_v1 }
 0x797   :  { %4365 = vmatprep.subr.bf16.mxu0 %v6705_v57 }
 0x799   :  { %4319 = vmatpush1.bf16.msra.mxu1 %v6363_v23 }
 0x79a   :  { %4321 = vmatprep.subr.bf16.mxu1 %v6366_v28  ;;  %4367 = vmatpush1.bf16.msra.mxu0 %v6707_v8 }
 0x79d   :  { %4323 = vmatpush1.bf16.msra.mxu1 %v6383_v10 }
 0x79e   :  { %4325 = vmatprep.subr.bf16.mxu1 %v6386_v35 }
 0x7a1   :  { %4327 = vmatpush1.bf16.msra.mxu1 %v6403_v15 }
 0x7a2   :  { %4329 = vmatprep.subr.bf16.mxu1 %v6406_v19 }
 0x7a5   :  { %4331 = vmatpush1.bf16.msra.mxu1 %v6423_v47  ;;  %v3734_v47 = vld [vmem:[%s8241_s0 + $0x24] sm:$0xff] }
 0x7a6   :  { %4333 = vmatprep.subr.bf16.mxu1 %v6426_v13 }
 0x7a9   :  { %4335 = vmatpush1.bf16.msra.mxu1 %v6443_v38 }
 0x7aa   :  { %4337 = vmatprep.subr.bf16.mxu1 %v6446_v5 }
 0x7ad   :  { %4339 = vmatpush1.bf16.msra.mxu1 %v6463_v27 }
 0x7ae   :  { %4341 = vmatprep.subr.bf16.mxu1 %v6466_v54 }
 0x7b1   :  { %4343 = vmatpush1.bf16.msra.mxu1 %v6483_v63 }
 0x7b2   :  { %4345 = vmatprep.subr.bf16.mxu1 %v6486_v36 }
 0x7b5   :  { %4347 = vmatpush1.bf16.msra.mxu1 %v6503_v59  ;;  %v3735_v59 = vld [vmem:[%s8241_s0 + $0x2c] sm:$0xf] }
 0x7b6   :  { %4349 = vmatprep.subr.bf16.mxu1 %v6506_v45 }
 0x7b9   :  { %4351 = vmatpush1.bf16.msra.mxu1 %v6523_v39 }
 0x7ba   :  { %4353 = vmatprep.subr.bf16.mxu1 %v6526_v33 }
 0x7bd   :  { %4355 = vmatpush1.bf16.msra.mxu1 %v6543_v60 }
 0x7be   :  { %4357 = vmatprep.subr.bf16.mxu1 %v6546_v21 }
 0x7c1   :  { %4359 = vmatpush1.bf16.msra.mxu1 %v6557_v9 }
 0x7c2   :  { %4409 = vmatprep.subr.bf16.mxu1 %v6680_v3 }
 0x7c4   :  { %1765 = vmatmul.mubr.f32.vlgmr.msra.gmra.mrb[10].mxu1 %v3736_v25  ;;  %v1888_v25 = vld [vmem:[%s8240_s1 + $0xc8] sm:$0xff] }
 0x7c5   :  { %4411 = vmatpush1.bf16.msra.mxu1 %v6692_v20 }
 0x7c6   :  { %4413 = vmatprep.subr.bf16.mxu1 %v6719_v24 }
 0x867   :  { %v1624_v40 = vpop.f32.mrb[8].mxu1  ;;  %v1695_v61 = vpop.f32.mrb[10].mxu0 }
 0x868   :  { %v1626_v23 = vpop.f32.mrb[9].mxu1  ;;  %v1697_v28 = vpop.f32.mrb[11].mxu0 }
 0x869   :  { %v1777_v10 = vcombine.low %v1624_v40, %v1626_v23  ;;  %v1778_v35 = vcombine.low %v1695_v61, %v1697_v28  ;;  %v6731_v40 = vpack.c.bf16 %v1883_v48, %v1877_v46  ;;  %v6733_v61 = vpack.c.bf16 %v1894_v49, %v1888_v25  ;;  %v1887_v23 = vld [vmem:[%s8240_s1 + $0xc0] sm:$0xff]  ;;  %v1893_v28 = vld [vmem:[%s8240_s1 + $0xf0] sm:$0xff] }
 0x86a   :  { %v6878_v46 = vpack.c.bf16 %v1929_v31, %v1923_v53  ;;  %v6882_v48 = vpack.c.bf16 %v1931_v7, %v1925_v58  ;;  %v6884_v25 = vpack.c.bf16 %v1942_v41, %v1936_v30  ;;  %v1935_v49 = vld [vmem:[%s8240_s1 + $0x240] sm:$0xff] }
 0x86b   :  { %v1785_v15 = vrot.slane %v1777_v10, %v5801_v43  ;;  %v1792_v19 = vrot.slane %v1778_v35, %v5801_v43  ;;  %v1890_v10 = vld [vmem:[%s8240_s1 + $0xd8] sm:$0xff]  ;;  %4415 = vmatpush1.bf16.msra.mxu1 %v6731_v40  ;;  %4369 = vmatprep.subr.bf16.mxu0 %v6733_v61  ;;  %v1967_v53 = vld [vmem:[%s8240_s1 + $0x340] sm:$0xff] }
 0x86c   :  { %v6978_v58 = vpack.c.bf16 %v1967_v53, %v1961_v18  ;;  %v1985_v18 = vld [vmem:[%s8240_s1 + $0x3d0] sm:$0xff] }
 0x86d   :  { %v1793_v13 = vcombine.low %v1785_v15, %v1792_v19  ;;  %v1896_v15 = vld [vmem:[%s8240_s1 + $0x108] sm:$0xff]  ;;  %v1889_v19 = vld [vmem:[%s8240_s1 + $0xd0] sm:$0xff] }
 0x86f   :  { %v1804_v38 = vadd.f32 %v3734_v47, %v1793_v13  ;;  %v1895_v47 = vld [vmem:[%s8240_s1 + $0x100] sm:$0xff]  ;;  %v6756_v13 = vpack.c.bf16 %v1893_v28, %v1887_v23  ;;  %v1941_v23 = vld [vmem:[%s8240_s1 + $0x270] sm:$0xff] }
 0x870   :  { %v1937_v28 = vld [vmem:[%s8240_s1 + $0x250] sm:$0xff] }
 0x871   :  { %1813 = vrot.lane.b32.xlu1 %v1804_v38, %s5069_s19  ;;  %v3740_v5 = vmul.f32 -1.442695, %v1804_v38  ;;  %v1826_v60 = vrot.slane %v1804_v38, 6  ;;  %v6758_v38 = vpack.c.bf16 %v1896_v15, %v1890_v10  ;;  %4371 = vmatpush1.bf16.msra.mxu0 %v6756_v13  ;;  %v6896_v10 = vpack.c.bf16 %v1944_v14, %v1938_v34  ;;  %v1948_v15 = vld [vmem:[%s8240_s1 + $0x2a8] sm:$0xff]  ;;  %v1978_v14 = vld [vmem:[%s8240_s1 + $0x398] sm:$0xff] }
 0x872   :  { %v1972_v34 = vld [vmem:[%s8240_s1 + $0x368] sm:$0xff] }
 0x873   :  { %4987 = vpow2.f32 %v3740_v5  ;;  %v1900_v5 = vld [vmem:[%s8240_s1 + $0x128] sm:$0xff]  ;;  %4417 = vmatprep.subr.bf16.mxu1 %v6758_v38 }
 0x87d   :  { %v4988_v36 = vpop.eup %4987 }
 0x87e   :  { %v1809_v39 = vadd.f32 1.0, %v4988_v36 }
 0x880   :  { %4989 = vrcp.f32 %v1809_v39  ;;  %v1908_v39 = vld [vmem:[%s8240_s1 + $0x168] sm:$0xff] }
 0x88a   :  { %v4990_v55 = vpop.eup %4989 }
 0x897   :  { %v1766_v27 = vpop.f32.mrb[10].mxu1 }
 0x898   :  { %v1768_v54 = vpop.f32.mrb[11].mxu1 }
 0x899   :  { %v1794_v63 = vcombine.low %v1766_v27, %v1768_v54  ;;  %v1906_v27 = vld [vmem:[%s8240_s1 + $0x158] sm:$0xff]  ;;  %v1899_v54 = vld [vmem:[%s8240_s1 + $0x120] sm:$0xff] }
 0x89a   :  { %v6773_v36 = vpack.c.bf16 %v1906_v27, %v1900_v5  ;;  %v1956_v5 = vld [vmem:[%s8240_s1 + $0x2e8] sm:$0xff]  ;;  %v6914_v27 = vpack.c.bf16 %v1941_v23, %v1935_v49  ;;  %v1971_v49 = vld [vmem:[%s8240_s1 + $0x360] sm:$0xff]  ;;  %v6993_v23 = vpack.c.bf16 %v1978_v14, %v1972_v34  ;;  %v2002_v34 = vld [vmem:[%s8240_s1 + $0x458] sm:$0xff] }
 0x89b   :  { %v1801_v45 = vrot.slane %v1794_v63, %v5801_v43  ;;  %v6771_v63 = vpack.c.bf16 %v1895_v47, %v1889_v19  ;;  %v1954_v19 = vld [vmem:[%s8240_s1 + $0x2d8] sm:$0xff] }
 0x89c   :  { %4373 = vmatprep.subr.bf16.mxu0 %v6773_v36  ;;  %v1950_v47 = vld [vmem:[%s8240_s1 + $0x2b8] sm:$0xff] }
 0x89d   :  { %v6651_v33 = vadd.f32 %v3735_v59, %v1801_v45  ;;  %v1905_v59 = vld [vmem:[%s8240_s1 + $0x150] sm:$0xff]  ;;  %v1902_v45 = vld [vmem:[%s8240_s1 + $0x138] sm:$0xff]  ;;  %4419 = vmatpush1.bf16.msra.mxu1 %v6771_v63 }
 0x89f   :  { %v1827_v21 = vrot.slane %v6651_v33, 6  ;;  %v3742_v7 = vmul.f32 -1.442695, %v6651_v33  ;;  %v1977_v33 = vld [vmem:[%s8240_s1 + $0x390] sm:$0xff] }
 0x8a1   :  { %v1828_v9 = vsel %vm11_vm0, %v1826_v60, %v1827_v21  ;;  %v6785_v60 = vpack.c.bf16 %v1908_v39, %v1902_v45  ;;  %v1901_v21 = vld [vmem:[%s8240_s1 + $0x130] sm:$0xff]  ;;  %v1947_v45 = vld [vmem:[%s8240_s1 + $0x2a0] sm:$0xff] }
 0x8a2   :  { %4991 = vtanh.f32 %v1828_v9  ;;  %v1907_v9 = vld [vmem:[%s8240_s1 + $0x160] sm:$0xff]  ;;  %v1953_v39 = vld [vmem:[%s8240_s1 + $0x2d0] sm:$0xff] }
 0x8a3   :  { %4421 = vmatprep.subr.bf16.mxu1 %v6785_v60 }
 0x8ac   :  { %v4992_v26 = vpop.eup %4991 }
 0x8ad   :  { %v1839_v4 = vmul.f32 %v4992_v26, %v4990_v55  ;;  %v1912_v55 = vld [vmem:[%s8240_s1 + $0x188] sm:$0xff]  ;;  %v1918_v26 = vld [vmem:[%s8240_s1 + $0x1b8] sm:$0xff] }
 0x8e3   :  { %v1814_v2 = vpop.permute.xlu1 %1813 }
 0x8e4   :  { %v1815_v32 = vrot.slane %v1814_v2, 2  ;;  %v1816_v17 = vrot.slane %v1814_v2, 4  ;;  %v1914_v2 = vld [vmem:[%s8240_s1 + $0x198] sm:$0xff] }
 0x8e6   :  { %v1817_v11 = vsel %vm173_vm3, %v1815_v32, %v1816_v17  ;;  %v1920_v32 = vld [vmem:[%s8240_s1 + $0x1c8] sm:$0xff]  ;;  %v6810_v17 = vpack.c.bf16 %v1907_v9, %v1901_v21  ;;  %v1949_v21 = vld [vmem:[%s8240_s1 + $0x2b0] sm:$0xff]  ;;  %v6932_v9 = vpack.c.bf16 %v1956_v5, %v1950_v47  ;;  %v1979_v5 = vld [vmem:[%s8240_s1 + $0x3a0] sm:$0xff] }
 0x8e7   :  { %v3741_v16 = vmul.f32 -1.442695, %v1817_v11  ;;  %v6812_v11 = vpack.c.bf16 %v1918_v26, %v1912_v55  ;;  %v1955_v55 = vld [vmem:[%s8240_s1 + $0x2e0] sm:$0xff]  ;;  %v1960_v26 = vld [vmem:[%s8240_s1 + $0x308] sm:$0xff]  ;;  %v1973_v47 = vld [vmem:[%s8240_s1 + $0x370] sm:$0xff] }
 0x8e8   :  { %4423 = vmatpush1.bf16.msra.mxu1 %v6810_v17 }
 0x8e9   :  { %4993 = vpow2.f32 %v3741_v16  ;;  %v1911_v16 = vld [vmem:[%s8240_s1 + $0x180] sm:$0xff] }
 0x8f3   :  { %v4994_v52 = vpop.eup %4993 }
 0x8f4   :  { %v1822_v22 = vadd.f32 1.0, %v4994_v52  ;;  %v1917_v52 = vld [vmem:[%s8240_s1 + $0x1b0] sm:$0xff] }
 0x8f5   :  { %v6842_v37 = vpack.c.bf16 %v1917_v52, %v1911_v16  ;;  %v1968_v16 = vld [vmem:[%s8240_s1 + $0x348] sm:$0xff]  ;;  %v6950_v52 = vpack.c.bf16 %v1953_v39, %v1947_v45  ;;  %v7018_v39 = vpack.c.bf16 %v1979_v5, %v1973_v47 }
 0x8f6   :  { %4995 = vrcp.f32 %v1822_v22  ;;  %v1913_v22 = vld [vmem:[%s8240_s1 + $0x190] sm:$0xff]  ;;  %v1984_v45 = vld [vmem:[%s8240_s1 + $0x3c8] sm:$0xff] }
 0x900   :  { %v4996_v42 = vpop.eup %4995 }
 0x901   :  { %v1838_v51 = vmul.f32 %v4996_v42, %v1837_v44  ;;  %v6824_v42 = vpack.c.bf16 %v1920_v32, %v1914_v2  ;;  %v1919_v44 = vld [vmem:[%s8240_s1 + $0x1c0] sm:$0xff]  ;;  %v1966_v2 = vld [vmem:[%s8240_s1 + $0x338] sm:$0xff] }
 0x902   :  { %v6846_v62 = vpack.c.bf16 %v1919_v44, %v1913_v22  ;;  %v1962_v32 = vld [vmem:[%s8240_s1 + $0x318] sm:$0xff]  ;;  %v6954_v22 = vpack.c.bf16 %v1955_v55, %v1949_v21  ;;  %v6956_v44 = vpack.c.bf16 %v1966_v2, %v1960_v26  ;;  %v1983_v55 = vld [vmem:[%s8240_s1 + $0x3c0] sm:$0xff]  ;;  %v1989_v26 = vld [vmem:[%s8240_s1 + $0x3f0] sm:$0xff] }
 0x903   :  { %v1840_v0 = vadd.f32 %v1839_v4, %v1838_v51  ;;  %v6800_v4 = vpack.c.bf16 %v1905_v59, %v1899_v54  ;;  %v1924_v51 = vld [vmem:[%s8240_s1 + $0x1e8] sm:$0xff]  ;;  %4425 = vmatprep.subr.bf16.mxu1 %v6824_v42  ;;  %v6920_v59 = vpack.c.bf16 %v1954_v19, %v1948_v15  ;;  %v6965_v29 = vpack.c.bf16 %v1968_v16, %v1962_v32  ;;  %v1990_v21 = vld [vmem:[%s8240_s1 + $0x3f8] sm:$0xff] }
 0x904   :  { %4427 = vmatpush1.bf16.msra.mxu1 %v6846_v62  ;;  %v7004_v15 = vpack.c.bf16 %v1977_v33, %v1971_v49  ;;  %v7031_v32 = vpack.c.bf16 %v1990_v21, %v1984_v45  ;;  %v7033_v16 = vpack.c.bf16 %v1989_v26, %v1983_v55  ;;  %v1995_v33 = vld [vmem:[%s8240_s1 + $0x420] sm:$0xff]  ;;  %v2004_v45 = vld [vmem:[%s8240_s1 + $0x468] sm:$0xff]  ;;  %v1997_v21 = vld [vmem:[%s8240_s1 + $0x430] sm:$0xff] }
 0x905   :  { %1849 = vst.msk [vmem:[#allocation3] sm:$0xf] %vm5415_vm2, %v1840_v0  ;;  %4997 = vtanh.f32 %v1840_v0  ;;  %v1930_v0 = vld [vmem:[%s8240_s1 + $0x218] sm:$0xff]  ;;  %4375 = vmatpush1.bf16.msra.mxu0 %v6800_v4  ;;  %4429 = vmatprep.subr.bf16.mxu1 %v6860_v12  ;;  %v2003_v55 = vld [vmem:[%s8240_s1 + $0x460] sm:$0xff] }
 0x906   :  { %4377 = vmatprep.subr.bf16.mxu0 %v6812_v11  ;;  %v6848_v50 = vpack.c.bf16 %v1930_v0, %v1924_v51  ;;  %v1959_v51 = vld [vmem:[%s8240_s1 + $0x300] sm:$0xff]  ;;  %v1965_v0 = vld [vmem:[%s8240_s1 + $0x330] sm:$0xff]  ;;  %4999 = vpow2.f32 %v3742_v7 }
 0x907   :  { %v6974_v31 = vpack.c.bf16 %v1965_v0, %v1959_v51  ;;  %v1986_v51 = vld [vmem:[%s8240_s1 + $0x3d8] sm:$0xff]  ;;  %v1992_v0 = vld [vmem:[%s8240_s1 + $0x408] sm:$0xff] }
 0x908   :  { %4431 = vmatpush1.bf16.msra.mxu1 %v6882_v48  ;;  %v7045_v7 = vpack.c.bf16 %v1992_v0, %v1986_v51  ;;  %v7088_v0 = vpack.c.bf16 %v2003_v55, %v1997_v21 }
 0x909   :  { %4379 = vmatpush1.bf16.msra.mxu0 %v6842_v37  ;;  %4433 = vmatprep.subr.bf16.mxu1 %v6896_v10 }
 0x90a   :  { %4381 = vmatprep.subr.bf16.mxu0 %v6848_v50 }
 0x90d   :  { %4383 = vmatpush1.bf16.msra.mxu0 %v6878_v46 }
 0x90e   :  { %4385 = vmatprep.subr.bf16.mxu0 %v6884_v25 }
 0x90f   :  { %v4998_v35 = vpop.eup %4997 }
 0x910   :  { %1843 = vrot.lane.b32.xlu0 %v4998_v35, %s5069_s19  ;;  %v1943_v35 = vld [vmem:[%s8240_s1 + $0x280] sm:$0xff]  ;;  %v5000_v30 = vpop.eup %4999 }
 0x911   :  { %v6918_v54 = vpack.c.bf16 %v1943_v35, %v1937_v28  ;;  %4387 = vmatpush1.bf16.msra.mxu0 %v6914_v27  ;;  %v1834_v41 = vadd.f32 1.0, %v5000_v30  ;;  %v1974_v28 = vld [vmem:[%s8240_s1 + $0x378] sm:$0xff]  ;;  %v1980_v35 = vld [vmem:[%s8240_s1 + $0x3a8] sm:$0xff]  ;;  %v1991_v30 = vld [vmem:[%s8240_s1 + $0x400] sm:$0xff] }
 0x912   :  { %4389 = vmatprep.subr.bf16.mxu0 %v6920_v59  ;;  %v7006_v19 = vpack.c.bf16 %v1980_v35, %v1974_v28  ;;  %v7057_v14 = vpack.c.bf16 %v1991_v30, %v1985_v18  ;;  %v2001_v28 = vld [vmem:[%s8240_s1 + $0x450] sm:$0xff]  ;;  %v1998_v35 = vld [vmem:[%s8240_s1 + $0x438] sm:$0xff]  ;;  %v1868_v18 = vld [vmem:[%s8240_s1 + $0x28] sm:$0xff] }
 0x913   :  { %4435 = vmatpush1.bf16.msra.mxu1 %v6918_v54  ;;  %5001 = vrcp.f32 %v1834_v41  ;;  %v1996_v41 = vld [vmem:[%s8240_s1 + $0x428] sm:$0xff]  ;;  %v7082_v51 = vpack.c.bf16 %v2001_v28, %v1995_v33  ;;  %v1867_v28 = vld [vmem:[%s8240_s1 + $0x20] sm:$0xff] }
 0x914   :  { %4437 = vmatprep.subr.bf16.mxu1 %v6932_v9  ;;  %v7059_v49 = vpack.c.bf16 %v2002_v34, %v1996_v41 }
 0x915   :  { %4391 = vmatpush1.bf16.msra.mxu0 %v6950_v52 }
 0x916   :  { %4393 = vmatprep.subr.bf16.mxu0 %v6956_v44 }
 0x917   :  { %4439 = vmatpush1.bf16.msra.mxu1 %v6954_v22 }
 0x918   :  { %4441 = vmatprep.subr.bf16.mxu1 %v6965_v29 }
 0x919   :  { %4395 = vmatpush1.bf16.msra.mxu0 %v6974_v31 }
 0x91a   :  { %4397 = vmatprep.subr.bf16.mxu0 %v6993_v23 }
 0x91b   :  { %4443 = vmatpush1.bf16.msra.mxu1 %v6978_v58 }
 0x91c   :  { %4445 = vmatprep.subr.bf16.mxu1 %v7006_v19 }
 0x91d   :  { %4399 = vmatpush1.bf16.msra.mxu0 %v7004_v15  ;;  %v5002_v47 = vpop.eup %5001 }
 0x91e   :  { %4401 = vmatprep.subr.bf16.mxu0 %v7031_v32 }
 0x91f   :  { %4447 = vmatpush1.bf16.msra.mxu1 %v7018_v39 }
 0x920   :  { %4449 = vmatprep.subr.bf16.mxu1 %v7045_v7 }
 0x921   :  { %4403 = vmatpush1.bf16.msra.mxu0 %v7033_v16 }
 0x922   :  { %4405 = vmatprep.subr.bf16.mxu0 %v7059_v49 }
 0x923   :  { %4451 = vmatpush1.bf16.msra.mxu1 %v7057_v14 }
 0x925   :  { %4407 = vmatpush1.bf16.msra.mxu0 %v7082_v51 }
 0x982   :  { %v1844_v2 = vpop.permute.xlu0 %1843 }
 0x983   :  { %v1845_v53 = vrot.slane %v1844_v2, 6 }
 0x985   :  { %v1846_v5 = vsel %vm173_vm3, %v1845_v53, %v1844_v2  ;;  %v7084_v2 = vpack.c.bf16 %v2004_v45, %v1998_v35  ;;  %v1874_v53 = vld [vmem:[%s8240_s1 + $0x58] sm:$0xff]  ;;  %v1880_v35 = vld [vmem:[%s8240_s1 + $0x88] sm:$0xff] }
 0x986   :  { %v1848_v26 = vmul.f32 %v5002_v47, %v1846_v5  ;;  %v7098_v30 = vpack.c.bf16 %v1874_v53, %v1868_v18  ;;  %v1886_v47 = vld [vmem:[%s8240_s1 + $0xb8] sm:$0xff]  ;;  %v1885_v18 = vld [vmem:[%s8240_s1 + $0xb0] sm:$0xff]  ;;  %v1892_v53 = vld [vmem:[%s8240_s1 + $0xe8] sm:$0xff] }
 0x987   :  { %4453 = vmatprep.subr.bf16.mxu1 %v7084_v2  ;;  %v7130_v55 = vpack.c.bf16 %v1886_v47, %v1880_v35  ;;  %v1904_v35 = vld [vmem:[%s8240_s1 + $0x148] sm:$0xff]  ;;  %v1910_v47 = vld [vmem:[%s8240_s1 + $0x178] sm:$0xff] }
 0x988   :  { %1851 = vrot.lane.b32.xlu1 %v1848_v26, %s5069_s19  ;;  %4455 = vmatpush1.bf16.msra.mxu1 %v7088_v0  ;;  %v1879_v26 = vld [vmem:[%s8240_s1 + $0x80] sm:$0xff] }
 0x989   :  { %4457 = vmatprep.subr.bf16.mxu0 %v7098_v30  ;;  %4505 = vmatprep.subr.bf16.mxu1 %v6667_v56  ;;  %v1873_v56 = vld [vmem:[%s8240_s1 + $0x50] sm:$0xff] }
 0x98a   :  { %v7128_v21 = vpack.c.bf16 %v1873_v56, %v1867_v28  ;;  %v1891_v28 = vld [vmem:[%s8240_s1 + $0xe0] sm:$0xff]  ;;  %v1897_v56 = vld [vmem:[%s8240_s1 + $0x110] sm:$0xff] }
 0x9fa   :  { %v1852_v41 = vpop.permute.xlu1 %1851 }
 0x9fb   :  { %v1853_v34 = vrot.slane %v1852_v41, 2 }
 0x9fd   :  { %v1854_v33 = vsel %vm173_vm3, %v1852_v41, %v1853_v34  ;;  %v1898_v41 = vld [vmem:[%s8240_s1 + $0x118] sm:$0xff]  ;;  %v7150_v34 = vpack.c.bf16 %v1885_v18, %v1879_v26  ;;  %v7173_v26 = vpack.c.bf16 %v1910_v47, %v1904_v35  ;;  %v1909_v18 = vld [vmem:[%s8240_s1 + $0x170] sm:$0xff] }
 0x9fe   :  { %1856 = vst.msk [vmem:[#allocation2] sm:$0xf] %vm5415_vm2, %v1854_v33  ;;  %3743 = vst.msk [vmem:[%s8242_s2 + $0xc] sm:$0xf] %vm5415_vm2, %v1854_v33  ;;  %v7153_v33 = vpack.c.bf16 %v1898_v41, %v1892_v53  ;;  %v1922_v53 = vld [vmem:[%s8240_s1 + $0x1d8] sm:$0xff] }
 0x9ff   :  { %v1934_v35 = vld [vmem:[%s8240_s1 + $0x238] sm:$0xff] }
 0xa05   :  { %v7124_v5 = vld.sshfl [vmem:[#allocation2] sm:$0x33 pattern:$0x76325410] }
 0xa06   :  { %v2015_v45 = vcombine.high %v7124_v5, %v7124_v5 }
 0xa08   :  { %3747 = vmatprep.mubr.msk.f32.mxu0 %vm173_vm3, %v2015_v45  ;;  %3748 = vmatprep.mubr.msk.f32.mxu1 %vm173_vm3, %v2015_v45 }
 0xa09   :  { %2084 = vmatmul.mubr.f32.vlgmr.msra.gmra.mrb[12].mxu0 %v7124_v5  ;;  %2155 = vmatmul.mubr.f32.vlgmr.msra.gmra.mrb[12].mxu1 %v7124_v5 }
 0xa0a   :  { %4459 = vmatpush1.bf16.msra.mxu0 %v7128_v21  ;;  %3749 = vmatprep.mubr.msk.f32.mxu0 %vm173_vm3, %v2015_v45  ;;  %v7170_v45 = vpack.c.bf16 %v1897_v56, %v1891_v28  ;;  %v1921_v56 = vld [vmem:[%s8240_s1 + $0x1d0] sm:$0xff] }
 0xa0b   :  { %4461 = vmatprep.subr.bf16.mxu0 %v7130_v55  ;;  %4507 = vmatpush1.bf16.msra.mxu1 %v6678_v1  ;;  %v1903_v1 = vld [vmem:[%s8240_s1 + $0x140] sm:$0xff] }
 0xa0c   :  { %4509 = vmatprep.subr.bf16.mxu1 %v6705_v57  ;;  %v1916_v57 = vld [vmem:[%s8240_s1 + $0x1a8] sm:$0xff]  ;;  %v7190_v41 = vpack.c.bf16 %v1909_v18, %v1903_v1  ;;  %v1933_v18 = vld [vmem:[%s8240_s1 + $0x230] sm:$0xff] }
 0xa0d   :  { %v7193_v28 = vpack.c.bf16 %v1922_v53, %v1916_v57  ;;  %v1946_v57 = vld [vmem:[%s8240_s1 + $0x298] sm:$0xff] }
 0xa0e   :  { %4463 = vmatpush1.bf16.msra.mxu0 %v7150_v34 }
 0xa0f   :  { %4465 = vmatprep.subr.bf16.mxu0 %v7153_v33  ;;  %4511 = vmatpush1.bf16.msra.mxu1 %v6707_v8  ;;  %v1915_v8 = vld [vmem:[%s8240_s1 + $0x1a0] sm:$0xff] }
 0xa10   :  { %4513 = vmatprep.subr.bf16.mxu1 %v6733_v61  ;;  %v1928_v61 = vld [vmem:[%s8240_s1 + $0x208] sm:$0xff]  ;;  %v7210_v47 = vpack.c.bf16 %v1921_v56, %v1915_v8  ;;  %v1945_v56 = vld [vmem:[%s8240_s1 + $0x290] sm:$0xff] }
 0xa11   :  { %v7213_v1 = vpack.c.bf16 %v1934_v35, %v1928_v61  ;;  %v1958_v61 = vld [vmem:[%s8240_s1 + $0x2f8] sm:$0xff] }
 0xa12   :  { %4467 = vmatpush1.bf16.msra.mxu0 %v7170_v45 }
 0xa13   :  { %4469 = vmatprep.subr.bf16.mxu0 %v7173_v26  ;;  %4515 = vmatpush1.bf16.msra.mxu1 %v6756_v13  ;;  %v1927_v13 = vld [vmem:[%s8240_s1 + $0x200] sm:$0xff] }
 0xa14   :  { %4517 = vmatprep.subr.bf16.mxu1 %v6773_v36  ;;  %v1940_v36 = vld [vmem:[%s8240_s1 + $0x268] sm:$0xff]  ;;  %v7230_v53 = vpack.c.bf16 %v1933_v18, %v1927_v13  ;;  %v1957_v18 = vld [vmem:[%s8240_s1 + $0x2f0] sm:$0xff] }
 0xa15   :  { %v7233_v8 = vpack.c.bf16 %v1946_v57, %v1940_v36  ;;  %v1970_v36 = vld [vmem:[%s8240_s1 + $0x358] sm:$0xff] }
 0xa16   :  { %4471 = vmatpush1.bf16.msra.mxu0 %v7190_v41 }
 0xa17   :  { %4473 = vmatprep.subr.bf16.mxu0 %v7193_v28  ;;  %4519 = vmatpush1.bf16.msra.mxu1 %v6800_v4  ;;  %v1939_v4 = vld [vmem:[%s8240_s1 + $0x260] sm:$0xff] }
 0xa18   :  { %4521 = vmatprep.subr.bf16.mxu1 %v6812_v11  ;;  %v1952_v11 = vld [vmem:[%s8240_s1 + $0x2c8] sm:$0xff]  ;;  %v7250_v35 = vpack.c.bf16 %v1945_v56, %v1939_v4  ;;  %v1969_v56 = vld [vmem:[%s8240_s1 + $0x350] sm:$0xff] }
 0xa19   :  { %v7253_v13 = vpack.c.bf16 %v1958_v61, %v1952_v11  ;;  %v1982_v11 = vld [vmem:[%s8240_s1 + $0x3b8] sm:$0xff] }
 0xa1a   :  { %4475 = vmatpush1.bf16.msra.mxu0 %v7210_v47 }
 0xa1b   :  { %4477 = vmatprep.subr.bf16.mxu0 %v7213_v1  ;;  %4523 = vmatpush1.bf16.msra.mxu1 %v6842_v37  ;;  %v1951_v37 = vld [vmem:[%s8240_s1 + $0x2c0] sm:$0xff] }
 0xa1c   :  { %4525 = vmatprep.subr.bf16.mxu1 %v6848_v50  ;;  %v1964_v50 = vld [vmem:[%s8240_s1 + $0x328] sm:$0xff]  ;;  %v7270_v57 = vpack.c.bf16 %v1957_v18, %v1951_v37  ;;  %v1981_v18 = vld [vmem:[%s8240_s1 + $0x3b0] sm:$0xff] }
 0xa1d   :  { %v7273_v4 = vpack.c.bf16 %v1970_v36, %v1964_v50  ;;  %v1994_v50 = vld [vmem:[%s8240_s1 + $0x418] sm:$0xff] }
 0xa1e   :  { %4479 = vmatpush1.bf16.msra.mxu0 %v7230_v53 }
 0xa1f   :  { %4481 = vmatprep.subr.bf16.mxu0 %v7233_v8  ;;  %4527 = vmatpush1.bf16.msra.mxu1 %v6878_v46  ;;  %v1963_v46 = vld [vmem:[%s8240_s1 + $0x320] sm:$0xff] }
 0xa20   :  { %4529 = vmatprep.subr.bf16.mxu1 %v6884_v25  ;;  %v1976_v25 = vld [vmem:[%s8240_s1 + $0x388] sm:$0xff]  ;;  %v7290_v61 = vpack.c.bf16 %v1969_v56, %v1963_v46  ;;  %v1993_v56 = vld [vmem:[%s8240_s1 + $0x410] sm:$0xff] }
 0xa21   :  { %v7293_v37 = vpack.c.bf16 %v1982_v11, %v1976_v25  ;;  %v2006_v25 = vld [vmem:[%s8240_s1 + $0x478] sm:$0xff] }
 0xa22   :  { %4483 = vmatpush1.bf16.msra.mxu0 %v7250_v35 }
 0xa23   :  { %4485 = vmatprep.subr.bf16.mxu0 %v7253_v13  ;;  %4531 = vmatpush1.bf16.msra.mxu1 %v6914_v27  ;;  %v1975_v27 = vld [vmem:[%s8240_s1 + $0x380] sm:$0xff] }
 0xa24   :  { %4533 = vmatprep.subr.bf16.mxu1 %v6920_v59  ;;  %v1988_v59 = vld [vmem:[%s8240_s1 + $0x3e8] sm:$0xff]  ;;  %v7310_v36 = vpack.c.bf16 %v1981_v18, %v1975_v27  ;;  %v2005_v18 = vld [vmem:[%s8240_s1 + $0x470] sm:$0xff] }
 0xa25   :  { %v7313_v46 = vpack.c.bf16 %v1994_v50, %v1988_v59 }
 0xa26   :  { %4487 = vmatpush1.bf16.msra.mxu0 %v7270_v57 }
 0xa27   :  { %4489 = vmatprep.subr.bf16.mxu0 %v7273_v4  ;;  %4535 = vmatpush1.bf16.msra.mxu1 %v6950_v52  ;;  %v1987_v52 = vld [vmem:[%s8240_s1 + $0x3e0] sm:$0xff] }
 0xa28   :  { %4537 = vmatprep.subr.bf16.mxu1 %v6956_v44  ;;  %v2000_v44 = vld [vmem:[%s8240_s1 + $0x448] sm:$0xff]  ;;  %v7330_v11 = vpack.c.bf16 %v1993_v56, %v1987_v52  ;;  %v2298_v56 = vld [vmem:[#allocation3] sm:$0xf] }
 0xa29   :  { %v7333_v27 = vpack.c.bf16 %v2006_v25, %v2000_v44 }
 0xa2a   :  { %4491 = vmatpush1.bf16.msra.mxu0 %v7290_v61 }
 0xa2b   :  { %4493 = vmatprep.subr.bf16.mxu0 %v7293_v37  ;;  %4539 = vmatpush1.bf16.msra.mxu1 %v6974_v31  ;;  %v1999_v31 = vld [vmem:[%s8240_s1 + $0x440] sm:$0xff] }
 0xa2c   :  { %4541 = vmatprep.subr.bf16.mxu1 %v6993_v23  ;;  %v7344_v23 = vpack.c.bf16 %v2005_v18, %v1999_v31 }
 0xa2e   :  { %4495 = vmatpush1.bf16.msra.mxu0 %v7310_v36 }
 0xa2f   :  { %4497 = vmatprep.subr.bf16.mxu0 %v7313_v46  ;;  %4543 = vmatpush1.bf16.msra.mxu1 %v7004_v15 }
 0xa30   :  { %4545 = vmatprep.subr.bf16.mxu1 %v7031_v32 }
 0xa32   :  { %4499 = vmatpush1.bf16.msra.mxu0 %v7330_v11 }
 0xa33   :  { %4501 = vmatprep.subr.bf16.mxu0 %v7333_v27  ;;  %4547 = vmatpush1.bf16.msra.mxu1 %v7033_v16 }
 0xa34   :  { %4549 = vmatprep.subr.bf16.mxu1 %v7059_v49 }
 0xa36   :  { %4503 = vmatpush1.bf16.msra.mxu0 %v7344_v23 }
 0xa37   :  { %4553 = vmatprep.subr.bf16.mxu0 %v6680_v3  ;;  %4551 = vmatpush1.bf16.msra.mxu1 %v7082_v51 }
 0xa38   :  { %4601 = vmatprep.subr.bf16.mxu1 %v7098_v30 }
 0xa39   :  { %2226 = vmatmul.mubr.f32.vlgmr.msra.gmra.mrb[14].mxu0 %v7124_v5 }
 0xa3a   :  { %4555 = vmatpush1.bf16.msra.mxu0 %v6692_v20 }
 0xa3b   :  { %4557 = vmatprep.subr.bf16.mxu0 %v6719_v24 }
 0xa3e   :  { %4559 = vmatpush1.bf16.msra.mxu0 %v6731_v40 }
 0xa3f   :  { %4561 = vmatprep.subr.bf16.mxu0 %v6758_v38 }
 0xa42   :  { %4563 = vmatpush1.bf16.msra.mxu0 %v6771_v63 }
 0xa43   :  { %4565 = vmatprep.subr.bf16.mxu0 %v6785_v60 }
 0xa46   :  { %4567 = vmatpush1.bf16.msra.mxu0 %v6810_v17 }
 0xa47   :  { %4569 = vmatprep.subr.bf16.mxu0 %v6824_v42  ;;  %v3744_v42 = vld [vmem:[%s8241_s0 + $0x30] sm:$0xff] }
 0xa4a   :  { %4571 = vmatpush1.bf16.msra.mxu0 %v6846_v62 }
 0xa4b   :  { %4573 = vmatprep.subr.bf16.mxu0 %v6860_v12 }
 0xa4e   :  { %4575 = vmatpush1.bf16.msra.mxu0 %v6882_v48 }
 0xa4f   :  { %4577 = vmatprep.subr.bf16.mxu0 %v6896_v10 }
 0xa52   :  { %4579 = vmatpush1.bf16.msra.mxu0 %v6918_v54 }
 0xa53   :  { %4581 = vmatprep.subr.bf16.mxu0 %v6932_v9 }
 0xa56   :  { %4583 = vmatpush1.bf16.msra.mxu0 %v6954_v22 }
 0xa57   :  { %4585 = vmatprep.subr.bf16.mxu0 %v6965_v29  ;;  %v3745_v29 = vld [vmem:[%s8241_s0 + $0x38] sm:$0xf] }
 0xa5a   :  { %4587 = vmatpush1.bf16.msra.mxu0 %v6978_v58 }
 0xa5b   :  { %4589 = vmatprep.subr.bf16.mxu0 %v7006_v19 }
 0xa5e   :  { %4591 = vmatpush1.bf16.msra.mxu0 %v7018_v39 }
 0xa5f   :  { %4593 = vmatprep.subr.bf16.mxu0 %v7045_v7 }
 0xa62   :  { %4595 = vmatpush1.bf16.msra.mxu0 %v7057_v14 }
 0xa63   :  { %4597 = vmatprep.subr.bf16.mxu0 %v7084_v2 }
 0xa66   :  { %4599 = vmatpush1.bf16.msra.mxu0 %v7088_v0 }
 0xadc   :  { %v2085_v3 = vpop.f32.mrb[12].mxu0  ;;  %v2156_v20 = vpop.f32.mrb[12].mxu1 }
 0xadd   :  { %v2087_v24 = vpop.f32.mrb[13].mxu0  ;;  %v2158_v40 = vpop.f32.mrb[13].mxu1 }
 0xade   :  { %v2238_v38 = vcombine.low %v2085_v3, %v2087_v24  ;;  %v2239_v63 = vcombine.low %v2156_v20, %v2158_v40 }
 0xae0   :  { %v2246_v60 = vrot.slane %v2238_v38, %v5801_v43  ;;  %v2253_v17 = vrot.slane %v2239_v63, %v5801_v43 }
 0xae2   :  { %v2254_v62 = vcombine.low %v2246_v60, %v2253_v17 }
 0xae4   :  { %v2265_v12 = vadd.f32 %v3744_v42, %v2254_v62 }
 0xae6   :  { %2274 = vrot.lane.b32.xlu0 %v2265_v12, %s5069_s19  ;;  %v3750_v48 = vmul.f32 -1.442695, %v2265_v12  ;;  %v2287_v39 = vrot.slane %v2265_v12, 6 }
 0xae8   :  { %5003 = vpow2.f32 %v3750_v48 }
 0xaf2   :  { %v5004_v22 = vpop.eup %5003 }
 0xaf3   :  { %v2270_v15 = vadd.f32 1.0, %v5004_v22 }
 0xaf5   :  { %5005 = vrcp.f32 %v2270_v15 }
 0xaff   :  { %v5006_v7 = vpop.eup %5005 }
 0xb0c   :  { %v2227_v10 = vpop.f32.mrb[14].mxu0 }
 0xb0d   :  { %v2229_v54 = vpop.f32.mrb[15].mxu0 }
 0xb0e   :  { %v2255_v9 = vcombine.low %v2227_v10, %v2229_v54 }
 0xb10   :  { %v2262_v58 = vrot.slane %v2255_v9, %v5801_v43 }
 0xb12   :  { %v2266_v19 = vadd.f32 %v3745_v29, %v2262_v58 }
 0xb14   :  { %v2288_v32 = vrot.slane %v2266_v19, 6  ;;  %v3752_v18 = vmul.f32 -1.442695, %v2266_v19 }
 0xb16   :  { %v2289_v16 = vsel %vm11_vm0, %v2287_v39, %v2288_v32 }
 0xb17   :  { %5007 = vtanh.f32 %v2289_v16 }
 0xb21   :  { %v5008_v14 = vpop.eup %5007 }
 0xb22   :  { %v2300_v49 = vmul.f32 %v5008_v14, %v5006_v7 }
 0xb58   :  { %v2275_v51 = vpop.permute.xlu0 %2274 }
 0xb59   :  { %v2276_v2 = vrot.slane %v2275_v51, 2  ;;  %v2277_v0 = vrot.slane %v2275_v51, 4  ;;  %v2786_v51 = vld [vmem:[%s8240_s1 + $0x8] sm:$0xff] }
 0xb5b   :  { %v2278_v30 = vsel %vm173_vm3, %v2276_v2, %v2277_v0  ;;  %v2792_v2 = vld [vmem:[%s8240_s1 + $0x38] sm:$0xff]  ;;  %v2785_v0 = vld [vmem:[%s8240_s1] sm:$0xff] }
 0xb5c   :  { %v3751_v5 = vmul.f32 -1.442695, %v2278_v30  ;;  %v7454_v30 = vpack.c.bf16 %v2792_v2, %v2786_v51  ;;  %v2848_v51 = vld [vmem:[%s8240_s1 + $0x1f8] sm:$0xff]  ;;  %v2854_v2 = vld [vmem:[%s8240_s1 + $0x228] sm:$0xff] }
 0xb5e   :  { %5009 = vpow2.f32 %v3751_v5  ;;  %v2791_v5 = vld [vmem:[%s8240_s1 + $0x30] sm:$0xff]  ;;  %4649 = vmatprep.subr.bf16.mxu0 %v7454_v30 }
 0xb68   :  { %v5010_v59 = vpop.eup %5009 }
 0xb69   :  { %v2283_v50 = vadd.f32 1.0, %v5010_v59  ;;  %v2788_v59 = vld [vmem:[%s8240_s1 + $0x18] sm:$0xff] }
 0xb6b   :  { %5011 = vrcp.f32 %v2283_v50  ;;  %v2794_v50 = vld [vmem:[%s8240_s1 + $0x48] sm:$0xff] }
 0xb75   :  { %v5012_v52 = vpop.eup %5011 }
 0xb76   :  { %v2299_v44 = vmul.f32 %v5012_v52, %v2298_v56  ;;  %v7465_v52 = vpack.c.bf16 %v2791_v5, %v2785_v0  ;;  %v7467_v56 = vpack.c.bf16 %v2794_v50, %v2788_v59  ;;  %v2845_v50 = vld [vmem:[%s8240_s1 + $0x1e0] sm:$0xff] }
 0xb78   :  { %v2301_v25 = vadd.f32 %v2300_v49, %v2299_v44  ;;  %v2787_v44 = vld [vmem:[%s8240_s1 + $0x10] sm:$0xff] }
 0xb7a   :  { %2310 = vst.msk [vmem:[#allocation3] sm:$0xf] %vm5415_vm2, %v2301_v25  ;;  %5013 = vtanh.f32 %v2301_v25  ;;  %v2793_v25 = vld [vmem:[%s8240_s1 + $0x40] sm:$0xff] }
 0xb7b   :  { %5015 = vpow2.f32 %v3752_v18  ;;  %v7479_v18 = vpack.c.bf16 %v2793_v25, %v2787_v44  ;;  %v2851_v44 = vld [vmem:[%s8240_s1 + $0x210] sm:$0xff] }
 0xb7c   :  { %v2847_v25 = vld [vmem:[%s8240_s1 + $0x1f0] sm:$0xff] }
 0xb81   :  { %v2759_v7 = vld [vmem:[#allocation3] sm:$0xf] }
 0xb84   :  { %v5014_v31 = vpop.eup %5013 }
 0xb85   :  { %2304 = vrot.lane.b32.xlu1 %v5014_v31, %s5069_s19  ;;  %v5016_v3 = vpop.eup %5015  ;;  %v2798_v31 = vld [vmem:[%s8240_s1 + $0x68] sm:$0xff] }
 0xb86   :  { %v2295_v20 = vadd.f32 1.0, %v5016_v3  ;;  %v2804_v3 = vld [vmem:[%s8240_s1 + $0x98] sm:$0xff] }
 0xb88   :  { %5017 = vrcp.f32 %v2295_v20  ;;  %v2797_v20 = vld [vmem:[%s8240_s1 + $0x60] sm:$0xff] }
 0xb92   :  { %v5018_v38 = vpop.eup %5017 }
 0xbf7   :  { %v2305_v24 = vpop.permute.xlu1 %2304 }
 0xbf8   :  { %v2306_v40 = vrot.slane %v2305_v24, 6 }
 0xbfa   :  { %v2307_v63 = vsel %vm173_vm3, %v2306_v40, %v2305_v24  ;;  %v2803_v24 = vld [vmem:[%s8240_s1 + $0x90] sm:$0xff]  ;;  %v7492_v40 = vpack.c.bf16 %v2804_v3, %v2798_v31  ;;  %v7647_v31 = vpack.c.bf16 %v2854_v2, %v2848_v51  ;;  %v2853_v3 = vld [vmem:[%s8240_s1 + $0x220] sm:$0xff] }
 0xbfb   :  { %v2309_v60 = vmul.f32 %v5018_v38, %v2307_v63  ;;  %v7494_v38 = vpack.c.bf16 %v2803_v24, %v2797_v20  ;;  %v2800_v63 = vld [vmem:[%s8240_s1 + $0x78] sm:$0xff]  ;;  %v2858_v20 = vld [vmem:[%s8240_s1 + $0x248] sm:$0xff]  ;;  %v2883_v2 = vld [vmem:[%s8240_s1 + $0x310] sm:$0xff] }
 0xbfc   :  { %v2864_v24 = vld [vmem:[%s8240_s1 + $0x278] sm:$0xff] }
 0xbfd   :  { %2312 = vrot.lane.b32.xlu0 %v2309_v60, %s5069_s19  ;;  %v2806_v60 = vld [vmem:[%s8240_s1 + $0xa8] sm:$0xff] }
 0xc6f   :  { %v2313_v17 = vpop.permute.xlu0 %2312 }
 0xc70   :  { %v2314_v42 = vrot.slane %v2313_v17, 2 }
 0xc72   :  { %v2315_v62 = vsel %vm173_vm3, %v2313_v17, %v2314_v42  ;;  %v2799_v17 = vld [vmem:[%s8240_s1 + $0x70] sm:$0xff]  ;;  %v7506_v42 = vpack.c.bf16 %v2806_v60, %v2800_v63  ;;  %v2860_v63 = vld [vmem:[%s8240_s1 + $0x258] sm:$0xff]  ;;  %v2866_v60 = vld [vmem:[%s8240_s1 + $0x288] sm:$0xff] }
 0xc73   :  { %2317 = vst.msk [vmem:[#allocation2] sm:$0xf] %vm5415_vm2, %v2315_v62  ;;  %3753 = vst.msk [vmem:[%s8242_s2 + $0x10] sm:$0xf] %vm5415_vm2, %v2315_v62  ;;  %v2805_v62 = vld [vmem:[%s8240_s1 + $0xa0] sm:$0xff] }
 0xc7a   :  { %v3756_v12 = vld.sshfl [vmem:[#allocation2] sm:$0x33 pattern:$0x76325410] }
 0xc7b   :  { %v2476_v48 = vcombine.high %v3756_v12, %v3756_v12 }
 0xc7d   :  { %3757 = vmatprep.mubr.msk.f32.mxu1 %vm173_vm3, %v2476_v48  ;;  %3758 = vmatprep.mubr.msk.f32.mxu0 %vm173_vm3, %v2476_v48 }
 0xc7e   :  { %2545 = vmatmul.mubr.f32.vlgmr.msra.gmra.mrb[14].mxu1 %v3756_v12  ;;  %2616 = vmatmul.mubr.f32.vlgmr.msra.gmra.mrb[16].mxu0 %v3756_v12 }
 0xc7f   :  { %4603 = vmatpush1.bf16.msra.mxu1 %v7128_v21  ;;  %3759 = vmatprep.mubr.msk.f32.mxu1 %vm173_vm3, %v2476_v48  ;;  %v2816_v48 = vld [vmem:[%s8240_s1 + $0xf8] sm:$0xff] }
 0xc80   :  { %4605 = vmatprep.subr.bf16.mxu1 %v7130_v55  ;;  %4651 = vmatpush1.bf16.msra.mxu0 %v7465_v52 }
 0xc81   :  { %4653 = vmatprep.subr.bf16.mxu0 %v7492_v40 }
 0xc83   :  { %4607 = vmatpush1.bf16.msra.mxu1 %v7150_v34 }
 0xc84   :  { %4609 = vmatprep.subr.bf16.mxu1 %v7153_v33  ;;  %4655 = vmatpush1.bf16.msra.mxu0 %v7494_v38 }
 0xc87   :  { %4611 = vmatpush1.bf16.msra.mxu1 %v7170_v45 }
 0xc88   :  { %4613 = vmatprep.subr.bf16.mxu1 %v7173_v26 }
 0xc8b   :  { %4615 = vmatpush1.bf16.msra.mxu1 %v7190_v41 }
 0xc8c   :  { %4617 = vmatprep.subr.bf16.mxu1 %v7193_v28 }
 0xc8f   :  { %4619 = vmatpush1.bf16.msra.mxu1 %v7210_v47  ;;  %v3754_v47 = vld [vmem:[%s8241_s0 + $0x3c] sm:$0xff] }
 0xc90   :  { %4621 = vmatprep.subr.bf16.mxu1 %v7213_v1 }
 0xc93   :  { %4623 = vmatpush1.bf16.msra.mxu1 %v7230_v53 }
 0xc94   :  { %4625 = vmatprep.subr.bf16.mxu1 %v7233_v8 }
 0xc97   :  { %4627 = vmatpush1.bf16.msra.mxu1 %v7250_v35 }
 0xc98   :  { %4629 = vmatprep.subr.bf16.mxu1 %v7253_v13 }
 0xc9b   :  { %4631 = vmatpush1.bf16.msra.mxu1 %v7270_v57 }
 0xc9c   :  { %4633 = vmatprep.subr.bf16.mxu1 %v7273_v4 }
 0xc9f   :  { %4635 = vmatpush1.bf16.msra.mxu1 %v7290_v61  ;;  %v3755_v61 = vld [vmem:[%s8241_s0 + $0x44] sm:$0xf] }
 0xca0   :  { %4637 = vmatprep.subr.bf16.mxu1 %v7293_v37 }
 0xca3   :  { %4639 = vmatpush1.bf16.msra.mxu1 %v7310_v36 }
 0xca4   :  { %4641 = vmatprep.subr.bf16.mxu1 %v7313_v46 }
 0xca7   :  { %4643 = vmatpush1.bf16.msra.mxu1 %v7330_v11 }
 0xca8   :  { %4645 = vmatprep.subr.bf16.mxu1 %v7333_v27 }
 0xcab   :  { %4647 = vmatpush1.bf16.msra.mxu1 %v7344_v23 }
 0xcac   :  { %4697 = vmatprep.subr.bf16.mxu1 %v7467_v56 }
 0xcae   :  { %2687 = vmatmul.mubr.f32.vlgmr.msra.gmra.mrb[16].mxu1 %v3756_v12  ;;  %v2810_v12 = vld [vmem:[%s8240_s1 + $0xc8] sm:$0xff] }
 0xcaf   :  { %4699 = vmatpush1.bf16.msra.mxu1 %v7479_v18 }
 0xcb0   :  { %4701 = vmatprep.subr.bf16.mxu1 %v7506_v42 }
 0xd51   :  { %v2546_v21 = vpop.f32.mrb[14].mxu1  ;;  %v2617_v55 = vpop.f32.mrb[16].mxu0 }
 0xd52   :  { %v2548_v34 = vpop.f32.mrb[15].mxu1  ;;  %v2619_v33 = vpop.f32.mrb[17].mxu0 }
 0xd53   :  { %v2699_v45 = vcombine.low %v2546_v21, %v2548_v34  ;;  %v2700_v26 = vcombine.low %v2617_v55, %v2619_v33  ;;  %v7518_v21 = vpack.c.bf16 %v2805_v62, %v2799_v17  ;;  %v7520_v55 = vpack.c.bf16 %v2816_v48, %v2810_v12  ;;  %v2809_v34 = vld [vmem:[%s8240_s1 + $0xc0] sm:$0xff]  ;;  %v2815_v33 = vld [vmem:[%s8240_s1 + $0xf0] sm:$0xff] }
 0xd54   :  { %v7665_v17 = vpack.c.bf16 %v2851_v44, %v2845_v50  ;;  %v7669_v62 = vpack.c.bf16 %v2853_v3, %v2847_v25  ;;  %v7671_v12 = vpack.c.bf16 %v2864_v24, %v2858_v20  ;;  %v2857_v48 = vld [vmem:[%s8240_s1 + $0x240] sm:$0xff] }
 0xd55   :  { %v2707_v41 = vrot.slane %v2699_v45, %v5801_v43  ;;  %v2714_v28 = vrot.slane %v2700_v26, %v5801_v43  ;;  %v2812_v45 = vld [vmem:[%s8240_s1 + $0xd8] sm:$0xff]  ;;  %4703 = vmatpush1.bf16.msra.mxu1 %v7518_v21  ;;  %4657 = vmatprep.subr.bf16.mxu0 %v7520_v55  ;;  %v2889_v50 = vld [vmem:[%s8240_s1 + $0x340] sm:$0xff] }
 0xd56   :  { %v7765_v25 = vpack.c.bf16 %v2889_v50, %v2883_v2  ;;  %v2907_v2 = vld [vmem:[%s8240_s1 + $0x3d0] sm:$0xff] }
 0xd57   :  { %v2715_v1 = vcombine.low %v2707_v41, %v2714_v28  ;;  %v2818_v41 = vld [vmem:[%s8240_s1 + $0x108] sm:$0xff]  ;;  %v2811_v28 = vld [vmem:[%s8240_s1 + $0xd0] sm:$0xff] }
 0xd59   :  { %v2726_v53 = vadd.f32 %v3754_v47, %v2715_v1  ;;  %v2817_v47 = vld [vmem:[%s8240_s1 + $0x100] sm:$0xff]  ;;  %v7543_v1 = vpack.c.bf16 %v2815_v33, %v2809_v34  ;;  %v2863_v34 = vld [vmem:[%s8240_s1 + $0x270] sm:$0xff] }
 0xd5a   :  { %v2859_v33 = vld [vmem:[%s8240_s1 + $0x250] sm:$0xff] }
 0xd5b   :  { %2735 = vrot.lane.b32.xlu1 %v2726_v53, %s5069_s19  ;;  %v3760_v8 = vmul.f32 -1.442695, %v2726_v53  ;;  %v2748_v11 = vrot.slane %v2726_v53, 6  ;;  %v7545_v53 = vpack.c.bf16 %v2818_v41, %v2812_v45  ;;  %4659 = vmatpush1.bf16.msra.mxu0 %v7543_v1  ;;  %v7683_v45 = vpack.c.bf16 %v2866_v60, %v2860_v63  ;;  %v2870_v41 = vld [vmem:[%s8240_s1 + $0x2a8] sm:$0xff]  ;;  %v2900_v60 = vld [vmem:[%s8240_s1 + $0x398] sm:$0xff] }
 0xd5c   :  { %v2894_v63 = vld [vmem:[%s8240_s1 + $0x368] sm:$0xff] }
 0xd5d   :  { %5019 = vpow2.f32 %v3760_v8  ;;  %v2822_v8 = vld [vmem:[%s8240_s1 + $0x128] sm:$0xff]  ;;  %4705 = vmatprep.subr.bf16.mxu1 %v7545_v53 }
 0xd67   :  { %v5020_v4 = vpop.eup %5019 }
 0xd68   :  { %v2731_v36 = vadd.f32 1.0, %v5020_v4 }
 0xd6a   :  { %5021 = vrcp.f32 %v2731_v36  ;;  %v2830_v36 = vld [vmem:[%s8240_s1 + $0x168] sm:$0xff] }
 0xd74   :  { %v5022_v10 = vpop.eup %5021 }
 0xd81   :  { %v2688_v35 = vpop.f32.mrb[16].mxu1 }
 0xd82   :  { %v2690_v13 = vpop.f32.mrb[17].mxu1 }
 0xd83   :  { %v2716_v57 = vcombine.low %v2688_v35, %v2690_v13  ;;  %v2828_v35 = vld [vmem:[%s8240_s1 + $0x158] sm:$0xff]  ;;  %v2821_v13 = vld [vmem:[%s8240_s1 + $0x120] sm:$0xff] }
 0xd84   :  { %v7560_v4 = vpack.c.bf16 %v2828_v35, %v2822_v8  ;;  %v2878_v8 = vld [vmem:[%s8240_s1 + $0x2e8] sm:$0xff]  ;;  %v7701_v35 = vpack.c.bf16 %v2863_v34, %v2857_v48  ;;  %v2893_v48 = vld [vmem:[%s8240_s1 + $0x360] sm:$0xff]  ;;  %v7780_v34 = vpack.c.bf16 %v2900_v60, %v2894_v63  ;;  %v2924_v63 = vld [vmem:[%s8240_s1 + $0x458] sm:$0xff] }
 0xd85   :  { %v2723_v37 = vrot.slane %v2716_v57, %v5801_v43  ;;  %v7558_v57 = vpack.c.bf16 %v2817_v47, %v2811_v28  ;;  %v2876_v28 = vld [vmem:[%s8240_s1 + $0x2d8] sm:$0xff] }
 0xd86   :  { %4661 = vmatprep.subr.bf16.mxu0 %v7560_v4  ;;  %v2872_v47 = vld [vmem:[%s8240_s1 + $0x2b8] sm:$0xff] }
 0xd87   :  { %v7438_v46 = vadd.f32 %v3755_v61, %v2723_v37  ;;  %v2827_v61 = vld [vmem:[%s8240_s1 + $0x150] sm:$0xff]  ;;  %v2824_v37 = vld [vmem:[%s8240_s1 + $0x138] sm:$0xff]  ;;  %4707 = vmatpush1.bf16.msra.mxu1 %v7558_v57 }
 0xd89   :  { %v2749_v27 = vrot.slane %v7438_v46, 6  ;;  %v3762_v3 = vmul.f32 -1.442695, %v7438_v46  ;;  %v2899_v46 = vld [vmem:[%s8240_s1 + $0x390] sm:$0xff] }
 0xd8b   :  { %v2750_v23 = vsel %vm11_vm0, %v2748_v11, %v2749_v27  ;;  %v7572_v11 = vpack.c.bf16 %v2830_v36, %v2824_v37  ;;  %v2823_v27 = vld [vmem:[%s8240_s1 + $0x130] sm:$0xff]  ;;  %v2869_v37 = vld [vmem:[%s8240_s1 + $0x2a0] sm:$0xff] }
 0xd8c   :  { %5023 = vtanh.f32 %v2750_v23  ;;  %v2829_v23 = vld [vmem:[%s8240_s1 + $0x160] sm:$0xff]  ;;  %v2875_v36 = vld [vmem:[%s8240_s1 + $0x2d0] sm:$0xff] }
 0xd8d   :  { %4709 = vmatprep.subr.bf16.mxu1 %v7572_v11 }
 0xd96   :  { %v5024_v54 = vpop.eup %5023 }
 0xd97   :  { %v2761_v9 = vmul.f32 %v5024_v54, %v5022_v10  ;;  %v2834_v10 = vld [vmem:[%s8240_s1 + $0x188] sm:$0xff]  ;;  %v2840_v54 = vld [vmem:[%s8240_s1 + $0x1b8] sm:$0xff] }
 0xdcd   :  { %v2736_v22 = vpop.permute.xlu1 %2735 }
 0xdce   :  { %v2737_v29 = vrot.slane %v2736_v22, 2  ;;  %v2738_v58 = vrot.slane %v2736_v22, 4  ;;  %v2836_v22 = vld [vmem:[%s8240_s1 + $0x198] sm:$0xff] }
 0xdd0   :  { %v2739_v15 = vsel %vm173_vm3, %v2737_v29, %v2738_v58  ;;  %v2842_v29 = vld [vmem:[%s8240_s1 + $0x1c8] sm:$0xff]  ;;  %v7597_v58 = vpack.c.bf16 %v2829_v23, %v2823_v27  ;;  %v2871_v27 = vld [vmem:[%s8240_s1 + $0x2b0] sm:$0xff]  ;;  %v7719_v23 = vpack.c.bf16 %v2878_v8, %v2872_v47  ;;  %v2901_v8 = vld [vmem:[%s8240_s1 + $0x3a0] sm:$0xff] }
 0xdd1   :  { %v3761_v19 = vmul.f32 -1.442695, %v2739_v15  ;;  %v7599_v15 = vpack.c.bf16 %v2840_v54, %v2834_v10  ;;  %v2877_v10 = vld [vmem:[%s8240_s1 + $0x2e0] sm:$0xff]  ;;  %v2882_v54 = vld [vmem:[%s8240_s1 + $0x308] sm:$0xff]  ;;  %v2895_v47 = vld [vmem:[%s8240_s1 + $0x370] sm:$0xff] }
 0xdd2   :  { %4711 = vmatpush1.bf16.msra.mxu1 %v7597_v58 }
 0xdd3   :  { %5025 = vpow2.f32 %v3761_v19  ;;  %v2833_v19 = vld [vmem:[%s8240_s1 + $0x180] sm:$0xff] }
 0xddd   :  { %v5026_v39 = vpop.eup %5025 }
 0xdde   :  { %v2744_v32 = vadd.f32 1.0, %v5026_v39  ;;  %v2839_v39 = vld [vmem:[%s8240_s1 + $0x1b0] sm:$0xff] }
 0xddf   :  { %v7629_v0 = vpack.c.bf16 %v2839_v39, %v2833_v19  ;;  %v2890_v19 = vld [vmem:[%s8240_s1 + $0x348] sm:$0xff]  ;;  %v7737_v39 = vpack.c.bf16 %v2875_v36, %v2869_v37  ;;  %v7805_v36 = vpack.c.bf16 %v2901_v8, %v2895_v47 }
 0xde0   :  { %5027 = vrcp.f32 %v2744_v32  ;;  %v2835_v32 = vld [vmem:[%s8240_s1 + $0x190] sm:$0xff]  ;;  %v2906_v37 = vld [vmem:[%s8240_s1 + $0x3c8] sm:$0xff] }
 0xdea   :  { %v5028_v16 = vpop.eup %5027 }
 0xdeb   :  { %v2760_v14 = vmul.f32 %v5028_v16, %v2759_v7  ;;  %v7611_v16 = vpack.c.bf16 %v2842_v29, %v2836_v22  ;;  %v2841_v7 = vld [vmem:[%s8240_s1 + $0x1c0] sm:$0xff]  ;;  %v2888_v22 = vld [vmem:[%s8240_s1 + $0x338] sm:$0xff] }
 0xdec   :  { %v7633_v5 = vpack.c.bf16 %v2841_v7, %v2835_v32  ;;  %v2884_v29 = vld [vmem:[%s8240_s1 + $0x318] sm:$0xff]  ;;  %v7741_v32 = vpack.c.bf16 %v2877_v10, %v2871_v27  ;;  %v7743_v7 = vpack.c.bf16 %v2888_v22, %v2882_v54  ;;  %v2905_v10 = vld [vmem:[%s8240_s1 + $0x3c0] sm:$0xff]  ;;  %v2911_v54 = vld [vmem:[%s8240_s1 + $0x3f0] sm:$0xff] }
 0xded   :  { %v2762_v49 = vadd.f32 %v2761_v9, %v2760_v14  ;;  %v7587_v9 = vpack.c.bf16 %v2827_v61, %v2821_v13  ;;  %v2846_v14 = vld [vmem:[%s8240_s1 + $0x1e8] sm:$0xff]  ;;  %4713 = vmatprep.subr.bf16.mxu1 %v7611_v16  ;;  %v7707_v61 = vpack.c.bf16 %v2876_v28, %v2870_v41  ;;  %v7752_v51 = vpack.c.bf16 %v2890_v19, %v2884_v29  ;;  %v2912_v27 = vld [vmem:[%s8240_s1 + $0x3f8] sm:$0xff] }
 0xdee   :  { %4715 = vmatpush1.bf16.msra.mxu1 %v7633_v5  ;;  %v7791_v41 = vpack.c.bf16 %v2899_v46, %v2893_v48  ;;  %v7818_v29 = vpack.c.bf16 %v2912_v27, %v2906_v37  ;;  %v7820_v19 = vpack.c.bf16 %v2911_v54, %v2905_v10  ;;  %v2917_v46 = vld [vmem:[%s8240_s1 + $0x420] sm:$0xff]  ;;  %v2926_v37 = vld [vmem:[%s8240_s1 + $0x468] sm:$0xff]  ;;  %v2919_v27 = vld [vmem:[%s8240_s1 + $0x430] sm:$0xff] }
 0xdef   :  { %2771 = vst.msk [vmem:[#allocation3] sm:$0xf] %vm5415_vm2, %v2762_v49  ;;  %5029 = vtanh.f32 %v2762_v49  ;;  %v2852_v49 = vld [vmem:[%s8240_s1 + $0x218] sm:$0xff]  ;;  %4663 = vmatpush1.bf16.msra.mxu0 %v7587_v9  ;;  %4717 = vmatprep.subr.bf16.mxu1 %v7647_v31  ;;  %v2925_v10 = vld [vmem:[%s8240_s1 + $0x460] sm:$0xff] }
 0xdf0   :  { %4665 = vmatprep.subr.bf16.mxu0 %v7599_v15  ;;  %v7635_v59 = vpack.c.bf16 %v2852_v49, %v2846_v14  ;;  %v2881_v14 = vld [vmem:[%s8240_s1 + $0x300] sm:$0xff]  ;;  %v2887_v49 = vld [vmem:[%s8240_s1 + $0x330] sm:$0xff]  ;;  %5031 = vpow2.f32 %v3762_v3 }
 0xdf1   :  { %v7761_v44 = vpack.c.bf16 %v2887_v49, %v2881_v14  ;;  %v2908_v14 = vld [vmem:[%s8240_s1 + $0x3d8] sm:$0xff]  ;;  %v2914_v49 = vld [vmem:[%s8240_s1 + $0x408] sm:$0xff] }
 0xdf2   :  { %4719 = vmatpush1.bf16.msra.mxu1 %v7669_v62  ;;  %v7832_v3 = vpack.c.bf16 %v2914_v49, %v2908_v14  ;;  %v7875_v49 = vpack.c.bf16 %v2925_v10, %v2919_v27 }
 0xdf3   :  { %4667 = vmatpush1.bf16.msra.mxu0 %v7629_v0  ;;  %4721 = vmatprep.subr.bf16.mxu1 %v7683_v45 }
 0xdf4   :  { %4669 = vmatprep.subr.bf16.mxu0 %v7635_v59 }
 0xdf7   :  { %4671 = vmatpush1.bf16.msra.mxu0 %v7665_v17 }
 0xdf8   :  { %4673 = vmatprep.subr.bf16.mxu0 %v7671_v12 }
 0xdf9   :  { %v5030_v26 = vpop.eup %5029 }
 0xdfa   :  { %2765 = vrot.lane.b32.xlu0 %v5030_v26, %s5069_s19  ;;  %v2865_v26 = vld [vmem:[%s8240_s1 + $0x280] sm:$0xff]  ;;  %v5032_v20 = vpop.eup %5031 }
 0xdfb   :  { %v7705_v13 = vpack.c.bf16 %v2865_v26, %v2859_v33  ;;  %4675 = vmatpush1.bf16.msra.mxu0 %v7701_v35  ;;  %v2756_v24 = vadd.f32 1.0, %v5032_v20  ;;  %v2896_v33 = vld [vmem:[%s8240_s1 + $0x378] sm:$0xff]  ;;  %v2902_v26 = vld [vmem:[%s8240_s1 + $0x3a8] sm:$0xff]  ;;  %v2913_v20 = vld [vmem:[%s8240_s1 + $0x400] sm:$0xff] }
 0xdfc   :  { %4677 = vmatprep.subr.bf16.mxu0 %v7707_v61  ;;  %v7793_v28 = vpack.c.bf16 %v2902_v26, %v2896_v33  ;;  %v7844_v60 = vpack.c.bf16 %v2913_v20, %v2907_v2  ;;  %v2923_v33 = vld [vmem:[%s8240_s1 + $0x450] sm:$0xff]  ;;  %v2920_v26 = vld [vmem:[%s8240_s1 + $0x438] sm:$0xff]  ;;  %v2790_v2 = vld [vmem:[%s8240_s1 + $0x28] sm:$0xff] }
 0xdfd   :  { %4723 = vmatpush1.bf16.msra.mxu1 %v7705_v13  ;;  %5033 = vrcp.f32 %v2756_v24  ;;  %v2918_v24 = vld [vmem:[%s8240_s1 + $0x428] sm:$0xff]  ;;  %v7869_v14 = vpack.c.bf16 %v2923_v33, %v2917_v46  ;;  %v2789_v33 = vld [vmem:[%s8240_s1 + $0x20] sm:$0xff] }
 0xdfe   :  { %4725 = vmatprep.subr.bf16.mxu1 %v7719_v23  ;;  %v7846_v48 = vpack.c.bf16 %v2924_v63, %v2918_v24 }
 0xdff   :  { %4679 = vmatpush1.bf16.msra.mxu0 %v7737_v39 }
 0xe00   :  { %4681 = vmatprep.subr.bf16.mxu0 %v7743_v7 }
 0xe01   :  { %4727 = vmatpush1.bf16.msra.mxu1 %v7741_v32 }
 0xe02   :  { %4729 = vmatprep.subr.bf16.mxu1 %v7752_v51 }
 0xe03   :  { %4683 = vmatpush1.bf16.msra.mxu0 %v7761_v44 }
 0xe04   :  { %4685 = vmatprep.subr.bf16.mxu0 %v7780_v34 }
 0xe05   :  { %4731 = vmatpush1.bf16.msra.mxu1 %v7765_v25 }
 0xe06   :  { %4733 = vmatprep.subr.bf16.mxu1 %v7793_v28 }
 0xe07   :  { %4687 = vmatpush1.bf16.msra.mxu0 %v7791_v41  ;;  %v5034_v47 = vpop.eup %5033 }
 0xe08   :  { %4689 = vmatprep.subr.bf16.mxu0 %v7818_v29 }
 0xe09   :  { %4735 = vmatpush1.bf16.msra.mxu1 %v7805_v36 }
 0xe0a   :  { %4737 = vmatprep.subr.bf16.mxu1 %v7832_v3 }
 0xe0b   :  { %4691 = vmatpush1.bf16.msra.mxu0 %v7820_v19 }
 0xe0c   :  { %4693 = vmatprep.subr.bf16.mxu0 %v7846_v48 }
 0xe0d   :  { %4739 = vmatpush1.bf16.msra.mxu1 %v7844_v60 }
 0xe0f   :  { %4695 = vmatpush1.bf16.msra.mxu0 %v7869_v14 }
 0xe6c   :  { %v2766_v22 = vpop.permute.xlu0 %2765 }
 0xe6d   :  { %v2767_v50 = vrot.slane %v2766_v22, 6 }
 0xe6f   :  { %v2768_v8 = vsel %vm173_vm3, %v2767_v50, %v2766_v22  ;;  %v7871_v22 = vpack.c.bf16 %v2926_v37, %v2920_v26  ;;  %v2796_v50 = vld [vmem:[%s8240_s1 + $0x58] sm:$0xff]  ;;  %v2802_v26 = vld [vmem:[%s8240_s1 + $0x88] sm:$0xff] }
 0xe70   :  { %v2770_v54 = vmul.f32 %v5034_v47, %v2768_v8  ;;  %v7885_v20 = vpack.c.bf16 %v2796_v50, %v2790_v2  ;;  %v2808_v47 = vld [vmem:[%s8240_s1 + $0xb8] sm:$0xff]  ;;  %v2807_v2 = vld [vmem:[%s8240_s1 + $0xb0] sm:$0xff]  ;;  %v2814_v50 = vld [vmem:[%s8240_s1 + $0xe8] sm:$0xff] }
 0xe71   :  { %4741 = vmatprep.subr.bf16.mxu1 %v7871_v22  ;;  %v7917_v10 = vpack.c.bf16 %v2808_v47, %v2802_v26  ;;  %v2826_v26 = vld [vmem:[%s8240_s1 + $0x148] sm:$0xff]  ;;  %v2832_v47 = vld [vmem:[%s8240_s1 + $0x178] sm:$0xff] }
 0xe72   :  { %2773 = vrot.lane.b32.xlu1 %v2770_v54, %s5069_s19  ;;  %4743 = vmatpush1.bf16.msra.mxu1 %v7875_v49  ;;  %v2801_v54 = vld [vmem:[%s8240_s1 + $0x80] sm:$0xff] }
 0xe73   :  { %4745 = vmatprep.subr.bf16.mxu0 %v7885_v20  ;;  %4793 = vmatprep.subr.bf16.mxu1 %v7454_v30  ;;  %v2795_v30 = vld [vmem:[%s8240_s1 + $0x50] sm:$0xff] }
 0xe74   :  { %v7915_v27 = vpack.c.bf16 %v2795_v30, %v2789_v33  ;;  %v2813_v33 = vld [vmem:[%s8240_s1 + $0xe0] sm:$0xff]  ;;  %v2819_v30 = vld [vmem:[%s8240_s1 + $0x110] sm:$0xff] }
 0xee4   :  { %v2774_v24 = vpop.permute.xlu1 %2773 }
 0xee5   :  { %v2775_v63 = vrot.slane %v2774_v24, 2 }
 0xee7   :  { %v2776_v46 = vsel %vm173_vm3, %v2774_v24, %v2775_v63  ;;  %v2820_v24 = vld [vmem:[%s8240_s1 + $0x118] sm:$0xff]  ;;  %v7937_v63 = vpack.c.bf16 %v2807_v2, %v2801_v54  ;;  %v7960_v54 = vpack.c.bf16 %v2832_v47, %v2826_v26  ;;  %v2831_v2 = vld [vmem:[%s8240_s1 + $0x170] sm:$0xff] }
 0xee8   :  { %2778 = vst.msk [vmem:[#allocation2] sm:$0xf] %vm5415_vm2, %v2776_v46  ;;  %3763 = vst.msk [vmem:[%s8242_s2 + $0x14] sm:$0xf] %vm5415_vm2, %v2776_v46  ;;  %v7940_v46 = vpack.c.bf16 %v2820_v24, %v2814_v50  ;;  %v2844_v50 = vld [vmem:[%s8240_s1 + $0x1d8] sm:$0xff] }
 0xee9   :  { %v2856_v26 = vld [vmem:[%s8240_s1 + $0x238] sm:$0xff] }
 0xeef   :  { %v7911_v8 = vld.sshfl [vmem:[#allocation2] sm:$0x33 pattern:$0x76325410] }
 0xef0   :  { %v2937_v37 = vcombine.high %v7911_v8, %v7911_v8 }
 0xef2   :  { %3767 = vmatprep.mubr.msk.f32.mxu0 %vm173_vm3, %v2937_v37  ;;  %3768 = vmatprep.mubr.msk.f32.mxu1 %vm173_vm3, %v2937_v37 }
 0xef3   :  { %3006 = vmatmul.mubr.f32.vlgmr.msra.gmra.mrb[18].mxu0 %v7911_v8  ;;  %3077 = vmatmul.mubr.f32.vlgmr.msra.gmra.mrb[18].mxu1 %v7911_v8 }
 0xef4   :  { %4747 = vmatpush1.bf16.msra.mxu0 %v7915_v27  ;;  %3769 = vmatprep.mubr.msk.f32.mxu0 %vm173_vm3, %v2937_v37  ;;  %v7957_v37 = vpack.c.bf16 %v2819_v30, %v2813_v33  ;;  %v2843_v30 = vld [vmem:[%s8240_s1 + $0x1d0] sm:$0xff] }
 0xef5   :  { %4749 = vmatprep.subr.bf16.mxu0 %v7917_v10  ;;  %4795 = vmatpush1.bf16.msra.mxu1 %v7465_v52  ;;  %v2825_v52 = vld [vmem:[%s8240_s1 + $0x140] sm:$0xff] }
 0xef6   :  { %4797 = vmatprep.subr.bf16.mxu1 %v7492_v40  ;;  %v2838_v40 = vld [vmem:[%s8240_s1 + $0x1a8] sm:$0xff]  ;;  %v7977_v24 = vpack.c.bf16 %v2831_v2, %v2825_v52  ;;  %v2855_v2 = vld [vmem:[%s8240_s1 + $0x230] sm:$0xff] }
 0xef7   :  { %v7980_v33 = vpack.c.bf16 %v2844_v50, %v2838_v40  ;;  %v2868_v40 = vld [vmem:[%s8240_s1 + $0x298] sm:$0xff] }
 0xef8   :  { %4751 = vmatpush1.bf16.msra.mxu0 %v7937_v63 }
 0xef9   :  { %4753 = vmatprep.subr.bf16.mxu0 %v7940_v46  ;;  %4799 = vmatpush1.bf16.msra.mxu1 %v7494_v38  ;;  %v2837_v38 = vld [vmem:[%s8240_s1 + $0x1a0] sm:$0xff] }
 0xefa   :  { %4801 = vmatprep.subr.bf16.mxu1 %v7520_v55  ;;  %v2850_v55 = vld [vmem:[%s8240_s1 + $0x208] sm:$0xff]  ;;  %v7997_v47 = vpack.c.bf16 %v2843_v30, %v2837_v38  ;;  %v2867_v30 = vld [vmem:[%s8240_s1 + $0x290] sm:$0xff] }
 0xefb   :  { %v8000_v52 = vpack.c.bf16 %v2856_v26, %v2850_v55  ;;  %v2880_v55 = vld [vmem:[%s8240_s1 + $0x2f8] sm:$0xff] }
 0xefc   :  { %4755 = vmatpush1.bf16.msra.mxu0 %v7957_v37 }
 0xefd   :  { %4757 = vmatprep.subr.bf16.mxu0 %v7960_v54  ;;  %4803 = vmatpush1.bf16.msra.mxu1 %v7543_v1  ;;  %v2849_v1 = vld [vmem:[%s8240_s1 + $0x200] sm:$0xff] }
 0xefe   :  { %4805 = vmatprep.subr.bf16.mxu1 %v7560_v4  ;;  %v2862_v4 = vld [vmem:[%s8240_s1 + $0x268] sm:$0xff]  ;;  %v8017_v50 = vpack.c.bf16 %v2855_v2, %v2849_v1  ;;  %v2879_v2 = vld [vmem:[%s8240_s1 + $0x2f0] sm:$0xff] }
 0xeff   :  { %v8020_v38 = vpack.c.bf16 %v2868_v40, %v2862_v4  ;;  %v2892_v4 = vld [vmem:[%s8240_s1 + $0x358] sm:$0xff] }
 0xf00   :  { %4759 = vmatpush1.bf16.msra.mxu0 %v7977_v24 }
 0xf01   :  { %4761 = vmatprep.subr.bf16.mxu0 %v7980_v33  ;;  %4807 = vmatpush1.bf16.msra.mxu1 %v7587_v9  ;;  %v2861_v9 = vld [vmem:[%s8240_s1 + $0x260] sm:$0xff] }
 0xf02   :  { %4809 = vmatprep.subr.bf16.mxu1 %v7599_v15  ;;  %v2874_v15 = vld [vmem:[%s8240_s1 + $0x2c8] sm:$0xff]  ;;  %v8037_v26 = vpack.c.bf16 %v2867_v30, %v2861_v9  ;;  %v2891_v30 = vld [vmem:[%s8240_s1 + $0x350] sm:$0xff] }
 0xf03   :  { %v8040_v1 = vpack.c.bf16 %v2880_v55, %v2874_v15  ;;  %v2904_v15 = vld [vmem:[%s8240_s1 + $0x3b8] sm:$0xff] }
 0xf04   :  { %4763 = vmatpush1.bf16.msra.mxu0 %v7997_v47 }
 0xf05   :  { %4765 = vmatprep.subr.bf16.mxu0 %v8000_v52  ;;  %4811 = vmatpush1.bf16.msra.mxu1 %v7629_v0  ;;  %v2873_v0 = vld [vmem:[%s8240_s1 + $0x2c0] sm:$0xff] }
 0xf06   :  { %4813 = vmatprep.subr.bf16.mxu1 %v7635_v59  ;;  %v2886_v59 = vld [vmem:[%s8240_s1 + $0x328] sm:$0xff]  ;;  %v8057_v40 = vpack.c.bf16 %v2879_v2, %v2873_v0  ;;  %v2903_v2 = vld [vmem:[%s8240_s1 + $0x3b0] sm:$0xff] }
 0xf07   :  { %v8060_v9 = vpack.c.bf16 %v2892_v4, %v2886_v59  ;;  %v2916_v59 = vld [vmem:[%s8240_s1 + $0x418] sm:$0xff] }
 0xf08   :  { %4767 = vmatpush1.bf16.msra.mxu0 %v8017_v50 }
 0xf09   :  { %4769 = vmatprep.subr.bf16.mxu0 %v8020_v38  ;;  %4815 = vmatpush1.bf16.msra.mxu1 %v7665_v17  ;;  %v2885_v17 = vld [vmem:[%s8240_s1 + $0x320] sm:$0xff] }
 0xf0a   :  { %4817 = vmatprep.subr.bf16.mxu1 %v7671_v12  ;;  %v2898_v12 = vld [vmem:[%s8240_s1 + $0x388] sm:$0xff]  ;;  %v8077_v55 = vpack.c.bf16 %v2891_v30, %v2885_v17  ;;  %v2915_v30 = vld [vmem:[%s8240_s1 + $0x410] sm:$0xff] }
 0xf0b   :  { %v8080_v0 = vpack.c.bf16 %v2904_v15, %v2898_v12  ;;  %v2928_v12 = vld [vmem:[%s8240_s1 + $0x478] sm:$0xff] }
 0xf0c   :  { %4771 = vmatpush1.bf16.msra.mxu0 %v8037_v26 }
 0xf0d   :  { %4773 = vmatprep.subr.bf16.mxu0 %v8040_v1  ;;  %4819 = vmatpush1.bf16.msra.mxu1 %v7701_v35  ;;  %v2897_v35 = vld [vmem:[%s8240_s1 + $0x380] sm:$0xff] }
 0xf0e   :  { %4821 = vmatprep.subr.bf16.mxu1 %v7707_v61  ;;  %v2910_v61 = vld [vmem:[%s8240_s1 + $0x3e8] sm:$0xff]  ;;  %v8097_v4 = vpack.c.bf16 %v2903_v2, %v2897_v35  ;;  %v2927_v2 = vld [vmem:[%s8240_s1 + $0x470] sm:$0xff] }
 0xf0f   :  { %v8100_v17 = vpack.c.bf16 %v2916_v59, %v2910_v61 }
 0xf10   :  { %4775 = vmatpush1.bf16.msra.mxu0 %v8057_v40 }
 0xf11   :  { %4777 = vmatprep.subr.bf16.mxu0 %v8060_v9  ;;  %4823 = vmatpush1.bf16.msra.mxu1 %v7737_v39  ;;  %v2909_v39 = vld [vmem:[%s8240_s1 + $0x3e0] sm:$0xff] }
 0xf12   :  { %4825 = vmatprep.subr.bf16.mxu1 %v7743_v7  ;;  %v2922_v7 = vld [vmem:[%s8240_s1 + $0x448] sm:$0xff]  ;;  %v8117_v15 = vpack.c.bf16 %v2915_v30, %v2909_v39  ;;  %v3220_v30 = vld [vmem:[#allocation3] sm:$0xf] }
 0xf13   :  { %v8120_v35 = vpack.c.bf16 %v2928_v12, %v2922_v7 }
 0xf14   :  { %4779 = vmatpush1.bf16.msra.mxu0 %v8077_v55 }
 0xf15   :  { %4781 = vmatprep.subr.bf16.mxu0 %v8080_v0  ;;  %4827 = vmatpush1.bf16.msra.mxu1 %v7761_v44  ;;  %v2921_v44 = vld [vmem:[%s8240_s1 + $0x440] sm:$0xff] }
 0xf16   :  { %4829 = vmatprep.subr.bf16.mxu1 %v7780_v34  ;;  %v8131_v34 = vpack.c.bf16 %v2927_v2, %v2921_v44 }
 0xf18   :  { %4783 = vmatpush1.bf16.msra.mxu0 %v8097_v4 }
 0xf19   :  { %4785 = vmatprep.subr.bf16.mxu0 %v8100_v17  ;;  %4831 = vmatpush1.bf16.msra.mxu1 %v7791_v41 }
 0xf1a   :  { %4833 = vmatprep.subr.bf16.mxu1 %v7818_v29 }
 0xf1c   :  { %4787 = vmatpush1.bf16.msra.mxu0 %v8117_v15 }
 0xf1d   :  { %4789 = vmatprep.subr.bf16.mxu0 %v8120_v35  ;;  %4835 = vmatpush1.bf16.msra.mxu1 %v7820_v19 }
 0xf1e   :  { %4837 = vmatprep.subr.bf16.mxu1 %v7846_v48 }
 0xf20   :  { %4791 = vmatpush1.bf16.msra.mxu0 %v8131_v34 }
 0xf21   :  { %4841 = vmatprep.subr.bf16.mxu0 %v7467_v56  ;;  %4839 = vmatpush1.bf16.msra.mxu1 %v7869_v14 }
 0xf22   :  { %4889 = vmatprep.subr.bf16.mxu1 %v7885_v20 }
 0xf23   :  { %3148 = vmatmul.mubr.f32.vlgmr.msra.gmra.mrb[20].mxu0 %v7911_v8 }
 0xf24   :  { %4843 = vmatpush1.bf16.msra.mxu0 %v7479_v18 }
 0xf25   :  { %4845 = vmatprep.subr.bf16.mxu0 %v7506_v42 }
 0xf28   :  { %4847 = vmatpush1.bf16.msra.mxu0 %v7518_v21 }
 0xf29   :  { %4849 = vmatprep.subr.bf16.mxu0 %v7545_v53 }
 0xf2c   :  { %4851 = vmatpush1.bf16.msra.mxu0 %v7558_v57 }
 0xf2d   :  { %4853 = vmatprep.subr.bf16.mxu0 %v7572_v11 }
 0xf30   :  { %4855 = vmatpush1.bf16.msra.mxu0 %v7597_v58 }
 0xf31   :  { %4857 = vmatprep.subr.bf16.mxu0 %v7611_v16  ;;  %v3764_v16 = vld [vmem:[%s8241_s0 + $0x48] sm:$0xff] }
 0xf34   :  { %4859 = vmatpush1.bf16.msra.mxu0 %v7633_v5 }
 0xf35   :  { %4861 = vmatprep.subr.bf16.mxu0 %v7647_v31 }
 0xf38   :  { %4863 = vmatpush1.bf16.msra.mxu0 %v7669_v62 }
 0xf39   :  { %4865 = vmatprep.subr.bf16.mxu0 %v7683_v45 }
 0xf3c   :  { %4867 = vmatpush1.bf16.msra.mxu0 %v7705_v13 }
 0xf3d   :  { %4869 = vmatprep.subr.bf16.mxu0 %v7719_v23 }
 0xf40   :  { %4871 = vmatpush1.bf16.msra.mxu0 %v7741_v32 }
 0xf41   :  { %4873 = vmatprep.subr.bf16.mxu0 %v7752_v51  ;;  %v3765_v51 = vld [vmem:[%s8241_s0 + $0x50] sm:$0xf] }
 0xf44   :  { %4875 = vmatpush1.bf16.msra.mxu0 %v7765_v25 }
 0xf45   :  { %4877 = vmatprep.subr.bf16.mxu0 %v7793_v28 }
 0xf48   :  { %4879 = vmatpush1.bf16.msra.mxu0 %v7805_v36 }
 0xf49   :  { %4881 = vmatprep.subr.bf16.mxu0 %v7832_v3 }
 0xf4c   :  { %4883 = vmatpush1.bf16.msra.mxu0 %v7844_v60 }
 0xf4d   :  { %4885 = vmatprep.subr.bf16.mxu0 %v7871_v22 }
 0xf50   :  { %4887 = vmatpush1.bf16.msra.mxu0 %v7875_v49 }
 0xfc6   :  { %v3007_v56 = vpop.f32.mrb[18].mxu0  ;;  %v3078_v18 = vpop.f32.mrb[18].mxu1 }
 0xfc7   :  { %v3009_v42 = vpop.f32.mrb[19].mxu0  ;;  %v3080_v21 = vpop.f32.mrb[19].mxu1 }
 0xfc8   :  { %v3160_v53 = vcombine.low %v3007_v56, %v3009_v42  ;;  %v3161_v57 = vcombine.low %v3078_v18, %v3080_v21 }
 0xfca   :  { %v3168_v11 = vrot.slane %v3160_v53, %v5801_v43  ;;  %v3175_v58 = vrot.slane %v3161_v57, %v5801_v43 }
 0xfcc   :  { %v3176_v5 = vcombine.low %v3168_v11, %v3175_v58 }
 0xfce   :  { %v3187_v31 = vadd.f32 %v3764_v16, %v3176_v5 }
 0xfd0   :  { %3196 = vrot.lane.b32.xlu0 %v3187_v31, %s5069_s19  ;;  %v3770_v62 = vmul.f32 -1.442695, %v3187_v31  ;;  %v3209_v36 = vrot.slane %v3187_v31, 6 }
 0xfd2   :  { %5035 = vpow2.f32 %v3770_v62 }
 0xfdc   :  { %v5036_v32 = vpop.eup %5035 }
 0xfdd   :  { %v3192_v41 = vadd.f32 1.0, %v5036_v32 }
 0xfdf   :  { %5037 = vrcp.f32 %v3192_v41 }
 0xfe9   :  { %v5038_v3 = vpop.eup %5037 }
 0xff6   :  { %v3149_v45 = vpop.f32.mrb[20].mxu0 }
 0xff7   :  { %v3151_v13 = vpop.f32.mrb[21].mxu0 }
 0xff8   :  { %v3177_v23 = vcombine.low %v3149_v45, %v3151_v13 }
 0xffa   :  { %v3184_v25 = vrot.slane %v3177_v23, %v5801_v43 }
 0xffc   :  { %v3188_v28 = vadd.f32 %v3765_v51, %v3184_v25 }
 0xffe   :  { %v3210_v29 = vrot.slane %v3188_v28, 6  ;;  %v3772_v2 = vmul.f32 -1.442695, %v3188_v28 }
0x1000   :  { %v3211_v19 = vsel %vm11_vm0, %v3209_v36, %v3210_v29 }
0x1001   :  { %5039 = vtanh.f32 %v3211_v19 }
0x100b   :  { %v5040_v60 = vpop.eup %5039 }
0x100c   :  { %v3222_v48 = vmul.f32 %v5040_v60, %v5038_v3 }
0x1042   :  { %v3197_v14 = vpop.permute.xlu0 %3196 }
0x1043   :  { %v3198_v22 = vrot.slane %v3197_v14, 2  ;;  %v3199_v49 = vrot.slane %v3197_v14, 4 }
0x1045   :  { %v3200_v20 = vsel %vm173_vm3, %v3198_v22, %v3199_v49 }
0x1046   :  { %v3771_v8 = vmul.f32 -1.442695, %v3200_v20 }
0x1048   :  { %5041 = vpow2.f32 %v3771_v8 }
0x1052   :  { %v5042_v61 = vpop.eup %5041 }
0x1053   :  { %v3205_v59 = vadd.f32 1.0, %v5042_v61 }
0x1055   :  { %5043 = vrcp.f32 %v3205_v59 }
0x105f   :  { %v5044_v39 = vpop.eup %5043 }
0x1060   :  { %v3221_v7 = vmul.f32 %v5044_v39, %v3220_v30 }
0x1062   :  { %v3223_v12 = vadd.f32 %v3222_v48, %v3221_v7 }
0x1064   :  { %3232 = vst.msk [vmem:[#allocation3] sm:$0xf] %vm5415_vm2, %v3223_v12  ;;  %5045 = vtanh.f32 %v3223_v12 }
0x1065   :  { %5047 = vpow2.f32 %v3772_v2 }
0x106b   :  { %v3681_v19 = vld [vmem:[#allocation3] sm:$0xf] }
0x106e   :  { %v5046_v44 = vpop.eup %5045 }
0x106f   :  { %3226 = vrot.lane.b32.xlu1 %v5046_v44, %s5069_s19  ;;  %v5048_v56 = vpop.eup %5047 }
0x1070   :  { %v3217_v18 = vadd.f32 1.0, %v5048_v56 }
0x1072   :  { %5049 = vrcp.f32 %v3217_v18 }
0x107c   :  { %v5050_v53 = vpop.eup %5049 }
0x10e1   :  { %v3227_v42 = vpop.permute.xlu1 %3226 }
0x10e2   :  { %v3228_v21 = vrot.slane %v3227_v42, 6 }
0x10e4   :  { %v3229_v57 = vsel %vm173_vm3, %v3228_v21, %v3227_v42 }
0x10e5   :  { %v3231_v11 = vmul.f32 %v5050_v53, %v3229_v57 }
0x10e7   :  { %3234 = vrot.lane.b32.xlu0 %v3231_v11, %s5069_s19 }
0x1159   :  { %v3235_v58 = vpop.permute.xlu0 %3234 }
0x115a   :  { %v3236_v16 = vrot.slane %v3235_v58, 2 }
0x115c   :  { %v3237_v5 = vsel %vm173_vm3, %v3235_v58, %v3236_v16 }
0x115d   :  { %3239 = vst.msk [vmem:[#allocation2] sm:$0xf] %vm5415_vm2, %v3237_v5  ;;  %3773 = vst.msk [vmem:[%s8242_s2 + $0x18] sm:$0xf] %vm5415_vm2, %v3237_v5 }
0x1164   :  { %v3776_v31 = vld.sshfl [vmem:[#allocation2] sm:$0x33 pattern:$0x76325410] }
0x1165   :  { %v3398_v62 = vcombine.high %v3776_v31, %v3776_v31 }
0x1167   :  { %3777 = vmatprep.mubr.msk.f32.mxu1 %vm173_vm3, %v3398_v62  ;;  %3778 = vmatprep.mubr.msk.f32.mxu0 %vm173_vm3, %v3398_v62 }
0x1168   :  { %3467 = vmatmul.mubr.f32.vlgmr.msra.gmra.mrb[20].mxu1 %v3776_v31  ;;  %3538 = vmatmul.mubr.f32.vlgmr.msra.gmra.mrb[22].mxu0 %v3776_v31 }
0x1169   :  { %4891 = vmatpush1.bf16.msra.mxu1 %v7915_v27  ;;  %3779 = vmatprep.mubr.msk.f32.mxu1 %vm173_vm3, %v3398_v62 }
0x116a   :  { %4893 = vmatprep.subr.bf16.mxu1 %v7917_v10 }
0x116d   :  { %4895 = vmatpush1.bf16.msra.mxu1 %v7937_v63 }
0x116e   :  { %4897 = vmatprep.subr.bf16.mxu1 %v7940_v46 }
0x1171   :  { %4899 = vmatpush1.bf16.msra.mxu1 %v7957_v37 }
0x1172   :  { %4901 = vmatprep.subr.bf16.mxu1 %v7960_v54 }
0x1175   :  { %4903 = vmatpush1.bf16.msra.mxu1 %v7977_v24 }
0x1176   :  { %4905 = vmatprep.subr.bf16.mxu1 %v7980_v33 }
0x1179   :  { %4907 = vmatpush1.bf16.msra.mxu1 %v7997_v47  ;;  %v3774_v47 = vld [vmem:[%s8241_s0 + $0x54] sm:$0xff] }
0x117a   :  { %4909 = vmatprep.subr.bf16.mxu1 %v8000_v52 }
0x117d   :  { %4911 = vmatpush1.bf16.msra.mxu1 %v8017_v50 }
0x117e   :  { %4913 = vmatprep.subr.bf16.mxu1 %v8020_v38 }
0x1181   :  { %4915 = vmatpush1.bf16.msra.mxu1 %v8037_v26 }
0x1182   :  { %4917 = vmatprep.subr.bf16.mxu1 %v8040_v1 }
0x1185   :  { %4919 = vmatpush1.bf16.msra.mxu1 %v8057_v40 }
0x1186   :  { %4921 = vmatprep.subr.bf16.mxu1 %v8060_v9 }
0x1189   :  { %4923 = vmatpush1.bf16.msra.mxu1 %v8077_v55  ;;  %v3775_v55 = vld [vmem:[%s8241_s0 + $0x5c] sm:$0xf] }
0x118a   :  { %4925 = vmatprep.subr.bf16.mxu1 %v8080_v0 }
0x118d   :  { %4927 = vmatpush1.bf16.msra.mxu1 %v8097_v4 }
0x118e   :  { %4929 = vmatprep.subr.bf16.mxu1 %v8100_v17 }
0x1191   :  { %4931 = vmatpush1.bf16.msra.mxu1 %v8117_v15 }
0x1192   :  { %4933 = vmatprep.subr.bf16.mxu1 %v8120_v35 }
0x1195   :  { %4935 = vmatpush1.bf16.msra.mxu1 %v8131_v34 }
0x1198   :  { %3609 = vmatmul.mubr.f32.vlgmr.msra.gmra.mrb[22].mxu1 %v3776_v31 }
0x123b   :  { %v3468_v27 = vpop.f32.mrb[20].mxu1  ;;  %v3539_v10 = vpop.f32.mrb[22].mxu0 }
0x123c   :  { %v3470_v63 = vpop.f32.mrb[21].mxu1  ;;  %v3541_v46 = vpop.f32.mrb[23].mxu0 }
0x123d   :  { %v3621_v37 = vcombine.low %v3468_v27, %v3470_v63  ;;  %v3622_v54 = vcombine.low %v3539_v10, %v3541_v46 }
0x123f   :  { %v3629_v24 = vrot.slane %v3621_v37, %v5801_v43  ;;  %v3636_v33 = vrot.slane %v3622_v54, %v5801_v43 }
0x1241   :  { %v3637_v52 = vcombine.low %v3629_v24, %v3636_v33 }
0x1243   :  { %v3648_v50 = vadd.f32 %v3774_v47, %v3637_v52 }
0x1245   :  { %3657 = vrot.lane.b32.xlu1 %v3648_v50, %s5069_s19  ;;  %v3780_v38 = vmul.f32 -1.442695, %v3648_v50  ;;  %v3670_v15 = vrot.slane %v3648_v50, 6 }
0x1247   :  { %5051 = vpow2.f32 %v3780_v38 }
0x1251   :  { %v5052_v9 = vpop.eup %5051 }
0x1252   :  { %v3653_v4 = vadd.f32 1.0, %v5052_v9 }
0x1254   :  { %5053 = vrcp.f32 %v3653_v4 }
0x125e   :  { %v5054_v45 = vpop.eup %5053 }
0x126b   :  { %v3610_v26 = vpop.f32.mrb[22].mxu1 }
0x126c   :  { %v3612_v1 = vpop.f32.mrb[23].mxu1 }
0x126d   :  { %v3638_v40 = vcombine.low %v3610_v26, %v3612_v1 }
0x126f   :  { %v3645_v0 = vrot.slane %v3638_v40, %v5801_v43 }
0x1271   :  { %v3649_v17 = vadd.f32 %v3775_v55, %v3645_v0 }
0x1273   :  { %v3671_v35 = vrot.slane %v3649_v17, 6  ;;  %v3782_v14 = vmul.f32 -1.442695, %v3649_v17 }
0x1275   :  { %v3672_v34 = vsel %vm11_vm0, %v3670_v15, %v3671_v35 }
0x1276   :  { %5055 = vtanh.f32 %v3672_v34 }
0x1280   :  { %v5056_v13 = vpop.eup %5055 }
0x1281   :  { %v3683_v23 = vmul.f32 %v5056_v13, %v5054_v45 }
0x12b7   :  { %v3658_v32 = vpop.permute.xlu1 %3657 }
0x12b8   :  { %v3659_v51 = vrot.slane %v3658_v32, 2  ;;  %v3660_v25 = vrot.slane %v3658_v32, 4 }
0x12ba   :  { %v3661_v41 = vsel %vm173_vm3, %v3659_v51, %v3660_v25 }
0x12bb   :  { %v3781_v28 = vmul.f32 -1.442695, %v3661_v41 }
0x12bd   :  { %5057 = vpow2.f32 %v3781_v28 }
0x12c7   :  { %v5058_v36 = vpop.eup %5057 }
0x12c8   :  { %v3666_v43 = vadd.f32 1.0, %v5058_v36 }
0x12ca   :  { %5059 = vrcp.f32 %v3666_v43 }
0x12d4   :  { %v5060_v29 = vpop.eup %5059 }
0x12d5   :  { %v3682_v3 = vmul.f32 %v5060_v29, %v3681_v19 }
0x12d7   :  { %v3684_v60 = vadd.f32 %v3683_v23, %v3682_v3 }
0x12d9   :  { %3693 = vst.msk [vmem:[#allocation3] sm:$0xf] %vm5415_vm2, %v3684_v60  ;;  %5061 = vtanh.f32 %v3684_v60 }
0x12da   :  { %5063 = vpow2.f32 %v3782_v14 }
0x12e3   :  { %v5062_v48 = vpop.eup %5061 }
0x12e4   :  { %3687 = vrot.lane.b32.xlu0 %v5062_v48, %s5069_s19  ;;  %v5064_v22 = vpop.eup %5063 }
0x12e5   :  { %v3678_v49 = vadd.f32 1.0, %v5064_v22 }
0x12e7   :  { %5065 = vrcp.f32 %v3678_v49 }
0x12f1   :  { %v5066_v61 = vpop.eup %5065 }
0x1356   :  { %v3688_v20 = vpop.permute.xlu0 %3687 }
0x1357   :  { %v3689_v8 = vrot.slane %v3688_v20, 6 }
0x1359   :  { %v3690_v59 = vsel %vm173_vm3, %v3689_v8, %v3688_v20 }
0x135a   :  { %v3692_v39 = vmul.f32 %v5066_v61, %v3690_v59 }
0x135c   :  { %3695 = vrot.lane.b32.xlu1 %v3692_v39, %s5069_s19 }
0x13ce   :  { %v3696_v30 = vpop.permute.xlu1 %3695 }
0x13cf   :  { %v3697_v7 = vrot.slane %v3696_v30, 2 }
0x13d1   :  { %v3698_v12 = vsel %vm173_vm3, %v3696_v30, %v3697_v7 }
0x13d2   :  { %3700 = vst.msk [vmem:[#allocation2] sm:$0xf] %vm5415_vm2, %v3698_v12  ;;  %3783 = vst.msk [vmem:[%s8242_s2 + $0x1c] sm:$0xf] %vm5415_vm2, %v3698_v12 }

</bundles_post_ra>
